<compile_context>
chip_gen: v7x
topology: tpu7x:2x2x1
jax: 0.10.0
libtpu: 0.0.40
codegen_flags: <defaults>
</compile_context>

<pallas_src>
import functools

import jax
import jax.numpy as jnp
from jax.experimental import pallas as pl
from jax.experimental.pallas import tpu as pltpu

# ----------------------------------------------------------------------------
# Architecture constants (implied by the module: 32x32 input -> 16*5*5 flatten)
# ----------------------------------------------------------------------------
H = W = 32              # input spatial size
KS = 5                  # conv kernel size
C_IN = 3                # input channels
C1, C2 = 6, 16          # conv1 / conv2 output channels
CK2 = 8                 # conv2 per-tap channel depth (6 padded to 8)
HO = H - KS + 1         # 28: conv1 output side
PG = HO // 2            # 14: pool1 grid side
POS1 = PG * PG          # 196 valid pool1 positions per image
POS1_PAD = 200          # padded to a multiple of 8
N2POS = 136             # conv2 row-positions computed per image (>=135+1, /8)
P2 = 5                  # pool2 grid side
F_IN, F1, F2, F3 = 400, 120, 84, 10
LANES = 128


# ----------------------------------------------------------------------------
# Fused forward-pass kernel (one batch tile of `bt` images per grid step)
# ----------------------------------------------------------------------------
def _lenet_kernel(x_ref, w1_ref, b1_ref, w2_ref, b2_ref,
                  wf1_ref, bf1_ref, wf2_ref, bf2_ref, wf3_ref, bf3_ref,
                  out_ref, acc1_ref, pool1_ref, acc2_ref, *, bt):
    n1 = POS1_PAD * bt      # rows per conv1 parity block == pool1 rows
    n2 = N2POS * bt         # conv2 rows computed (covers every valid position)

    # --- conv1: one dense-K MXU matmul over wrapper-built im2col patches -----
    # Row layout: par*(200*bt) + (p*14+q)*bt + b  (par = (i%2)*2 + j%2).
    acc1_ref[...] = jnp.dot(x_ref[...], w1_ref[...],
                            preferred_element_type=jnp.float32)

    # --- ReLU + 2x2/2 max-pool #1, fully vectorized over the 4 parity slabs --
    pooled = jnp.maximum(
        jnp.maximum(acc1_ref[pl.ds(0 * n1, n1), :],
                    acc1_ref[pl.ds(1 * n1, n1), :]),
        jnp.maximum(acc1_ref[pl.ds(2 * n1, n1), :],
                    acc1_ref[pl.ds(3 * n1, n1), :]))
    # bias (commutes with max) + ReLU in the epilogue; single dense store.
    pool1_ref[...] = jnp.maximum(pooled + b1_ref[...], 0.0)

    # --- conv2: pack the 25 taps into the contraction dim (K = 25*8 = 200) ---
    # pool1 rows are position-major / image-minor, so each tap is a contiguous
    # row-shifted slice; the MXU does the tap accumulation in one matmul.
    taps = [pool1_ref[pl.ds((di * PG + dj) * bt, n2), :CK2]
            for di in range(KS) for dj in range(KS)]
    lhs2 = jnp.concatenate(taps, axis=-1)                    # (n2, 200)
    acc2_ref[...] = jnp.dot(lhs2, w2_ref[...],
                            preferred_element_type=jnp.float32)

    # --- ReLU + 2x2/2 max-pool #2 -> lane-packed (bt, 400) fc1 activation ----
    b2 = b2_ref[...]
    pieces = []
    for p in range(P2):
        for q in range(P2):
            r = (2 * p * PG + 2 * q) * bt                    # image-minor rows
            m = jnp.maximum(
                jnp.maximum(acc2_ref[pl.ds(r, bt), :],
                            acc2_ref[pl.ds(r + bt, bt), :]),
                jnp.maximum(acc2_ref[pl.ds(r + PG * bt, bt), :],
                            acc2_ref[pl.ds(r + (PG + 1) * bt, bt), :]))
            pieces.append(jnp.maximum(m + b2, 0.0)[:, :C2])
    flat = jnp.concatenate(pieces, axis=-1)                  # (bt, 400)

    # --- classifier: fc1 (single K=400 matmul) -> fc2 -> fc3, lane-dense -----
    h = jnp.dot(flat, wf1_ref[...], preferred_element_type=jnp.float32)
    h = jnp.maximum(h + bf1_ref[...], 0.0)
    h = jnp.dot(h, wf2_ref[...], preferred_element_type=jnp.float32)
    h = jnp.maximum(h + bf2_ref[...], 0.0)
    y = jnp.dot(h, wf3_ref[...], preferred_element_type=jnp.float32)
    out_ref[...] = y + bf3_ref[...]                          # (bt, 128) store


def _lenet_pallas(patches, kp, num_tiles, bt):
    kernel = functools.partial(_lenet_kernel, bt=bt)

    def rep(a):  # weights: full array in VMEM, pinned to block 0 every step
        return pl.BlockSpec(a.shape, lambda i, nd=a.ndim: (0,) * nd)

    weights = (kp["w1"], kp["b1"], kp["w2"], kp["b2"], kp["wf1"], kp["bf1"],
               kp["wf2"], kp["bf2"], kp["wf3"], kp["bf3"])
    return pl.pallas_call(
        kernel,
        out_shape=jax.ShapeDtypeStruct((num_tiles, bt, LANES), jnp.float32),
        grid=(num_tiles,),
        in_specs=[pl.BlockSpec((4 * POS1_PAD * bt, LANES), lambda i: (i, 0))]
                 + [rep(w) for w in weights],
        out_specs=pl.BlockSpec((None, bt, LANES), lambda i: (i, 0, 0)),
        scratch_shapes=[
            pltpu.VMEM((4 * POS1_PAD * bt, LANES), jnp.float32),  # conv1 out
            pltpu.VMEM((POS1_PAD * bt, LANES), jnp.float32),      # pool1
            pltpu.VMEM((N2POS * bt, LANES), jnp.float32),         # conv2 out
        ],
        compiler_params=pltpu.CompilerParams(
            dimension_semantics=("parallel",)),
    )(patches, *weights)


# ----------------------------------------------------------------------------
# Wrapper-side layout prep (tiny relative to the kernel)
# ----------------------------------------------------------------------------
def _build_patches(x_nchw, bt):
    """NCHW -> lane-dense, parity-blocked, image-minor conv1 im2col patches."""
    B = x_nchw.shape[0]
    num_tiles = -(-B // bt)
    b_pad = num_tiles * bt
    x = jnp.transpose(x_nchw, (0, 2, 3, 1))                     # (B, 32, 32, 3)
    x = jnp.pad(x, ((0, b_pad - B), (0, 0), (0, 0), (0, 0)))
    cols = [x[:, di:di + HO, dj:dj + HO, :]
            for di in range(KS) for dj in range(KS)]
    p = jnp.stack(cols, axis=3).reshape(b_pad, HO, HO, KS * KS * C_IN)
    p = p.reshape(b_pad, PG, 2, PG, 2, KS * KS * C_IN)          # i=2p+a, j=2q+c
    p = jnp.transpose(p, (0, 2, 4, 1, 3, 5))                    # (b,a,c,p,q,f)
    p = p.reshape(num_tiles, bt, 4, POS1, KS * KS * C_IN)
    p = jnp.pad(p, ((0, 0), (0, 0), (0, 0),
                    (0, POS1_PAD - POS1), (0, LANES - KS * KS * C_IN)))
    p = jnp.transpose(p, (0, 2, 3, 1, 4))                       # (t,par,pos,b,f)
    return p.reshape(num_tiles * 4 * POS1_PAD * bt, LANES), num_tiles


def _uniform(key, shape, fan_in):
    bound = float(fan_in) ** -0.5
    return jax.random.uniform(key, shape, jnp.float32, -bound, bound)


def init_params(key):
    ks = jax.random.split(key, 10)
    return {
        "w1": _uniform(ks[0], (C1, C_IN, KS, KS), C_IN * KS * KS),
        "b1": _uniform(ks[1], (C1,), C_IN * KS * KS),
        "w2": _uniform(ks[2], (C2, C1, KS, KS), C1 * KS * KS),
        "b2": _uniform(ks[3], (C2,), C1 * KS * KS),
        "wf1": _uniform(ks[4], (F1, F_IN), F_IN),
        "bf1": _uniform(ks[5], (F1,), F_IN),
        "wf2": _uniform(ks[6], (F2, F1), F1),
        "bf2": _uniform(ks[7], (F2,), F1),
        "wf3": _uniform(ks[8], (F3, F2), F2),
        "bf3": _uniform(ks[9], (F3,), F2),
    }


def prepare_params(p):
    """One-time conversion of PyTorch-layout params into the kernel layout."""
    def pad_rc(w, rows, cols=LANES):
        return jnp.pad(w, ((0, rows - w.shape[0]), (0, cols - w.shape[1])))

    def pad_vec(b):
        return jnp.pad(b, (0, LANES - b.shape[0])).reshape(1, LANES)

    # conv1: (O,I,kh,kw) -> (75, 6), row k = (di*5+dj)*3 + c; pad to (128,128).
    w1 = jnp.transpose(p["w1"], (2, 3, 1, 0)).reshape(KS * KS * C_IN, C1)
    w1 = pad_rc(w1, LANES)
    # conv2: (O,I,kh,kw) -> packed-tap (200, 16), row k = (di*5+dj)*8 + c.
    w2 = jnp.transpose(p["w2"], (2, 3, 1, 0))                   # (5,5,6,16)
    w2 = jnp.pad(w2, ((0, 0), (0, 0), (0, CK2 - C1), (0, 0)))   # (5,5,8,16)
    w2 = pad_rc(w2.reshape(KS * KS * CK2, C2), KS * KS * CK2)   # (200,128)
    # fc1: torch (120, 400) with input idx c*25+s  ->  kernel rows s*16+c.
    wf1 = p["wf1"].reshape(F1, C2, P2 * P2)                     # (120,16,25)
    wf1 = jnp.transpose(wf1, (2, 1, 0)).reshape(P2 * P2 * C2, F1)
    wf1 = pad_rc(wf1, P2 * P2 * C2)                             # (400,128)
    return {
        "w1": w1, "b1": pad_vec(p["b1"]),
        "w2": w2, "b2": pad_vec(p["b2"]),
        "wf1": wf1, "bf1": pad_vec(p["bf1"]),
        "wf2": pad_rc(p["wf2"].T, LANES), "bf2": pad_vec(p["bf2"]),
        "wf3": pad_rc(p["wf3"].T, LANES), "bf3": pad_vec(p["bf3"]),
    }


# ----------------------------------------------------------------------------
# Forward pass (matches Net.forward) and a pure-JAX reference
# ----------------------------------------------------------------------------
@functools.partial(jax.jit, static_argnames=("batch_tile",))
def net_forward(kparams, x_nchw, batch_tile=2):
    """Forward pass of `Net`; x is NCHW float32, returns (B, 10) logits."""
    B = x_nchw.shape[0]
    bt = min(batch_tile, B)
    patches, num_tiles = _build_patches(x_nchw.astype(jnp.float32), bt)
    out = _lenet_pallas(patches, kparams, num_tiles, bt)
    return out.reshape(num_tiles * bt, LANES)[:B, :F3]


def net_forward_reference(p, x):
    """Pure-JAX (XLA) reference of the same forward pass, for validation."""
    hp = jax.lax.Precision.HIGHEST
    y = jax.lax.conv_general_dilated(
        x, p["w1"], window_strides=(1, 1), padding="VALID",
        dimension_numbers=("NCHW", "OIHW", "NCHW"), precision=hp)
    y = jax.nn.relu(y + p["b1"][None, :, None, None])
    y = jax.lax.reduce_window(y, -jnp.inf, jax.lax.max,
                              (1, 1, 2, 2), (1, 1, 2, 2), "VALID")
    y = jax.lax.conv_general_dilated(
        y, p["w2"], window_strides=(1, 1), padding="VALID",
        dimension_numbers=("NCHW", "OIHW", "NCHW"), precision=hp)
    y = jax.nn.relu(y + p["b2"][None, :, None, None])
    y = jax.lax.reduce_window(y, -jnp.inf, jax.lax.max,
                              (1, 1, 2, 2), (1, 1, 2, 2), "VALID")
    y = y.reshape(y.shape[0], -1)
    y = jax.nn.relu(jnp.dot(y, p["wf1"].T, precision=hp) + p["bf1"])
    y = jax.nn.relu(jnp.dot(y, p["wf2"].T, precision=hp) + p["bf2"])
    return jnp.dot(y, p["wf3"].T, precision=hp) + p["bf3"]


if __name__ == "__main__":
    key = jax.random.PRNGKey(0)
    pkey, xkey = jax.random.split(key)
    params = init_params(pkey)            # PyTorch-layout parameters
    kparams = prepare_params(params)      # padded / packed kernel layout
    # Architecture implies 32x32 spatial input (16*5*5 flatten after two
    # conv(5)/pool(2) stages); batch=4 with batch_tile=2 exercises the grid.
    x = jax.random.normal(xkey, (4, 3, 32, 32), dtype=jnp.float32)

    out = jax.block_until_ready(net_forward(kparams, x, batch_tile=2))
    assert out.shape == (4, F3), out.shape

    ref = jax.block_until_ready(net_forward_reference(params, x))
    err = float(jnp.max(jnp.abs(out - ref)))
    assert err < 2e-3, f"kernel mismatch vs reference: max|diff|={err}"
    print("KERNEL_OK")
</pallas_src>

<mosaic_0001>
module attributes {stable_mosaic.version = 11 : i64} {
  func.func @_lenet_kernel(%arg0: i32, %arg1: memref<1600x128xf32, #tpu.memory_space<vmem>>, %arg2: memref<128x128xf32, #tpu.memory_space<vmem>>, %arg3: memref<1x128xf32, #tpu.memory_space<vmem>>, %arg4: memref<200x128xf32, #tpu.memory_space<vmem>>, %arg5: memref<1x128xf32, #tpu.memory_space<vmem>>, %arg6: memref<400x128xf32, #tpu.memory_space<vmem>>, %arg7: memref<1x128xf32, #tpu.memory_space<vmem>>, %arg8: memref<128x128xf32, #tpu.memory_space<vmem>>, %arg9: memref<1x128xf32, #tpu.memory_space<vmem>>, %arg10: memref<128x128xf32, #tpu.memory_space<vmem>>, %arg11: memref<1x128xf32, #tpu.memory_space<vmem>>, %arg12: memref<1x2x128xf32, #tpu.memory_space<vmem>>, %arg13: memref<1600x128xf32, #tpu.memory_space<vmem>>, %arg14: memref<400x128xf32, #tpu.memory_space<vmem>>, %arg15: memref<272x128xf32, #tpu.memory_space<vmem>>) attributes {dimension_semantics = [#tpu.dimension_semantics<parallel>], iteration_bounds = array<i64: 2>, scalar_prefetch = 0 : i64, scratch_operands = 3 : i64, tpu.core_type = #tpu.core_type<tc>, window_params = [{transform_indices = @transform_0, window_bounds = array<i64: 1600, 128>}, {pipeline_mode = #tpu.pipeline_mode<synchronous>, transform_indices = @transform_1, window_bounds = array<i64: 128, 128>}, {pipeline_mode = #tpu.pipeline_mode<synchronous>, transform_indices = @transform_2, window_bounds = array<i64: 1, 128>}, {pipeline_mode = #tpu.pipeline_mode<synchronous>, transform_indices = @transform_3, window_bounds = array<i64: 200, 128>}, {pipeline_mode = #tpu.pipeline_mode<synchronous>, transform_indices = @transform_4, window_bounds = array<i64: 1, 128>}, {pipeline_mode = #tpu.pipeline_mode<synchronous>, transform_indices = @transform_5, window_bounds = array<i64: 400, 128>}, {pipeline_mode = #tpu.pipeline_mode<synchronous>, transform_indices = @transform_6, window_bounds = array<i64: 1, 128>}, {pipeline_mode = #tpu.pipeline_mode<synchronous>, transform_indices = @transform_7, window_bounds = array<i64: 128, 128>}, {pipeline_mode = #tpu.pipeline_mode<synchronous>, transform_indices = @transform_8, window_bounds = array<i64: 1, 128>}, {pipeline_mode = #tpu.pipeline_mode<synchronous>, transform_indices = @transform_9, window_bounds = array<i64: 128, 128>}, {pipeline_mode = #tpu.pipeline_mode<synchronous>, transform_indices = @transform_10, window_bounds = array<i64: 1, 128>}, {transform_indices = @transform_11, window_bounds = array<i64: 1, 2, 128>}]} {
    %c0 = arith.constant 0 : index
    %c0_0 = arith.constant 0 : index
    %0 = vector.load %arg1[%c0, %c0_0] : memref<1600x128xf32, #tpu.memory_space<vmem>>, vector<1600x128xf32>
    %c0_1 = arith.constant 0 : index
    %c0_2 = arith.constant 0 : index
    %1 = vector.load %arg2[%c0_1, %c0_2] : memref<128x128xf32, #tpu.memory_space<vmem>>, vector<128x128xf32>
    %cst = arith.constant dense<0.000000e+00> : vector<1600x128xf32>
    %2 = tpu.matmul %0, %1, %cst {dimension_numbers = #tpu.dot_dimension_numbers<[1], [0], [0], [1], [0, 0, 1, 1], [], []>} : vector<1600x128xf32>, vector<128x128xf32>, vector<1600x128xf32> -> vector<1600x128xf32>
    %c0_3 = arith.constant 0 : index
    %c0_4 = arith.constant 0 : index
    %3 = vector.load %arg13[%c0_3, %c0_4] : memref<1600x128xf32, #tpu.memory_space<vmem>>, vector<1600x128xf32>
    tpu.vector_store %arg13[%c0_3, %c0_4], %2 {strides = array<i32>} : memref<1600x128xf32, #tpu.memory_space<vmem>>, vector<1600x128xf32>,
    %c0_5 = arith.constant 0 : index
    %c0_6 = arith.constant 0 : index
    %4 = vector.load %arg13[%c0_5, %c0_6] : memref<1600x128xf32, #tpu.memory_space<vmem>>, vector<400x128xf32>
    %c400 = arith.constant 400 : index
    %c0_7 = arith.constant 0 : index
    %5 = vector.load %arg13[%c400, %c0_7] : memref<1600x128xf32, #tpu.memory_space<vmem>>, vector<400x128xf32>
    %6 = arith.maximumf %4, %5 : vector<400x128xf32>
    %c800 = arith.constant 800 : index
    %c0_8 = arith.constant 0 : index
    %7 = vector.load %arg13[%c800, %c0_8] : memref<1600x128xf32, #tpu.memory_space<vmem>>, vector<400x128xf32>
    %c1200 = arith.constant 1200 : index
    %c0_9 = arith.constant 0 : index
    %8 = vector.load %arg13[%c1200, %c0_9] : memref<1600x128xf32, #tpu.memory_space<vmem>>, vector<400x128xf32>
    %9 = arith.maximumf %7, %8 : vector<400x128xf32>
    %10 = arith.maximumf %6, %9 : vector<400x128xf32>
    %c0_10 = arith.constant 0 : index
    %c0_11 = arith.constant 0 : index
    %11 = vector.load %arg3[%c0_10, %c0_11] : memref<1x128xf32, #tpu.memory_space<vmem>>, vector<1x128xf32>
    %12 = vector.broadcast %11 : vector<1x128xf32> to vector<400x128xf32>
    %13 = arith.addf %10, %12 : vector<400x128xf32>
    %cst_12 = arith.constant 0.000000e+00 : f32
    %14 = vector.broadcast %cst_12 : f32 to vector<400x128xf32>
    %15 = arith.maximumf %13, %14 : vector<400x128xf32>
    %c0_13 = arith.constant 0 : index
    %c0_14 = arith.constant 0 : index
    %16 = vector.load %arg14[%c0_13, %c0_14] : memref<400x128xf32, #tpu.memory_space<vmem>>, vector<400x128xf32>
    tpu.vector_store %arg14[%c0_13, %c0_14], %15 {strides = array<i32>} : memref<400x128xf32, #tpu.memory_space<vmem>>, vector<400x128xf32>,
    %c0_15 = arith.constant 0 : index
    %c0_16 = arith.constant 0 : index
    %17 = vector.load %arg14[%c0_15, %c0_16] : memref<400x128xf32, #tpu.memory_space<vmem>>, vector<272x8xf32>
    %c2 = arith.constant 2 : index
    %c0_17 = arith.constant 0 : index
    %18 = vector.load %arg14[%c2, %c0_17] : memref<400x128xf32, #tpu.memory_space<vmem>>, vector<272x8xf32>
    %c4 = arith.constant 4 : index
    %c0_18 = arith.constant 0 : index
    %19 = vector.load %arg14[%c4, %c0_18] : memref<400x128xf32, #tpu.memory_space<vmem>>, vector<272x8xf32>
    %c6 = arith.constant 6 : index
    %c0_19 = arith.constant 0 : index
    %20 = vector.load %arg14[%c6, %c0_19] : memref<400x128xf32, #tpu.memory_space<vmem>>, vector<272x8xf32>
    %c8 = arith.constant 8 : index
    %c0_20 = arith.constant 0 : index
    %21 = vector.load %arg14[%c8, %c0_20] : memref<400x128xf32, #tpu.memory_space<vmem>>, vector<272x8xf32>
    %c28 = arith.constant 28 : index
    %c0_21 = arith.constant 0 : index
    %22 = vector.load %arg14[%c28, %c0_21] : memref<400x128xf32, #tpu.memory_space<vmem>>, vector<272x8xf32>
    %c30 = arith.constant 30 : index
    %c0_22 = arith.constant 0 : index
    %23 = vector.load %arg14[%c30, %c0_22] : memref<400x128xf32, #tpu.memory_space<vmem>>, vector<272x8xf32>
    %c32 = arith.constant 32 : index
    %c0_23 = arith.constant 0 : index
    %24 = vector.load %arg14[%c32, %c0_23] : memref<400x128xf32, #tpu.memory_space<vmem>>, vector<272x8xf32>
    %c34 = arith.constant 34 : index
    %c0_24 = arith.constant 0 : index
    %25 = vector.load %arg14[%c34, %c0_24] : memref<400x128xf32, #tpu.memory_space<vmem>>, vector<272x8xf32>
    %c36 = arith.constant 36 : index
    %c0_25 = arith.constant 0 : index
    %26 = vector.load %arg14[%c36, %c0_25] : memref<400x128xf32, #tpu.memory_space<vmem>>, vector<272x8xf32>
    %c56 = arith.constant 56 : index
    %c0_26 = arith.constant 0 : index
    %27 = vector.load %arg14[%c56, %c0_26] : memref<400x128xf32, #tpu.memory_space<vmem>>, vector<272x8xf32>
    %c58 = arith.constant 58 : index
    %c0_27 = arith.constant 0 : index
    %28 = vector.load %arg14[%c58, %c0_27] : memref<400x128xf32, #tpu.memory_space<vmem>>, vector<272x8xf32>
    %c60 = arith.constant 60 : index
    %c0_28 = arith.constant 0 : index
    %29 = vector.load %arg14[%c60, %c0_28] : memref<400x128xf32, #tpu.memory_space<vmem>>, vector<272x8xf32>
    %c62 = arith.constant 62 : index
    %c0_29 = arith.constant 0 : index
    %30 = vector.load %arg14[%c62, %c0_29] : memref<400x128xf32, #tpu.memory_space<vmem>>, vector<272x8xf32>
    %c64 = arith.constant 64 : index
    %c0_30 = arith.constant 0 : index
    %31 = vector.load %arg14[%c64, %c0_30] : memref<400x128xf32, #tpu.memory_space<vmem>>, vector<272x8xf32>
    %c84 = arith.constant 84 : index
    %c0_31 = arith.constant 0 : index
    %32 = vector.load %arg14[%c84, %c0_31] : memref<400x128xf32, #tpu.memory_space<vmem>>, vector<272x8xf32>
    %c86 = arith.constant 86 : index
    %c0_32 = arith.constant 0 : index
    %33 = vector.load %arg14[%c86, %c0_32] : memref<400x128xf32, #tpu.memory_space<vmem>>, vector<272x8xf32>
    %c88 = arith.constant 88 : index
    %c0_33 = arith.constant 0 : index
    %34 = vector.load %arg14[%c88, %c0_33] : memref<400x128xf32, #tpu.memory_space<vmem>>, vector<272x8xf32>
    %c90 = arith.constant 90 : index
    %c0_34 = arith.constant 0 : index
    %35 = vector.load %arg14[%c90, %c0_34] : memref<400x128xf32, #tpu.memory_space<vmem>>, vector<272x8xf32>
    %c92 = arith.constant 92 : index
    %c0_35 = arith.constant 0 : index
    %36 = vector.load %arg14[%c92, %c0_35] : memref<400x128xf32, #tpu.memory_space<vmem>>, vector<272x8xf32>
    %c112 = arith.constant 112 : index
    %c0_36 = arith.constant 0 : index
    %37 = vector.load %arg14[%c112, %c0_36] : memref<400x128xf32, #tpu.memory_space<vmem>>, vector<272x8xf32>
    %c114 = arith.constant 114 : index
    %c0_37 = arith.constant 0 : index
    %38 = vector.load %arg14[%c114, %c0_37] : memref<400x128xf32, #tpu.memory_space<vmem>>, vector<272x8xf32>
    %c116 = arith.constant 116 : index
    %c0_38 = arith.constant 0 : index
    %39 = vector.load %arg14[%c116, %c0_38] : memref<400x128xf32, #tpu.memory_space<vmem>>, vector<272x8xf32>
    %c118 = arith.constant 118 : index
    %c0_39 = arith.constant 0 : index
    %40 = vector.load %arg14[%c118, %c0_39] : memref<400x128xf32, #tpu.memory_space<vmem>>, vector<272x8xf32>
    %c120 = arith.constant 120 : index
    %c0_40 = arith.constant 0 : index
    %41 = vector.load %arg14[%c120, %c0_40] : memref<400x128xf32, #tpu.memory_space<vmem>>, vector<272x8xf32>
    %42 = tpu.concatenate %17, %18, %19, %20, %21, %22, %23, %24, %25, %26, %27, %28, %29, %30, %31, %32 in 1 : vector<272x8xf32>, vector<272x8xf32>, vector<272x8xf32>, vector<272x8xf32>, vector<272x8xf32>, vector<272x8xf32>, vector<272x8xf32>, vector<272x8xf32>, vector<272x8xf32>, vector<272x8xf32>, vector<272x8xf32>, vector<272x8xf32>, vector<272x8xf32>, vector<272x8xf32>, vector<272x8xf32>, vector<272x8xf32> -> vector<272x128xf32>
    %43 = tpu.concatenate %33, %34, %35, %36, %37, %38, %39, %40, %41 in 1 : vector<272x8xf32>, vector<272x8xf32>, vector<272x8xf32>, vector<272x8xf32>, vector<272x8xf32>, vector<272x8xf32>, vector<272x8xf32>, vector<272x8xf32>, vector<272x8xf32> -> vector<272x72xf32>
    %44 = tpu.concatenate %42, %43 in 1 : vector<272x128xf32>, vector<272x72xf32> -> vector<272x200xf32>
    %c0_41 = arith.constant 0 : index
    %c0_42 = arith.constant 0 : index
    %45 = vector.load %arg4[%c0_41, %c0_42] : memref<200x128xf32, #tpu.memory_space<vmem>>, vector<200x128xf32>
    %cst_43 = arith.constant dense<0.000000e+00> : vector<272x128xf32>
    %46 = tpu.matmul %44, %45, %cst_43 {dimension_numbers = #tpu.dot_dimension_numbers<[1], [0], [0], [1], [0, 0, 1, 1], [], []>} : vector<272x200xf32>, vector<200x128xf32>, vector<272x128xf32> -> vector<272x128xf32>
    %c0_44 = arith.constant 0 : index
    %c0_45 = arith.constant 0 : index
    %47 = vector.load %arg15[%c0_44, %c0_45] : memref<272x128xf32, #tpu.memory_space<vmem>>, vector<272x128xf32>
    tpu.vector_store %arg15[%c0_44, %c0_45], %46 {strides = array<i32>} : memref<272x128xf32, #tpu.memory_space<vmem>>, vector<272x128xf32>,
    %c0_46 = arith.constant 0 : index
    %c0_47 = arith.constant 0 : index
    %48 = vector.load %arg5[%c0_46, %c0_47] : memref<1x128xf32, #tpu.memory_space<vmem>>, vector<1x128xf32>
    %c0_48 = arith.constant 0 : index
    %c0_49 = arith.constant 0 : index
    %49 = vector.load %arg15[%c0_48, %c0_49] : memref<272x128xf32, #tpu.memory_space<vmem>>, vector<2x128xf32>
    %c2_50 = arith.constant 2 : index
    %c0_51 = arith.constant 0 : index
    %50 = vector.load %arg15[%c2_50, %c0_51] : memref<272x128xf32, #tpu.memory_space<vmem>>, vector<2x128xf32>
    %51 = arith.maximumf %49, %50 : vector<2x128xf32>
    %c28_52 = arith.constant 28 : index
    %c0_53 = arith.constant 0 : index
    %52 = vector.load %arg15[%c28_52, %c0_53] : memref<272x128xf32, #tpu.memory_space<vmem>>, vector<2x128xf32>
    %c30_54 = arith.constant 30 : index
    %c0_55 = arith.constant 0 : index
    %53 = vector.load %arg15[%c30_54, %c0_55] : memref<272x128xf32, #tpu.memory_space<vmem>>, vector<2x128xf32>
    %54 = arith.maximumf %52, %53 : vector<2x128xf32>
    %55 = arith.maximumf %51, %54 : vector<2x128xf32>
    %56 = vector.broadcast %48 : vector<1x128xf32> to vector<2x128xf32>
    %57 = arith.addf %55, %56 : vector<2x128xf32>
    %cst_56 = arith.constant 0.000000e+00 : f32
    %58 = vector.broadcast %cst_56 : f32 to vector<2x128xf32>
    %59 = arith.maximumf %57, %58 : vector<2x128xf32>
    %60 = vector.extract_strided_slice %59 {offsets = [0, 0], sizes = [2, 16], strides = [1, 1]} : vector<2x128xf32> to vector<2x16xf32>
    %c4_57 = arith.constant 4 : index
    %c0_58 = arith.constant 0 : index
    %61 = vector.load %arg15[%c4_57, %c0_58] : memref<272x128xf32, #tpu.memory_space<vmem>>, vector<2x128xf32>
    %c6_59 = arith.constant 6 : index
    %c0_60 = arith.constant 0 : index
    %62 = vector.load %arg15[%c6_59, %c0_60] : memref<272x128xf32, #tpu.memory_space<vmem>>, vector<2x128xf32>
    %63 = arith.maximumf %61, %62 : vector<2x128xf32>
    %c32_61 = arith.constant 32 : index
    %c0_62 = arith.constant 0 : index
    %64 = vector.load %arg15[%c32_61, %c0_62] : memref<272x128xf32, #tpu.memory_space<vmem>>, vector<2x128xf32>
    %c34_63 = arith.constant 34 : index
    %c0_64 = arith.constant 0 : index
    %65 = vector.load %arg15[%c34_63, %c0_64] : memref<272x128xf32, #tpu.memory_space<vmem>>, vector<2x128xf32>
    %66 = arith.maximumf %64, %65 : vector<2x128xf32>
    %67 = arith.maximumf %63, %66 : vector<2x128xf32>
    %68 = vector.broadcast %48 : vector<1x128xf32> to vector<2x128xf32>
    %69 = arith.addf %67, %68 : vector<2x128xf32>
    %cst_65 = arith.constant 0.000000e+00 : f32
    %70 = vector.broadcast %cst_65 : f32 to vector<2x128xf32>
    %71 = arith.maximumf %69, %70 : vector<2x128xf32>
    %72 = vector.extract_strided_slice %71 {offsets = [0, 0], sizes = [2, 16], strides = [1, 1]} : vector<2x128xf32> to vector<2x16xf32>
    %c8_66 = arith.constant 8 : index
    %c0_67 = arith.constant 0 : index
    %73 = vector.load %arg15[%c8_66, %c0_67] : memref<272x128xf32, #tpu.memory_space<vmem>>, vector<2x128xf32>
    %c10 = arith.constant 10 : index
    %c0_68 = arith.constant 0 : index
    %74 = vector.load %arg15[%c10, %c0_68] : memref<272x128xf32, #tpu.memory_space<vmem>>, vector<2x128xf32>
    %75 = arith.maximumf %73, %74 : vector<2x128xf32>
    %c36_69 = arith.constant 36 : index
    %c0_70 = arith.constant 0 : index
    %76 = vector.load %arg15[%c36_69, %c0_70] : memref<272x128xf32, #tpu.memory_space<vmem>>, vector<2x128xf32>
    %c38 = arith.constant 38 : index
    %c0_71 = arith.constant 0 : index
    %77 = vector.load %arg15[%c38, %c0_71] : memref<272x128xf32, #tpu.memory_space<vmem>>, vector<2x128xf32>
    %78 = arith.maximumf %76, %77 : vector<2x128xf32>
    %79 = arith.maximumf %75, %78 : vector<2x128xf32>
    %80 = vector.broadcast %48 : vector<1x128xf32> to vector<2x128xf32>
    %81 = arith.addf %79, %80 : vector<2x128xf32>
    %cst_72 = arith.constant 0.000000e+00 : f32
    %82 = vector.broadcast %cst_72 : f32 to vector<2x128xf32>
    %83 = arith.maximumf %81, %82 : vector<2x128xf32>
    %84 = vector.extract_strided_slice %83 {offsets = [0, 0], sizes = [2, 16], strides = [1, 1]} : vector<2x128xf32> to vector<2x16xf32>
    %c12 = arith.constant 12 : index
    %c0_73 = arith.constant 0 : index
    %85 = vector.load %arg15[%c12, %c0_73] : memref<272x128xf32, #tpu.memory_space<vmem>>, vector<2x128xf32>
    %c14 = arith.constant 14 : index
    %c0_74 = arith.constant 0 : index
    %86 = vector.load %arg15[%c14, %c0_74] : memref<272x128xf32, #tpu.memory_space<vmem>>, vector<2x128xf32>
    %87 = arith.maximumf %85, %86 : vector<2x128xf32>
    %c40 = arith.constant 40 : index
    %c0_75 = arith.constant 0 : index
    %88 = vector.load %arg15[%c40, %c0_75] : memref<272x128xf32, #tpu.memory_space<vmem>>, vector<2x128xf32>
    %c42 = arith.constant 42 : index
    %c0_76 = arith.constant 0 : index
    %89 = vector.load %arg15[%c42, %c0_76] : memref<272x128xf32, #tpu.memory_space<vmem>>, vector<2x128xf32>
    %90 = arith.maximumf %88, %89 : vector<2x128xf32>
    %91 = arith.maximumf %87, %90 : vector<2x128xf32>
    %92 = vector.broadcast %48 : vector<1x128xf32> to vector<2x128xf32>
    %93 = arith.addf %91, %92 : vector<2x128xf32>
    %cst_77 = arith.constant 0.000000e+00 : f32
    %94 = vector.broadcast %cst_77 : f32 to vector<2x128xf32>
    %95 = arith.maximumf %93, %94 : vector<2x128xf32>
    %96 = vector.extract_strided_slice %95 {offsets = [0, 0], sizes = [2, 16], strides = [1, 1]} : vector<2x128xf32> to vector<2x16xf32>
    %c16 = arith.constant 16 : index
    %c0_78 = arith.constant 0 : index
    %97 = vector.load %arg15[%c16, %c0_78] : memref<272x128xf32, #tpu.memory_space<vmem>>, vector<2x128xf32>
    %c18 = arith.constant 18 : index
    %c0_79 = arith.constant 0 : index
    %98 = vector.load %arg15[%c18, %c0_79] : memref<272x128xf32, #tpu.memory_space<vmem>>, vector<2x128xf32>
    %99 = arith.maximumf %97, %98 : vector<2x128xf32>
    %c44 = arith.constant 44 : index
    %c0_80 = arith.constant 0 : index
    %100 = vector.load %arg15[%c44, %c0_80] : memref<272x128xf32, #tpu.memory_space<vmem>>, vector<2x128xf32>
    %c46 = arith.constant 46 : index
    %c0_81 = arith.constant 0 : index
    %101 = vector.load %arg15[%c46, %c0_81] : memref<272x128xf32, #tpu.memory_space<vmem>>, vector<2x128xf32>
    %102 = arith.maximumf %100, %101 : vector<2x128xf32>
    %103 = arith.maximumf %99, %102 : vector<2x128xf32>
    %104 = vector.broadcast %48 : vector<1x128xf32> to vector<2x128xf32>
    %105 = arith.addf %103, %104 : vector<2x128xf32>
    %cst_82 = arith.constant 0.000000e+00 : f32
    %106 = vector.broadcast %cst_82 : f32 to vector<2x128xf32>
    %107 = arith.maximumf %105, %106 : vector<2x128xf32>
    %108 = vector.extract_strided_slice %107 {offsets = [0, 0], sizes = [2, 16], strides = [1, 1]} : vector<2x128xf32> to vector<2x16xf32>
    %c56_83 = arith.constant 56 : index
    %c0_84 = arith.constant 0 : index
    %109 = vector.load %arg15[%c56_83, %c0_84] : memref<272x128xf32, #tpu.memory_space<vmem>>, vector<2x128xf32>
    %c58_85 = arith.constant 58 : index
    %c0_86 = arith.constant 0 : index
    %110 = vector.load %arg15[%c58_85, %c0_86] : memref<272x128xf32, #tpu.memory_space<vmem>>, vector<2x128xf32>
    %111 = arith.maximumf %109, %110 : vector<2x128xf32>
    %c84_87 = arith.constant 84 : index
    %c0_88 = arith.constant 0 : index
    %112 = vector.load %arg15[%c84_87, %c0_88] : memref<272x128xf32, #tpu.memory_space<vmem>>, vector<2x128xf32>
    %c86_89 = arith.constant 86 : index
    %c0_90 = arith.constant 0 : index
    %113 = vector.load %arg15[%c86_89, %c0_90] : memref<272x128xf32, #tpu.memory_space<vmem>>, vector<2x128xf32>
    %114 = arith.maximumf %112, %113 : vector<2x128xf32>
    %115 = arith.maximumf %111, %114 : vector<2x128xf32>
    %116 = vector.broadcast %48 : vector<1x128xf32> to vector<2x128xf32>
    %117 = arith.addf %115, %116 : vector<2x128xf32>
    %cst_91 = arith.constant 0.000000e+00 : f32
    %118 = vector.broadcast %cst_91 : f32 to vector<2x128xf32>
    %119 = arith.maximumf %117, %118 : vector<2x128xf32>
    %120 = vector.extract_strided_slice %119 {offsets = [0, 0], sizes = [2, 16], strides = [1, 1]} : vector<2x128xf32> to vector<2x16xf32>
    %c60_92 = arith.constant 60 : index
    %c0_93 = arith.constant 0 : index
    %121 = vector.load %arg15[%c60_92, %c0_93] : memref<272x128xf32, #tpu.memory_space<vmem>>, vector<2x128xf32>
    %c62_94 = arith.constant 62 : index
    %c0_95 = arith.constant 0 : index
    %122 = vector.load %arg15[%c62_94, %c0_95] : memref<272x128xf32, #tpu.memory_space<vmem>>, vector<2x128xf32>
    %123 = arith.maximumf %121, %122 : vector<2x128xf32>
    %c88_96 = arith.constant 88 : index
    %c0_97 = arith.constant 0 : index
    %124 = vector.load %arg15[%c88_96, %c0_97] : memref<272x128xf32, #tpu.memory_space<vmem>>, vector<2x128xf32>
    %c90_98 = arith.constant 90 : index
    %c0_99 = arith.constant 0 : index
    %125 = vector.load %arg15[%c90_98, %c0_99] : memref<272x128xf32, #tpu.memory_space<vmem>>, vector<2x128xf32>
    %126 = arith.maximumf %124, %125 : vector<2x128xf32>
    %127 = arith.maximumf %123, %126 : vector<2x128xf32>
    %128 = vector.broadcast %48 : vector<1x128xf32> to vector<2x128xf32>
    %129 = arith.addf %127, %128 : vector<2x128xf32>
    %cst_100 = arith.constant 0.000000e+00 : f32
    %130 = vector.broadcast %cst_100 : f32 to vector<2x128xf32>
    %131 = arith.maximumf %129, %130 : vector<2x128xf32>
    %132 = vector.extract_strided_slice %131 {offsets = [0, 0], sizes = [2, 16], strides = [1, 1]} : vector<2x128xf32> to vector<2x16xf32>
    %c64_101 = arith.constant 64 : index
    %c0_102 = arith.constant 0 : index
    %133 = vector.load %arg15[%c64_101, %c0_102] : memref<272x128xf32, #tpu.memory_space<vmem>>, vector<2x128xf32>
    %c66 = arith.constant 66 : index
    %c0_103 = arith.constant 0 : index
    %134 = vector.load %arg15[%c66, %c0_103] : memref<272x128xf32, #tpu.memory_space<vmem>>, vector<2x128xf32>
    %135 = arith.maximumf %133, %134 : vector<2x128xf32>
    %c92_104 = arith.constant 92 : index
    %c0_105 = arith.constant 0 : index
    %136 = vector.load %arg15[%c92_104, %c0_105] : memref<272x128xf32, #tpu.memory_space<vmem>>, vector<2x128xf32>
    %c94 = arith.constant 94 : index
    %c0_106 = arith.constant 0 : index
    %137 = vector.load %arg15[%c94, %c0_106] : memref<272x128xf32, #tpu.memory_space<vmem>>, vector<2x128xf32>
    %138 = arith.maximumf %136, %137 : vector<2x128xf32>
    %139 = arith.maximumf %135, %138 : vector<2x128xf32>
    %140 = vector.broadcast %48 : vector<1x128xf32> to vector<2x128xf32>
    %141 = arith.addf %139, %140 : vector<2x128xf32>
    %cst_107 = arith.constant 0.000000e+00 : f32
    %142 = vector.broadcast %cst_107 : f32 to vector<2x128xf32>
    %143 = arith.maximumf %141, %142 : vector<2x128xf32>
    %144 = vector.extract_strided_slice %143 {offsets = [0, 0], sizes = [2, 16], strides = [1, 1]} : vector<2x128xf32> to vector<2x16xf32>
    %c68 = arith.constant 68 : index
    %c0_108 = arith.constant 0 : index
    %145 = vector.load %arg15[%c68, %c0_108] : memref<272x128xf32, #tpu.memory_space<vmem>>, vector<2x128xf32>
    %c70 = arith.constant 70 : index
    %c0_109 = arith.constant 0 : index
    %146 = vector.load %arg15[%c70, %c0_109] : memref<272x128xf32, #tpu.memory_space<vmem>>, vector<2x128xf32>
    %147 = arith.maximumf %145, %146 : vector<2x128xf32>
    %c96 = arith.constant 96 : index
    %c0_110 = arith.constant 0 : index
    %148 = vector.load %arg15[%c96, %c0_110] : memref<272x128xf32, #tpu.memory_space<vmem>>, vector<2x128xf32>
    %c98 = arith.constant 98 : index
    %c0_111 = arith.constant 0 : index
    %149 = vector.load %arg15[%c98, %c0_111] : memref<272x128xf32, #tpu.memory_space<vmem>>, vector<2x128xf32>
    %150 = arith.maximumf %148, %149 : vector<2x128xf32>
    %151 = arith.maximumf %147, %150 : vector<2x128xf32>
    %152 = vector.broadcast %48 : vector<1x128xf32> to vector<2x128xf32>
    %153 = arith.addf %151, %152 : vector<2x128xf32>
    %cst_112 = arith.constant 0.000000e+00 : f32
    %154 = vector.broadcast %cst_112 : f32 to vector<2x128xf32>
    %155 = arith.maximumf %153, %154 : vector<2x128xf32>
    %156 = vector.extract_strided_slice %155 {offsets = [0, 0], sizes = [2, 16], strides = [1, 1]} : vector<2x128xf32> to vector<2x16xf32>
    %c72 = arith.constant 72 : index
    %c0_113 = arith.constant 0 : index
    %157 = vector.load %arg15[%c72, %c0_113] : memref<272x128xf32, #tpu.memory_space<vmem>>, vector<2x128xf32>
    %c74 = arith.constant 74 : index
    %c0_114 = arith.constant 0 : index
    %158 = vector.load %arg15[%c74, %c0_114] : memref<272x128xf32, #tpu.memory_space<vmem>>, vector<2x128xf32>
    %159 = arith.maximumf %157, %158 : vector<2x128xf32>
    %c100 = arith.constant 100 : index
    %c0_115 = arith.constant 0 : index
    %160 = vector.load %arg15[%c100, %c0_115] : memref<272x128xf32, #tpu.memory_space<vmem>>, vector<2x128xf32>
    %c102 = arith.constant 102 : index
    %c0_116 = arith.constant 0 : index
    %161 = vector.load %arg15[%c102, %c0_116] : memref<272x128xf32, #tpu.memory_space<vmem>>, vector<2x128xf32>
    %162 = arith.maximumf %160, %161 : vector<2x128xf32>
    %163 = arith.maximumf %159, %162 : vector<2x128xf32>
    %164 = vector.broadcast %48 : vector<1x128xf32> to vector<2x128xf32>
    %165 = arith.addf %163, %164 : vector<2x128xf32>
    %cst_117 = arith.constant 0.000000e+00 : f32
    %166 = vector.broadcast %cst_117 : f32 to vector<2x128xf32>
    %167 = arith.maximumf %165, %166 : vector<2x128xf32>
    %168 = vector.extract_strided_slice %167 {offsets = [0, 0], sizes = [2, 16], strides = [1, 1]} : vector<2x128xf32> to vector<2x16xf32>
    %c112_118 = arith.constant 112 : index
    %c0_119 = arith.constant 0 : index
    %169 = vector.load %arg15[%c112_118, %c0_119] : memref<272x128xf32, #tpu.memory_space<vmem>>, vector<2x128xf32>
    %c114_120 = arith.constant 114 : index
    %c0_121 = arith.constant 0 : index
    %170 = vector.load %arg15[%c114_120, %c0_121] : memref<272x128xf32, #tpu.memory_space<vmem>>, vector<2x128xf32>
    %171 = arith.maximumf %169, %170 : vector<2x128xf32>
    %c140 = arith.constant 140 : index
    %c0_122 = arith.constant 0 : index
    %172 = vector.load %arg15[%c140, %c0_122] : memref<272x128xf32, #tpu.memory_space<vmem>>, vector<2x128xf32>
    %c142 = arith.constant 142 : index
    %c0_123 = arith.constant 0 : index
    %173 = vector.load %arg15[%c142, %c0_123] : memref<272x128xf32, #tpu.memory_space<vmem>>, vector<2x128xf32>
    %174 = arith.maximumf %172, %173 : vector<2x128xf32>
    %175 = arith.maximumf %171, %174 : vector<2x128xf32>
    %176 = vector.broadcast %48 : vector<1x128xf32> to vector<2x128xf32>
    %177 = arith.addf %175, %176 : vector<2x128xf32>
    %cst_124 = arith.constant 0.000000e+00 : f32
    %178 = vector.broadcast %cst_124 : f32 to vector<2x128xf32>
    %179 = arith.maximumf %177, %178 : vector<2x128xf32>
    %180 = vector.extract_strided_slice %179 {offsets = [0, 0], sizes = [2, 16], strides = [1, 1]} : vector<2x128xf32> to vector<2x16xf32>
    %c116_125 = arith.constant 116 : index
    %c0_126 = arith.constant 0 : index
    %181 = vector.load %arg15[%c116_125, %c0_126] : memref<272x128xf32, #tpu.memory_space<vmem>>, vector<2x128xf32>
    %c118_127 = arith.constant 118 : index
    %c0_128 = arith.constant 0 : index
    %182 = vector.load %arg15[%c118_127, %c0_128] : memref<272x128xf32, #tpu.memory_space<vmem>>, vector<2x128xf32>
    %183 = arith.maximumf %181, %182 : vector<2x128xf32>
    %c144 = arith.constant 144 : index
    %c0_129 = arith.constant 0 : index
    %184 = vector.load %arg15[%c144, %c0_129] : memref<272x128xf32, #tpu.memory_space<vmem>>, vector<2x128xf32>
    %c146 = arith.constant 146 : index
    %c0_130 = arith.constant 0 : index
    %185 = vector.load %arg15[%c146, %c0_130] : memref<272x128xf32, #tpu.memory_space<vmem>>, vector<2x128xf32>
    %186 = arith.maximumf %184, %185 : vector<2x128xf32>
    %187 = arith.maximumf %183, %186 : vector<2x128xf32>
    %188 = vector.broadcast %48 : vector<1x128xf32> to vector<2x128xf32>
    %189 = arith.addf %187, %188 : vector<2x128xf32>
    %cst_131 = arith.constant 0.000000e+00 : f32
    %190 = vector.broadcast %cst_131 : f32 to vector<2x128xf32>
    %191 = arith.maximumf %189, %190 : vector<2x128xf32>
    %192 = vector.extract_strided_slice %191 {offsets = [0, 0], sizes = [2, 16], strides = [1, 1]} : vector<2x128xf32> to vector<2x16xf32>
    %c120_132 = arith.constant 120 : index
    %c0_133 = arith.constant 0 : index
    %193 = vector.load %arg15[%c120_132, %c0_133] : memref<272x128xf32, #tpu.memory_space<vmem>>, vector<2x128xf32>
    %c122 = arith.constant 122 : index
    %c0_134 = arith.constant 0 : index
    %194 = vector.load %arg15[%c122, %c0_134] : memref<272x128xf32, #tpu.memory_space<vmem>>, vector<2x128xf32>
    %195 = arith.maximumf %193, %194 : vector<2x128xf32>
    %c148 = arith.constant 148 : index
    %c0_135 = arith.constant 0 : index
    %196 = vector.load %arg15[%c148, %c0_135] : memref<272x128xf32, #tpu.memory_space<vmem>>, vector<2x128xf32>
    %c150 = arith.constant 150 : index
    %c0_136 = arith.constant 0 : index
    %197 = vector.load %arg15[%c150, %c0_136] : memref<272x128xf32, #tpu.memory_space<vmem>>, vector<2x128xf32>
    %198 = arith.maximumf %196, %197 : vector<2x128xf32>
    %199 = arith.maximumf %195, %198 : vector<2x128xf32>
    %200 = vector.broadcast %48 : vector<1x128xf32> to vector<2x128xf32>
    %201 = arith.addf %199, %200 : vector<2x128xf32>
    %cst_137 = arith.constant 0.000000e+00 : f32
    %202 = vector.broadcast %cst_137 : f32 to vector<2x128xf32>
    %203 = arith.maximumf %201, %202 : vector<2x128xf32>
    %204 = vector.extract_strided_slice %203 {offsets = [0, 0], sizes = [2, 16], strides = [1, 1]} : vector<2x128xf32> to vector<2x16xf32>
    %c124 = arith.constant 124 : index
    %c0_138 = arith.constant 0 : index
    %205 = vector.load %arg15[%c124, %c0_138] : memref<272x128xf32, #tpu.memory_space<vmem>>, vector<2x128xf32>
    %c126 = arith.constant 126 : index
    %c0_139 = arith.constant 0 : index
    %206 = vector.load %arg15[%c126, %c0_139] : memref<272x128xf32, #tpu.memory_space<vmem>>, vector<2x128xf32>
    %207 = arith.maximumf %205, %206 : vector<2x128xf32>
    %c152 = arith.constant 152 : index
    %c0_140 = arith.constant 0 : index
    %208 = vector.load %arg15[%c152, %c0_140] : memref<272x128xf32, #tpu.memory_space<vmem>>, vector<2x128xf32>
    %c154 = arith.constant 154 : index
    %c0_141 = arith.constant 0 : index
    %209 = vector.load %arg15[%c154, %c0_141] : memref<272x128xf32, #tpu.memory_space<vmem>>, vector<2x128xf32>
    %210 = arith.maximumf %208, %209 : vector<2x128xf32>
    %211 = arith.maximumf %207, %210 : vector<2x128xf32>
    %212 = vector.broadcast %48 : vector<1x128xf32> to vector<2x128xf32>
    %213 = arith.addf %211, %212 : vector<2x128xf32>
    %cst_142 = arith.constant 0.000000e+00 : f32
    %214 = vector.broadcast %cst_142 : f32 to vector<2x128xf32>
    %215 = arith.maximumf %213, %214 : vector<2x128xf32>
    %216 = vector.extract_strided_slice %215 {offsets = [0, 0], sizes = [2, 16], strides = [1, 1]} : vector<2x128xf32> to vector<2x16xf32>
    %c128 = arith.constant 128 : index
    %c0_143 = arith.constant 0 : index
    %217 = vector.load %arg15[%c128, %c0_143] : memref<272x128xf32, #tpu.memory_space<vmem>>, vector<2x128xf32>
    %c130 = arith.constant 130 : index
    %c0_144 = arith.constant 0 : index
    %218 = vector.load %arg15[%c130, %c0_144] : memref<272x128xf32, #tpu.memory_space<vmem>>, vector<2x128xf32>
    %219 = arith.maximumf %217, %218 : vector<2x128xf32>
    %c156 = arith.constant 156 : index
    %c0_145 = arith.constant 0 : index
    %220 = vector.load %arg15[%c156, %c0_145] : memref<272x128xf32, #tpu.memory_space<vmem>>, vector<2x128xf32>
    %c158 = arith.constant 158 : index
    %c0_146 = arith.constant 0 : index
    %221 = vector.load %arg15[%c158, %c0_146] : memref<272x128xf32, #tpu.memory_space<vmem>>, vector<2x128xf32>
    %222 = arith.maximumf %220, %221 : vector<2x128xf32>
    %223 = arith.maximumf %219, %222 : vector<2x128xf32>
    %224 = vector.broadcast %48 : vector<1x128xf32> to vector<2x128xf32>
    %225 = arith.addf %223, %224 : vector<2x128xf32>
    %cst_147 = arith.constant 0.000000e+00 : f32
    %226 = vector.broadcast %cst_147 : f32 to vector<2x128xf32>
    %227 = arith.maximumf %225, %226 : vector<2x128xf32>
    %228 = vector.extract_strided_slice %227 {offsets = [0, 0], sizes = [2, 16], strides = [1, 1]} : vector<2x128xf32> to vector<2x16xf32>
    %c168 = arith.constant 168 : index
    %c0_148 = arith.constant 0 : index
    %229 = vector.load %arg15[%c168, %c0_148] : memref<272x128xf32, #tpu.memory_space<vmem>>, vector<2x128xf32>
    %c170 = arith.constant 170 : index
    %c0_149 = arith.constant 0 : index
    %230 = vector.load %arg15[%c170, %c0_149] : memref<272x128xf32, #tpu.memory_space<vmem>>, vector<2x128xf32>
    %231 = arith.maximumf %229, %230 : vector<2x128xf32>
    %c196 = arith.constant 196 : index
    %c0_150 = arith.constant 0 : index
    %232 = vector.load %arg15[%c196, %c0_150] : memref<272x128xf32, #tpu.memory_space<vmem>>, vector<2x128xf32>
    %c198 = arith.constant 198 : index
    %c0_151 = arith.constant 0 : index
    %233 = vector.load %arg15[%c198, %c0_151] : memref<272x128xf32, #tpu.memory_space<vmem>>, vector<2x128xf32>
    %234 = arith.maximumf %232, %233 : vector<2x128xf32>
    %235 = arith.maximumf %231, %234 : vector<2x128xf32>
    %236 = vector.broadcast %48 : vector<1x128xf32> to vector<2x128xf32>
    %237 = arith.addf %235, %236 : vector<2x128xf32>
    %cst_152 = arith.constant 0.000000e+00 : f32
    %238 = vector.broadcast %cst_152 : f32 to vector<2x128xf32>
    %239 = arith.maximumf %237, %238 : vector<2x128xf32>
    %240 = vector.extract_strided_slice %239 {offsets = [0, 0], sizes = [2, 16], strides = [1, 1]} : vector<2x128xf32> to vector<2x16xf32>
    %c172 = arith.constant 172 : index
    %c0_153 = arith.constant 0 : index
    %241 = vector.load %arg15[%c172, %c0_153] : memref<272x128xf32, #tpu.memory_space<vmem>>, vector<2x128xf32>
    %c174 = arith.constant 174 : index
    %c0_154 = arith.constant 0 : index
    %242 = vector.load %arg15[%c174, %c0_154] : memref<272x128xf32, #tpu.memory_space<vmem>>, vector<2x128xf32>
    %243 = arith.maximumf %241, %242 : vector<2x128xf32>
    %c200 = arith.constant 200 : index
    %c0_155 = arith.constant 0 : index
    %244 = vector.load %arg15[%c200, %c0_155] : memref<272x128xf32, #tpu.memory_space<vmem>>, vector<2x128xf32>
    %c202 = arith.constant 202 : index
    %c0_156 = arith.constant 0 : index
    %245 = vector.load %arg15[%c202, %c0_156] : memref<272x128xf32, #tpu.memory_space<vmem>>, vector<2x128xf32>
    %246 = arith.maximumf %244, %245 : vector<2x128xf32>
    %247 = arith.maximumf %243, %246 : vector<2x128xf32>
    %248 = vector.broadcast %48 : vector<1x128xf32> to vector<2x128xf32>
    %249 = arith.addf %247, %248 : vector<2x128xf32>
    %cst_157 = arith.constant 0.000000e+00 : f32
    %250 = vector.broadcast %cst_157 : f32 to vector<2x128xf32>
    %251 = arith.maximumf %249, %250 : vector<2x128xf32>
    %252 = vector.extract_strided_slice %251 {offsets = [0, 0], sizes = [2, 16], strides = [1, 1]} : vector<2x128xf32> to vector<2x16xf32>
    %c176 = arith.constant 176 : index
    %c0_158 = arith.constant 0 : index
    %253 = vector.load %arg15[%c176, %c0_158] : memref<272x128xf32, #tpu.memory_space<vmem>>, vector<2x128xf32>
    %c178 = arith.constant 178 : index
    %c0_159 = arith.constant 0 : index
    %254 = vector.load %arg15[%c178, %c0_159] : memref<272x128xf32, #tpu.memory_space<vmem>>, vector<2x128xf32>
    %255 = arith.maximumf %253, %254 : vector<2x128xf32>
    %c204 = arith.constant 204 : index
    %c0_160 = arith.constant 0 : index
    %256 = vector.load %arg15[%c204, %c0_160] : memref<272x128xf32, #tpu.memory_space<vmem>>, vector<2x128xf32>
    %c206 = arith.constant 206 : index
    %c0_161 = arith.constant 0 : index
    %257 = vector.load %arg15[%c206, %c0_161] : memref<272x128xf32, #tpu.memory_space<vmem>>, vector<2x128xf32>
    %258 = arith.maximumf %256, %257 : vector<2x128xf32>
    %259 = arith.maximumf %255, %258 : vector<2x128xf32>
    %260 = vector.broadcast %48 : vector<1x128xf32> to vector<2x128xf32>
    %261 = arith.addf %259, %260 : vector<2x128xf32>
    %cst_162 = arith.constant 0.000000e+00 : f32
    %262 = vector.broadcast %cst_162 : f32 to vector<2x128xf32>
    %263 = arith.maximumf %261, %262 : vector<2x128xf32>
    %264 = vector.extract_strided_slice %263 {offsets = [0, 0], sizes = [2, 16], strides = [1, 1]} : vector<2x128xf32> to vector<2x16xf32>
    %c180 = arith.constant 180 : index
    %c0_163 = arith.constant 0 : index
    %265 = vector.load %arg15[%c180, %c0_163] : memref<272x128xf32, #tpu.memory_space<vmem>>, vector<2x128xf32>
    %c182 = arith.constant 182 : index
    %c0_164 = arith.constant 0 : index
    %266 = vector.load %arg15[%c182, %c0_164] : memref<272x128xf32, #tpu.memory_space<vmem>>, vector<2x128xf32>
    %267 = arith.maximumf %265, %266 : vector<2x128xf32>
    %c208 = arith.constant 208 : index
    %c0_165 = arith.constant 0 : index
    %268 = vector.load %arg15[%c208, %c0_165] : memref<272x128xf32, #tpu.memory_space<vmem>>, vector<2x128xf32>
    %c210 = arith.constant 210 : index
    %c0_166 = arith.constant 0 : index
    %269 = vector.load %arg15[%c210, %c0_166] : memref<272x128xf32, #tpu.memory_space<vmem>>, vector<2x128xf32>
    %270 = arith.maximumf %268, %269 : vector<2x128xf32>
    %271 = arith.maximumf %267, %270 : vector<2x128xf32>
    %272 = vector.broadcast %48 : vector<1x128xf32> to vector<2x128xf32>
    %273 = arith.addf %271, %272 : vector<2x128xf32>
    %cst_167 = arith.constant 0.000000e+00 : f32
    %274 = vector.broadcast %cst_167 : f32 to vector<2x128xf32>
    %275 = arith.maximumf %273, %274 : vector<2x128xf32>
    %276 = vector.extract_strided_slice %275 {offsets = [0, 0], sizes = [2, 16], strides = [1, 1]} : vector<2x128xf32> to vector<2x16xf32>
    %c184 = arith.constant 184 : index
    %c0_168 = arith.constant 0 : index
    %277 = vector.load %arg15[%c184, %c0_168] : memref<272x128xf32, #tpu.memory_space<vmem>>, vector<2x128xf32>
    %c186 = arith.constant 186 : index
    %c0_169 = arith.constant 0 : index
    %278 = vector.load %arg15[%c186, %c0_169] : memref<272x128xf32, #tpu.memory_space<vmem>>, vector<2x128xf32>
    %279 = arith.maximumf %277, %278 : vector<2x128xf32>
    %c212 = arith.constant 212 : index
    %c0_170 = arith.constant 0 : index
    %280 = vector.load %arg15[%c212, %c0_170] : memref<272x128xf32, #tpu.memory_space<vmem>>, vector<2x128xf32>
    %c214 = arith.constant 214 : index
    %c0_171 = arith.constant 0 : index
    %281 = vector.load %arg15[%c214, %c0_171] : memref<272x128xf32, #tpu.memory_space<vmem>>, vector<2x128xf32>
    %282 = arith.maximumf %280, %281 : vector<2x128xf32>
    %283 = arith.maximumf %279, %282 : vector<2x128xf32>
    %284 = vector.broadcast %48 : vector<1x128xf32> to vector<2x128xf32>
    %285 = arith.addf %283, %284 : vector<2x128xf32>
    %cst_172 = arith.constant 0.000000e+00 : f32
    %286 = vector.broadcast %cst_172 : f32 to vector<2x128xf32>
    %287 = arith.maximumf %285, %286 : vector<2x128xf32>
    %288 = vector.extract_strided_slice %287 {offsets = [0, 0], sizes = [2, 16], strides = [1, 1]} : vector<2x128xf32> to vector<2x16xf32>
    %c224 = arith.constant 224 : index
    %c0_173 = arith.constant 0 : index
    %289 = vector.load %arg15[%c224, %c0_173] : memref<272x128xf32, #tpu.memory_space<vmem>>, vector<2x128xf32>
    %c226 = arith.constant 226 : index
    %c0_174 = arith.constant 0 : index
    %290 = vector.load %arg15[%c226, %c0_174] : memref<272x128xf32, #tpu.memory_space<vmem>>, vector<2x128xf32>
    %291 = arith.maximumf %289, %290 : vector<2x128xf32>
    %c252 = arith.constant 252 : index
    %c0_175 = arith.constant 0 : index
    %292 = vector.load %arg15[%c252, %c0_175] : memref<272x128xf32, #tpu.memory_space<vmem>>, vector<2x128xf32>
    %c254 = arith.constant 254 : index
    %c0_176 = arith.constant 0 : index
    %293 = vector.load %arg15[%c254, %c0_176] : memref<272x128xf32, #tpu.memory_space<vmem>>, vector<2x128xf32>
    %294 = arith.maximumf %292, %293 : vector<2x128xf32>
    %295 = arith.maximumf %291, %294 : vector<2x128xf32>
    %296 = vector.broadcast %48 : vector<1x128xf32> to vector<2x128xf32>
    %297 = arith.addf %295, %296 : vector<2x128xf32>
    %cst_177 = arith.constant 0.000000e+00 : f32
    %298 = vector.broadcast %cst_177 : f32 to vector<2x128xf32>
    %299 = arith.maximumf %297, %298 : vector<2x128xf32>
    %300 = vector.extract_strided_slice %299 {offsets = [0, 0], sizes = [2, 16], strides = [1, 1]} : vector<2x128xf32> to vector<2x16xf32>
    %c228 = arith.constant 228 : index
    %c0_178 = arith.constant 0 : index
    %301 = vector.load %arg15[%c228, %c0_178] : memref<272x128xf32, #tpu.memory_space<vmem>>, vector<2x128xf32>
    %c230 = arith.constant 230 : index
    %c0_179 = arith.constant 0 : index
    %302 = vector.load %arg15[%c230, %c0_179] : memref<272x128xf32, #tpu.memory_space<vmem>>, vector<2x128xf32>
    %303 = arith.maximumf %301, %302 : vector<2x128xf32>
    %c256 = arith.constant 256 : index
    %c0_180 = arith.constant 0 : index
    %304 = vector.load %arg15[%c256, %c0_180] : memref<272x128xf32, #tpu.memory_space<vmem>>, vector<2x128xf32>
    %c258 = arith.constant 258 : index
    %c0_181 = arith.constant 0 : index
    %305 = vector.load %arg15[%c258, %c0_181] : memref<272x128xf32, #tpu.memory_space<vmem>>, vector<2x128xf32>
    %306 = arith.maximumf %304, %305 : vector<2x128xf32>
    %307 = arith.maximumf %303, %306 : vector<2x128xf32>
    %308 = vector.broadcast %48 : vector<1x128xf32> to vector<2x128xf32>
    %309 = arith.addf %307, %308 : vector<2x128xf32>
    %cst_182 = arith.constant 0.000000e+00 : f32
    %310 = vector.broadcast %cst_182 : f32 to vector<2x128xf32>
    %311 = arith.maximumf %309, %310 : vector<2x128xf32>
    %312 = vector.extract_strided_slice %311 {offsets = [0, 0], sizes = [2, 16], strides = [1, 1]} : vector<2x128xf32> to vector<2x16xf32>
    %c232 = arith.constant 232 : index
    %c0_183 = arith.constant 0 : index
    %313 = vector.load %arg15[%c232, %c0_183] : memref<272x128xf32, #tpu.memory_space<vmem>>, vector<2x128xf32>
    %c234 = arith.constant 234 : index
    %c0_184 = arith.constant 0 : index
    %314 = vector.load %arg15[%c234, %c0_184] : memref<272x128xf32, #tpu.memory_space<vmem>>, vector<2x128xf32>
    %315 = arith.maximumf %313, %314 : vector<2x128xf32>
    %c260 = arith.constant 260 : index
    %c0_185 = arith.constant 0 : index
    %316 = vector.load %arg15[%c260, %c0_185] : memref<272x128xf32, #tpu.memory_space<vmem>>, vector<2x128xf32>
    %c262 = arith.constant 262 : index
    %c0_186 = arith.constant 0 : index
    %317 = vector.load %arg15[%c262, %c0_186] : memref<272x128xf32, #tpu.memory_space<vmem>>, vector<2x128xf32>
    %318 = arith.maximumf %316, %317 : vector<2x128xf32>
    %319 = arith.maximumf %315, %318 : vector<2x128xf32>
    %320 = vector.broadcast %48 : vector<1x128xf32> to vector<2x128xf32>
    %321 = arith.addf %319, %320 : vector<2x128xf32>
    %cst_187 = arith.constant 0.000000e+00 : f32
    %322 = vector.broadcast %cst_187 : f32 to vector<2x128xf32>
    %323 = arith.maximumf %321, %322 : vector<2x128xf32>
    %324 = vector.extract_strided_slice %323 {offsets = [0, 0], sizes = [2, 16], strides = [1, 1]} : vector<2x128xf32> to vector<2x16xf32>
    %c236 = arith.constant 236 : index
    %c0_188 = arith.constant 0 : index
    %325 = vector.load %arg15[%c236, %c0_188] : memref<272x128xf32, #tpu.memory_space<vmem>>, vector<2x128xf32>
    %c238 = arith.constant 238 : index
    %c0_189 = arith.constant 0 : index
    %326 = vector.load %arg15[%c238, %c0_189] : memref<272x128xf32, #tpu.memory_space<vmem>>, vector<2x128xf32>
    %327 = arith.maximumf %325, %326 : vector<2x128xf32>
    %c264 = arith.constant 264 : index
    %c0_190 = arith.constant 0 : index
    %328 = vector.load %arg15[%c264, %c0_190] : memref<272x128xf32, #tpu.memory_space<vmem>>, vector<2x128xf32>
    %c266 = arith.constant 266 : index
    %c0_191 = arith.constant 0 : index
    %329 = vector.load %arg15[%c266, %c0_191] : memref<272x128xf32, #tpu.memory_space<vmem>>, vector<2x128xf32>
    %330 = arith.maximumf %328, %329 : vector<2x128xf32>
    %331 = arith.maximumf %327, %330 : vector<2x128xf32>
    %332 = vector.broadcast %48 : vector<1x128xf32> to vector<2x128xf32>
    %333 = arith.addf %331, %332 : vector<2x128xf32>
    %cst_192 = arith.constant 0.000000e+00 : f32
    %334 = vector.broadcast %cst_192 : f32 to vector<2x128xf32>
    %335 = arith.maximumf %333, %334 : vector<2x128xf32>
    %336 = vector.extract_strided_slice %335 {offsets = [0, 0], sizes = [2, 16], strides = [1, 1]} : vector<2x128xf32> to vector<2x16xf32>
    %c240 = arith.constant 240 : index
    %c0_193 = arith.constant 0 : index
    %337 = vector.load %arg15[%c240, %c0_193] : memref<272x128xf32, #tpu.memory_space<vmem>>, vector<2x128xf32>
    %c242 = arith.constant 242 : index
    %c0_194 = arith.constant 0 : index
    %338 = vector.load %arg15[%c242, %c0_194] : memref<272x128xf32, #tpu.memory_space<vmem>>, vector<2x128xf32>
    %339 = arith.maximumf %337, %338 : vector<2x128xf32>
    %c268 = arith.constant 268 : index
    %c0_195 = arith.constant 0 : index
    %340 = vector.load %arg15[%c268, %c0_195] : memref<272x128xf32, #tpu.memory_space<vmem>>, vector<2x128xf32>
    %c270 = arith.constant 270 : index
    %c0_196 = arith.constant 0 : index
    %341 = vector.load %arg15[%c270, %c0_196] : memref<272x128xf32, #tpu.memory_space<vmem>>, vector<2x128xf32>
    %342 = arith.maximumf %340, %341 : vector<2x128xf32>
    %343 = arith.maximumf %339, %342 : vector<2x128xf32>
    %344 = vector.broadcast %48 : vector<1x128xf32> to vector<2x128xf32>
    %345 = arith.addf %343, %344 : vector<2x128xf32>
    %cst_197 = arith.constant 0.000000e+00 : f32
    %346 = vector.broadcast %cst_197 : f32 to vector<2x128xf32>
    %347 = arith.maximumf %345, %346 : vector<2x128xf32>
    %348 = vector.extract_strided_slice %347 {offsets = [0, 0], sizes = [2, 16], strides = [1, 1]} : vector<2x128xf32> to vector<2x16xf32>
    %349 = tpu.concatenate %60, %72, %84, %96, %108, %120, %132, %144, %156, %168, %180, %192, %204, %216, %228, %240 in 1 : vector<2x16xf32>, vector<2x16xf32>, vector<2x16xf32>, vector<2x16xf32>, vector<2x16xf32>, vector<2x16xf32>, vector<2x16xf32>, vector<2x16xf32>, vector<2x16xf32>, vector<2x16xf32>, vector<2x16xf32>, vector<2x16xf32>, vector<2x16xf32>, vector<2x16xf32>, vector<2x16xf32>, vector<2x16xf32> -> vector<2x256xf32>
    %350 = tpu.concatenate %252, %264, %276, %288, %300, %312, %324, %336, %348 in 1 : vector<2x16xf32>, vector<2x16xf32>, vector<2x16xf32>, vector<2x16xf32>, vector<2x16xf32>, vector<2x16xf32>, vector<2x16xf32>, vector<2x16xf32>, vector<2x16xf32> -> vector<2x144xf32>
    %351 = tpu.concatenate %349, %350 in 1 : vector<2x256xf32>, vector<2x144xf32> -> vector<2x400xf32>
    %c0_198 = arith.constant 0 : index
    %c0_199 = arith.constant 0 : index
    %352 = vector.load %arg6[%c0_198, %c0_199] : memref<400x128xf32, #tpu.memory_space<vmem>>, vector<400x128xf32>
    %cst_200 = arith.constant dense<0.000000e+00> : vector<2x128xf32>
    %353 = tpu.matmul %351, %352, %cst_200 {dimension_numbers = #tpu.dot_dimension_numbers<[1], [0], [0], [1], [0, 0, 1, 1], [], []>} : vector<2x400xf32>, vector<400x128xf32>, vector<2x128xf32> -> vector<2x128xf32>
    %c0_201 = arith.constant 0 : index
    %c0_202 = arith.constant 0 : index
    %354 = vector.load %arg7[%c0_201, %c0_202] : memref<1x128xf32, #tpu.memory_space<vmem>>, vector<1x128xf32>
    %355 = vector.broadcast %354 : vector<1x128xf32> to vector<2x128xf32>
    %356 = arith.addf %353, %355 : vector<2x128xf32>
    %cst_203 = arith.constant 0.000000e+00 : f32
    %357 = vector.broadcast %cst_203 : f32 to vector<2x128xf32>
    %358 = arith.maximumf %356, %357 : vector<2x128xf32>
    %c0_204 = arith.constant 0 : index
    %c0_205 = arith.constant 0 : index
    %359 = vector.load %arg8[%c0_204, %c0_205] : memref<128x128xf32, #tpu.memory_space<vmem>>, vector<128x128xf32>
    %cst_206 = arith.constant dense<0.000000e+00> : vector<2x128xf32>
    %360 = tpu.matmul %358, %359, %cst_206 {dimension_numbers = #tpu.dot_dimension_numbers<[1], [0], [0], [1], [0, 0, 1, 1], [], []>} : vector<2x128xf32>, vector<128x128xf32>, vector<2x128xf32> -> vector<2x128xf32>
    %c0_207 = arith.constant 0 : index
    %c0_208 = arith.constant 0 : index
    %361 = vector.load %arg9[%c0_207, %c0_208] : memref<1x128xf32, #tpu.memory_space<vmem>>, vector<1x128xf32>
    %362 = vector.broadcast %361 : vector<1x128xf32> to vector<2x128xf32>
    %363 = arith.addf %360, %362 : vector<2x128xf32>
    %cst_209 = arith.constant 0.000000e+00 : f32
    %364 = vector.broadcast %cst_209 : f32 to vector<2x128xf32>
    %365 = arith.maximumf %363, %364 : vector<2x128xf32>
    %c0_210 = arith.constant 0 : index
    %c0_211 = arith.constant 0 : index
    %366 = vector.load %arg10[%c0_210, %c0_211] : memref<128x128xf32, #tpu.memory_space<vmem>>, vector<128x128xf32>
    %cst_212 = arith.constant dense<0.000000e+00> : vector<2x128xf32>
    %367 = tpu.matmul %365, %366, %cst_212 {dimension_numbers = #tpu.dot_dimension_numbers<[1], [0], [0], [1], [0, 0, 1, 1], [], []>} : vector<2x128xf32>, vector<128x128xf32>, vector<2x128xf32> -> vector<2x128xf32>
    %c0_213 = arith.constant 0 : index
    %c0_214 = arith.constant 0 : index
    %368 = vector.load %arg11[%c0_213, %c0_214] : memref<1x128xf32, #tpu.memory_space<vmem>>, vector<1x128xf32>
    %369 = vector.broadcast %368 : vector<1x128xf32> to vector<2x128xf32>
    %370 = arith.addf %367, %369 : vector<2x128xf32>
    %c0_215 = arith.constant 0 : index
    %c0_216 = arith.constant 0 : index
    %c0_217 = arith.constant 0 : index
    %371 = vector.load %arg12[%c0_215, %c0_216, %c0_217] : memref<1x2x128xf32, #tpu.memory_space<vmem>>, vector<1x2x128xf32>
    %372 = vector.shape_cast %371 : vector<1x2x128xf32> to vector<2x128xf32>
    %373 = vector.shape_cast %370 : vector<2x128xf32> to vector<1x2x128xf32>
    tpu.vector_store %arg12[%c0_215, %c0_216, %c0_217], %373 {strides = array<i32>} : memref<1x2x128xf32, #tpu.memory_space<vmem>>, vector<1x2x128xf32>,
    return
  }
  func.func @transform_0(%arg0: i32) -> (i32, i32) {
    %c0_i32 = arith.constant 0 : i32
    %c0_i32_0 = arith.constant 0 : i32
    return %arg0, %c0_i32 : i32, i32
  }
  func.func @transform_1(%arg0: i32) -> (i32, i32) {
    %c0_i32 = arith.constant 0 : i32
    %c0_i32_0 = arith.constant 0 : i32
    %c0_i32_1 = arith.constant 0 : i32
    return %c0_i32, %c0_i32_0 : i32, i32
  }
  func.func @transform_2(%arg0: i32) -> (i32, i32) {
    %c0_i32 = arith.constant 0 : i32
    %c0_i32_0 = arith.constant 0 : i32
    %c0_i32_1 = arith.constant 0 : i32
    return %c0_i32, %c0_i32_0 : i32, i32
  }
  func.func @transform_3(%arg0: i32) -> (i32, i32) {
    %c0_i32 = arith.constant 0 : i32
    %c0_i32_0 = arith.constant 0 : i32
    %c0_i32_1 = arith.constant 0 : i32
    return %c0_i32, %c0_i32_0 : i32, i32
  }
  func.func @transform_4(%arg0: i32) -> (i32, i32) {
    %c0_i32 = arith.constant 0 : i32
    %c0_i32_0 = arith.constant 0 : i32
    %c0_i32_1 = arith.constant 0 : i32
    return %c0_i32, %c0_i32_0 : i32, i32
  }
  func.func @transform_5(%arg0: i32) -> (i32, i32) {
    %c0_i32 = arith.constant 0 : i32
    %c0_i32_0 = arith.constant 0 : i32
    %c0_i32_1 = arith.constant 0 : i32
    return %c0_i32, %c0_i32_0 : i32, i32
  }
  func.func @transform_6(%arg0: i32) -> (i32, i32) {
    %c0_i32 = arith.constant 0 : i32
    %c0_i32_0 = arith.constant 0 : i32
    %c0_i32_1 = arith.constant 0 : i32
    return %c0_i32, %c0_i32_0 : i32, i32
  }
  func.func @transform_7(%arg0: i32) -> (i32, i32) {
    %c0_i32 = arith.constant 0 : i32
    %c0_i32_0 = arith.constant 0 : i32
    %c0_i32_1 = arith.constant 0 : i32
    return %c0_i32, %c0_i32_0 : i32, i32
  }
  func.func @transform_8(%arg0: i32) -> (i32, i32) {
    %c0_i32 = arith.constant 0 : i32
    %c0_i32_0 = arith.constant 0 : i32
    %c0_i32_1 = arith.constant 0 : i32
    return %c0_i32, %c0_i32_0 : i32, i32
  }
  func.func @transform_9(%arg0: i32) -> (i32, i32) {
    %c0_i32 = arith.constant 0 : i32
    %c0_i32_0 = arith.constant 0 : i32
    %c0_i32_1 = arith.constant 0 : i32
    return %c0_i32, %c0_i32_0 : i32, i32
  }
  func.func @transform_10(%arg0: i32) -> (i32, i32) {
    %c0_i32 = arith.constant 0 : i32
    %c0_i32_0 = arith.constant 0 : i32
    %c0_i32_1 = arith.constant 0 : i32
    return %c0_i32, %c0_i32_0 : i32, i32
  }
  func.func @transform_11(%arg0: i32) -> (i32, i32, i32) {
    %c0_i32 = arith.constant 0 : i32
    %c0_i32_0 = arith.constant 0 : i32
    %c0_i32_1 = arith.constant 0 : i32
    return %arg0, %c0_i32, %c0_i32_0 : i32, i32, i32
  }
}

</mosaic_0001>

<bundles_post_ra>
// kernel: net_forward.1
= control target key start
LH: loop header
LB: loop body
LE: loop exit
PB: predicated region body
PF: predicated region fallthrough
CT: control target
= control target key end

     0   :  { %s15014_s0 = inlined_call_operand.vmem [shape: f32[3200,128], index: 0, kind: input, shape index: {}]   ;;  %s15015_s1 = inlined_call_operand.vmem [shape: f32[128,128], index: 1, kind: input, shape index: {}]   ;;  %s15016_s2 = inlined_call_operand.vmem [shape: f32[1,128], index: 2, kind: input, shape index: {}]   ;;  %s15017_s3 = inlined_call_operand.vmem [shape: f32[200,128], index: 3, kind: input, shape index: {}]   ;;  %s15018_s4 = inlined_call_operand.vmem [shape: f32[1,128], index: 4, kind: input, shape index: {}]   ;;  %s15019_s5 = inlined_call_operand.vmem [shape: f32[400,128], index: 5, kind: input, shape index: {}]   ;;  %s15020_s6 = inlined_call_operand.vmem [shape: f32[1,128], index: 6, kind: input, shape index: {}]   ;;  %s15021_s7 = inlined_call_operand.vmem [shape: f32[128,128], index: 7, kind: input, shape index: {}]   ;;  %s15022_s8 = inlined_call_operand.vmem [shape: f32[1,128], index: 8, kind: input, shape index: {}]   ;;  %s15023_s9 = inlined_call_operand.vmem [shape: f32[128,128], index: 9, kind: input, shape index: {}]   ;;  %s15024_s10 = inlined_call_operand.vmem [shape: f32[1,128], index: 10, kind: input, shape index: {}]   ;;  %s15025_s11 = inlined_call_operand.hbm [shape: f32[2,2,128], index: 11, kind: output, shape index: {}]  }
   0x1   :  { %15302 = sst [smem:[#allocation260_spill]] %s15014_s0 }
   0x2   :  { %15303 = sst [smem:[#allocation261_spill]] %s15015_s1 }
   0x3   :  { %15304 = sst [smem:[#allocation262_spill]] %s15016_s2 }
   0x4   :  { %15305 = sst [smem:[#allocation263_spill]] %s15024_s10 }
   0x5   :  { %15306 = sst [smem:[#allocation264_spill]] %s15025_s11 }
   0x6   :  { %16 = vsyncpa [#allocation6], 0 }
   0x7   :  { %18 = vsyncpa [#allocation6 + $0x1], 0  ;;  %s9557_s17 = smov 0   ;;  %s9559_s18 = smov 0  }
   0x8   :  { %s9561_s19 = smov 0   ;;  %s9563_s20 = smov 0  }
   0x9 LB: > { %15307 = sst [smem:[#allocation8_spill]] %s9464_s17  ;;  %s9578_s21 = sadd.s32 4294967295, %s9476_s20   ;;  %s9476_s20 = sphi %s9563_s20, %s16213_s20   ;;  %s9472_s19 = sphi %s9561_s19, %s16215_s19   ;;  %s9468_s18 = sphi %s9559_s18, %s16217_s18   ;;  %s9464_s17 = sphi %s9557_s17, %s16216_s17  }
   0xa   : > { %15308 = sst [smem:[#allocation9_spill]] %s9472_s19  ;;  %s7035_s22 = sadd.s32 4294967294, %s9476_s20  }
   0xb   : > { %15309 = sst [smem:[#allocation10_spill]] %s9476_s20  ;;  %s9582_s23 = sadd.s32 1, %s9476_s20  }
   0xc   : > { %15310 = sst [smem:[#allocation11_spill]] %s9582_s23  ;;  %s267_s24 = sadd.s32 1, %s9472_s19 }
   0xd   : > { %s264_s25 = ssub.s32 %s9476_s20, %s9582_s23  ;;  %p277_p0 = scmp.ne.s32.totalorder %s9472_s19, %s9468_s18 }
   0xe   : > { %p265_p1 = scmp.eq.s32.totalorder %s264_s25, 0  ;;  %p278_p2 = scmp.eq.s32.totalorder %s9578_s21, 1 }
   0xf   : > { %p283_p3 = scmp.ne.s32.totalorder %s9468_s18, %s9464_s17  ;;  %p284_p4 = scmp.eq.s32.totalorder %s7035_s22, 1 }
  0x10   : > { %s9593_s26 = scalar_select %p265_p1, %s9472_s19, %s267_s24  }
  0x11   : > { %p9595_p5 = por %p278_p2, %p277_p0  ;;  %p9599_p6 = por %p284_p4, %p283_p3 }
  0x12   : > { %15311 = sst [smem:[#allocation12_spill]] %s9593_s26  ;;  %p7038_p7 = scmp.ge.s32.totalorder %s9476_s20, 1 }
  0x13   : > { %s15313_s28 = scalar_select %p9599_p6, 1, 0 }
  0x14   : > { %p341_p8 = scmp.lt.s32.totalorder %s9476_s20, 3 }
  0x15   : > { %15314 = sst [smem:[#allocation13_spill]] %s15313_s28 }
  0x16   : > { %p342_p9 = pnand %p7038_p7, %p341_p8 }
  0x18   : > { %345 = sbr.rel (%p342_p9) target bundleno = 2690 (0xa82), region = 64 }
  0x1f   : > { %s15315_s1 = sld [smem:[#allocation261_spill]]  ;;  %s381_s16 = smul.u32 200, %s9578_s21  ;;  %vm4265_vm0 = vcmask 64512   ;;  %vm4300_vm1 = vcmask 130048   ;;  %vm4335_vm2 = vcmask 195584   ;;  %vm4370_vm3 = vcmask 261120  }
  0x20   : > { %s15316_s0 = sld [smem:[#allocation260_spill]]  ;;  %s15415_s2 = sld [smem:[#allocation262_spill]]  ;;  %vm4405_vm4 = vcmask 326656   ;;  %vm4440_vm5 = vcmask 392192   ;;  %vm4510_vm6 = vcmask 523264   ;;  %vm4475_vm7 = vcmask 457728  }
  0x21   : > { %p382_p10 = scmp.lt.s32.totalorder %s381_s16, 399  ;;  %s15110_s22 = smov 56   ;;  %vm4545_vm8 = vcmask 588800   ;;  %vm4580_vm9 = vcmask 654336   ;;  %vm4615_vm10 = vcmask 719872   ;;  %vm4650_vm11 = vcmask 785408  }
  0x22   : > { %s15100_s24 = smov 32   ;;  %s15084_s29 = smov 112   ;;  %vm4685_vm12 = vcmask 850944   ;;  %vm4720_vm13 = vcmask 916480   ;;  %vm4755_vm14 = vcmask 982016   ;;  %vm9495_vm15 = vmmov 0  }
  0x23   : > { %s16219_s16 = smov (!%p382_p10, %s381_s16), 399  ;;  %s15108_s30 = smov 16  }
  0x24   : > { %s7040_s15 = sshll.u32 %s16219_s16, 3  ;;  %s15092_s12 = smov 24  }
  0x25   : > { %v587_v0 = vld [vmem:[%s15315_s1] sm:$0xff]  ;;  %v588_v1 = vld [vmem:[%s15315_s1 + $0x8] sm:$0xff]  ;;  %v589_v2 = vld [vmem:[%s15315_s1 + $0x10] sm:$0xff]  ;;  %s15104_s13 = smov 48   ;;  %s15106_s16 = smov 40  }
  0x26   : > { %v7772_v3 = vpack.c.bf16 %v588_v1, %v587_v0  ;;  %v590_v4 = vld [vmem:[%s15315_s1 + $0x18] sm:$0xff]  ;;  %v591_v6 = vld [vmem:[%s15315_s1 + $0x20] sm:$0xff]  ;;  %v592_v7 = vld [vmem:[%s15315_s1 + $0x28] sm:$0xff]  ;;  %s9633_s25 = scalar_lea.vmem %s15316_s0, %s7040_s15  ;;  %s15096_s15 = smov 8  }
  0x27   : > { %v7776_v5 = vpack.c.bf16 %v590_v4, %v589_v2  ;;  %v7780_v8 = vpack.c.bf16 %v592_v7, %v591_v6  ;;  %v593_v9 = vld [vmem:[%s15315_s1 + $0x30] sm:$0xff]  ;;  %v594_v10 = vld [vmem:[%s15315_s1 + $0x38] sm:$0xff]  ;;  %v387_v11 = vld [vmem:[%s9633_s25] sm:$0xff]  ;;  %s15090_s14 = smov 120   ;;  %s15082_s26 = smov 80  }
  0x28   : > { %7773 = vmatprep.subr.bf16.mxu0 %v7772_v3  ;;  %7947 = vmatprep.subr.bf16.mxu1 %v7772_v3  ;;  %v7784_v12 = vpack.c.bf16 %v594_v10, %v593_v9  ;;  %v595_v13 = vld [vmem:[%s15315_s1 + $0x40] sm:$0xff]  ;;  %v596_v14 = vld [vmem:[%s15315_s1 + $0x48] sm:$0xff]  ;;  %v597_v16 = vld [vmem:[%s15315_s1 + $0x50] sm:$0xff]  ;;  %s15589_s0 = smov 40   ;;  %s15595_s19 = smov 48  }
  0x29   : > { %7775 = vmatpush3.bf16.msra.mxu0 %v7772_v3  ;;  %7955 = vmatpush3.bf16.msra.mxu1 %v7772_v3  ;;  %v7788_v15 = vpack.c.bf16 %v596_v14, %v595_v13  ;;  %v598_v17 = vld [vmem:[%s15315_s1 + $0x58] sm:$0xff]  ;;  %v599_v19 = vld [vmem:[%s15315_s1 + $0x60] sm:$0xff]  ;;  %v600_v20 = vld [vmem:[%s15315_s1 + $0x68] sm:$0xff]  ;;  %s378_s23 = sand.u32 1, %s9468_s18  }
  0x2a   : > { %7777 = vmatprep.subr.bf16.mxu0 %v7776_v5  ;;  %7948 = vmatprep.subr.bf16.mxu1 %v7776_v5  ;;  %v7792_v18 = vpack.c.bf16 %v598_v17, %v597_v16  ;;  %v7796_v21 = vpack.c.bf16 %v600_v20, %v599_v19  ;;  %v601_v22 = vld [vmem:[%s15315_s1 + $0x70] sm:$0xff]  ;;  %v602_v23 = vld [vmem:[%s15315_s1 + $0x78] sm:$0xff]  ;;  %v388_v25 = vld [vmem:[%s9633_s25 + $0x8] sm:$0xff]  ;;  %s15593_s1 = smov 56   ;;  %s7039_s28 = sshll.u32 %s378_s23, 1 }
  0x2b   : > { %7402 = vmatprep.mubr.f32.mxu0 %v387_v11  ;;  %v7800_v24 = vpack.c.bf16 %v602_v23, %v601_v22  ;;  %v389_v26 = vld [vmem:[%s9633_s25 + $0x10] sm:$0xff]  ;;  %v390_v27 = vld [vmem:[%s9633_s25 + $0x18] sm:$0xff]  ;;  %v391_v28 = vld [vmem:[%s9633_s25 + $0x20] sm:$0xff]  ;;  %s6963_s20 = scalar_lea.sflag [#allocation6], %s378_s23 }
  0x2c   : > { %v392_v29 = vld [vmem:[%s9633_s25 + $0x28] sm:$0xff]  ;;  %v393_v30 = vld [vmem:[%s9633_s25 + $0x30] sm:$0xff]  ;;  %v394_v31 = vld [vmem:[%s9633_s25 + $0x38] sm:$0xff] }
  0x2d   : > { %7779 = vmatpush3.bf16.msra.mxu0 %v7776_v5  ;;  %7956 = vmatpush3.bf16.msra.mxu1 %v7776_v5  ;;  %v395_v32 = vld [vmem:[%s9633_s25 + $0x40] sm:$0xff]  ;;  %v396_v33 = vld [vmem:[%s9633_s25 + $0x48] sm:$0xff]  ;;  %v397_v34 = vld [vmem:[%s9633_s25 + $0x50] sm:$0xff] }
  0x2e   : > { %7781 = vmatprep.subr.bf16.mxu0 %v7780_v8  ;;  %7949 = vmatprep.subr.bf16.mxu1 %v7780_v8  ;;  %v398_v35 = vld [vmem:[%s9633_s25 + $0x58] sm:$0xff]  ;;  %v399_v36 = vld [vmem:[%s9633_s25 + $0x60] sm:$0xff]  ;;  %v400_v37 = vld [vmem:[%s9633_s25 + $0x68] sm:$0xff] }
  0x2f   : > { %v401_v38 = vld [vmem:[%s9633_s25 + $0x70] sm:$0xff]  ;;  %v402_v39 = vld [vmem:[%s9633_s25 + $0x78] sm:$0xff]  ;;  %v403_v40 = vld [vmem:[%s9633_s25 + $0x80] sm:$0xff] }
  0x30   : > { %v404_v41 = vld [vmem:[%s9633_s25 + $0x88] sm:$0xff]  ;;  %v405_v42 = vld [vmem:[%s9633_s25 + $0x90] sm:$0xff]  ;;  %v406_v43 = vld [vmem:[%s9633_s25 + $0x98] sm:$0xff] }
  0x31   : > { %7783 = vmatpush3.bf16.msra.mxu0 %v7780_v8  ;;  %7957 = vmatpush3.bf16.msra.mxu1 %v7780_v8  ;;  %v407_v44 = vld [vmem:[%s9633_s25 + $0xa0] sm:$0xff]  ;;  %v408_v45 = vld [vmem:[%s9633_s25 + $0xa8] sm:$0xff]  ;;  %v409_v46 = vld [vmem:[%s9633_s25 + $0xb0] sm:$0xff] }
  0x32   : > { %7785 = vmatprep.subr.bf16.mxu0 %v7784_v12  ;;  %7950 = vmatprep.subr.bf16.mxu1 %v7784_v12  ;;  %v410_v47 = vld [vmem:[%s9633_s25 + $0xb8] sm:$0xff]  ;;  %v411_v48 = vld [vmem:[%s9633_s25 + $0xc0] sm:$0xff]  ;;  %v412_v49 = vld [vmem:[%s9633_s25 + $0xc8] sm:$0xff] }
  0x33   : > { %v413_v50 = vld [vmem:[%s9633_s25 + $0xd0] sm:$0xff]  ;;  %v414_v51 = vld [vmem:[%s9633_s25 + $0xd8] sm:$0xff]  ;;  %v415_v52 = vld [vmem:[%s9633_s25 + $0xe0] sm:$0xff] }
  0x34   : > { %v416_v53 = vld [vmem:[%s9633_s25 + $0xe8] sm:$0xff]  ;;  %v417_v54 = vld [vmem:[%s9633_s25 + $0xf0] sm:$0xff]  ;;  %v418_v55 = vld [vmem:[%s9633_s25 + $0xf8] sm:$0xff] }
  0x35   : > { %7787 = vmatpush3.bf16.msra.mxu0 %v7784_v12  ;;  %7958 = vmatpush3.bf16.msra.mxu1 %v7784_v12  ;;  %v419_v56 = vld [vmem:[%s9633_s25 + $0x100] sm:$0xff]  ;;  %v420_v57 = vld [vmem:[%s9633_s25 + $0x108] sm:$0xff]  ;;  %v421_v58 = vld [vmem:[%s9633_s25 + $0x110] sm:$0xff] }
  0x36   : > { %7789 = vmatprep.subr.bf16.mxu0 %v7788_v15  ;;  %7951 = vmatprep.subr.bf16.mxu1 %v7788_v15  ;;  %v422_v59 = vld [vmem:[%s9633_s25 + $0x118] sm:$0xff]  ;;  %v423_v60 = vld [vmem:[%s9633_s25 + $0x120] sm:$0xff]  ;;  %v424_v61 = vld [vmem:[%s9633_s25 + $0x128] sm:$0xff] }
  0x37   : > { %v425_v62 = vld [vmem:[%s9633_s25 + $0x130] sm:$0xff]  ;;  %v426_v63 = vld [vmem:[%s9633_s25 + $0x138] sm:$0xff]  ;;  %v427_v0 = vld [vmem:[%s9633_s25 + $0x140] sm:$0xff] }
  0x38   : > { %v428_v1 = vld [vmem:[%s9633_s25 + $0x148] sm:$0xff]  ;;  %v429_v2 = vld [vmem:[%s9633_s25 + $0x150] sm:$0xff]  ;;  %v430_v3 = vld [vmem:[%s9633_s25 + $0x158] sm:$0xff] }
  0x39   : > { %7791 = vmatpush3.bf16.msra.mxu0 %v7788_v15  ;;  %7959 = vmatpush3.bf16.msra.mxu1 %v7788_v15  ;;  %v431_v4 = vld [vmem:[%s9633_s25 + $0x160] sm:$0xff]  ;;  %v432_v5 = vld [vmem:[%s9633_s25 + $0x168] sm:$0xff]  ;;  %v433_v6 = vld [vmem:[%s9633_s25 + $0x170] sm:$0xff] }
  0x3a   : > { %7793 = vmatprep.subr.bf16.mxu0 %v7792_v18  ;;  %7952 = vmatprep.subr.bf16.mxu1 %v7792_v18  ;;  %v547_v7 = vld [vmem:[%s9633_s25 + $0x500] sm:$0xff]  ;;  %v434_v8 = vld [vmem:[%s9633_s25 + $0x178] sm:$0xff]  ;;  %v548_v10 = vld [vmem:[%s9633_s25 + $0x508] sm:$0xff] }
  0x3b   : > { %7642 = vmatprep.mubr.f32.mxu1 %v547_v7  ;;  %v435_v9 = vld [vmem:[%s9633_s25 + $0x180] sm:$0xff]  ;;  %v436_v11 = vld [vmem:[%s9633_s25 + $0x188] sm:$0xff]  ;;  %v549_v12 = vld [vmem:[%s9633_s25 + $0x510] sm:$0xff] }
  0x3c   : > { %v437_v13 = vld [vmem:[%s9633_s25 + $0x190] sm:$0xff]  ;;  %v550_v14 = vld [vmem:[%s9633_s25 + $0x518] sm:$0xff]  ;;  %v439_v16 = vld [vmem:[%s9633_s25 + $0x1a0] sm:$0xff] }
  0x3d   : > { %7795 = vmatpush3.bf16.msra.mxu0 %v7792_v18  ;;  %7960 = vmatpush3.bf16.msra.mxu1 %v7792_v18  ;;  %v438_v15 = vld [vmem:[%s9633_s25 + $0x198] sm:$0xff]  ;;  %v551_v17 = vld [vmem:[%s9633_s25 + $0x520] sm:$0xff]  ;;  %v552_v18 = vld [vmem:[%s9633_s25 + $0x528] sm:$0xff] }
  0x3e   : > { %7797 = vmatprep.subr.bf16.mxu0 %v7796_v21  ;;  %7953 = vmatprep.subr.bf16.mxu1 %v7796_v21  ;;  %v440_v19 = vld [vmem:[%s9633_s25 + $0x1a8] sm:$0xff]  ;;  %v441_v20 = vld [vmem:[%s9633_s25 + $0x1b0] sm:$0xff]  ;;  %v554_v22 = vld [vmem:[%s9633_s25 + $0x538] sm:$0xff] }
  0x3f   : > { %v442_v23 = vld [vmem:[%s9633_s25 + $0x1b8] sm:$0xff] }
  0x40   : > { %v466_v7 = vld [vmem:[%s9633_s25 + $0x278] sm:$0xff] }
  0x41   : > { %7799 = vmatpush3.bf16.msra.mxu0 %v7796_v21  ;;  %7961 = vmatpush3.bf16.msra.mxu1 %v7796_v21  ;;  %v553_v21 = vld [vmem:[%s9633_s25 + $0x530] sm:$0xff] }
  0x42   : > { %7801 = vmatprep.subr.bf16.mxu0 %v7800_v24  ;;  %7954 = vmatprep.subr.bf16.mxu1 %v7800_v24 }
  0x45   : > { %7803 = vmatpush3.bf16.msra.mxu0 %v7800_v24  ;;  %7962 = vmatpush3.bf16.msra.mxu1 %v7800_v24  ;;  %v443_v24 = vld [vmem:[%s9633_s25 + $0x1c0] sm:$0xff] }
  0x48   : > { %7403 = vmatmul.mubr.f32.vlgmr.msra.gmra.mrb[0].mxu0 %v388_v25  ;;  %7643 = vmatmul.mubr.f32.vlgmr.msra.gmra.mrb[0].mxu1 %v548_v10  ;;  %v555_v25 = vld [vmem:[%s9633_s25 + $0x540] sm:$0xff]  ;;  %v580_v10 = vld [vmem:[%s9633_s25 + $0x608] sm:$0xff] }
  0x49   : > { %7405 = vmatprep.mubr.f32.mxu0 %v389_v26  ;;  %7645 = vmatprep.mubr.f32.mxu1 %v549_v12  ;;  %v556_v26 = vld [vmem:[%s9633_s25 + $0x548] sm:$0xff]  ;;  %v469_v12 = vld [vmem:[%s9633_s25 + $0x290] sm:$0xff] }
  0x4c   : > { %7406 = vmatmul.mubr.f32.gmra.mrb[2].mxu0 %v390_v27  ;;  %7646 = vmatmul.mubr.f32.gmra.mrb[2].mxu1 %v550_v14  ;;  %v444_v27 = vld [vmem:[%s9633_s25 + $0x1c8] sm:$0xff]  ;;  %v582_v14 = vld [vmem:[%s9633_s25 + $0x618] sm:$0xff] }
  0x4d   : > { %7408 = vmatprep.mubr.f32.mxu0 %v391_v28  ;;  %7648 = vmatprep.mubr.f32.mxu1 %v551_v17  ;;  %v445_v28 = vld [vmem:[%s9633_s25 + $0x1d0] sm:$0xff]  ;;  %v583_v17 = vld [vmem:[%s9633_s25 + $0x620] sm:$0xff] }
  0x50   : > { %7409 = vmatmul.mubr.f32.gmra.mrb[4].mxu0 %v392_v29  ;;  %7649 = vmatmul.mubr.f32.gmra.mrb[4].mxu1 %v552_v18  ;;  %v557_v29 = vld [vmem:[%s9633_s25 + $0x550] sm:$0xff]  ;;  %v584_v18 = vld [vmem:[%s9633_s25 + $0x628] sm:$0xff] }
  0x51   : > { %7411 = vmatprep.mubr.f32.mxu0 %v393_v30  ;;  %7651 = vmatprep.mubr.f32.mxu1 %v553_v21  ;;  %v558_v30 = vld [vmem:[%s9633_s25 + $0x558] sm:$0xff]  ;;  %v585_v21 = vld [vmem:[%s9633_s25 + $0x630] sm:$0xff] }
  0x54   : > { %7412 = vmatmul.mubr.f32.gmra.mrb[6].mxu0 %v394_v31  ;;  %7652 = vmatmul.mubr.f32.gmra.mrb[6].mxu1 %v554_v22  ;;  %v446_v31 = vld [vmem:[%s9633_s25 + $0x1d8] sm:$0xff] }
  0x55   : > { %7414 = vmatprep.mubr.f32.mxu0 %v395_v32  ;;  %7654 = vmatprep.mubr.f32.mxu1 %v555_v25  ;;  %v447_v32 = vld [vmem:[%s9633_s25 + $0x1e0] sm:$0xff]  ;;  %v586_v22 = vld [vmem:[%s9633_s25 + $0x638] sm:$0xff]  ;;  %v476_v25 = vld [vmem:[%s9633_s25 + $0x2c8] sm:$0xff] }
  0x58   : > { %7415 = vmatmul.mubr.f32.gmra.mrb[8].mxu0 %v396_v33  ;;  %7655 = vmatmul.mubr.f32.gmra.mrb[8].mxu1 %v556_v26  ;;  %v559_v33 = vld [vmem:[%s9633_s25 + $0x560] sm:$0xff]  ;;  %v477_v26 = vld [vmem:[%s9633_s25 + $0x2d0] sm:$0xff] }
  0x59   : > { %7417 = vmatprep.mubr.f32.mxu0 %v397_v34  ;;  %7657 = vmatprep.mubr.f32.mxu1 %v557_v29  ;;  %v560_v34 = vld [vmem:[%s9633_s25 + $0x568] sm:$0xff] }
  0x5a   : > { %v480_v29 = vld [vmem:[%s9633_s25 + $0x2e8] sm:$0xff] }
  0x5c   : > { %7418 = vmatmul.mubr.f32.gmra.mrb[10].mxu0 %v398_v35  ;;  %7658 = vmatmul.mubr.f32.gmra.mrb[10].mxu1 %v558_v30  ;;  %v448_v35 = vld [vmem:[%s9633_s25 + $0x1e8] sm:$0xff]  ;;  %v481_v30 = vld [vmem:[%s9633_s25 + $0x2f0] sm:$0xff] }
  0x5d   : > { %7420 = vmatprep.mubr.f32.mxu0 %v399_v36  ;;  %7660 = vmatprep.mubr.f32.mxu1 %v559_v33  ;;  %v449_v36 = vld [vmem:[%s9633_s25 + $0x1f0] sm:$0xff]  ;;  %v484_v33 = vld [vmem:[%s9633_s25 + $0x308] sm:$0xff] }
  0x60   : > { %7421 = vmatmul.mubr.f32.gmra.mrb[12].mxu0 %v400_v37  ;;  %7661 = vmatmul.mubr.f32.gmra.mrb[12].mxu1 %v560_v34  ;;  %v561_v37 = vld [vmem:[%s9633_s25 + $0x570] sm:$0xff] }
  0x61   : > { %7423 = vmatprep.mubr.f32.mxu0 %v401_v38  ;;  %7663 = vmatprep.mubr.f32.mxu1 %v561_v37  ;;  %v562_v38 = vld [vmem:[%s9633_s25 + $0x578] sm:$0xff]  ;;  %v485_v34 = vld [vmem:[%s9633_s25 + $0x310] sm:$0xff]  ;;  %v488_v37 = vld [vmem:[%s9633_s25 + $0x328] sm:$0xff] }
  0x64   : > { %7424 = vmatmul.mubr.f32.gmra.mrb[14].mxu0 %v402_v39  ;;  %7664 = vmatmul.mubr.f32.gmra.mrb[14].mxu1 %v562_v38  ;;  %v450_v39 = vld [vmem:[%s9633_s25 + $0x1f8] sm:$0xff]  ;;  %v489_v38 = vld [vmem:[%s9633_s25 + $0x330] sm:$0xff] }
  0x65   : > { %7426 = vmatprep.mubr.f32.mxu0 %v403_v40  ;;  %v451_v40 = vld [vmem:[%s9633_s25 + $0x200] sm:$0xff] }
  0x68   : > { %7427 = vmatmul.mubr.f32.gmra.mrb[16].mxu0 %v404_v41  ;;  %v563_v41 = vld [vmem:[%s9633_s25 + $0x580] sm:$0xff] }
  0x69   : > { %7429 = vmatprep.mubr.f32.mxu0 %v405_v42  ;;  %7666 = vmatprep.mubr.f32.mxu1 %v563_v41  ;;  %v564_v42 = vld [vmem:[%s9633_s25 + $0x588] sm:$0xff] }
  0x6a   : > { %7667 = vmatmul.mubr.f32.gmra.mrb[16].mxu1 %v564_v42  ;;  %v492_v41 = vld [vmem:[%s9633_s25 + $0x348] sm:$0xff]  ;;  %v493_v42 = vld [vmem:[%s9633_s25 + $0x350] sm:$0xff] }
  0x6c   : > { %7430 = vmatmul.mubr.f32.gmra.mrb[18].mxu0 %v406_v43  ;;  %v452_v43 = vld [vmem:[%s9633_s25 + $0x208] sm:$0xff] }
  0x6d   : > { %7432 = vmatprep.mubr.f32.mxu0 %v407_v44  ;;  %v453_v44 = vld [vmem:[%s9633_s25 + $0x210] sm:$0xff] }
  0x70   : > { %7433 = vmatmul.mubr.f32.gmra.mrb[20].mxu0 %v408_v45  ;;  %v565_v45 = vld [vmem:[%s9633_s25 + $0x590] sm:$0xff] }
  0x71   : > { %7435 = vmatprep.mubr.f32.mxu0 %v409_v46  ;;  %7669 = vmatprep.mubr.f32.mxu1 %v565_v45  ;;  %v566_v46 = vld [vmem:[%s9633_s25 + $0x598] sm:$0xff] }
  0x72   : > { %7670 = vmatmul.mubr.f32.gmra.mrb[18].mxu1 %v566_v46 }
  0x74   : > { %7436 = vmatmul.mubr.f32.gmra.mrb[22].mxu0 %v410_v47  ;;  %v454_v47 = vld [vmem:[%s9633_s25 + $0x218] sm:$0xff] }
  0x75   : > { %7438 = vmatprep.mubr.f32.mxu0 %v411_v48  ;;  %v455_v48 = vld [vmem:[%s9633_s25 + $0x220] sm:$0xff] }
  0x78   : > { %7439 = vmatmul.mubr.f32.gmra.mrb[24].mxu0 %v412_v49  ;;  %v567_v49 = vld [vmem:[%s9633_s25 + $0x5a0] sm:$0xff] }
  0x79   : > { %7441 = vmatprep.mubr.f32.mxu0 %v413_v50  ;;  %7672 = vmatprep.mubr.f32.mxu1 %v567_v49  ;;  %v568_v50 = vld [vmem:[%s9633_s25 + $0x5a8] sm:$0xff] }
  0x7a   : > { %7673 = vmatmul.mubr.f32.gmra.mrb[20].mxu1 %v568_v50 }
  0x7c   : > { %7442 = vmatmul.mubr.f32.gmra.mrb[26].mxu0 %v414_v51  ;;  %v456_v51 = vld [vmem:[%s9633_s25 + $0x228] sm:$0xff] }
  0x7d   : > { %7444 = vmatprep.mubr.f32.mxu0 %v415_v52  ;;  %v457_v52 = vld [vmem:[%s9633_s25 + $0x230] sm:$0xff] }
  0x80   : > { %7445 = vmatmul.mubr.f32.gmra.mrb[28].mxu0 %v416_v53  ;;  %v569_v53 = vld [vmem:[%s9633_s25 + $0x5b0] sm:$0xff] }
  0x81   : > { %7447 = vmatprep.mubr.f32.mxu0 %v417_v54  ;;  %7675 = vmatprep.mubr.f32.mxu1 %v569_v53  ;;  %v570_v54 = vld [vmem:[%s9633_s25 + $0x5b8] sm:$0xff] }
  0x82   : > { %7676 = vmatmul.mubr.f32.gmra.mrb[22].mxu1 %v570_v54 }
  0x84   : > { %7448 = vmatmul.mubr.f32.gmra.mrb[30].mxu0 %v418_v55  ;;  %v458_v55 = vld [vmem:[%s9633_s25 + $0x238] sm:$0xff] }
  0x85   : > { %7450 = vmatprep.mubr.f32.mxu0 %v419_v56  ;;  %v459_v56 = vld [vmem:[%s9633_s25 + $0x240] sm:$0xff] }
  0x88   : > { %7451 = vmatmul.mubr.f32.gmra.mrb[32].mxu0 %v420_v57  ;;  %v571_v57 = vld [vmem:[%s9633_s25 + $0x5c0] sm:$0xff] }
  0x89   : > { %7453 = vmatprep.mubr.f32.mxu0 %v421_v58  ;;  %7678 = vmatprep.mubr.f32.mxu1 %v571_v57  ;;  %v572_v58 = vld [vmem:[%s9633_s25 + $0x5c8] sm:$0xff] }
  0x8a   : > { %7679 = vmatmul.mubr.f32.gmra.mrb[24].mxu1 %v572_v58 }
  0x8c   : > { %7454 = vmatmul.mubr.f32.gmra.mrb[34].mxu0 %v422_v59  ;;  %v460_v59 = vld [vmem:[%s9633_s25 + $0x248] sm:$0xff] }
  0x8d   : > { %7456 = vmatprep.mubr.f32.mxu0 %v423_v60  ;;  %v461_v60 = vld [vmem:[%s9633_s25 + $0x250] sm:$0xff] }
  0x90   : > { %7457 = vmatmul.mubr.f32.gmra.mrb[36].mxu0 %v424_v61  ;;  %v573_v61 = vld [vmem:[%s9633_s25 + $0x5d0] sm:$0xff] }
  0x91   : > { %7459 = vmatprep.mubr.f32.mxu0 %v425_v62  ;;  %7681 = vmatprep.mubr.f32.mxu1 %v573_v61  ;;  %v574_v62 = vld [vmem:[%s9633_s25 + $0x5d8] sm:$0xff] }
  0x92   : > { %7682 = vmatmul.mubr.f32.gmra.mrb[26].mxu1 %v574_v62 }
  0x94   : > { %7460 = vmatmul.mubr.f32.gmra.mrb[38].mxu0 %v426_v63  ;;  %v462_v63 = vld [vmem:[%s9633_s25 + $0x258] sm:$0xff] }
  0x95   : > { %7462 = vmatprep.mubr.f32.mxu0 %v427_v0  ;;  %v463_v0 = vld [vmem:[%s9633_s25 + $0x260] sm:$0xff] }
  0x98   : > { %7463 = vmatmul.mubr.f32.gmra.mrb[40].mxu0 %v428_v1  ;;  %v575_v1 = vld [vmem:[%s9633_s25 + $0x5e0] sm:$0xff] }
  0x99   : > { %7465 = vmatprep.mubr.f32.mxu0 %v429_v2  ;;  %7684 = vmatprep.mubr.f32.mxu1 %v575_v1  ;;  %v576_v2 = vld [vmem:[%s9633_s25 + $0x5e8] sm:$0xff] }
  0x9a   : > { %7685 = vmatmul.mubr.f32.gmra.mrb[28].mxu1 %v576_v2 }
  0x9c   : > { %7466 = vmatmul.mubr.f32.gmra.mrb[42].mxu0 %v430_v3  ;;  %v464_v3 = vld [vmem:[%s9633_s25 + $0x268] sm:$0xff] }
  0x9d   : > { %7468 = vmatprep.mubr.f32.mxu0 %v431_v4  ;;  %v465_v4 = vld [vmem:[%s9633_s25 + $0x270] sm:$0xff] }
  0xa0   : > { %7469 = vmatmul.mubr.f32.gmra.mrb[44].mxu0 %v432_v5  ;;  %v577_v5 = vld [vmem:[%s9633_s25 + $0x5f0] sm:$0xff] }
  0xa1   : > { %7471 = vmatprep.mubr.f32.mxu0 %v433_v6  ;;  %7687 = vmatprep.mubr.f32.mxu1 %v577_v5  ;;  %v578_v6 = vld [vmem:[%s9633_s25 + $0x5f8] sm:$0xff] }
  0xa2   : > { %7688 = vmatmul.mubr.f32.gmra.mrb[30].mxu1 %v578_v6 }
  0xa4   : > { %7472 = vmatmul.mubr.f32.gmra.mrb[46].mxu0 %v434_v8  ;;  %v467_v8 = vld [vmem:[%s9633_s25 + $0x280] sm:$0xff] }
  0xa5   : > { %7474 = vmatprep.mubr.f32.mxu0 %v435_v9  ;;  %v579_v9 = vld [vmem:[%s9633_s25 + $0x600] sm:$0xff] }
  0xa6   : > { %7690 = vmatprep.mubr.f32.mxu1 %v579_v9 }
  0xa7   : > { %7691 = vmatmul.mubr.f32.gmra.mrb[32].mxu1 %v580_v10 }
  0xa8   : > { %7475 = vmatmul.mubr.f32.gmra.mrb[48].mxu0 %v436_v11  ;;  %v468_v11 = vld [vmem:[%s9633_s25 + $0x288] sm:$0xff] }
  0xa9   : > { %7477 = vmatprep.mubr.f32.mxu0 %v437_v13  ;;  %v581_v13 = vld [vmem:[%s9633_s25 + $0x610] sm:$0xff] }
  0xaa   : > { %7693 = vmatprep.mubr.f32.mxu1 %v581_v13 }
  0xab   : > { %7694 = vmatmul.mubr.f32.gmra.mrb[34].mxu1 %v582_v14 }
  0xac   : > { %7478 = vmatmul.mubr.f32.gmra.mrb[50].mxu0 %v438_v15  ;;  %v470_v15 = vld [vmem:[%s9633_s25 + $0x298] sm:$0xff]  ;;  %7696 = vmatprep.mubr.f32.mxu1 %v583_v17 }
  0xad   : > { %7480 = vmatprep.mubr.f32.mxu0 %v439_v16  ;;  %v471_v16 = vld [vmem:[%s9633_s25 + $0x2a0] sm:$0xff] }
  0xaf   : > { %7697 = vmatmul.mubr.f32.gmra.mrb[36].mxu1 %v584_v18 }
  0xb0   : > { %7481 = vmatmul.mubr.f32.gmra.mrb[52].mxu0 %v440_v19  ;;  %v472_v19 = vld [vmem:[%s9633_s25 + $0x2a8] sm:$0xff]  ;;  %7699 = vmatprep.mubr.f32.mxu1 %v585_v21 }
  0xb1   : > { %7483 = vmatprep.mubr.f32.mxu0 %v441_v20  ;;  %v473_v20 = vld [vmem:[%s9633_s25 + $0x2b0] sm:$0xff] }
  0xb3   : > { %7700 = vmatmul.mubr.f32.gmra.mrb[38].mxu1 %v586_v22 }
  0xb4   : > { %7484 = vmatmul.mubr.f32.gmra.mrb[54].mxu0 %v442_v23  ;;  %v474_v23 = vld [vmem:[%s9633_s25 + $0x2b8] sm:$0xff] }
  0xb5   : > { %7486 = vmatprep.mubr.f32.mxu0 %v443_v24  ;;  %v475_v24 = vld [vmem:[%s9633_s25 + $0x2c0] sm:$0xff] }
  0xb8   : > { %7487 = vmatmul.mubr.f32.gmra.mrb[56].mxu0 %v444_v27  ;;  %v478_v27 = vld [vmem:[%s9633_s25 + $0x2d8] sm:$0xff] }
  0xb9   : > { %7489 = vmatprep.mubr.f32.mxu0 %v445_v28  ;;  %v479_v28 = vld [vmem:[%s9633_s25 + $0x2e0] sm:$0xff] }
  0xbc   : > { %7490 = vmatmul.mubr.f32.gmra.mrb[58].mxu0 %v446_v31  ;;  %v482_v31 = vld [vmem:[%s9633_s25 + $0x2f8] sm:$0xff] }
  0xbd   : > { %7492 = vmatprep.mubr.f32.mxu0 %v447_v32  ;;  %v483_v32 = vld [vmem:[%s9633_s25 + $0x300] sm:$0xff] }
  0xc0   : > { %7493 = vmatmul.mubr.f32.gmra.mrb[60].mxu0 %v448_v35  ;;  %v486_v35 = vld [vmem:[%s9633_s25 + $0x318] sm:$0xff] }
  0xc1   : > { %7495 = vmatprep.mubr.f32.mxu0 %v449_v36  ;;  %v487_v36 = vld [vmem:[%s9633_s25 + $0x320] sm:$0xff] }
  0xc4   : > { %7496 = vmatmul.mubr.f32.gmra.mrb[62].mxu0 %v450_v39  ;;  %v490_v39 = vld [vmem:[%s9633_s25 + $0x338] sm:$0xff] }
  0xc5   : > { %7498 = vmatprep.mubr.f32.mxu0 %v451_v40  ;;  %v491_v40 = vld [vmem:[%s9633_s25 + $0x340] sm:$0xff] }
  0xc8   : > { %7499 = vmatmul.mubr.f32.gmra.mrb[64].mxu0 %v452_v43  ;;  %v494_v43 = vld [vmem:[%s9633_s25 + $0x358] sm:$0xff] }
  0xc9   : > { %7501 = vmatprep.mubr.f32.mxu0 %v453_v44  ;;  %v495_v44 = vld [vmem:[%s9633_s25 + $0x360] sm:$0xff] }
  0xcc   : > { %7502 = vmatmul.mubr.f32.gmra.mrb[66].mxu0 %v454_v47  ;;  %v496_v47 = vld [vmem:[%s9633_s25 + $0x368] sm:$0xff] }
  0xcd   : > { %7504 = vmatprep.mubr.f32.mxu0 %v455_v48  ;;  %v497_v48 = vld [vmem:[%s9633_s25 + $0x370] sm:$0xff] }
  0xd0   : > { %7505 = vmatmul.mubr.f32.gmra.mrb[68].mxu0 %v456_v51  ;;  %v498_v51 = vld [vmem:[%s9633_s25 + $0x378] sm:$0xff] }
  0xd1   : > { %7507 = vmatprep.mubr.f32.mxu0 %v457_v52  ;;  %v499_v52 = vld [vmem:[%s9633_s25 + $0x380] sm:$0xff] }
  0xd4   : > { %7508 = vmatmul.mubr.f32.gmra.mrb[70].mxu0 %v458_v55  ;;  %v500_v55 = vld [vmem:[%s9633_s25 + $0x388] sm:$0xff] }
  0xd5   : > { %7510 = vmatprep.mubr.f32.mxu0 %v459_v56  ;;  %v501_v56 = vld [vmem:[%s9633_s25 + $0x390] sm:$0xff] }
  0xd8   : > { %7511 = vmatmul.mubr.f32.gmra.mrb[72].mxu0 %v460_v59  ;;  %v502_v59 = vld [vmem:[%s9633_s25 + $0x398] sm:$0xff] }
  0xd9   : > { %7513 = vmatprep.mubr.f32.mxu0 %v461_v60  ;;  %v503_v60 = vld [vmem:[%s9633_s25 + $0x3a0] sm:$0xff] }
  0xdc   : > { %7514 = vmatmul.mubr.f32.gmra.mrb[74].mxu0 %v462_v63  ;;  %v504_v63 = vld [vmem:[%s9633_s25 + $0x3a8] sm:$0xff] }
  0xdd   : > { %7516 = vmatprep.mubr.f32.mxu0 %v463_v0  ;;  %v505_v0 = vld [vmem:[%s9633_s25 + $0x3b0] sm:$0xff] }
  0xe0   : > { %7517 = vmatmul.mubr.f32.gmra.mrb[76].mxu0 %v464_v3  ;;  %v506_v3 = vld [vmem:[%s9633_s25 + $0x3b8] sm:$0xff] }
  0xe1   : > { %7519 = vmatprep.mubr.f32.mxu0 %v465_v4  ;;  %v507_v4 = vld [vmem:[%s9633_s25 + $0x3c0] sm:$0xff] }
  0xe4   : > { %7520 = vmatmul.mubr.f32.gmra.mrb[78].mxu0 %v466_v7  ;;  %v508_v7 = vld [vmem:[%s9633_s25 + $0x3c8] sm:$0xff] }
  0xe5   : > { %7522 = vmatprep.mubr.f32.mxu0 %v467_v8  ;;  %v509_v8 = vld [vmem:[%s9633_s25 + $0x3d0] sm:$0xff] }
  0xe8   : > { %7523 = vmatmul.mubr.f32.gmra.mrb[80].mxu0 %v468_v11  ;;  %v510_v11 = vld [vmem:[%s9633_s25 + $0x3d8] sm:$0xff] }
  0xe9   : > { %7525 = vmatprep.mubr.f32.mxu0 %v469_v12  ;;  %v511_v12 = vld [vmem:[%s9633_s25 + $0x3e0] sm:$0xff] }
  0xec   : > { %7526 = vmatmul.mubr.f32.gmra.mrb[82].mxu0 %v470_v15  ;;  %v512_v15 = vld [vmem:[%s9633_s25 + $0x3e8] sm:$0xff] }
  0xed   : > { %7528 = vmatprep.mubr.f32.mxu0 %v471_v16  ;;  %v513_v16 = vld [vmem:[%s9633_s25 + $0x3f0] sm:$0xff] }
  0xf0   : > { %7529 = vmatmul.mubr.f32.gmra.mrb[84].mxu0 %v472_v19  ;;  %v514_v19 = vld [vmem:[%s9633_s25 + $0x3f8] sm:$0xff] }
  0xf1   : > { %7531 = vmatprep.mubr.f32.mxu0 %v473_v20  ;;  %v515_v20 = vld [vmem:[%s9633_s25 + $0x400] sm:$0xff] }
  0xf4   : > { %7532 = vmatmul.mubr.f32.gmra.mrb[86].mxu0 %v474_v23  ;;  %v516_v23 = vld [vmem:[%s9633_s25 + $0x408] sm:$0xff] }
  0xf5   : > { %7534 = vmatprep.mubr.f32.mxu0 %v475_v24  ;;  %v517_v24 = vld [vmem:[%s9633_s25 + $0x410] sm:$0xff] }
  0xf8   : > { %7535 = vmatmul.mubr.f32.gmra.mrb[88].mxu0 %v476_v25 }
  0xf9   : > { %7537 = vmatprep.mubr.f32.mxu0 %v477_v26 }
  0xfc   : > { %7538 = vmatmul.mubr.f32.gmra.mrb[90].mxu0 %v478_v27  ;;  %v518_v27 = vld [vmem:[%s9633_s25 + $0x418] sm:$0xff] }
  0xfd   : > { %7540 = vmatprep.mubr.f32.mxu0 %v479_v28  ;;  %v519_v28 = vld [vmem:[%s9633_s25 + $0x420] sm:$0xff] }
 0x100   : > { %7541 = vmatmul.mubr.f32.gmra.mrb[92].mxu0 %v480_v29 }
 0x101   : > { %7543 = vmatprep.mubr.f32.mxu0 %v481_v30 }
 0x104   : > { %7544 = vmatmul.mubr.f32.gmra.mrb[94].mxu0 %v482_v31  ;;  %v520_v31 = vld [vmem:[%s9633_s25 + $0x428] sm:$0xff] }
 0x105   : > { %7546 = vmatprep.mubr.f32.mxu0 %v483_v32  ;;  %v521_v32 = vld [vmem:[%s9633_s25 + $0x430] sm:$0xff] }
 0x108   : > { %7547 = vmatmul.mubr.f32.gmra.mrb[96].mxu0 %v484_v33 }
 0x109   : > { %7549 = vmatprep.mubr.f32.mxu0 %v485_v34 }
 0x10c   : > { %7550 = vmatmul.mubr.f32.gmra.mrb[98].mxu0 %v486_v35  ;;  %v522_v35 = vld [vmem:[%s9633_s25 + $0x438] sm:$0xff] }
 0x10d   : > { %7552 = vmatprep.mubr.f32.mxu0 %v487_v36  ;;  %v523_v36 = vld [vmem:[%s9633_s25 + $0x440] sm:$0xff] }
 0x110   : > { %7553 = vmatmul.mubr.f32.gmra.mrb[100].mxu0 %v488_v37 }
 0x111   : > { %7555 = vmatprep.mubr.f32.mxu0 %v489_v38 }
 0x114   : > { %7556 = vmatmul.mubr.f32.gmra.mrb[102].mxu0 %v490_v39  ;;  %v524_v39 = vld [vmem:[%s9633_s25 + $0x448] sm:$0xff] }
 0x115   : > { %7558 = vmatprep.mubr.f32.mxu0 %v491_v40  ;;  %v525_v40 = vld [vmem:[%s9633_s25 + $0x450] sm:$0xff] }
 0x118   : > { %7559 = vmatmul.mubr.f32.gmra.mrb[104].mxu0 %v492_v41 }
 0x119   : > { %7561 = vmatprep.mubr.f32.mxu0 %v493_v42 }
 0x11b   : > { %v9808_v45 = vpop.f32.mrb[0].mxu0 }
 0x11c   : > { %15317 = vst [vmem:[#allocation14_spill] sm:$0xff] %v9808_v45  ;;  %v9810_v46 = vpop.f32.mrb[1].mxu0  ;;  %7562 = vmatmul.mubr.f32.gmra.mrb[106].mxu0 %v494_v43  ;;  %v526_v43 = vld [vmem:[%s9633_s25 + $0x458] sm:$0xff] }
 0x11d   : > { %15318 = vst [vmem:[#allocation15_spill] sm:$0xff] %v9810_v46  ;;  %7564 = vmatprep.mubr.f32.mxu0 %v495_v44  ;;  %v527_v44 = vld [vmem:[%s9633_s25 + $0x460] sm:$0xff] }
 0x11f   : > { %v9814_v49 = vpop.f32.mrb[2].mxu0 }
 0x120   : > { %15319 = vst [vmem:[#allocation16_spill] sm:$0xff] %v9814_v49  ;;  %v9816_v50 = vpop.f32.mrb[3].mxu0  ;;  %7565 = vmatmul.mubr.f32.gmra.mrb[108].mxu0 %v496_v47 }
 0x121   : > { %15320 = vst [vmem:[#allocation17_spill] sm:$0xff] %v9816_v50  ;;  %7567 = vmatprep.mubr.f32.mxu0 %v497_v48 }
 0x123   : > { %v9820_v53 = vpop.f32.mrb[4].mxu0 }
 0x124   : > { %15321 = vst [vmem:[#allocation18_spill] sm:$0xff] %v9820_v53  ;;  %v9822_v54 = vpop.f32.mrb[5].mxu0  ;;  %7568 = vmatmul.mubr.f32.gmra.mrb[110].mxu0 %v498_v51  ;;  %v528_v51 = vld [vmem:[%s9633_s25 + $0x468] sm:$0xff] }
 0x125   : > { %15322 = vst [vmem:[#allocation19_spill] sm:$0xff] %v9822_v54  ;;  %7570 = vmatprep.mubr.f32.mxu0 %v499_v52  ;;  %v529_v52 = vld [vmem:[%s9633_s25 + $0x470] sm:$0xff] }
 0x127   : > { %v9826_v57 = vpop.f32.mrb[6].mxu0 }
 0x128   : > { %15323 = vst [vmem:[#allocation20_spill] sm:$0xff] %v9826_v57  ;;  %v9828_v58 = vpop.f32.mrb[7].mxu0  ;;  %7571 = vmatmul.mubr.f32.gmra.mrb[112].mxu0 %v500_v55 }
 0x129   : > { %15324 = vst [vmem:[#allocation21_spill] sm:$0xff] %v9828_v58  ;;  %7573 = vmatprep.mubr.f32.mxu0 %v501_v56 }
 0x12b   : > { %v9832_v61 = vpop.f32.mrb[8].mxu0 }
 0x12c   : > { %15325 = vst [vmem:[#allocation22_spill] sm:$0xff] %v9832_v61  ;;  %v9834_v62 = vpop.f32.mrb[9].mxu0  ;;  %7574 = vmatmul.mubr.f32.gmra.mrb[114].mxu0 %v502_v59  ;;  %v530_v59 = vld [vmem:[%s9633_s25 + $0x478] sm:$0xff] }
 0x12d   : > { %15326 = vst [vmem:[#allocation23_spill] sm:$0xff] %v9834_v62  ;;  %7576 = vmatprep.mubr.f32.mxu0 %v503_v60  ;;  %v531_v60 = vld [vmem:[%s9633_s25 + $0x480] sm:$0xff] }
 0x12f   : > { %v9838_v1 = vpop.f32.mrb[10].mxu0 }
 0x130   : > { %v9840_v2 = vpop.f32.mrb[11].mxu0  ;;  %7577 = vmatmul.mubr.f32.gmra.mrb[116].mxu0 %v504_v63 }
 0x131   : > { %7579 = vmatprep.mubr.f32.mxu0 %v505_v0 }
 0x133   : > { %v9844_v5 = vpop.f32.mrb[12].mxu0 }
 0x134   : > { %v9846_v6 = vpop.f32.mrb[13].mxu0  ;;  %7580 = vmatmul.mubr.f32.gmra.mrb[118].mxu0 %v506_v3  ;;  %v532_v3 = vld [vmem:[%s9633_s25 + $0x488] sm:$0xff] }
 0x135   : > { %7582 = vmatprep.mubr.f32.mxu0 %v507_v4  ;;  %v533_v4 = vld [vmem:[%s9633_s25 + $0x490] sm:$0xff] }
 0x137   : > { %v9850_v9 = vpop.f32.mrb[14].mxu0 }
 0x138   : > { %v9852_v10 = vpop.f32.mrb[15].mxu0  ;;  %7583 = vmatmul.mubr.f32.gmra.mrb[120].mxu0 %v508_v7 }
 0x139   : > { %7585 = vmatprep.mubr.f32.mxu0 %v509_v8 }
 0x13b   : > { %v9856_v13 = vpop.f32.mrb[16].mxu0 }
 0x13c   : > { %v9858_v14 = vpop.f32.mrb[17].mxu0  ;;  %7586 = vmatmul.mubr.f32.gmra.mrb[122].mxu0 %v510_v11  ;;  %v534_v11 = vld [vmem:[%s9633_s25 + $0x498] sm:$0xff] }
 0x13d   : > { %7588 = vmatprep.mubr.f32.mxu0 %v511_v12  ;;  %v535_v12 = vld [vmem:[%s9633_s25 + $0x4a0] sm:$0xff] }
 0x13f   : > { %v9862_v17 = vpop.f32.mrb[18].mxu0 }
 0x140   : > { %15327 = vst [vmem:[#allocation24_spill] sm:$0xff] %v9862_v17  ;;  %v9864_v18 = vpop.f32.mrb[19].mxu0  ;;  %7589 = vmatmul.mubr.f32.gmra.mrb[124].mxu0 %v512_v15 }
 0x141   : > { %7591 = vmatprep.mubr.f32.mxu0 %v513_v16 }
 0x143   : > { %v9868_v21 = vpop.f32.mrb[20].mxu0 }
 0x144   : > { %15328 = vst [vmem:[#allocation25_spill] sm:$0xff] %v9868_v21  ;;  %v9870_v22 = vpop.f32.mrb[21].mxu0  ;;  %7592 = vmatmul.mubr.f32.gmra.mrb[126].mxu0 %v514_v19  ;;  %v536_v19 = vld [vmem:[%s9633_s25 + $0x4a8] sm:$0xff] }
 0x145   : > { %7594 = vmatprep.mubr.f32.mxu0 %v515_v20  ;;  %v537_v20 = vld [vmem:[%s9633_s25 + $0x4b0] sm:$0xff] }
 0x147   : > { %v9874_v25 = vpop.f32.mrb[22].mxu0 }
 0x148   : > { %15329 = vst [vmem:[#allocation26_spill] sm:$0xff] %v9874_v25  ;;  %v9876_v26 = vpop.f32.mrb[23].mxu0  ;;  %7595 = vmatmul.mubr.f32.gmra.mrb[128].mxu0 %v516_v23 }
 0x149   : > { %7597 = vmatprep.mubr.f32.mxu0 %v517_v24 }
 0x14b   : > { %v9880_v29 = vpop.f32.mrb[24].mxu0 }
 0x14c   : > { %15330 = vst [vmem:[#allocation27_spill] sm:$0xff] %v9880_v29  ;;  %v9882_v30 = vpop.f32.mrb[25].mxu0  ;;  %7598 = vmatmul.mubr.f32.gmra.mrb[130].mxu0 %v518_v27  ;;  %v538_v27 = vld [vmem:[%s9633_s25 + $0x4b8] sm:$0xff] }
 0x14d   : > { %7600 = vmatprep.mubr.f32.mxu0 %v519_v28  ;;  %v539_v28 = vld [vmem:[%s9633_s25 + $0x4c0] sm:$0xff] }
 0x14f   : > { %v9886_v33 = vpop.f32.mrb[26].mxu0 }
 0x150   : > { %v9888_v34 = vpop.f32.mrb[27].mxu0  ;;  %7601 = vmatmul.mubr.f32.gmra.mrb[132].mxu0 %v520_v31 }
 0x151   : > { %7603 = vmatprep.mubr.f32.mxu0 %v521_v32 }
 0x153   : > { %v9892_v37 = vpop.f32.mrb[28].mxu0 }
 0x154   : > { %v9894_v38 = vpop.f32.mrb[29].mxu0  ;;  %7604 = vmatmul.mubr.f32.gmra.mrb[134].mxu0 %v522_v35  ;;  %v540_v35 = vld [vmem:[%s9633_s25 + $0x4c8] sm:$0xff] }
 0x155   : > { %7606 = vmatprep.mubr.f32.mxu0 %v523_v36  ;;  %v541_v36 = vld [vmem:[%s9633_s25 + $0x4d0] sm:$0xff] }
 0x157   : > { %v9898_v41 = vpop.f32.mrb[30].mxu0 }
 0x158   : > { %v9900_v42 = vpop.f32.mrb[31].mxu0  ;;  %7607 = vmatmul.mubr.f32.gmra.mrb[136].mxu0 %v524_v39  ;;  %v9946_v39 = vpop.f32.mrb[0].mxu1 }
 0x159   : > { %7609 = vmatprep.mubr.f32.mxu0 %v525_v40 }
 0x15b   : > { %v9904_v47 = vpop.f32.mrb[32].mxu0 }
 0x15c   : > { %v9906_v48 = vpop.f32.mrb[33].mxu0  ;;  %7610 = vmatmul.mubr.f32.gmra.mrb[138].mxu0 %v526_v43  ;;  %v9950_v43 = vpop.f32.mrb[1].mxu1 }
 0x15d   : > { %7612 = vmatprep.mubr.f32.mxu0 %v527_v44 }
 0x15f   : > { %v9910_v55 = vpop.f32.mrb[34].mxu0 }
 0x160   : > { %15331 = vst [vmem:[#allocation28_spill] sm:$0xff] %v9910_v55  ;;  %v9912_v56 = vpop.f32.mrb[35].mxu0  ;;  %7613 = vmatmul.mubr.f32.gmra.mrb[140].mxu0 %v528_v51  ;;  %v542_v51 = vld [vmem:[%s9633_s25 + $0x4d8] sm:$0xff] }
 0x161   : > { %7615 = vmatprep.mubr.f32.mxu0 %v529_v52  ;;  %v543_v52 = vld [vmem:[%s9633_s25 + $0x4e0] sm:$0xff] }
 0x163   : > { %v9916_v63 = vpop.f32.mrb[36].mxu0 }
 0x164   : > { %v9918_v0 = vpop.f32.mrb[37].mxu0  ;;  %7616 = vmatmul.mubr.f32.gmra.mrb[142].mxu0 %v530_v59  ;;  %v9956_v59 = vpop.f32.mrb[2].mxu1 }
 0x165   : > { %7618 = vmatprep.mubr.f32.mxu0 %v531_v60 }
 0x167   : > { %v9922_v7 = vpop.f32.mrb[38].mxu0 }
 0x168   : > { %v9924_v8 = vpop.f32.mrb[39].mxu0  ;;  %7619 = vmatmul.mubr.f32.gmra.mrb[144].mxu0 %v532_v3  ;;  %v9958_v3 = vpop.f32.mrb[3].mxu1 }
 0x169   : > { %7621 = vmatprep.mubr.f32.mxu0 %v533_v4  ;;  %15337 = vst [vmem:[#allocation34_spill] sm:$0xff] %v9958_v3 }
 0x16b   : > { %v9928_v15 = vpop.f32.mrb[40].mxu0 }
 0x16c   : > { %v9930_v16 = vpop.f32.mrb[41].mxu0  ;;  %7622 = vmatmul.mubr.f32.gmra.mrb[146].mxu0 %v534_v11  ;;  %v544_v11 = vld [vmem:[%s9633_s25 + $0x4e8] sm:$0xff] }
 0x16d   : > { %7624 = vmatprep.mubr.f32.mxu0 %v535_v12  ;;  %v545_v12 = vld [vmem:[%s9633_s25 + $0x4f0] sm:$0xff] }
 0x16f   : > { %v9934_v23 = vpop.f32.mrb[42].mxu0 }
 0x170   : > { %v9936_v24 = vpop.f32.mrb[43].mxu0  ;;  %7625 = vmatmul.mubr.f32.gmra.mrb[148].mxu0 %v536_v19 }
 0x171   : > { %15332 = vst [vmem:[#allocation29_spill] sm:$0xff] %v9936_v24  ;;  %7627 = vmatprep.mubr.f32.mxu0 %v537_v20  ;;  %v9966_v20 = vpop.f32.mrb[4].mxu1 }
 0x172   : > { %15340 = vst [vmem:[#allocation37_spill] sm:$0xff] %v9966_v20 }
 0x173   : > { %v9940_v31 = vpop.f32.mrb[44].mxu0 }
 0x174   : > { %15333 = vst [vmem:[#allocation30_spill] sm:$0xff] %v9940_v31  ;;  %v9942_v32 = vpop.f32.mrb[45].mxu0  ;;  %7628 = vmatmul.mubr.f32.gmra.mrb[150].mxu0 %v538_v27 }
 0x175   : > { %15334 = vst [vmem:[#allocation31_spill] sm:$0xff] %v9942_v32  ;;  %7630 = vmatprep.mubr.f32.mxu0 %v539_v28 }
 0x177   : > { %v9948_v40 = vpop.f32.mrb[46].mxu0 }
 0x178   : > { %15335 = vst [vmem:[#allocation32_spill] sm:$0xff] %v9948_v40  ;;  %v9952_v44 = vpop.f32.mrb[47].mxu0  ;;  %7631 = vmatmul.mubr.f32.gmra.mrb[152].mxu0 %v540_v35  ;;  %v9972_v35 = vpop.f32.mrb[5].mxu1 }
 0x179   : > { %15336 = vst [vmem:[#allocation33_spill] sm:$0xff] %v9952_v44  ;;  %7633 = vmatprep.mubr.f32.mxu0 %v541_v36 }
 0x17b   : > { %v7476_v60 = vpop.f32.mrb[48].mxu0 }
 0x17c   : > { %v9960_v4 = vpop.f32.mrb[49].mxu0  ;;  %7634 = vmatmul.mubr.f32.gmra.mrb[154].mxu0 %v542_v51  ;;  %v546_v51 = vld [vmem:[%s9633_s25 + $0x4f8] sm:$0xff]  ;;  %v9979_v60 = vpop.f32.mrb[6].mxu1  ;;  %s15094_s25 = smov 96  }
 0x17d   : > { %15338 = vst [vmem:[#allocation35_spill] sm:$0xff] %v9960_v4  ;;  %7636 = vmatprep.mubr.f32.mxu0 %v543_v52  ;;  %v9985_v27 = vpop.f32.mrb[7].mxu1  ;;  %v15418_v4 = vld [vmem:[#allocation34_spill] sm:$0xff] }
 0x17e   : > { %v9991_v36 = vpop.f32.mrb[8].mxu1 }
 0x17f   : > { %v9964_v19 = vpop.f32.mrb[50].mxu0  ;;  %v9997_v46 = vpop.f32.mrb[9].mxu1 }
 0x180   : > { %15339 = vst [vmem:[#allocation36_spill] sm:$0xff] %v9964_v19  ;;  %v9970_v28 = vpop.f32.mrb[51].mxu0  ;;  %7637 = vmatmul.mubr.f32.gmra.mrb[156].mxu0 %v544_v11  ;;  %15346 = vst [vmem:[#allocation43_spill] sm:$0xff] %v9997_v46 }
 0x181   : > { %15341 = vst [vmem:[#allocation38_spill] sm:$0xff] %v9970_v28  ;;  %7639 = vmatprep.mubr.f32.mxu0 %v545_v12 }
 0x183   : > { %v9977_v52 = vpop.f32.mrb[52].mxu0 }
 0x184   : > { %15342 = vst [vmem:[#allocation39_spill] sm:$0xff] %v9977_v52  ;;  %v9983_v3 = vpop.f32.mrb[53].mxu0  ;;  %7640 = vmatmul.mubr.f32.gmra.mrb[158].mxu0 %v546_v51  ;;  %v10003_v52 = vpop.f32.mrb[10].mxu1 }
 0x185   : > { %15343 = vst [vmem:[#allocation40_spill] sm:$0xff] %v9983_v3  ;;  %15348 = vst [vmem:[#allocation45_spill] sm:$0xff] %v10003_v52  ;;  %v10009_v50 = vpop.f32.mrb[11].mxu1 }
 0x186   : > { %15350 = vst [vmem:[#allocation47_spill] sm:$0xff] %v10009_v50  ;;  %v10015_v53 = vpop.f32.mrb[12].mxu1 }
 0x187   : > { %v9989_v19 = vpop.f32.mrb[54].mxu0  ;;  %15352 = vst [vmem:[#allocation49_spill] sm:$0xff] %v10015_v53  ;;  %v10021_v54 = vpop.f32.mrb[13].mxu1 }
 0x188   : > { %15344 = vst [vmem:[#allocation41_spill] sm:$0xff] %v9989_v19  ;;  %v9995_v28 = vpop.f32.mrb[55].mxu0  ;;  %15354 = vst [vmem:[#allocation51_spill] sm:$0xff] %v10021_v54  ;;  %v10027_v57 = vpop.f32.mrb[14].mxu1 }
 0x189   : > { %15345 = vst [vmem:[#allocation42_spill] sm:$0xff] %v9995_v28  ;;  %15355 = vst [vmem:[#allocation52_spill] sm:$0xff] %v10027_v57  ;;  %v10033_v58 = vpop.f32.mrb[15].mxu1 }
 0x18a   : > { %15356 = vst [vmem:[#allocation53_spill] sm:$0xff] %v10033_v58  ;;  %v10039_v61 = vpop.f32.mrb[16].mxu1 }
 0x18b   : > { %v10001_v51 = vpop.f32.mrb[56].mxu0  ;;  %15357 = vst [vmem:[#allocation54_spill] sm:$0xff] %v10039_v61  ;;  %v10045_v62 = vpop.f32.mrb[17].mxu1 }
 0x18c   : > { %15347 = vst [vmem:[#allocation44_spill] sm:$0xff] %v10001_v51  ;;  %v10007_v3 = vpop.f32.mrb[57].mxu0  ;;  %15358 = vst [vmem:[#allocation55_spill] sm:$0xff] %v10045_v62  ;;  %v10055_v58 = vpop.f32.mrb[18].mxu1 }
 0x18d   : > { %15349 = vst [vmem:[#allocation46_spill] sm:$0xff] %v10007_v3  ;;  %15359 = vst [vmem:[#allocation56_spill] sm:$0xff] %v10055_v58  ;;  %v10059_v11 = vpop.f32.mrb[19].mxu1 }
 0x18e   : > { %15360 = vst [vmem:[#allocation57_spill] sm:$0xff] %v10059_v11  ;;  %v10069_v45 = vpop.f32.mrb[20].mxu1 }
 0x18f   : > { %v10013_v19 = vpop.f32.mrb[58].mxu0  ;;  %15361 = vst [vmem:[#allocation58_spill] sm:$0xff] %v10069_v45  ;;  %v10071_v53 = vpop.f32.mrb[21].mxu1 }
 0x190   : > { %15351 = vst [vmem:[#allocation48_spill] sm:$0xff] %v10013_v19  ;;  %v10019_v28 = vpop.f32.mrb[59].mxu0  ;;  %15362 = vst [vmem:[#allocation59_spill] sm:$0xff] %v10071_v53  ;;  %v10081_v62 = vpop.f32.mrb[22].mxu1 }
 0x191   : > { %15353 = vst [vmem:[#allocation50_spill] sm:$0xff] %v10019_v28  ;;  %15364 = vst [vmem:[#allocation61_spill] sm:$0xff] %v10081_v62  ;;  %v10083_v52 = vpop.f32.mrb[23].mxu1 }
 0x192   : > { %15365 = vst [vmem:[#allocation62_spill] sm:$0xff] %v10083_v52  ;;  %v10093_v61 = vpop.f32.mrb[24].mxu1 }
 0x193   : > { %v10025_v51 = vpop.f32.mrb[60].mxu0  ;;  %15367 = vst [vmem:[#allocation64_spill] sm:$0xff] %v10093_v61 }
 0x194   : > { %v10031_v3 = vpop.f32.mrb[61].mxu0 }
 0x197   : > { %v10037_v19 = vpop.f32.mrb[62].mxu0 }
 0x198   : > { %v10043_v28 = vpop.f32.mrb[63].mxu0 }
 0x19b   : > { %v10049_v49 = vpop.f32.mrb[64].mxu0 }
 0x19c   : > { %v10053_v20 = vpop.f32.mrb[65].mxu0 }
 0x19f   : > { %v10061_v57 = vpop.f32.mrb[66].mxu0 }
 0x1a0   : > { %v10065_v12 = vpop.f32.mrb[67].mxu0 }
 0x1a3   : > { %v10073_v58 = vpop.f32.mrb[68].mxu0 }
 0x1a4   : > { %15363 = vst [vmem:[#allocation60_spill] sm:$0xff] %v10073_v58  ;;  %v10077_v11 = vpop.f32.mrb[69].mxu0  ;;  %v10095_v58 = vpop.f32.mrb[25].mxu1 }
 0x1a5   : > { %15368 = vst [vmem:[#allocation65_spill] sm:$0xff] %v10095_v58  ;;  %v10105_v54 = vpop.f32.mrb[26].mxu1 }
 0x1a6   : > { %15370 = vst [vmem:[#allocation67_spill] sm:$0xff] %v10105_v54  ;;  %v10109_v21 = vpop.f32.mrb[27].mxu1 }
 0x1a7   : > { %v10085_v46 = vpop.f32.mrb[70].mxu0  ;;  %15372 = vst [vmem:[#allocation69_spill] sm:$0xff] %v10109_v21  ;;  %v10117_v50 = vpop.f32.mrb[28].mxu1 }
 0x1a8   : > { %15366 = vst [vmem:[#allocation63_spill] sm:$0xff] %v10085_v46  ;;  %v10089_v53 = vpop.f32.mrb[71].mxu0  ;;  %15373 = vst [vmem:[#allocation70_spill] sm:$0xff] %v10117_v50  ;;  %v10121_v25 = vpop.f32.mrb[29].mxu1 }
 0x1a9   : > { %15375 = vst [vmem:[#allocation72_spill] sm:$0xff] %v10121_v25  ;;  %v10129_v45 = vpop.f32.mrb[30].mxu1 }
 0x1aa   : > { %15377 = vst [vmem:[#allocation74_spill] sm:$0xff] %v10129_v45  ;;  %v10133_v29 = vpop.f32.mrb[31].mxu1 }
 0x1ab   : > { %v10097_v17 = vpop.f32.mrb[72].mxu0  ;;  %15379 = vst [vmem:[#allocation76_spill] sm:$0xff] %v10133_v29 }
 0x1ac   : > { %15369 = vst [vmem:[#allocation66_spill] sm:$0xff] %v10097_v17  ;;  %v10101_v52 = vpop.f32.mrb[73].mxu0 }
 0x1af   : > { %v10107_v46 = vpop.f32.mrb[74].mxu0 }
 0x1b0   : > { %15371 = vst [vmem:[#allocation68_spill] sm:$0xff] %v10107_v46  ;;  %v10113_v58 = vpop.f32.mrb[75].mxu0 }
 0x1b3   : > { %v10119_v17 = vpop.f32.mrb[76].mxu0 }
 0x1b4   : > { %15374 = vst [vmem:[#allocation71_spill] sm:$0xff] %v10119_v17  ;;  %v10125_v54 = vpop.f32.mrb[77].mxu0  ;;  %v10143_v17 = vpop.f32.mrb[32].mxu1 }
 0x1b5   : > { %15376 = vst [vmem:[#allocation73_spill] sm:$0xff] %v10125_v54  ;;  %15382 = vst [vmem:[#allocation79_spill] sm:$0xff] %v10143_v17  ;;  %v10149_v54 = vpop.f32.mrb[33].mxu1 }
 0x1b6   : > { %15384 = vst [vmem:[#allocation81_spill] sm:$0xff] %v10149_v54 }
 0x1b7   : > { %v10131_v46 = vpop.f32.mrb[78].mxu0 }
 0x1b8   : > { %15378 = vst [vmem:[#allocation75_spill] sm:$0xff] %v10131_v46  ;;  %v10137_v50 = vpop.f32.mrb[79].mxu0 }
 0x1b9   : > { %15380 = vst [vmem:[#allocation77_spill] sm:$0xff] %v10137_v50  ;;  %v10159_v50 = vpop.f32.mrb[34].mxu1 }
 0x1ba   : > { %15387 = vst [vmem:[#allocation84_spill] sm:$0xff] %v10159_v50  ;;  %v10163_v21 = vpop.f32.mrb[35].mxu1 }
 0x1bb   : > { %v10141_v62 = vpop.f32.mrb[80].mxu0  ;;  %15388 = vst [vmem:[#allocation85_spill] sm:$0xff] %v10163_v21  ;;  %v10173_v46 = vpop.f32.mrb[36].mxu1 }
 0x1bc   : > { %15381 = vst [vmem:[#allocation78_spill] sm:$0xff] %v10141_v62  ;;  %v10147_v45 = vpop.f32.mrb[81].mxu0  ;;  %15391 = vst [vmem:[#allocation88_spill] sm:$0xff] %v10173_v46 }
 0x1bd   : > { %15383 = vst [vmem:[#allocation80_spill] sm:$0xff] %v10147_v45 }
 0x1bf   : > { %v10153_v61 = vpop.f32.mrb[82].mxu0 }
 0x1c0   : > { %15385 = vst [vmem:[#allocation82_spill] sm:$0xff] %v10153_v61  ;;  %v10157_v25 = vpop.f32.mrb[83].mxu0  ;;  %v10175_v61 = vpop.f32.mrb[37].mxu1 }
 0x1c1   : > { %15386 = vst [vmem:[#allocation83_spill] sm:$0xff] %v10157_v25  ;;  %15392 = vst [vmem:[#allocation89_spill] sm:$0xff] %v10175_v61  ;;  %v7701_v54 = vpop.f32.mrb[38].mxu1 }
 0x1c3   : > { %v10165_v62 = vpop.f32.mrb[84].mxu0 }
 0x1c4   : > { %15389 = vst [vmem:[#allocation86_spill] sm:$0xff] %v10165_v62  ;;  %v10169_v29 = vpop.f32.mrb[85].mxu0  ;;  %v10185_v62 = vpop.f32.mrb[39].mxu1 }
 0x1c5   : > { %15390 = vst [vmem:[#allocation87_spill] sm:$0xff] %v10169_v29  ;;  %15394 = vst [vmem:[#allocation91_spill] sm:$0xff] %v10185_v62 }
 0x1c7   : > { %v10177_v50 = vpop.f32.mrb[86].mxu0 }
 0x1c8   : > { %15393 = vst [vmem:[#allocation90_spill] sm:$0xff] %v10177_v50  ;;  %v10181_v21 = vpop.f32.mrb[87].mxu0 }
 0x1cb   : > { %v10187_v55 = vpop.f32.mrb[88].mxu0 }
 0x1cc   : > { %v10191_v46 = vpop.f32.mrb[89].mxu0 }
 0x1cd   : > { %15395 = vst [vmem:[#allocation92_spill] sm:$0xff] %v10191_v46 }
 0x1cf   : > { %v10195_v29 = vpop.f32.mrb[90].mxu0 }
 0x1d0   : > { %15396 = vst [vmem:[#allocation93_spill] sm:$0xff] %v10195_v29  ;;  %v10199_v50 = vpop.f32.mrb[91].mxu0 }
 0x1d1   : > { %15397 = vst [vmem:[#allocation94_spill] sm:$0xff] %v10199_v50 }
 0x1d3   : > { %v10203_v25 = vpop.f32.mrb[92].mxu0 }
 0x1d4   : > { %15398 = vst [vmem:[#allocation95_spill] sm:$0xff] %v10203_v25  ;;  %v10207_v62 = vpop.f32.mrb[93].mxu0 }
 0x1d5   : > { %15399 = vst [vmem:[#allocation96_spill] sm:$0xff] %v10207_v62 }
 0x1d7   : > { %v10211_v46 = vpop.f32.mrb[94].mxu0 }
 0x1d8   : > { %15400 = vst [vmem:[#allocation97_spill] sm:$0xff] %v10211_v46  ;;  %v10215_v29 = vpop.f32.mrb[95].mxu0 }
 0x1d9   : > { %15401 = vst [vmem:[#allocation98_spill] sm:$0xff] %v10215_v29 }
 0x1db   : > { %v10219_v50 = vpop.f32.mrb[96].mxu0 }
 0x1dc   : > { %15402 = vst [vmem:[#allocation99_spill] sm:$0xff] %v10219_v50  ;;  %v10223_v25 = vpop.f32.mrb[97].mxu0 }
 0x1dd   : > { %15403 = vst [vmem:[#allocation100_spill] sm:$0xff] %v10223_v25 }
 0x1df   : > { %v7551_v62 = vpop.f32.mrb[98].mxu0 }
 0x1e0   : > { %v10227_v24 = vpop.f32.mrb[99].mxu0 }
 0x1e1   : > { %15404 = vst [vmem:[#allocation101_spill] sm:$0xff] %v10227_v24 }
 0x1e3   : > { %v10231_v46 = vpop.f32.mrb[100].mxu0 }
 0x1e4   : > { %15405 = vst [vmem:[#allocation102_spill] sm:$0xff] %v10231_v46  ;;  %v10233_v31 = vpop.f32.mrb[101].mxu0 }
 0x1e5   : > { %15406 = vst [vmem:[#allocation103_spill] sm:$0xff] %v10233_v31 }
 0x1e7   : > { %v10235_v54 = vpop.f32.mrb[102].mxu0 }
 0x1e8   : > { %15407 = vst [vmem:[#allocation104_spill] sm:$0xff] %v10235_v54  ;;  %v10237_v29 = vpop.f32.mrb[103].mxu0 }
 0x1e9   : > { %15408 = vst [vmem:[#allocation105_spill] sm:$0xff] %v10237_v29  ;;  %v10255_v29 = vld [vmem:[%s15415_s2] ss:$0 sm:$0xff]  ;;  %s15594_s2 = smov 16  }
 0x1eb   : > { %v10239_v45 = vpop.f32.mrb[104].mxu0 }
 0x1ec   : > { %15409 = vst [vmem:[#allocation106_spill] sm:$0xff] %v10239_v45  ;;  %v10241_v50 = vpop.f32.mrb[105].mxu0 }
 0x1ed   : > { %15410 = vst [vmem:[#allocation107_spill] sm:$0xff] %v10241_v50 }
 0x1ef   : > { %v10243_v40 = vpop.f32.mrb[106].mxu0 }
 0x1f0   : > { %15411 = vst [vmem:[#allocation108_spill] sm:$0xff] %v10243_v40  ;;  %v10245_v62 = vpop.f32.mrb[107].mxu0  ;;  %v15416_v40 = vmax.f32 %v9838_v1, %v10025_v51  ;;  %v15419_v1 = vmax.f32 %v9844_v5, %v10037_v19  ;;  %v15423_v19 = vmax.f32 %v9852_v10, %v10053_v20  ;;  %v15424_v20 = vmax.f32 %v9856_v13, %v10061_v57  ;;  %v15426_v13 = vld [vmem:[#allocation43_spill] sm:$0xff] }
 0x1f1   : > { %15412 = vst [vmem:[#allocation109_spill] sm:$0xff] %v10245_v62 }
 0x1f3   : > { %v10247_v61 = vpop.f32.mrb[108].mxu0 }
 0x1f4   : > { %15413 = vst [vmem:[#allocation110_spill] sm:$0xff] %v10247_v61  ;;  %v10249_v25 = vpop.f32.mrb[109].mxu0  ;;  %v15417_v61 = vmax.f32 %v9840_v2, %v10031_v3 }
 0x1f5   : > { %15414 = vst [vmem:[#allocation111_spill] sm:$0xff] %v10249_v25 }
 0x1f7   : > { %v7569_v17 = vpop.f32.mrb[110].mxu0 }
 0x1f8   : > { %v2129_v46 = vmax.f32 %v7569_v17, %v9946_v39  ;;  %v1219_v31 = vpop.f32.mrb[111].mxu0 }
 0x1f9   : > { %v2128_v45 = vmax.f32 %v1219_v31, %v9950_v43 }
 0x1fa   : > { %v2179_v50 = vmax.f32 %v15416_v40, %v2129_v46 }
 0x1fb   : > { %v2178_v62 = vmax.f32 %v15417_v61, %v2128_v45  ;;  %v7572_v25 = vpop.f32.mrb[112].mxu0  ;;  %v15420_v45 = vmax.f32 %v9846_v6, %v10043_v28 }
 0x1fc   : > { %v2236_v54 = vadd.f32 %v10255_v29, %v2179_v50  ;;  %v2131_v17 = vmax.f32 %v7572_v25, %v9956_v59  ;;  %v1229_v39 = vpop.f32.mrb[113].mxu0  ;;  %v15421_v25 = vld [vmem:[#allocation37_spill] sm:$0xff]  ;;  %v15422_v59 = vmax.f32 %v9850_v9, %v10049_v49 }
 0x1fd   : > { %v2235_v24 = vadd.f32 %v10255_v29, %v2178_v62  ;;  %v2130_v44 = vmax.f32 %v1229_v39, %v15418_v4 }
 0x1fe   : > { %v10268_v32 = vmax.f32 %v2236_v54, 0.0  ;;  %v2181_v46 = vmax.f32 %v15419_v1, %v2131_v17 }
 0x1ff   : > { %v2285_v31 = vmax.f32 %v2235_v24, 0.0  ;;  %v2180_v61 = vmax.f32 %v15420_v45, %v2130_v44  ;;  %v7575_v2 = vpop.f32.mrb[114].mxu0 }
 0x200   : > { %2336 = vst [vmem:[#allocation3 + $0x58] sm:$0xff] %v10268_v32  ;;  %v2238_v50 = vadd.f32 %v10255_v29, %v2181_v46  ;;  %v2133_v40 = vmax.f32 %v7575_v2, %v15421_v25  ;;  %v1239_v43 = vpop.f32.mrb[115].mxu0  ;;  %4793 = vrot.lane.b32.xlu1 %v10268_v32, %s15096_s15  ;;  %v15428_v2 = vld [vmem:[#allocation60_spill] sm:$0xff] }
 0x201   : > { %2335 = vst [vmem:[#allocation3 + $0x50] sm:$0xff] %v2285_v31  ;;  %v2237_v5 = vadd.f32 %v10255_v29, %v2180_v61  ;;  %v2132_v24 = vmax.f32 %v1239_v43, %v9972_v35  ;;  %v8020_v6 = vpack.i.bf16 %v10268_v32, %v2285_v31  ;;  %v15427_v61 = vld [vmem:[#allocation24_spill] sm:$0xff] }
 0x202   : > { %v10284_v44 = vmax.f32 %v2238_v50, 0.0  ;;  %v2183_v3 = vmax.f32 %v15422_v59, %v2133_v40  ;;  %v15429_v50 = vmax.f32 %v15427_v61, %v15428_v2  ;;  %v15431_v59 = vld [vmem:[#allocation45_spill] sm:$0xff] }
 0x203   : > { %v10289_v4 = vmax.f32 %v2237_v5, 0.0  ;;  %v2182_v28 = vmax.f32 %v15423_v19, %v2132_v24  ;;  %v7578_v51 = vpop.f32.mrb[116].mxu0  ;;  %8021 = vrot.lane.b32.xlu0 %v8020_v6, %s15110_s22 }
 0x204   : > { %2338 = vst [vmem:[#allocation3 + $0x68] sm:$0xff] %v10284_v44  ;;  %v2240_v35 = vadd.f32 %v10255_v29, %v2183_v3  ;;  %v2135_v54 = vmax.f32 %v7578_v51, %v9979_v60  ;;  %v1249_v62 = vpop.f32.mrb[117].mxu0  ;;  %3034 = vrot.lane.b32.xlu1 %v10284_v44, %s15100_s24  ;;  %v15425_v60 = vmax.f32 %v9858_v14, %v10065_v12 }
 0x205   : > { %2337 = vst [vmem:[#allocation3 + $0x60] sm:$0xff] %v10289_v4  ;;  %v2239_v49 = vadd.f32 %v10255_v29, %v2182_v28  ;;  %v2134_v9 = vmax.f32 %v1249_v62, %v9985_v27 }
 0x206   : > { %v10303_v10 = vmax.f32 %v2240_v35, 0.0  ;;  %v2185_v17 = vmax.f32 %v15424_v20, %v2135_v54  ;;  %v15433_v20 = vld [vmem:[#allocation25_spill] sm:$0xff] }
 0x207   : > { %v10308_v39 = vmax.f32 %v2239_v49, 0.0  ;;  %v2184_v1 = vmax.f32 %v15425_v60, %v2134_v9  ;;  %v7581_v46 = vpop.f32.mrb[118].mxu0  ;;  %8026 = vrot.lane.b32.xlu0 %v8020_v6, %s15084_s29 }
 0x208   : > { %2340 = vst [vmem:[#allocation3 + $0x78] sm:$0xff] %v10303_v10  ;;  %v2242_v27 = vadd.f32 %v10255_v29, %v2185_v17  ;;  %v2137_v31 = vmax.f32 %v7581_v46, %v9991_v36  ;;  %v1259_v45 = vpop.f32.mrb[119].mxu0  ;;  %4797 = vrot.lane.b32.xlu1 %v10284_v44, %s15096_s15  ;;  %v15430_v36 = vmax.f32 %v9864_v18, %v10077_v11  ;;  %v2453_v24 = vld [vmem:[#allocation3 + $0x54] sm:$0xff]  ;;  %v15432_v18 = vld [vmem:[#allocation47_spill] sm:$0xff] }
 0x209   : > { %2339 = vst [vmem:[#allocation3 + $0x70] sm:$0xff] %v10308_v39  ;;  %v2241_v57 = vadd.f32 %v10255_v29, %v2184_v1  ;;  %v2136_v14 = vmax.f32 %v1259_v45, %v15426_v13  ;;  %v2419_v51 = vld [vmem:[#allocation3 + $0x52] sm:$0xff] }
 0x20a   : > { %v10322_v12 = vmax.f32 %v2242_v27, 0.0  ;;  %v2187_v25 = vmax.f32 %v15429_v50, %v2137_v31  ;;  %v15434_v17 = vld [vmem:[#allocation63_spill] sm:$0xff]  ;;  %v15436_v31 = vmax.f32 %v9870_v22, %v10089_v53  ;;  %v10360_v50 = vld [vmem:[#allocation3 + $0x56] sm:$0xff] }
 0x20b   : > { %v10327_v40 = vmax.f32 %v2241_v57, 0.0  ;;  %v2186_v43 = vmax.f32 %v15430_v36, %v2136_v14  ;;  %v7584_v5 = vpop.f32.mrb[120].mxu0  ;;  %v15435_v60 = vmax.f32 %v15433_v20, %v15434_v17  ;;  %v15437_v14 = vld [vmem:[#allocation49_spill] sm:$0xff]  ;;  %v15438_v22 = vld [vmem:[#allocation51_spill] sm:$0xff]  ;;  %v10366_v36 = vpack.i.bf16 %v10289_v4, %v10268_v32  ;;  %v15443_v20 = vld [vmem:[#allocation52_spill] sm:$0xff] }
 0x20c   : > { %2342 = vst [vmem:[#allocation3 + $0x88] sm:$0xff] %v10322_v12  ;;  %v2244_v6 = vadd.f32 %v10255_v29, %v2187_v25  ;;  %v2139_v3 = vmax.f32 %v7584_v5, %v15431_v59  ;;  %v1269_v19 = vpop.f32.mrb[121].mxu0  ;;  %v10335_v28 = vld [vmem:[#allocation3 + $0x5c] sm:$0xff] }
 0x20d   : > { %v10337_v35 = vld [vmem:[#allocation3 + $0x5a] sm:$0xff]  ;;  %2341 = vst [vmem:[#allocation3 + $0x80] sm:$0xff] %v10327_v40  ;;  %v2243_v54 = vadd.f32 %v10255_v29, %v2186_v43  ;;  %v2138_v11 = vmax.f32 %v1269_v19, %v15432_v18  ;;  %v10343_v62 = vpack.i.bf16 %v10335_v28, %v2453_v24  ;;  %v15439_v24 = vld [vmem:[#allocation26_spill] sm:$0xff]  ;;  %v15442_v18 = vmax.f32 %v9876_v26, %v10101_v52 }
 0x20e   : > { %v10346_v49 = vpack.i.bf16 %v10337_v35, %v2419_v51  ;;  %v2294_v9 = vmax.f32 %v2244_v6, 0.0  ;;  %v2189_v1 = vmax.f32 %v15435_v60, %v2139_v3  ;;  %v2488_v46 = vld [vmem:[#allocation3 + $0x5e] sm:$0xff]  ;;  %v10372_v19 = vld [vmem:[#allocation3 + $0x66] sm:$0xff] }
 0x20f   : > { %v2293_v27 = vmax.f32 %v2243_v54, 0.0  ;;  %v2188_v45 = vmax.f32 %v15436_v31, %v2138_v11  ;;  %v7587_v57 = vpop.f32.mrb[122].mxu0  ;;  %8036 = vrot.lane.b32.xlu0 %v10343_v62, %s15108_s30  ;;  %v8040_v43 = vpack.i.bf16 %v2488_v46, %v10360_v50  ;;  %v15440_v6 = vld [vmem:[#allocation66_spill] sm:$0xff]  ;;  %v10387_v26 = vpack.i.bf16 %v10372_v19, %v2488_v46 }
 0x210   : > { %8031 = vrot.lane.b32.xlu1 %v10346_v49, %s15096_s15  ;;  %2344 = vst [vmem:[#allocation3 + $0x98] sm:$0xff] %v2294_v9  ;;  %v2246_v13 = vadd.f32 %v10255_v29, %v2189_v1  ;;  %v2141_v61 = vmax.f32 %v7587_v57, %v15437_v14  ;;  %v1279_v2 = vpop.f32.mrb[123].mxu0  ;;  %v15441_v59 = vmax.f32 %v15439_v24, %v15440_v6  ;;  %v10374_v51 = vld [vmem:[#allocation3 + $0x64] sm:$0xff]  ;;  %v15445_v57 = vld [vmem:[#allocation27_spill] sm:$0xff] }
 0x211   : > { %2343 = vst [vmem:[#allocation3 + $0x90] sm:$0xff] %v2293_v27  ;;  %v2245_v53 = vadd.f32 %v10255_v29, %v2188_v45  ;;  %v2140_v25 = vmax.f32 %v1279_v2, %v15438_v22  ;;  %v15444_v27 = vld [vmem:[#allocation53_spill] sm:$0xff]  ;;  %v10391_v52 = vpack.i.bf16 %v10374_v51, %v10335_v28 }
 0x212   : > { %v2296_v5 = vmax.f32 %v2246_v13, 0.0  ;;  %v2191_v3 = vmax.f32 %v15441_v59, %v2141_v61  ;;  %v15446_v13 = vld [vmem:[#allocation68_spill] sm:$0xff]  ;;  %v10409_v59 = vpack.i.bf16 %v10284_v44, %v10289_v4 }
 0x213   : > { %v2295_v54 = vmax.f32 %v2245_v53, 0.0  ;;  %v2190_v11 = vmax.f32 %v15442_v18, %v2140_v25  ;;  %v7590_v9 = vpop.f32.mrb[124].mxu0  ;;  %8046 = vrot.lane.b32.xlu0 %v10366_v36, %s15100_s24  ;;  %v15447_v14 = vmax.f32 %v15445_v57, %v15446_v13  ;;  %v15448_v53 = vmax.f32 %v9882_v30, %v10113_v58  ;;  %v15450_v58 = vld [vmem:[#allocation55_spill] sm:$0xff]  ;;  %v15456_v57 = vld [vmem:[#allocation57_spill] sm:$0xff] }
 0x214   : > { %8041 = vrot.lane.b32.xlu1 %v8040_v43, %s15092_s12  ;;  %2346 = vst [vmem:[#allocation3 + $0xa8] sm:$0xff] %v2296_v5  ;;  %v2248_v32 = vadd.f32 %v10255_v29, %v2191_v3  ;;  %v2143_v17 = vmax.f32 %v7590_v9, %v15443_v20  ;;  %v1289_v60 = vpop.f32.mrb[125].mxu0  ;;  %v15449_v43 = vld [vmem:[#allocation54_spill] sm:$0xff] }
 0x215   : > { %2345 = vst [vmem:[#allocation3 + $0xa0] sm:$0xff] %v2295_v54  ;;  %v2247_v1 = vadd.f32 %v10255_v29, %v2190_v11  ;;  %v2142_v31 = vmax.f32 %v1289_v60, %v15444_v27  ;;  %v15451_v54 = vld [vmem:[#allocation71_spill] sm:$0xff]  ;;  %v15455_v27 = vld [vmem:[#allocation56_spill] sm:$0xff] }
 0x216   : > { %v2298_v45 = vmax.f32 %v2248_v32, 0.0  ;;  %v2193_v61 = vmax.f32 %v15447_v14, %v2143_v17  ;;  %v15452_v18 = vmax.f32 %v9886_v33, %v15451_v54  ;;  %v15453_v32 = vld [vmem:[#allocation73_spill] sm:$0xff]  ;;  %v15457_v14 = vld [vmem:[#allocation75_spill] sm:$0xff] }
 0x217   : > { %v2297_v2 = vmax.f32 %v2247_v1, 0.0  ;;  %v2192_v22 = vmax.f32 %v15448_v53, %v2142_v31  ;;  %v7593_v25 = vpop.f32.mrb[126].mxu0  ;;  %8056 = vrot.lane.b32.xlu0 %v10387_v26, %s15104_s13  ;;  %v15454_v20 = vmax.f32 %v9888_v34, %v15453_v32  ;;  %v15459_v53 = vld [vmem:[#allocation77_spill] sm:$0xff] }
 0x218   : > { %8051 = vrot.lane.b32.xlu1 %v10391_v52, %s15106_s16  ;;  %2348 = vst [vmem:[#allocation3 + $0xb8] sm:$0xff] %v2298_v45  ;;  %v2250_v46 = vadd.f32 %v10255_v29, %v2193_v61  ;;  %v2145_v5 = vmax.f32 %v7593_v25, %v15449_v43  ;;  %v1299_v24 = vpop.f32.mrb[127].mxu0  ;;  %v15458_v61 = vmax.f32 %v9892_v37, %v15457_v14  ;;  %v2421_v14 = vld [vmem:[#allocation3 + $0x62] sm:$0xff] }
 0x219   : > { %2347 = vst [vmem:[#allocation3 + $0xb0] sm:$0xff] %v2297_v2  ;;  %v2249_v6 = vadd.f32 %v10255_v29, %v2192_v22  ;;  %v2144_v30 = vmax.f32 %v1299_v24, %v15450_v58  ;;  %v15460_v22 = vmax.f32 %v9894_v38, %v15459_v53  ;;  %v15462_v58 = vld [vmem:[#allocation59_spill] sm:$0xff] }
 0x21a   : > { %v2300_v3 = vmax.f32 %v2250_v46, 0.0  ;;  %v2195_v11 = vmax.f32 %v15452_v18, %v2145_v5  ;;  %v15461_v5 = vld [vmem:[#allocation58_spill] sm:$0xff] }
 0x21b   : > { %v2299_v9 = vmax.f32 %v2249_v6, 0.0  ;;  %v2194_v17 = vmax.f32 %v15454_v20, %v2144_v30  ;;  %v7596_v60 = vpop.f32.mrb[128].mxu0  ;;  %4795 = vrot.lane.b32.xlu0 %v10289_v4, %s15096_s15 }
 0x21c   : > { %8061 = vrot.lane.b32.xlu1 %v10409_v59, %s15110_s22  ;;  %2350 = vst [vmem:[#allocation3 + $0xc8] sm:$0xff] %v2300_v3  ;;  %v2252_v1 = vadd.f32 %v10255_v29, %v2195_v11  ;;  %v2147_v31 = vmax.f32 %v7596_v60, %v15455_v27  ;;  %v1309_v45 = vpop.f32.mrb[129].mxu0  ;;  %v15463_v3 = vld [vmem:[#allocation78_spill] sm:$0xff] }
 0x21d   : > { %2349 = vst [vmem:[#allocation3 + $0xc0] sm:$0xff] %v2299_v9  ;;  %v2251_v33 = vadd.f32 %v10255_v29, %v2194_v17  ;;  %v2146_v13 = vmax.f32 %v1309_v45, %v15456_v57  ;;  %v15464_v54 = vmax.f32 %v9898_v41, %v15463_v3  ;;  %v15465_v9 = vld [vmem:[#allocation80_spill] sm:$0xff]  ;;  %v15468_v45 = vld [vmem:[#allocation62_spill] sm:$0xff] }
 0x21e   : > { %v2302_v34 = vmax.f32 %v2252_v1, 0.0  ;;  %v2197_v2 = vmax.f32 %v15458_v61, %v2147_v31  ;;  %v15466_v32 = vmax.f32 %v9900_v42, %v15465_v9  ;;  %v15467_v1 = vld [vmem:[#allocation61_spill] sm:$0xff]  ;;  %v15469_v57 = vld [vmem:[#allocation82_spill] sm:$0xff]  ;;  %v15480_v9 = vld [vmem:[#allocation67_spill] sm:$0xff] }
 0x21f   : > { %v2301_v4 = vmax.f32 %v2251_v33, 0.0  ;;  %v2196_v25 = vmax.f32 %v15460_v22, %v2146_v13  ;;  %v7599_v46 = vpop.f32.mrb[130].mxu0  ;;  %5004 = vrot.lane.b32.xlu0 %v10374_v51, %s15092_s12  ;;  %v15470_v13 = vmax.f32 %v9904_v47, %v15469_v57 }
 0x220   : > { %4899 = vrot.lane.b32.xlu1 %v10337_v35, %s15108_s30  ;;  %2352 = vst [vmem:[#allocation3 + $0xd8] sm:$0xff] %v2302_v34  ;;  %v2254_v43 = vadd.f32 %v10255_v29, %v2197_v2  ;;  %v2149_v24 = vmax.f32 %v7599_v46, %v15461_v5  ;;  %v1319_v6 = vpop.f32.mrb[131].mxu0  ;;  %v15474_v5 = vld [vmem:[#allocation65_spill] sm:$0xff] }
 0x221   : > { %2351 = vst [vmem:[#allocation3 + $0xd0] sm:$0xff] %v2301_v4  ;;  %v2253_v37 = vadd.f32 %v10255_v29, %v2196_v25  ;;  %v2148_v30 = vmax.f32 %v1319_v6, %v15462_v58  ;;  %v15473_v25 = vld [vmem:[#allocation64_spill] sm:$0xff] }
 0x222   : > { %v2304_v38 = vmax.f32 %v2254_v43, 0.0  ;;  %v2199_v18 = vmax.f32 %v15464_v54, %v2149_v24  ;;  %v15475_v6 = vld [vmem:[#allocation28_spill] sm:$0xff] }
 0x223   : > { %v2303_v11 = vmax.f32 %v2253_v37, 0.0  ;;  %v2198_v20 = vmax.f32 %v15466_v32, %v2148_v30  ;;  %v7602_v17 = vpop.f32.mrb[132].mxu0  ;;  %8066 = vrot.lane.b32.xlu0 %v10343_v62, %s15090_s14  ;;  %v15476_v37 = vld [vmem:[#allocation86_spill] sm:$0xff] }
 0x224   : > { %5002 = vrot.lane.b32.xlu1 %v10335_v28, %s15092_s12  ;;  %2354 = vst [vmem:[#allocation3 + $0xe8] sm:$0xff] %v2304_v38  ;;  %v2256_v60 = vadd.f32 %v10255_v29, %v2199_v18  ;;  %v2151_v27 = vmax.f32 %v7602_v17, %v15467_v1  ;;  %v1329_v41 = vpop.f32.mrb[133].mxu0  ;;  %v15471_v28 = vld [vmem:[#allocation83_spill] sm:$0xff]  ;;  %v15477_v58 = vmax.f32 %v15475_v6, %v15476_v37 }
 0x225   : > { %2353 = vst [vmem:[#allocation3 + $0xe0] sm:$0xff] %v2303_v11  ;;  %v2255_v31 = vadd.f32 %v10255_v29, %v2198_v20  ;;  %v2150_v42 = vmax.f32 %v1329_v41, %v15468_v45  ;;  %v15472_v2 = vmax.f32 %v9906_v48, %v15471_v28  ;;  %v8075_v1 = vpack.i.bf16 %v2421_v14, %v10337_v35  ;;  %v10484_v45 = vld [vmem:[#allocation3 + $0x6a] sm:$0xff]  ;;  %v15486_v28 = vld [vmem:[#allocation72_spill] sm:$0xff] }
 0x226   : > { %v2306_v33 = vmax.f32 %v2256_v60, 0.0  ;;  %v2201_v34 = vmax.f32 %v15470_v13, %v2151_v27  ;;  %v15481_v60 = vld [vmem:[#allocation69_spill] sm:$0xff] }
 0x227   : > { %v2305_v61 = vmax.f32 %v2255_v31, 0.0  ;;  %v2200_v4 = vmax.f32 %v15472_v2, %v2150_v42  ;;  %v7605_v53 = vpop.f32.mrb[134].mxu0  ;;  %8081 = vrot.lane.b32.xlu0 %v10391_v52, %s15094_s25  ;;  %v15478_v52 = vld [vmem:[#allocation87_spill] sm:$0xff]  ;;  %v15484_v42 = vmax.f32 %v9918_v0, %v10181_v21  ;;  %v10497_v0 = vpack.i.bf16 %v10484_v45, %v2421_v14 }
 0x228   : > { %4901 = vrot.lane.b32.xlu1 %v2421_v14, %s15108_s30  ;;  %2356 = vst [vmem:[#allocation3 + $0xf8] sm:$0xff] %v2306_v33  ;;  %v2258_v22 = vadd.f32 %v10255_v29, %v2201_v34  ;;  %v2153_v46 = vmax.f32 %v7605_v53, %v15473_v25  ;;  %v1339_v47 = vpop.f32.mrb[135].mxu0  ;;  %v15479_v3 = vmax.f32 %v9912_v56, %v15478_v52  ;;  %v10502_v53 = vld [vmem:[#allocation3 + $0x6e] sm:$0xff]  ;;  %v15494_v52 = vld [vmem:[#allocation94_spill] sm:$0xff] }
 0x229   : > { %2355 = vst [vmem:[#allocation3 + $0xf0] sm:$0xff] %v2305_v61  ;;  %v2257_v43 = vadd.f32 %v10255_v29, %v2200_v4  ;;  %v2152_v24 = vmax.f32 %v1339_v47, %v15474_v5  ;;  %v15488_v25 = vld [vmem:[#allocation92_spill] sm:$0xff]  ;;  %v8115_v6 = vpack.i.bf16 %v10502_v53, %v10372_v19 }
 0x22a   : > { %v2308_v48 = vmax.f32 %v2258_v22, 0.0  ;;  %v2203_v30 = vmax.f32 %v15477_v58, %v2153_v46  ;;  %v15489_v46 = vmax.f32 %v9924_v8, %v15488_v25  ;;  %v15492_v58 = vld [vmem:[#allocation93_spill] sm:$0xff] }
 0x22b   : > { %v2307_v38 = vmax.f32 %v2257_v43, 0.0  ;;  %v2202_v54 = vmax.f32 %v15479_v3, %v2152_v24  ;;  %v7608_v18 = vpop.f32.mrb[136].mxu0  ;;  %8091 = vrot.lane.b32.xlu0 %v10409_v59, %s15084_s29  ;;  %v15482_v59 = vld [vmem:[#allocation90_spill] sm:$0xff]  ;;  %s15086_s29 = smov 88   ;;  %v15495_v3 = vmax.f32 %v9930_v16, %v15494_v52 }
 0x22c   : > { %8071 = vrot.lane.b32.xlu1 %v10366_v36, %s15082_s26  ;;  %2358 = vst [vmem:[#allocation3 + $0x108] sm:$0xff] %v2308_v48  ;;  %v2260_v11 = vadd.f32 %v10255_v29, %v2203_v30  ;;  %v2155_v32 = vmax.f32 %v7608_v18, %v15480_v9  ;;  %v1349_v20 = vpop.f32.mrb[137].mxu0  ;;  %v15483_v41 = vmax.f32 %v9916_v63, %v15482_v59  ;;  %s15098_s26 = smov 72   ;;  %v15485_v63 = vld [vmem:[#allocation70_spill] sm:$0xff]  ;;  %v15491_v48 = vld [vmem:[#allocation76_spill] sm:$0xff] }
 0x22d   : > { %2357 = vst [vmem:[#allocation3 + $0x100] sm:$0xff] %v2307_v38  ;;  %v2259_v17 = vadd.f32 %v10255_v29, %v2202_v54  ;;  %v2154_v56 = vmax.f32 %v1349_v20, %v15481_v60  ;;  %v15493_v30 = vmax.f32 %v9928_v15, %v15492_v58  ;;  %v15497_v20 = vld [vmem:[#allocation81_spill] sm:$0xff]  ;;  %v15498_v60 = vld [vmem:[#allocation95_spill] sm:$0xff]  ;;  %v10535_v59 = vld [vmem:[#allocation3 + $0x74] sm:$0xff]  ;;  %v10568_v58 = vpack.i.bf16 %v10303_v10, %v10308_v39 }
 0x22e   : > { %v2310_v27 = vmax.f32 %v2260_v11, 0.0  ;;  %v2205_v31 = vmax.f32 %v15483_v41, %v2155_v32  ;;  %v15496_v11 = vld [vmem:[#allocation79_spill] sm:$0xff]  ;;  %v15500_v41 = vld [vmem:[#allocation29_spill] sm:$0xff] }
 0x22f   : > { %v2309_v36 = vmax.f32 %v2259_v17, 0.0  ;;  %v2204_v33 = vmax.f32 %v15484_v42, %v2154_v56  ;;  %v7611_v57 = vpop.f32.mrb[138].mxu0  ;;  %8101 = vrot.lane.b32.xlu0 %v10343_v62, %s15098_s26  ;;  %v15487_v62 = vmax.f32 %v9922_v7, %v10187_v55  ;;  %v15490_v55 = vld [vmem:[#allocation74_spill] sm:$0xff]  ;;  %v15499_v56 = vmax.f32 %v9934_v23, %v15498_v60 }
 0x230   : > { %8076 = vrot.lane.b32.xlu1 %v8075_v1, %s15086_s29  ;;  %2360 = vst [vmem:[#allocation3 + $0x118] sm:$0xff] %v2310_v27  ;;  %v2262_v35 = vadd.f32 %v10255_v29, %v2205_v31  ;;  %v2157_v13 = vmax.f32 %v7611_v57, %v15485_v63  ;;  %v1359_v34 = vpop.f32.mrb[139].mxu0  ;;  %s15088_s29 = smov 104   ;;  %v10533_v27 = vld [vmem:[#allocation3 + $0x6c] sm:$0xff]  ;;  %v15501_v31 = vld [vmem:[#allocation96_spill] sm:$0xff] }
 0x231   : > { %2359 = vst [vmem:[#allocation3 + $0x110] sm:$0xff] %v2309_v36  ;;  %v2261_v61 = vadd.f32 %v10255_v29, %v2204_v33  ;;  %v2156_v21 = vmax.f32 %v1359_v34, %v15486_v28  ;;  %v15502_v36 = vmax.f32 %v15500_v41, %v15501_v31  ;;  %v15503_v57 = vld [vmem:[#allocation84_spill] sm:$0xff]  ;;  %v15504_v34 = vld [vmem:[#allocation85_spill] sm:$0xff]  ;;  %v10550_v28 = vpack.i.bf16 %v10535_v59, %v10533_v27  ;;  %v15520_v31 = vld [vmem:[#allocation35_spill] sm:$0xff] }
 0x232   : > { %v2312_v2 = vmax.f32 %v2262_v35, 0.0  ;;  %v2207_v4 = vmax.f32 %v15487_v62, %v2157_v13  ;;  %v15506_v62 = vld [vmem:[#allocation97_spill] sm:$0xff] }
 0x233   : > { %v2311_v22 = vmax.f32 %v2261_v61, 0.0  ;;  %v2206_v47 = vmax.f32 %v15489_v46, %v2156_v21  ;;  %v7614_v43 = vpop.f32.mrb[140].mxu0  ;;  %8106 = vrot.lane.b32.xlu0 %v10497_v0, %s15096_s15  ;;  %v15508_v46 = vld [vmem:[#allocation31_spill] sm:$0xff] }
 0x234   : > { %8086 = vrot.lane.b32.xlu1 %v10387_v26, %s15088_s29  ;;  %2362 = vst [vmem:[#allocation3 + $0x128] sm:$0xff] %v2312_v2  ;;  %v2264_v14 = vadd.f32 %v10255_v29, %v2207_v4  ;;  %v2159_v7 = vmax.f32 %v7614_v43, %v15490_v55  ;;  %v1369_v5 = vpop.f32.mrb[141].mxu0  ;;  %s15102_s29 = smov 64   ;;  %v15505_v2 = vld [vmem:[#allocation30_spill] sm:$0xff] }
 0x235   : > { %2361 = vst [vmem:[#allocation3 + $0x120] sm:$0xff] %v2311_v22  ;;  %v2263_v24 = vadd.f32 %v10255_v29, %v2206_v47  ;;  %v2158_v8 = vmax.f32 %v1369_v5, %v15491_v48  ;;  %v15507_v4 = vmax.f32 %v15505_v2, %v15506_v62  ;;  %v15509_v47 = vld [vmem:[#allocation98_spill] sm:$0xff]  ;;  %v15511_v5 = vld [vmem:[#allocation88_spill] sm:$0xff] }
 0x236   : > { %v2314_v37 = vmax.f32 %v2264_v14, 0.0  ;;  %v2209_v38 = vmax.f32 %v15493_v30, %v2159_v7  ;;  %v15510_v43 = vmax.f32 %v15508_v46, %v15509_v47  ;;  %v15526_v2 = vld [vmem:[#allocation36_spill] sm:$0xff]  ;;  %v15529_v46 = vld [vmem:[#allocation38_spill] sm:$0xff] }
 0x237   : > { %v2313_v26 = vmax.f32 %v2263_v24, 0.0  ;;  %v2208_v54 = vmax.f32 %v15495_v3, %v2158_v8  ;;  %v7617_v18 = vpop.f32.mrb[142].mxu0  ;;  %8116 = vrot.lane.b32.xlu0 %v8115_v6, %s15092_s12  ;;  %v15512_v6 = vld [vmem:[#allocation89_spill] sm:$0xff] }
 0x238   : > { %8096 = vrot.lane.b32.xlu1 %v10346_v49, %s15102_s29  ;;  %2364 = vst [vmem:[#allocation3 + $0x138] sm:$0xff] %v2314_v37  ;;  %v2266_v19 = vadd.f32 %v10255_v29, %v2209_v38  ;;  %v2161_v9 = vmax.f32 %v7617_v18, %v15496_v11  ;;  %v1379_v32 = vpop.f32.mrb[143].mxu0  ;;  %v15513_v38 = vld [vmem:[#allocation32_spill] sm:$0xff]  ;;  %v15516_v18 = vld [vmem:[#allocation33_spill] sm:$0xff] }
 0x239   : > { %2363 = vst [vmem:[#allocation3 + $0x130] sm:$0xff] %v2313_v26  ;;  %v2265_v15 = vadd.f32 %v10255_v29, %v2208_v54  ;;  %v2160_v17 = vmax.f32 %v1379_v32, %v15497_v20  ;;  %v15514_v26 = vld [vmem:[#allocation99_spill] sm:$0xff] }
 0x23a   : > { %v2316_v16 = vmax.f32 %v2266_v19, 0.0  ;;  %v2211_v1 = vmax.f32 %v15499_v56, %v2161_v9  ;;  %v15515_v52 = vmax.f32 %v15513_v38, %v15514_v26  ;;  %v15517_v19 = vld [vmem:[#allocation100_spill] sm:$0xff]  ;;  %v10585_v56 = vpack.i.bf16 %v10533_v27, %v10374_v51 }
 0x23b   : > { %v2315_v49 = vmax.f32 %v2265_v15, 0.0  ;;  %v2210_v42 = vmax.f32 %v15502_v36, %v2160_v17  ;;  %v7620_v33 = vpop.f32.mrb[144].mxu0  ;;  %3036 = vrot.lane.b32.xlu0 %v10308_v39, %s15100_s24  ;;  %v15518_v11 = vmax.f32 %v15516_v18, %v15517_v19  ;;  %v15521_v36 = vld [vmem:[#allocation101_spill] sm:$0xff]  ;;  %v15537_v18 = vld [vmem:[#allocation40_spill] sm:$0xff] }
 0x23c   : > { %3038 = vrot.lane.b32.xlu1 %v10303_v10, %s15100_s24  ;;  %2366 = vst [vmem:[#allocation3 + $0x148] sm:$0xff] %v2316_v16  ;;  %v2268_v23 = vadd.f32 %v10255_v29, %v2211_v1  ;;  %v2163_v35 = vmax.f32 %v7620_v33, %v15503_v57  ;;  %v1389_v63 = vpop.f32.mrb[145].mxu0  ;;  %v15519_v16 = vld [vmem:[#allocation91_spill] sm:$0xff]  ;;  %v15523_v57 = vld [vmem:[#allocation102_spill] sm:$0xff] }
 0x23d   : > { %2365 = vst [vmem:[#allocation3 + $0x140] sm:$0xff] %v2315_v49  ;;  %v2267_v13 = vadd.f32 %v10255_v29, %v2210_v42  ;;  %v2162_v61 = vmax.f32 %v1389_v63, %v15504_v34  ;;  %v10587_v49 = vld [vmem:[#allocation3 + $0x76] sm:$0xff]  ;;  %v15522_v42 = vmax.f32 %v15520_v31, %v15521_v36  ;;  %v15541_v31 = vld [vmem:[#allocation18_spill] sm:$0xff] }
 0x23e   : > { %v2318_v21 = vmax.f32 %v2268_v23, 0.0  ;;  %v2213_v22 = vmax.f32 %v15507_v4, %v2163_v35  ;;  %v15542_v36 = vld [vmem:[#allocation41_spill] sm:$0xff] }
 0x23f   : > { %v2317_v25 = vmax.f32 %v2267_v13, 0.0  ;;  %v2212_v14 = vmax.f32 %v15510_v43, %v2162_v61  ;;  %v7623_v55 = vpop.f32.mrb[146].mxu0  ;;  %8121 = vrot.lane.b32.xlu0 %v10550_v28, %s15106_s16  ;;  %v15524_v13 = vld [vmem:[#allocation103_spill] sm:$0xff]  ;;  %v10601_v61 = vpack.i.bf16 %v10587_v49, %v10502_v53  ;;  %v15531_v53 = vld [vmem:[#allocation104_spill] sm:$0xff] }
 0x240   : > { %5466 = vrot.lane.b32.xlu1 %v10303_v10, %s15102_s29  ;;  %2368 = vst [vmem:[#allocation3 + $0x158] sm:$0xff] %v2318_v21  ;;  %v2270_v7 = vadd.f32 %v10255_v29, %v2213_v22  ;;  %v2165_v24 = vmax.f32 %v7623_v55, %v15511_v5  ;;  %v1399_v48 = vpop.f32.mrb[147].mxu0  ;;  %v15525_v21 = vld [vmem:[#allocation14_spill] sm:$0xff] }
 0x241   : > { %2367 = vst [vmem:[#allocation3 + $0x150] sm:$0xff] %v2317_v25  ;;  %v2269_v8 = vadd.f32 %v10255_v29, %v2212_v14  ;;  %v2164_v37 = vmax.f32 %v1399_v48, %v15512_v6  ;;  %v15527_v62 = vmax.f32 %v15525_v21, %v15526_v2  ;;  %v15528_v25 = vld [vmem:[#allocation15_spill] sm:$0xff]  ;;  %v15532_v48 = vld [vmem:[#allocation105_spill] sm:$0xff]  ;;  %v15547_v21 = vld [vmem:[#allocation108_spill] sm:$0xff] }
 0x242   : > { %v2320_v30 = vmax.f32 %v2270_v7, 0.0  ;;  %v2215_v3 = vmax.f32 %v15515_v52, %v2165_v24  ;;  %v15530_v47 = vmax.f32 %v15528_v25, %v15529_v46  ;;  %v10620_v52 = vld [vmem:[#allocation3 + $0x72] sm:$0xff] }
 0x243   : > { %v2319_v54 = vmax.f32 %v2269_v8, 0.0  ;;  %v2214_v9 = vmax.f32 %v15518_v11, %v2164_v37  ;;  %v7626_v32 = vpop.f32.mrb[148].mxu0  ;;  %8131 = vrot.lane.b32.xlu0 %v10568_v58, %s15110_s22  ;;  %v15533_v37 = vld [vmem:[#allocation16_spill] sm:$0xff] }
 0x244   : > { %4801 = vrot.lane.b32.xlu1 %v10303_v10, %s15096_s15  ;;  %2370 = vst [vmem:[#allocation3 + $0x168] sm:$0xff] %v2320_v30  ;;  %v2272_v15 = vadd.f32 %v10255_v29, %v2215_v3  ;;  %v1409_v20 = vpop.f32.mrb[149].mxu0  ;;  %v15534_v30 = vld [vmem:[#allocation39_spill] sm:$0xff] }
 0x245   : > { %2369 = vst [vmem:[#allocation3 + $0x160] sm:$0xff] %v2319_v54  ;;  %v2271_v17 = vadd.f32 %v10255_v29, %v2214_v9  ;;  %v2166_v60 = vmax.f32 %v1409_v20, %v15519_v16  ;;  %v15535_v38 = vmax.f32 %v15533_v37, %v15534_v30  ;;  %v15536_v54 = vld [vmem:[#allocation17_spill] sm:$0xff]  ;;  %v15555_v37 = vld [vmem:[#allocation110_spill] sm:$0xff] }
 0x246   : > { %v2322_v1 = vmax.f32 %v2272_v15, 0.0  ;;  %v15538_v19 = vmax.f32 %v15536_v54, %v15537_v18  ;;  %v15539_v15 = vld [vmem:[#allocation106_spill] sm:$0xff] }
 0x247   : > { %v2321_v41 = vmax.f32 %v2271_v17, 0.0  ;;  %v2216_v33 = vmax.f32 %v15522_v42, %v2166_v60  ;;  %v7629_v23 = vpop.f32.mrb[150].mxu0  ;;  %5254 = vrot.lane.b32.xlu0 %v10535_v59, %s15104_s13  ;;  %v15540_v60 = vld [vmem:[#allocation107_spill] sm:$0xff]  ;;  %v15543_v42 = vmax.f32 %v15541_v31, %v15542_v36 }
 0x248   : > { %8111 = vrot.lane.b32.xlu1 %v10585_v56, %s15108_s30  ;;  %2372 = vst [vmem:[#allocation3 + $0x178] sm:$0xff] %v2322_v1  ;;  %v2119_v35 = vmax.f32 %v15523_v57, %v7629_v23  ;;  %v1419_v51 = vpop.f32.mrb[151].mxu0  ;;  %v15544_v57 = vld [vmem:[#allocation19_spill] sm:$0xff] }
 0x249   : > { %2371 = vst [vmem:[#allocation3 + $0x170] sm:$0xff] %v2321_v41  ;;  %v2273_v63 = vadd.f32 %v10255_v29, %v2216_v33  ;;  %v2118_v34 = vmax.f32 %v15524_v13, %v1419_v51 }
 0x24a   : > { %v2169_v4 = vmax.f32 %v15527_v62, %v2119_v35  ;;  %v15545_v35 = vld [vmem:[#allocation42_spill] sm:$0xff] }
 0x24b   : > { %v2323_v22 = vmax.f32 %v2273_v63, 0.0  ;;  %v2168_v43 = vmax.f32 %v15530_v47, %v2118_v34  ;;  %v7632_v14 = vpop.f32.mrb[152].mxu0  ;;  %4903 = vrot.lane.b32.xlu0 %v10484_v45, %s15108_s30  ;;  %v15546_v51 = vmax.f32 %v15544_v57, %v15545_v35  ;;  %v15549_v47 = vld [vmem:[#allocation20_spill] sm:$0xff]  ;;  %v10718_v35 = vld [vmem:[#allocation3 + $0x84] sm:$0xff] }
 0x24c   : > { %8126 = vrot.lane.b32.xlu1 %v10601_v61, %s15104_s13  ;;  %v2226_v55 = vadd.f32 %v10255_v29, %v2169_v4  ;;  %v2121_v7 = vmax.f32 %v15531_v53, %v7632_v14  ;;  %v1429_v5 = vpop.f32.mrb[153].mxu0 }
 0x24d   : > { %2373 = vst [vmem:[#allocation3 + $0x180] sm:$0xff] %v2323_v22  ;;  %v2225_v24 = vadd.f32 %v10255_v29, %v2168_v43  ;;  %v2120_v8 = vmax.f32 %v15532_v48, %v1429_v5  ;;  %v15548_v22 = vld [vmem:[#allocation109_spill] sm:$0xff]  ;;  %v15550_v43 = vld [vmem:[#allocation44_spill] sm:$0xff]  ;;  %v15553_v5 = vld [vmem:[#allocation46_spill] sm:$0xff] }
 0x24e   : > { %v2276_v6 = vmax.f32 %v2226_v55, 0.0  ;;  %v2171_v26 = vmax.f32 %v15535_v38, %v2121_v7  ;;  %v15551_v14 = vmax.f32 %v15549_v47, %v15550_v43  ;;  %v15552_v7 = vld [vmem:[#allocation21_spill] sm:$0xff]  ;;  %v8225_v43 = vpack.i.bf16 %v10322_v12, %v10327_v40 }
 0x24f   : > { %v2275_v3 = vmax.f32 %v2225_v24, 0.0  ;;  %v2170_v11 = vmax.f32 %v15538_v19, %v2120_v8  ;;  %v7635_v9 = vpop.f32.mrb[154].mxu0  ;;  %4799 = vrot.lane.b32.xlu0 %v10308_v39, %s15096_s15  ;;  %v15554_v24 = vmax.f32 %v15552_v7, %v15553_v5  ;;  %v15557_v19 = vld [vmem:[#allocation22_spill] sm:$0xff]  ;;  %s15566_s15 = smov 104  }
 0x250   : > { %5149 = vrot.lane.b32.xlu1 %v10620_v52, %s15106_s16  ;;  %2326 = vst [vmem:[#allocation3 + $0x8] sm:$0xff] %v2276_v6  ;;  %v2228_v32 = vadd.f32 %v10255_v29, %v2171_v26  ;;  %v2123_v20 = vmax.f32 %v15539_v15, %v7635_v9  ;;  %v1439_v17 = vpop.f32.mrb[155].mxu0 }
 0x251   : > { %2325 = vst [vmem:[#allocation3] sm:$0xff] %v2275_v3  ;;  %v2227_v16 = vadd.f32 %v10255_v29, %v2170_v11  ;;  %v2122_v1 = vmax.f32 %v15540_v60, %v1439_v17  ;;  %v15556_v3 = vld [vmem:[#allocation111_spill] sm:$0xff]  ;;  %v15558_v11 = vld [vmem:[#allocation48_spill] sm:$0xff]  ;;  %v15561_v17 = vld [vmem:[#allocation50_spill] sm:$0xff] }
 0x252   : > { %v2278_v41 = vmax.f32 %v2228_v32, 0.0  ;;  %v2173_v33 = vmax.f32 %v15543_v42, %v2123_v20  ;;  %v15559_v9 = vmax.f32 %v15557_v19, %v15558_v11  ;;  %v15560_v20 = vld [vmem:[#allocation23_spill] sm:$0xff]  ;;  %v2458_v42 = vld [vmem:[#allocation3 + $0x7c] sm:$0xff]  ;;  %v10806_v11 = vld [vmem:[#allocation3 + $0x94] sm:$0xff] }
 0x253   : > { %v2277_v23 = vmax.f32 %v2227_v16, 0.0  ;;  %v2172_v63 = vmax.f32 %v15546_v51, %v2122_v1  ;;  %v7638_v13 = vpop.f32.mrb[156].mxu0  ;;  %5008 = vrot.lane.b32.xlu0 %v10535_v59, %s15092_s12  ;;  %v2460_v19 = vld [vmem:[#allocation3 + $0x8c] sm:$0xff] }
 0x254   : > { %5363 = vrot.lane.b32.xlu1 %v10587_v49, %s15110_s22  ;;  %2328 = vst [vmem:[#allocation3 + $0x18] sm:$0xff] %v2278_v41  ;;  %v2230_v34 = vadd.f32 %v10255_v29, %v2173_v33  ;;  %v2125_v2 = vmax.f32 %v15547_v21, %v7638_v13  ;;  %v1449_v62 = vpop.f32.mrb[157].mxu0  ;;  %v8140_v41 = vpack.i.bf16 %v10308_v39, %v10284_v44  ;;  %v2492_v44 = vld [vmem:[#allocation3 + $0x7e] sm:$0xff]  ;;  %v10687_v39 = vld [vmem:[#allocation3 + $0x86] sm:$0xff] }
 0x255   : > { %2327 = vst [vmem:[#allocation3 + $0x10] sm:$0xff] %v2277_v23  ;;  %v2229_v4 = vadd.f32 %v10255_v29, %v2172_v63  ;;  %v2124_v25 = vmax.f32 %v15548_v22, %v1449_v62  ;;  %v8185_v57 = vpack.i.bf16 %v2492_v44, %v10587_v49  ;;  %v8190_v63 = vpack.i.bf16 %v10718_v35, %v2458_v42 }
 0x256   : > { %v2280_v46 = vmax.f32 %v2230_v34, 0.0  ;;  %v2175_v55 = vmax.f32 %v15551_v14, %v2125_v2  ;;  %v2425_v2 = vld [vmem:[#allocation3 + $0x82] sm:$0xff] }
 0x257   : > { %v2279_v53 = vmax.f32 %v2229_v4, 0.0  ;;  %v2174_v48 = vmax.f32 %v15554_v24, %v2124_v25  ;;  %v7641_v8 = vpop.f32.mrb[158].mxu0  ;;  %8136 = vrot.lane.b32.xlu0 %v10585_v56, %s15090_s14  ;;  %s15563_s14 = smov 112  }
 0x258   : > { %5006 = vrot.lane.b32.xlu1 %v10533_v27, %s15092_s12  ;;  %2330 = vst [vmem:[#allocation3 + $0x28] sm:$0xff] %v2280_v46  ;;  %v2232_v6 = vadd.f32 %v10255_v29, %v2175_v55  ;;  %v2127_v30 = vmax.f32 %v15555_v37, %v7641_v8  ;;  %v1459_v38 = vpop.f32.mrb[159].mxu0  ;;  %v15562_v27 = vmax.f32 %v15560_v20, %v15561_v17  ;;  %s15564_s12 = smov 80  }
 0x259   : > { %2329 = vst [vmem:[#allocation3 + $0x20] sm:$0xff] %v2279_v53  ;;  %v2231_v26 = vadd.f32 %v10255_v29, %v2174_v48  ;;  %v2126_v54 = vmax.f32 %v15556_v3, %v1459_v38  ;;  %v8205_v53 = vpack.i.bf16 %v10327_v40, %v10303_v10  ;;  %v10777_v48 = vld [vmem:[#allocation3 + $0x8a] sm:$0xff] }
 0x25a   : > { %v2282_v18 = vmax.f32 %v2232_v6, 0.0  ;;  %v2177_v32 = vmax.f32 %v15559_v9, %v2127_v30  ;;  %v10786_v10 = vpack.i.bf16 %v10777_v48, %v2425_v2 }
 0x25b   : > { %v2281_v15 = vmax.f32 %v2231_v26, 0.0  ;;  %v2176_v16 = vmax.f32 %v15562_v27, %v2126_v54  ;;  %8151 = vrot.lane.b32.xlu0 %v10550_v28, %s15094_s25  ;;  %v8145_v28 = vpack.i.bf16 %v10620_v52, %v10484_v45  ;;  %s15565_s25 = smov 88   ;;  %v8195_v45 = vpack.i.bf16 %v10687_v39, %v2492_v44  ;;  %v10802_v54 = vld [vmem:[#allocation3 + $0x98] sm:$0xff] }
 0x25c   : > { %4905 = vrot.lane.b32.xlu1 %v10620_v52, %s15108_s30  ;;  %2332 = vst [vmem:[#allocation3 + $0x38] sm:$0xff] %v2282_v18  ;;  %v2234_v60 = vadd.f32 %v10255_v29, %v2177_v32  ;;  %v10804_v18 = vld [vmem:[#allocation3 + $0x90] sm:$0xff] }
 0x25d   : > { %2331 = vst [vmem:[#allocation3 + $0x30] sm:$0xff] %v2281_v15  ;;  %v2233_v1 = vadd.f32 %v10255_v29, %v2176_v16  ;;  %v8180_v29 = vpack.i.bf16 %v2458_v42, %v10535_v59  ;;  %v2424_v59 = vld [vmem:[#allocation3 + $0x7a] sm:$0xff]  ;;  %v8260_v15 = vpack.i.bf16 %v10806_v11, %v2460_v19 }
 0x25e   : > { %v2284_v31 = vmax.f32 %v2234_v60, 0.0  ;;  %v8210_v24 = vpack.i.bf16 %v2425_v2, %v2424_v59  ;;  %v10831_v60 = vpack.i.bf16 %v2460_v19, %v10718_v35 }
 0x25f   : > { %v2283_v36 = vmax.f32 %v2233_v1, 0.0  ;;  %8161 = vrot.lane.b32.xlu0 %v10568_v58, %s15563_s14  ;;  %v10833_v1 = vld [vmem:[#allocation3 + $0x96] sm:$0xff] }
 0x260   : > { %8141 = vrot.lane.b32.xlu1 %v8140_v41, %s15564_s12  ;;  %2334 = vst [vmem:[#allocation3 + $0x48] sm:$0xff] %v2284_v31 }
 0x261   : > { %2333 = vst [vmem:[#allocation3 + $0x40] sm:$0xff] %v2283_v36 }
 0x263   : > { %8171 = vrot.lane.b32.xlu0 %v10585_v56, %s15098_s26  ;;  %s15567_s26 = smov 8  }
 0x264   : > { %8146 = vrot.lane.b32.xlu1 %v8145_v28, %s15565_s25 }
 0x267   : > { %8181 = vrot.lane.b32.xlu0 %v8180_v29, %s15108_s30 }
 0x268   : > { %8156 = vrot.lane.b32.xlu1 %v10601_v61, %s15566_s15  ;;  %v8175_v61 = vpack.i.bf16 %v2424_v59, %v10620_v52 }
 0x26b   : > { %3040 = vrot.lane.b32.xlu0 %v10327_v40, %s15100_s24 }
 0x26c   : > { %8166 = vrot.lane.b32.xlu1 %v10497_v0, %s15102_s29 }
 0x26f   : > { %8196 = vrot.lane.b32.xlu0 %v8195_v45, %s15104_s13 }
 0x270   : > { %3042 = vrot.lane.b32.xlu1 %v10322_v12, %s15100_s24  ;;  %s15571_s24 = smov 24  }
 0x272   : > { %v10697_v58 = vpop.permute.xlu1 %4793 }
 0x273   : > { %5151 = vrot.lane.b32.xlu0 %v2424_v59, %s15106_s16 }
 0x274   : > { %5470 = vrot.lane.b32.xlu1 %v10322_v12, %s15102_s29 }
 0x275   : > { %v10705_v0 = vpop.permute.xlu0 %8021 }
 0x276   : > { %15568 = vst [vmem:[#allocation34_spill] sm:$0xff] %v10705_v0  ;;  %v10707_v56 = vpop.permute.xlu1 %3034 }
 0x277   : > { %5365 = vrot.lane.b32.xlu0 %v2492_v44, %s15110_s22  ;;  %15569 = vst [vmem:[#allocation37_spill] sm:$0xff] %v10707_v56 }
 0x278   : > { %4805 = vrot.lane.b32.xlu1 %v10322_v12, %s15567_s26 }
 0x279   : > { %v10713_v33 = vpop.permute.xlu0 %8026 }
 0x27a   : > { %15570 = vst [vmem:[#allocation43_spill] sm:$0xff] %v10713_v33  ;;  %v10715_v23 = vpop.permute.xlu1 %4797 }
 0x27b   : > { %5468 = vrot.lane.b32.xlu0 %v10327_v40, %s15102_s29  ;;  %s15573_s29 = smov 120  }
 0x27c   : > { %8176 = vrot.lane.b32.xlu1 %v8175_v61, %s15567_s26 }
 0x27f   : > { %5258 = vrot.lane.b32.xlu0 %v10718_v35, %s15104_s13 }
 0x280   : > { %8186 = vrot.lane.b32.xlu1 %v8185_v57, %s15571_s24 }
 0x281   : > { %v10723_v51 = vpop.permute.xlu0 %8036 }
 0x282   : > { %v10725_v52 = vpop.permute.xlu1 %8031 }
 0x283   : > { %4907 = vrot.lane.b32.xlu0 %v2424_v59, %s15108_s30 }
 0x284   : > { %8191 = vrot.lane.b32.xlu1 %v8190_v63, %s15106_s16 }
 0x285   : > { %v10730_v13 = vpop.permute.xlu0 %8046 }
 0x286   : > { %v10732_v49 = vpop.permute.xlu1 %8041 }
 0x287   : > { %4803 = vrot.lane.b32.xlu0 %v10327_v40, %s15567_s26  ;;  %v2494_v40 = vld [vmem:[#allocation3 + $0x8e] sm:$0xff] }
 0x288   : > { %5256 = vrot.lane.b32.xlu1 %v2458_v42, %s15104_s13  ;;  %s15574_s13 = smov 96   ;;  %v8255_v38 = vpack.i.bf16 %v2494_v40, %v10687_v39  ;;  %v8265_v36 = vpack.i.bf16 %v10833_v1, %v2494_v40 }
 0x289   : > { %v10737_v34 = vpop.permute.xlu0 %8056 }
 0x28a   : > { %v10739_v21 = vpop.permute.xlu1 %8051 }
 0x28b   : > { %5012 = vrot.lane.b32.xlu0 %v10718_v35, %s15571_s24 }
 0x28c   : > { %5153 = vrot.lane.b32.xlu1 %v2425_v2, %s15106_s16  ;;  %s15577_s16 = smov 72  }
 0x28d   : > { %v10744_v62 = vpop.permute.xlu0 %4795 }
 0x28e   : > { %v10746_v4 = vpop.permute.xlu1 %8061 }
 0x28f   : > { %15572 = vst [vmem:[#allocation24_spill] sm:$0xff] %v10746_v4  ;;  %8201 = vrot.lane.b32.xlu0 %v8180_v29, %s15573_s29 }
 0x290   : > { %5367 = vrot.lane.b32.xlu1 %v10687_v39, %s15110_s22 }
 0x291   : > { %v10751_v22 = vpop.permute.xlu0 %5004 }
 0x292   : > { %v10753_v25 = vpop.permute.xlu1 %4899 }
 0x293   : > { %8216 = vrot.lane.b32.xlu0 %v8190_v63, %s15574_s13 }
 0x294   : > { %5010 = vrot.lane.b32.xlu1 %v2458_v42, %s15571_s24 }
 0x295   : > { %v10757_v46 = vpop.permute.xlu0 %8066 }
 0x296   : > { %15575 = vst [vmem:[#allocation60_spill] sm:$0xff] %v10757_v46  ;;  %v10759_v47 = vpop.permute.xlu1 %5002  ;;  %v12184_v46 = vld [vmem:[#allocation3 + $0xfa] sm:$0xff] }
 0x297   : > { %8226 = vrot.lane.b32.xlu0 %v8225_v43, %s15563_s14 }
 0x298   : > { %4909 = vrot.lane.b32.xlu1 %v2425_v2, %s15108_s30  ;;  %s15583_s30 = smov 64  }
 0x299   : > { %v10765_v14 = vpop.permute.xlu0 %8081 }
 0x29a   : > { %15576 = vst [vmem:[#allocation45_spill] sm:$0xff] %v10765_v14  ;;  %v10767_v55 = vpop.permute.xlu1 %4901 }
 0x29b   : > { %8236 = vrot.lane.b32.xlu0 %v8180_v29, %s15577_s16  ;;  %v5568_v29 = vsel %vm4265_vm0, %v10360_v50, %v10697_v58 }
 0x29c   : > { %8206 = vrot.lane.b32.xlu1 %v8205_v53, %s15564_s12  ;;  %v5602_v44 = vsel %vm4300_vm1, %v5568_v29, %v10753_v25  ;;  %v8295_v29 = vpack.i.bf16 %v10802_v54, %v10804_v18 }
 0x29d   : > { %v10773_v7 = vpop.permute.xlu0 %8091  ;;  %v5636_v39 = vsel %vm4335_vm2, %v5602_v44, %v10759_v47 }
 0x29e   : > { %15578 = vst [vmem:[#allocation47_spill] sm:$0xff] %v10773_v7  ;;  %v10775_v5 = vpop.permute.xlu1 %8071  ;;  %v9293_v7 = vld [vmem:[#allocation3 + $0x78] sm:$0xff] }
 0x29f   : > { %15579 = vst [vmem:[#allocation25_spill] sm:$0xff] %v10775_v5  ;;  %8241 = vrot.lane.b32.xlu0 %v8225_v43, %s15110_s22  ;;  %s15586_s22 = smov 32   ;;  %v2383_v5 = vld [vmem:[#allocation3 + $0x40] sm:$0xff] }
 0x2a0   : > { %8211 = vrot.lane.b32.xlu1 %v8210_v24, %s15565_s25 }
 0x2a1   : > { %v10781_v8 = vpop.permute.xlu0 %8101 }
 0x2a2   : > { %15580 = vst [vmem:[#allocation63_spill] sm:$0xff] %v10781_v8  ;;  %v10783_v6 = vpop.permute.xlu1 %8076  ;;  %v5859_v8 = vld [vmem:[%s15017_s3 + $0x98] sm:$0xff] }
 0x2a3   : > { %15581 = vst [vmem:[#allocation49_spill] sm:$0xff] %v10783_v6  ;;  %8246 = vrot.lane.b32.xlu0 %v10786_v10, %s15567_s26  ;;  %v2485_v6 = vld [vmem:[#allocation3 + $0x46] sm:$0xff] }
 0x2a4   : > { %8221 = vrot.lane.b32.xlu1 %v8195_v45, %s15566_s15 }
 0x2a5   : > { %v10791_v37 = vpop.permute.xlu0 %8106 }
 0x2a6   : > { %v10793_v30 = vpop.permute.xlu1 %8086 }
 0x2a7   : > { %15582 = vst [vmem:[#allocation51_spill] sm:$0xff] %v10793_v30  ;;  %8256 = vrot.lane.b32.xlu0 %v8255_v38, %s15571_s24  ;;  %v9273_v30 = vld [vmem:[#allocation3 + $0x52] sm:$0xff] }
 0x2a8   : > { %8231 = vrot.lane.b32.xlu1 %v8175_v61, %s15583_s30  ;;  %v10863_v61 = vld [vmem:[#allocation3 + $0x92] sm:$0xff] }
 0x2a9   : > { %v10798_v26 = vpop.permute.xlu0 %8116  ;;  %v8280_v44 = vpack.i.bf16 %v10863_v61, %v10777_v48 }
 0x2aa   : > { %15584 = vst [vmem:[#allocation26_spill] sm:$0xff] %v10798_v26  ;;  %v10800_v3 = vpop.permute.xlu1 %8096 }
 0x2ab   : > { %15585 = vst [vmem:[#allocation66_spill] sm:$0xff] %v10800_v3  ;;  %3044 = vrot.lane.b32.xlu0 %v10804_v18, %s15586_s22  ;;  %v2448_v3 = vld [vmem:[#allocation3 + $0x2c] sm:$0xff] }
 0x2ac   : > { %3046 = vrot.lane.b32.xlu1 %v10802_v54, %s15586_s22 }
 0x2ad   : > { %v10812_v9 = vpop.permute.xlu0 %3036 }
 0x2ae   : > { %15587 = vst [vmem:[#allocation52_spill] sm:$0xff] %v10812_v9  ;;  %v10814_v32 = vpop.permute.xlu1 %3038  ;;  %v5670_v45 = vsel %vm4370_vm3, %v5636_v39, %v10812_v9  ;;  %v2440_v9 = vld [vmem:[#allocation3 + $0xfa] sm:$0xff] }
 0x2af   : > { %15588 = vst [vmem:[#allocation53_spill] sm:$0xff] %v10814_v32  ;;  %8261 = vrot.lane.b32.xlu0 %v8260_v15, %s15589_s0  ;;  %v2447_v32 = vld [vmem:[#allocation3 + $0x24] sm:$0xff] }
 0x2b0   : > { %5474 = vrot.lane.b32.xlu1 %v10802_v54, %s15583_s30 }
 0x2b1   : > { %v10820_v20 = vpop.permute.xlu0 %8121 }
 0x2b2   : > { %15590 = vst [vmem:[#allocation27_spill] sm:$0xff] %v10820_v20  ;;  %v5467_v17 = vpop.permute.xlu1 %5466 }
 0x2b3   : > { %5155 = vrot.lane.b32.xlu0 %v10777_v48, %s15589_s0 }
 0x2b4   : > { %4809 = vrot.lane.b32.xlu1 %v10802_v54, %s15567_s26 }
 0x2b5   : > { %v10826_v27 = vpop.permute.xlu0 %8131 }
 0x2b6   : > { %15591 = vst [vmem:[#allocation68_spill] sm:$0xff] %v10826_v27  ;;  %v10828_v16 = vpop.permute.xlu1 %4801  ;;  %v2476_v27 = vld [vmem:[#allocation3 + $0x10c] sm:$0xff] }
 0x2b7   : > { %15592 = vst [vmem:[#allocation54_spill] sm:$0xff] %v10828_v16  ;;  %5369 = vrot.lane.b32.xlu0 %v2494_v40, %s15593_s1  ;;  %v2475_v16 = vld [vmem:[#allocation3 + $0x104] sm:$0xff] }
 0x2b8   : > { %8251 = vrot.lane.b32.xlu1 %v10831_v60, %s15594_s2 }
 0x2b9   : > { %v5255_v41 = vpop.permute.xlu0 %5254 }
 0x2ba   : > { %v10838_v31 = vpop.permute.xlu1 %8111 }
 0x2bb   : > { %5472 = vrot.lane.b32.xlu0 %v10804_v18, %s15583_s30 }
 0x2bc   : > { %8266 = vrot.lane.b32.xlu1 %v8265_v36, %s15595_s19 }
 0x2bd   : > { %v10844_v28 = vpop.permute.xlu0 %4903 }
 0x2be   : > { %15596 = vst [vmem:[#allocation55_spill] sm:$0xff] %v10844_v28  ;;  %v10846_v42 = vpop.permute.xlu1 %8126  ;;  %v2442_v28 = vld [vmem:[#allocation3 + $0x10a] sm:$0xff] }
 0x2bf   : > { %15597 = vst [vmem:[#allocation71_spill] sm:$0xff] %v10846_v42  ;;  %5262 = vrot.lane.b32.xlu0 %v10806_v11, %s15595_s19  ;;  %v2484_v42 = vld [vmem:[#allocation3 + $0x3e] sm:$0xff] }
 0x2c0   : > { %5260 = vrot.lane.b32.xlu1 %v2460_v19, %s15595_s19 }
 0x2c1   : > { %v10860_v59 = vpop.permute.xlu0 %4799 }
 0x2c2   : > { %15598 = vst [vmem:[#allocation73_spill] sm:$0xff] %v10860_v59  ;;  %v5150_v50 = vpop.permute.xlu1 %5149 }
 0x2c3   : > { %v5704_v58 = vsel %vm4405_vm4, %v5670_v45, %v5150_v50  ;;  %4911 = vrot.lane.b32.xlu0 %v10777_v48, %s15594_s2 }
 0x2c4   : > { %5157 = vrot.lane.b32.xlu1 %v10863_v61, %s15589_s0  ;;  %v5738_v63 = vsel %vm4440_vm5, %v5704_v58, %v5255_v41 }
 0x2c5   : > { %v10869_v57 = vpop.permute.xlu0 %5008 }
 0x2c6   : > { %15599 = vst [vmem:[#allocation56_spill] sm:$0xff] %v10869_v57  ;;  %v5364_v35 = vpop.permute.xlu1 %5363 }
 0x2c7   : > { %v5772_v2 = vsel %vm4475_vm7, %v5738_v63, %v5364_v35  ;;  %4807 = vrot.lane.b32.xlu0 %v10804_v18, %s15567_s26  ;;  %v10936_v35 = vld [vmem:[#allocation3 + $0xa6] sm:$0xff] }
 0x2c8   : > { %5371 = vrot.lane.b32.xlu1 %v10833_v1, %s15593_s1  ;;  %v5806_v25 = vsel %vm4510_vm6, %v5772_v2, %v5467_v17  ;;  %v8275_v17 = vpack.i.bf16 %v10804_v18, %v10322_v12  ;;  %v10946_v2 = vld [vmem:[#allocation3 + $0xa8] sm:$0xff] }
 0x2c9   : > { %7042 = vmatprep.mubr.msk.f32.mxu1 %vm4545_vm8, %v5806_v25  ;;  %v10879_v47 = vpop.permute.xlu0 %8136 }
 0x2ca   : > { %15600 = vst [vmem:[#allocation57_spill] sm:$0xff] %v10879_v47  ;;  %v10881_v43 = vpop.permute.xlu1 %5006 }
 0x2cb   : > { %15601 = vst [vmem:[#allocation75_spill] sm:$0xff] %v10881_v43  ;;  %5016 = vrot.lane.b32.xlu0 %v10806_v11, %s15571_s24  ;;  %v11419_v43 = vld [vmem:[#allocation3 + $0xec] sm:$0xff] }
 0x2cc   : > { %5014 = vrot.lane.b32.xlu1 %v2460_v19, %s15571_s24 }
 0x2cd   : > { %v10886_v53 = vpop.permute.xlu0 %8151 }
 0x2ce   : > { %15602 = vst [vmem:[#allocation77_spill] sm:$0xff] %v10886_v53  ;;  %v10888_v24 = vpop.permute.xlu1 %4905  ;;  %v2406_v53 = vld [vmem:[#allocation3 + $0xf8] sm:$0xff] }
 0x2cf   : > { %15603 = vst [vmem:[#allocation58_spill] sm:$0xff] %v10888_v24  ;;  %8271 = vrot.lane.b32.xlu0 %v10831_v60, %s15573_s29  ;;  %v2509_v24 = vld [vmem:[#allocation3 + $0x106] sm:$0xff] }
 0x2d0   : > { %4913 = vrot.lane.b32.xlu1 %v10863_v61, %s15594_s2 }
 0x2d1   : > { %v10894_v40 = vpop.permute.xlu0 %8161 }
 0x2d2   : > { %15604 = vst [vmem:[#allocation59_spill] sm:$0xff] %v10894_v40  ;;  %v10896_v38 = vpop.permute.xlu1 %8141 }
 0x2d3   : > { %15605 = vst [vmem:[#allocation78_spill] sm:$0xff] %v10896_v38  ;;  %8286 = vrot.lane.b32.xlu0 %v8260_v15, %s15574_s13  ;;  %v2462_v15 = vld [vmem:[#allocation3 + $0x9c] sm:$0xff] }
 0x2d4   : > { %8276 = vrot.lane.b32.xlu1 %v8275_v17, %s15564_s12  ;;  %v10924_v48 = vpack.i.bf16 %v2462_v15, %v10806_v11 }
 0x2d5   : > { %v10902_v19 = vpop.permute.xlu0 %8171 }
 0x2d6   : > { %15606 = vst [vmem:[#allocation80_spill] sm:$0xff] %v10902_v19  ;;  %v10904_v41 = vpop.permute.xlu1 %8146 }
 0x2d7   : > { %15607 = vst [vmem:[#allocation61_spill] sm:$0xff] %v10904_v41  ;;  %8296 = vrot.lane.b32.xlu0 %v8295_v29, %s15563_s14 }
 0x2d8   : > { %8281 = vrot.lane.b32.xlu1 %v8280_v44, %s15565_s25  ;;  %v2428_v44 = vld [vmem:[#allocation3 + $0x9a] sm:$0xff] }
 0x2d9   : > { %v10912_v39 = vpop.permute.xlu0 %8181 }
 0x2da   : > { %15608 = vst [vmem:[#allocation62_spill] sm:$0xff] %v10912_v39  ;;  %v10914_v12 = vpop.permute.xlu1 %8156  ;;  %v2505_v39 = vld [vmem:[#allocation3 + $0xe6] sm:$0xff] }
 0x2db   : > { %15609 = vst [vmem:[#allocation82_spill] sm:$0xff] %v10914_v12  ;;  %8301 = vrot.lane.b32.xlu0 %v10786_v10, %s15583_s30  ;;  %v10934_v10 = vld [vmem:[#allocation3 + $0xa0] sm:$0xff] }
 0x2dc   : > { %8291 = vrot.lane.b32.xlu1 %v8265_v36, %s15566_s15  ;;  %v2496_v36 = vld [vmem:[#allocation3 + $0x9e] sm:$0xff] }
 0x2dd   : > { %v10919_v45 = vpop.permute.xlu0 %3040  ;;  %v2463_v12 = vld [vmem:[#allocation3 + $0xa4] sm:$0xff] }
 0x2de   : > { %15610 = vst [vmem:[#allocation83_spill] sm:$0xff] %v10919_v45  ;;  %v10921_v18 = vpop.permute.xlu1 %8166  ;;  %v2469_v45 = vld [vmem:[#allocation3 + $0xd4] sm:$0xff] }
 0x2df   : > { %15611 = vst [vmem:[#allocation64_spill] sm:$0xff] %v10921_v18  ;;  %8321 = vrot.lane.b32.xlu0 %v10924_v48, %s15594_s2  ;;  %v8325_v18 = vpack.i.bf16 %v2496_v36, %v10833_v1 }
 0x2e0   : > { %8306 = vrot.lane.b32.xlu1 %v10831_v60, %s15577_s16  ;;  %v8335_v60 = vpack.i.bf16 %v10936_v35, %v2496_v36 }
 0x2e1   : > { %v10930_v50 = vpop.permute.xlu0 %8196 }
 0x2e2   : > { %15612 = vst [vmem:[#allocation65_spill] sm:$0xff] %v10930_v50  ;;  %v10932_v58 = vpop.permute.xlu1 %3042 }
 0x2e3   : > { %15613 = vst [vmem:[#allocation28_spill] sm:$0xff] %v10932_v58  ;;  %3048 = vrot.lane.b32.xlu0 %v10934_v10, %s15586_s22 }
 0x2e4   : > { %8311 = vrot.lane.b32.xlu1 %v8295_v29, %s15593_s1 }
 0x2e5   : > { %v10941_v11 = vpop.permute.xlu0 %5151 }
 0x2e6   : > { %15614 = vst [vmem:[#allocation86_spill] sm:$0xff] %v10941_v11  ;;  %v10943_v63 = vpop.permute.xlu1 %5470 }
 0x2e7   : > { %15615 = vst [vmem:[#allocation87_spill] sm:$0xff] %v10943_v63  ;;  %8336 = vrot.lane.b32.xlu0 %v8335_v60, %s15595_s19 }
 0x2e8   : > { %3050 = vrot.lane.b32.xlu1 %v10946_v2, %s15586_s22 }
 0x2e9   : > { %v10951_v25 = vpop.permute.xlu0 %5365 }
 0x2ea   : > { %15616 = vst [vmem:[#allocation67_spill] sm:$0xff] %v10951_v25  ;;  %v10953_v17 = vpop.permute.xlu1 %4805 }
 0x2eb   : > { %15617 = vst [vmem:[#allocation69_spill] sm:$0xff] %v10953_v17  ;;  %5159 = vrot.lane.b32.xlu0 %v2428_v44, %s15589_s0  ;;  %v8315_v17 = vpack.i.bf16 %v2428_v44, %v10863_v61  ;;  %v8330_v61 = vpack.i.bf16 %v2463_v12, %v2462_v15 }
 0x2ec   : > { %5478 = vrot.lane.b32.xlu1 %v10946_v2, %s15583_s30 }
 0x2ed   : > { %v10958_v29 = vpop.permute.xlu0 %5468 }
 0x2ee   : > { %15618 = vst [vmem:[#allocation90_spill] sm:$0xff] %v10958_v29  ;;  %v10960_v63 = vpop.permute.xlu1 %8176 }
 0x2ef   : > { %15619 = vst [vmem:[#allocation70_spill] sm:$0xff] %v10960_v63  ;;  %5373 = vrot.lane.b32.xlu0 %v2496_v36, %s15593_s1  ;;  %v2429_v36 = vld [vmem:[#allocation3 + $0xa2] sm:$0xff]  ;;  %v11430_v63 = vld [vmem:[#allocation3 + $0xf0] sm:$0xff] }
 0x2f0   : > { %4813 = vrot.lane.b32.xlu1 %v10946_v2, %s15567_s26  ;;  %15746 = vst [vmem:[#allocation182_spill] sm:$0xff] %v11430_v63 }
 0x2f1   : > { %v10965_v58 = vpop.permute.xlu0 %5258 }
 0x2f2   : > { %15620 = vst [vmem:[#allocation72_spill] sm:$0xff] %v10965_v58  ;;  %v10967_v25 = vpop.permute.xlu1 %8186 }
 0x2f3   : > { %15621 = vst [vmem:[#allocation92_spill] sm:$0xff] %v10967_v25  ;;  %5476 = vrot.lane.b32.xlu0 %v10934_v10, %s15583_s30  ;;  %v2503_v25 = vld [vmem:[#allocation3 + $0xd6] sm:$0xff] }
 0x2f4   : > { %8316 = vrot.lane.b32.xlu1 %v8315_v17, %s15567_s26 }
 0x2f5   : > { %v10973_v50 = vpop.permute.xlu0 %4907 }
 0x2f6   : > { %15622 = vst [vmem:[#allocation74_spill] sm:$0xff] %v10973_v50  ;;  %v10975_v29 = vpop.permute.xlu1 %8191 }
 0x2f7   : > { %15623 = vst [vmem:[#allocation76_spill] sm:$0xff] %v10975_v29  ;;  %5266 = vrot.lane.b32.xlu0 %v2463_v12, %s15595_s19 }
 0x2f8   : > { %8326 = vrot.lane.b32.xlu1 %v8325_v18, %s15571_s24 }
 0x2f9   : > { %v10980_v58 = vpop.permute.xlu0 %4803 }
 0x2fa   : > { %15624 = vst [vmem:[#allocation93_spill] sm:$0xff] %v10980_v58  ;;  %v10982_v11 = vpop.permute.xlu1 %5256 }
 0x2fb   : > { %15625 = vst [vmem:[#allocation94_spill] sm:$0xff] %v10982_v11  ;;  %4915 = vrot.lane.b32.xlu0 %v2428_v44, %s15594_s2 }
 0x2fc   : > { %8331 = vrot.lane.b32.xlu1 %v8330_v61, %s15589_s0 }
 0x2fd   : > { %v10986_v41 = vpop.permute.xlu0 %5012 }
 0x2fe   : > { %15626 = vst [vmem:[#allocation79_spill] sm:$0xff] %v10986_v41  ;;  %v10988_v50 = vpop.permute.xlu1 %5153 }
 0x2ff   : > { %15627 = vst [vmem:[#allocation81_spill] sm:$0xff] %v10988_v50  ;;  %4811 = vrot.lane.b32.xlu0 %v10934_v10, %s15567_s26  ;;  %v8350_v50 = vpack.i.bf16 %v2429_v36, %v2428_v44 }
 0x300   : > { %5264 = vrot.lane.b32.xlu1 %v2462_v15, %s15595_s19 }
 0x301   : > { %v10993_v1 = vpop.permute.xlu0 %8201 }
 0x302   : > { %15628 = vst [vmem:[#allocation95_spill] sm:$0xff] %v10993_v1  ;;  %v10995_v18 = vpop.permute.xlu1 %5367 }
 0x303   : > { %15629 = vst [vmem:[#allocation29_spill] sm:$0xff] %v10995_v18  ;;  %5020 = vrot.lane.b32.xlu0 %v2463_v12, %s15571_s24  ;;  %v8345_v18 = vpack.i.bf16 %v10934_v10, %v10802_v54 }
 0x304   : > { %5161 = vrot.lane.b32.xlu1 %v2429_v36, %s15589_s0 }
 0x305   : > { %v10999_v58 = vpop.permute.xlu0 %8216 }
 0x306   : > { %15630 = vst [vmem:[#allocation96_spill] sm:$0xff] %v10999_v58  ;;  %v11001_v11 = vpop.permute.xlu1 %5010 }
 0x307   : > { %15631 = vst [vmem:[#allocation84_spill] sm:$0xff] %v11001_v11  ;;  %8341 = vrot.lane.b32.xlu0 %v10924_v48, %s15573_s29 }
 0x308   : > { %5375 = vrot.lane.b32.xlu1 %v10936_v35, %s15593_s1 }
 0x309   : > { %v11007_v41 = vpop.permute.xlu0 %8226 }
 0x30a   : > { %15632 = vst [vmem:[#allocation85_spill] sm:$0xff] %v11007_v41  ;;  %v11009_v1 = vpop.permute.xlu1 %4909 }
 0x30b   : > { %15633 = vst [vmem:[#allocation30_spill] sm:$0xff] %v11009_v1  ;;  %8346 = vrot.lane.b32.xlu0 %v8345_v18, %s15564_s12  ;;  %v8365_v18 = vpack.i.bf16 %v10946_v2, %v10934_v10  ;;  %v2468_v1 = vld [vmem:[#allocation3 + $0xcc] sm:$0xff] }
 0x30c   : > { %5018 = vrot.lane.b32.xlu1 %v2462_v15, %s15571_s24 }
 0x30d   : > { %v11015_v58 = vpop.permute.xlu0 %8236 }
 0x30e   : > { %15634 = vst [vmem:[#allocation97_spill] sm:$0xff] %v11015_v58  ;;  %v11017_v11 = vpop.permute.xlu1 %8206  ;;  %v2464_v58 = vld [vmem:[#allocation3 + $0xac] sm:$0xff] }
 0x30f   : > { %15635 = vst [vmem:[#allocation31_spill] sm:$0xff] %v11017_v11  ;;  %8351 = vrot.lane.b32.xlu0 %v8350_v50, %s15565_s25 }
 0x310   : > { %4917 = vrot.lane.b32.xlu1 %v2429_v36, %s15594_s2 }
 0x311   : > { %v11021_v29 = vpop.permute.xlu0 %8241 }
 0x312   : > { %15636 = vst [vmem:[#allocation98_spill] sm:$0xff] %v11021_v29  ;;  %v11023_v41 = vpop.permute.xlu1 %8211 }
 0x313   : > { %15637 = vst [vmem:[#allocation88_spill] sm:$0xff] %v11023_v41  ;;  %8361 = vrot.lane.b32.xlu0 %v8335_v60, %s15566_s15  ;;  %v11040_v41 = vld [vmem:[#allocation3 + $0xb8] sm:$0xff]  ;;  %v11042_v60 = vld [vmem:[#allocation3 + $0xaa] sm:$0xff] }
 0x314   : > { %8356 = vrot.lane.b32.xlu1 %v8330_v61, %s15574_s13 }
 0x315   : > { %v11027_v54 = vpop.permute.xlu0 %8246 }
 0x316   : > { %15638 = vst [vmem:[#allocation89_spill] sm:$0xff] %v11027_v54  ;;  %v11029_v15 = vpop.permute.xlu1 %8221  ;;  %v11067_v54 = vld [vmem:[#allocation3 + $0xb6] sm:$0xff] }
 0x317   : > { %15639 = vst [vmem:[#allocation32_spill] sm:$0xff] %v11029_v15  ;;  %8376 = vrot.lane.b32.xlu0 %v10924_v48, %s15577_s16  ;;  %v8380_v48 = vpack.i.bf16 %v11042_v60, %v2429_v36 }
 0x318   : > { %8366 = vrot.lane.b32.xlu1 %v8365_v18, %s15563_s14  ;;  %v2498_v18 = vld [vmem:[#allocation3 + $0xae] sm:$0xff] }
 0x319   : > { %v11036_v50 = vpop.permute.xlu0 %8256  ;;  %v8390_v11 = vpack.i.bf16 %v2498_v18, %v10936_v35 }
 0x31a   : > { %15640 = vst [vmem:[#allocation99_spill] sm:$0xff] %v11036_v50  ;;  %v11038_v44 = vpop.permute.xlu1 %8231 }
 0x31b   : > { %15641 = vst [vmem:[#allocation33_spill] sm:$0xff] %v11038_v44  ;;  %4817 = vrot.lane.b32.xlu0 %v11040_v41, %s15567_s26 }
 0x31c   : > { %8371 = vrot.lane.b32.xlu1 %v8315_v17, %s15583_s30 }
 0x31d   : > { %v11047_v61 = vpop.permute.xlu0 %3044 }
 0x31e   : > { %15642 = vst [vmem:[#allocation100_spill] sm:$0xff] %v11047_v61  ;;  %v11049_v10 = vpop.permute.xlu1 %3046  ;;  %v2465_v61 = vld [vmem:[#allocation3 + $0xb4] sm:$0xff] }
 0x31f   : > { %15643 = vst [vmem:[#allocation91_spill] sm:$0xff] %v11049_v10  ;;  %8381 = vrot.lane.b32.xlu0 %v8380_v48, %s15567_s26  ;;  %v8385_v48 = vpack.i.bf16 %v2464_v58, %v2463_v12  ;;  %v2397_v10 = vld [vmem:[#allocation3 + $0xb0] sm:$0xff] }
 0x320   : > { %3054 = vrot.lane.b32.xlu1 %v11040_v41, %s15586_s22 }
 0x321   : > { %v11055_v50 = vpop.permute.xlu0 %8261 }
 0x322   : > { %15644 = vst [vmem:[#allocation35_spill] sm:$0xff] %v11055_v50  ;;  %v11057_v15 = vpop.permute.xlu1 %5474  ;;  %v8400_v50 = vpack.i.bf16 %v11067_v54, %v2498_v18 }
 0x323   : > { %15645 = vst [vmem:[#allocation101_spill] sm:$0xff] %v11057_v15  ;;  %8391 = vrot.lane.b32.xlu0 %v8390_v11, %s15571_s24  ;;  %v8395_v11 = vpack.i.bf16 %v2465_v61, %v2464_v58 }
 0x324   : > { %5482 = vrot.lane.b32.xlu1 %v11040_v41, %s15583_s30 }
 0x325   : > { %v11063_v17 = vpop.permute.xlu0 %5155 }
 0x326   : > { %15646 = vst [vmem:[#allocation102_spill] sm:$0xff] %v11063_v17  ;;  %v11065_v36 = vpop.permute.xlu1 %4809 }
 0x327   : > { %15647 = vst [vmem:[#allocation103_spill] sm:$0xff] %v11065_v36  ;;  %3052 = vrot.lane.b32.xlu0 %v2397_v10, %s15586_s22 }
 0x328   : > { %8386 = vrot.lane.b32.xlu1 %v8385_v48, %s15594_s2 }
 0x329   : > { %v11071_v35 = vpop.permute.xlu0 %5369 }
 0x32a   : > { %15648 = vst [vmem:[#allocation14_spill] sm:$0xff] %v11071_v35  ;;  %v11073_v15 = vpop.permute.xlu1 %8251 }
 0x32b   : > { %15649 = vst [vmem:[#allocation36_spill] sm:$0xff] %v11073_v15  ;;  %8396 = vrot.lane.b32.xlu0 %v8395_v11, %s15589_s0  ;;  %v2431_v15 = vld [vmem:[#allocation3 + $0xb2] sm:$0xff] }
 0x32c   : > { %8401 = vrot.lane.b32.xlu1 %v8400_v50, %s15595_s19 }
 0x32d   : > { %v11078_v12 = vpop.permute.xlu0 %5472 }
 0x32e   : > { %15650 = vst [vmem:[#allocation15_spill] sm:$0xff] %v11078_v12  ;;  %v11080_v36 = vpop.permute.xlu1 %8266 }
 0x32f   : > { %15651 = vst [vmem:[#allocation38_spill] sm:$0xff] %v11080_v36  ;;  %5163 = vrot.lane.b32.xlu0 %v11042_v60, %s15589_s0 }
 0x330   : > { %5268 = vrot.lane.b32.xlu1 %v2464_v58, %s15595_s19 }
 0x331   : > { %v11085_v17 = vpop.permute.xlu0 %5262 }
 0x332   : > { %15652 = vst [vmem:[#allocation104_spill] sm:$0xff] %v11085_v17  ;;  %v11087_v35 = vpop.permute.xlu1 %5260 }
 0x333   : > { %15653 = vst [vmem:[#allocation105_spill] sm:$0xff] %v11087_v35  ;;  %5377 = vrot.lane.b32.xlu0 %v2498_v18, %s15593_s1 }
 0x334   : > { %5165 = vrot.lane.b32.xlu1 %v2431_v15, %s15589_s0 }
 0x335   : > { %v11091_v44 = vpop.permute.xlu0 %4911 }
 0x336   : > { %15654 = vst [vmem:[#allocation16_spill] sm:$0xff] %v11091_v44  ;;  %v11093_v29 = vpop.permute.xlu1 %5157 }
 0x337   : > { %15655 = vst [vmem:[#allocation39_spill] sm:$0xff] %v11093_v29  ;;  %5480 = vrot.lane.b32.xlu0 %v2397_v10, %s15583_s30 }
 0x338   : > { %5379 = vrot.lane.b32.xlu1 %v11067_v54, %s15593_s1 }
 0x339   : > { %v11098_v12 = vpop.permute.xlu0 %4807 }
 0x33a   : > { %15656 = vst [vmem:[#allocation17_spill] sm:$0xff] %v11098_v12  ;;  %v11100_v36 = vpop.permute.xlu1 %5371 }
 0x33b   : > { %15657 = vst [vmem:[#allocation40_spill] sm:$0xff] %v11100_v36  ;;  %5270 = vrot.lane.b32.xlu0 %v2465_v61, %s15595_s19 }
 0x33c   : > { %5022 = vrot.lane.b32.xlu1 %v2464_v58, %s15571_s24 }
 0x33d   : > { %v11104_v18 = vpop.permute.xlu0 %5016 }
 0x33e   : > { %15658 = vst [vmem:[#allocation106_spill] sm:$0xff] %v11104_v18  ;;  %v11106_v17 = vpop.permute.xlu1 %5014  ;;  %v8410_v18 = vpack.i.bf16 %v2397_v10, %v10946_v2  ;;  %v8430_v2 = vpack.i.bf16 %v11040_v41, %v2397_v10 }
 0x33f   : > { %15659 = vst [vmem:[#allocation107_spill] sm:$0xff] %v11106_v17  ;;  %4919 = vrot.lane.b32.xlu0 %v11042_v60, %s15594_s2 }
 0x340   : > { %4921 = vrot.lane.b32.xlu1 %v2431_v15, %s15594_s2 }
 0x341   : > { %v11111_v44 = vpop.permute.xlu0 %8271 }
 0x342   : > { %15660 = vst [vmem:[#allocation18_spill] sm:$0xff] %v11111_v44  ;;  %v11113_v29 = vpop.permute.xlu1 %4913  ;;  %v8415_v44 = vpack.i.bf16 %v2431_v15, %v11042_v60 }
 0x343   : > { %15661 = vst [vmem:[#allocation41_spill] sm:$0xff] %v11113_v29  ;;  %4815 = vrot.lane.b32.xlu0 %v2397_v10, %s15567_s26  ;;  %v11136_v29 = vld [vmem:[#allocation3 + $0xbc] sm:$0xff] }
 0x344   : > { %8406 = vrot.lane.b32.xlu1 %v8385_v48, %s15573_s29  ;;  %v8440_v60 = vpack.i.bf16 %v11136_v29, %v2465_v61  ;;  %v11154_v10 = vld [vmem:[#allocation3 + $0xc0] sm:$0xff] }
 0x345   : > { %v11117_v12 = vpop.permute.xlu0 %8286 }
 0x346   : > { %15662 = vst [vmem:[#allocation19_spill] sm:$0xff] %v11117_v12  ;;  %v11119_v58 = vpop.permute.xlu1 %8276 }
 0x347   : > { %15663 = vst [vmem:[#allocation42_spill] sm:$0xff] %v11119_v58  ;;  %5024 = vrot.lane.b32.xlu0 %v2465_v61, %s15571_s24  ;;  %v2467_v58 = vld [vmem:[#allocation3 + $0xc4] sm:$0xff] }
 0x348   : > { %8411 = vrot.lane.b32.xlu1 %v8410_v18, %s15564_s12 }
 0x349   : > { %v11124_v17 = vpop.permute.xlu0 %8296 }
 0x34a   : > { %15664 = vst [vmem:[#allocation108_spill] sm:$0xff] %v11124_v17  ;;  %v11126_v36 = vpop.permute.xlu1 %8281 }
 0x34b   : > { %15665 = vst [vmem:[#allocation109_spill] sm:$0xff] %v11126_v36  ;;  %8421 = vrot.lane.b32.xlu0 %v8395_v11, %s15574_s13  ;;  %v11145_v11 = vld [vmem:[#allocation3 + $0xc8] sm:$0xff] }
 0x34c   : > { %8416 = vrot.lane.b32.xlu1 %v8415_v44, %s15565_s25 }
 0x34d   : > { %v11131_v48 = vpop.permute.xlu0 %8301 }
 0x34e   : > { %15666 = vst [vmem:[#allocation20_spill] sm:$0xff] %v11131_v48  ;;  %v11133_v12 = vpop.permute.xlu1 %8291  ;;  %v11166_v48 = vld [vmem:[#allocation3 + $0xba] sm:$0xff] }
 0x34f   : > { %15667 = vst [vmem:[#allocation44_spill] sm:$0xff] %v11133_v12  ;;  %8431 = vrot.lane.b32.xlu0 %v8430_v2, %s15563_s14  ;;  %v2501_v2 = vld [vmem:[#allocation3 + $0xc6] sm:$0xff]  ;;  %v8435_v12 = vpack.i.bf16 %v11166_v48, %v2431_v15  ;;  %v11192_v15 = vpack.i.bf16 %v2467_v58, %v11136_v29 }
 0x350   : > { %8426 = vrot.lane.b32.xlu1 %v8400_v50, %s15566_s15  ;;  %v2500_v50 = vld [vmem:[#allocation3 + $0xbe] sm:$0xff] }
 0x351   : > { %v11140_v18 = vpop.permute.xlu0 %8321  ;;  %v8445_v36 = vpack.i.bf16 %v2500_v50, %v11067_v54  ;;  %15681 = vst [vmem:[#allocation117_spill] sm:$0xff] %v11192_v15 }
 0x352   : > { %15668 = vst [vmem:[#allocation21_spill] sm:$0xff] %v11140_v18  ;;  %v11142_v17 = vpop.permute.xlu1 %8306 }
 0x353   : > { %15669 = vst [vmem:[#allocation46_spill] sm:$0xff] %v11142_v17  ;;  %8441 = vrot.lane.b32.xlu0 %v8440_v60, %s15594_s2  ;;  %v11164_v17 = vpack.i.bf16 %v2501_v2, %v2500_v50 }
 0x354   : > { %3058 = vrot.lane.b32.xlu1 %v11145_v11, %s15586_s22 }
 0x355   : > { %v11150_v41 = vpop.permute.xlu0 %3048  ;;  %15674 = vst [vmem:[#allocation23_spill] sm:$0xff] %v11164_v17 }
 0x356   : > { %15670 = vst [vmem:[#allocation110_spill] sm:$0xff] %v11150_v41  ;;  %v11152_v44 = vpop.permute.xlu1 %8311 }
 0x357   : > { %15671 = vst [vmem:[#allocation111_spill] sm:$0xff] %v11152_v44  ;;  %3056 = vrot.lane.b32.xlu0 %v11154_v10, %s15586_s22 }
 0x358   : > { %5486 = vrot.lane.b32.xlu1 %v11145_v11, %s15583_s30 }
 0x359   : > { %v11160_v61 = vpop.permute.xlu0 %8336 }
 0x35a   : > { %15672 = vst [vmem:[#allocation22_spill] sm:$0xff] %v11160_v61  ;;  %v11162_v18 = vpop.permute.xlu1 %3050 }
 0x35b   : > { %15673 = vst [vmem:[#allocation48_spill] sm:$0xff] %v11162_v18  ;;  %8456 = vrot.lane.b32.xlu0 %v11164_v17, %s15595_s19  ;;  %v11263_v17 = vpack.i.bf16 %v2468_v1, %v2467_v58 }
 0x35c   : > { %4821 = vrot.lane.b32.xlu1 %v11145_v11, %s15567_s26 }
 0x35d   : > { %v11172_v41 = vpop.permute.xlu0 %5159 }
 0x35e   : > { %15675 = vst [vmem:[#allocation50_spill] sm:$0xff] %v11172_v41  ;;  %v11174_v44 = vpop.permute.xlu1 %5478 }
 0x35f   : > { %15676 = vst [vmem:[#allocation112_spill] sm:$0xff] %v11174_v44  ;;  %5167 = vrot.lane.b32.xlu0 %v11166_v48, %s15589_s0 }
 0x360   : > { %8436 = vrot.lane.b32.xlu1 %v8435_v12, %s15567_s26 }
 0x361   : > { %v11180_v18 = vpop.permute.xlu0 %5373 }
 0x362   : > { %15677 = vst [vmem:[#allocation113_spill] sm:$0xff] %v11180_v18  ;;  %v11182_v61 = vpop.permute.xlu1 %4813 }
 0x363   : > { %15678 = vst [vmem:[#allocation114_spill] sm:$0xff] %v11182_v61  ;;  %5381 = vrot.lane.b32.xlu0 %v2500_v50, %s15593_s1 }
 0x364   : > { %8446 = vrot.lane.b32.xlu1 %v8445_v36, %s15571_s24 }
 0x365   : > { %v11187_v41 = vpop.permute.xlu0 %5476 }
 0x366   : > { %15679 = vst [vmem:[#allocation115_spill] sm:$0xff] %v11187_v41  ;;  %v11189_v44 = vpop.permute.xlu1 %8316 }
 0x367   : > { %15680 = vst [vmem:[#allocation116_spill] sm:$0xff] %v11189_v44  ;;  %5484 = vrot.lane.b32.xlu0 %v11154_v10, %s15583_s30  ;;  %v11209_v44 = vld [vmem:[#allocation3 + $0xc2] sm:$0xff] }
 0x368   : > { %8451 = vrot.lane.b32.xlu1 %v11192_v15, %s15589_s0 }
 0x369   : > { %v11198_v12 = vpop.permute.xlu0 %5266 }
 0x36a   : > { %15682 = vst [vmem:[#allocation118_spill] sm:$0xff] %v11198_v12  ;;  %v11200_v54 = vpop.permute.xlu1 %8326 }
 0x36b   : > { %15683 = vst [vmem:[#allocation119_spill] sm:$0xff] %v11200_v54  ;;  %5274 = vrot.lane.b32.xlu0 %v2467_v58, %s15595_s19 }
 0x36c   : > { %5272 = vrot.lane.b32.xlu1 %v11136_v29, %s15595_s19 }
 0x36d   : > { %v11205_v36 = vpop.permute.xlu0 %4915 }
 0x36e   : > { %15684 = vst [vmem:[#allocation120_spill] sm:$0xff] %v11205_v36  ;;  %v11207_v50 = vpop.permute.xlu1 %8331 }
 0x36f   : > { %15685 = vst [vmem:[#allocation121_spill] sm:$0xff] %v11207_v50  ;;  %5026 = vrot.lane.b32.xlu0 %v11136_v29, %s15571_s24 }
 0x370   : > { %5169 = vrot.lane.b32.xlu1 %v11209_v44, %s15589_s0 }
 0x371   : > { %v11215_v41 = vpop.permute.xlu0 %4811 }
 0x372   : > { %15686 = vst [vmem:[#allocation122_spill] sm:$0xff] %v11215_v41  ;;  %v11217_v54 = vpop.permute.xlu1 %5264  ;;  %v11233_v41 = vld [vmem:[#allocation3 + $0xd8] sm:$0xff] }
 0x373   : > { %15687 = vst [vmem:[#allocation123_spill] sm:$0xff] %v11217_v54  ;;  %4925 = vrot.lane.b32.xlu0 %v11209_v44, %s15594_s2  ;;  %15692 = vst [vmem:[#allocation128_spill] sm:$0xff] %v11233_v41  ;;  %v11235_v54 = vld [vmem:[#allocation3 + $0xca] sm:$0xff] }
 0x374   : > { %5383 = vrot.lane.b32.xlu1 %v2501_v2, %s15593_s1 }
 0x375   : > { %v11222_v12 = vpop.permute.xlu0 %5020 }
 0x376   : > { %15688 = vst [vmem:[#allocation124_spill] sm:$0xff] %v11222_v12  ;;  %v11224_v18 = vpop.permute.xlu1 %5161 }
 0x377   : > { %15689 = vst [vmem:[#allocation125_spill] sm:$0xff] %v11224_v18  ;;  %8461 = vrot.lane.b32.xlu0 %v8440_v60, %s15573_s29  ;;  %v11247_v18 = vpack.i.bf16 %v11235_v54, %v11209_v44 }
 0x378   : > { %4923 = vrot.lane.b32.xlu1 %v11166_v48, %s15594_s2 }
 0x379   : > { %v11229_v36 = vpop.permute.xlu0 %8341  ;;  %15695 = vst [vmem:[#allocation131_spill] sm:$0xff] %v11247_v18 }
 0x37a   : > { %15690 = vst [vmem:[#allocation126_spill] sm:$0xff] %v11229_v36  ;;  %v11231_v50 = vpop.permute.xlu1 %5375  ;;  %v2502_v36 = vld [vmem:[#allocation3 + $0xce] sm:$0xff] }
 0x37b   : > { %15691 = vst [vmem:[#allocation127_spill] sm:$0xff] %v11231_v50  ;;  %5490 = vrot.lane.b32.xlu0 %v11233_v41, %s15583_s30  ;;  %v8475_v35 = vpack.i.bf16 %v2502_v36, %v2501_v2 }
 0x37c   : > { %4819 = vrot.lane.b32.xlu1 %v11154_v10, %s15567_s26 }
 0x37d   : > { %v11241_v12 = vpop.permute.xlu0 %8346 }
 0x37e   : > { %15693 = vst [vmem:[#allocation129_spill] sm:$0xff] %v11241_v12  ;;  %v11243_v60 = vpop.permute.xlu1 %5018 }
 0x37f   : > { %15694 = vst [vmem:[#allocation130_spill] sm:$0xff] %v11243_v60  ;;  %8466 = vrot.lane.b32.xlu0 %v11247_v18, %s15567_s26  ;;  %v11265_v18 = vld [vmem:[#allocation3 + $0xd0] sm:$0xff] }
 0x380   : > { %5028 = vrot.lane.b32.xlu1 %v2467_v58, %s15571_s24 }
 0x381   : > { %v11252_v50 = vpop.permute.xlu0 %8351 }
 0x382   : > { %15696 = vst [vmem:[#allocation132_spill] sm:$0xff] %v11252_v50  ;;  %v11254_v61 = vpop.permute.xlu1 %4917  ;;  %v11275_v50 = vpack.i.bf16 %v2469_v45, %v2468_v1 }
 0x383   : > { %15697 = vst [vmem:[#allocation133_spill] sm:$0xff] %v11254_v61  ;;  %8476 = vrot.lane.b32.xlu0 %v8475_v35, %s15571_s24  ;;  %v11294_v61 = vld [vmem:[#allocation3 + $0xd2] sm:$0xff] }
 0x384   : > { %3062 = vrot.lane.b32.xlu1 %v11233_v41, %s15586_s22  ;;  %15702 = vst [vmem:[#allocation138_spill] sm:$0xff] %v11275_v50 }
 0x385   : > { %v11259_v60 = vpop.permute.xlu0 %8361 }
 0x386   : > { %15698 = vst [vmem:[#allocation134_spill] sm:$0xff] %v11259_v60  ;;  %v11261_v12 = vpop.permute.xlu1 %8356  ;;  %v11277_v60 = vpack.i.bf16 %v2503_v25, %v2502_v36 }
 0x387   : > { %15699 = vst [vmem:[#allocation135_spill] sm:$0xff] %v11261_v12  ;;  %3060 = vrot.lane.b32.xlu0 %v11265_v18, %s15586_s22 }
 0x388   : > { %8471 = vrot.lane.b32.xlu1 %v11263_v17, %s15594_s2  ;;  %15703 = vst [vmem:[#allocation139_spill] sm:$0xff] %v11277_v60 }
 0x389   : > { %v11271_v35 = vpop.permute.xlu0 %8376 }
 0x38a   : > { %15700 = vst [vmem:[#allocation136_spill] sm:$0xff] %v11271_v35  ;;  %v11273_v2 = vpop.permute.xlu1 %8366 }
 0x38b   : > { %15701 = vst [vmem:[#allocation137_spill] sm:$0xff] %v11273_v2  ;;  %8481 = vrot.lane.b32.xlu0 %v11275_v50, %s15589_s0  ;;  %v11336_v50 = vld [vmem:[#allocation3 + $0xe8] sm:$0xff] }
 0x38c   : > { %8486 = vrot.lane.b32.xlu1 %v11277_v60, %s15595_s19  ;;  %15719 = vst [vmem:[#allocation155_spill] sm:$0xff] %v11336_v50 }
 0x38d   : > { %v11283_v58 = vpop.permute.xlu0 %4817 }
 0x38e   : > { %15704 = vst [vmem:[#allocation140_spill] sm:$0xff] %v11283_v58  ;;  %v11285_v12 = vpop.permute.xlu1 %8371 }
 0x38f   : > { %15705 = vst [vmem:[#allocation141_spill] sm:$0xff] %v11285_v12  ;;  %5276 = vrot.lane.b32.xlu0 %v2468_v1, %s15595_s19 }
 0x390   : > { %5171 = vrot.lane.b32.xlu1 %v11235_v54, %s15589_s0 }
 0x391   : > { %v11290_v35 = vpop.permute.xlu0 %8381 }
 0x392   : > { %15706 = vst [vmem:[#allocation142_spill] sm:$0xff] %v11290_v35  ;;  %v11292_v2 = vpop.permute.xlu1 %3054 }
 0x393   : > { %15707 = vst [vmem:[#allocation143_spill] sm:$0xff] %v11292_v2  ;;  %5173 = vrot.lane.b32.xlu0 %v11294_v61, %s15589_s0 }
 0x394   : > { %5385 = vrot.lane.b32.xlu1 %v2502_v36, %s15593_s1 }
 0x395   : > { %v11299_v60 = vpop.permute.xlu0 %8391 }
 0x396   : > { %15708 = vst [vmem:[#allocation144_spill] sm:$0xff] %v11299_v60  ;;  %v11301_v58 = vpop.permute.xlu1 %5482 }
 0x397   : > { %15709 = vst [vmem:[#allocation145_spill] sm:$0xff] %v11301_v58  ;;  %5387 = vrot.lane.b32.xlu0 %v2503_v25, %s15593_s1 }
 0x398   : > { %5488 = vrot.lane.b32.xlu1 %v11265_v18, %s15583_s30 }
 0x399   : > { %v11306_v12 = vpop.permute.xlu0 %3052 }
 0x39a   : > { %15710 = vst [vmem:[#allocation146_spill] sm:$0xff] %v11306_v12  ;;  %v11308_v35 = vpop.permute.xlu1 %8386  ;;  %v11324_v12 = vld [vmem:[#allocation3 + $0xdc] sm:$0xff] }
 0x39b   : > { %15711 = vst [vmem:[#allocation147_spill] sm:$0xff] %v11308_v35  ;;  %4927 = vrot.lane.b32.xlu0 %v11235_v54, %s15594_s2 }
 0x39c   : > { %5278 = vrot.lane.b32.xlu1 %v2469_v45, %s15595_s19 }
 0x39d   : > { %v11313_v2 = vpop.permute.xlu0 %8396 }
 0x39e   : > { %15712 = vst [vmem:[#allocation148_spill] sm:$0xff] %v11313_v2  ;;  %v11315_v36 = vpop.permute.xlu1 %8401 }
 0x39f   : > { %15713 = vst [vmem:[#allocation149_spill] sm:$0xff] %v11315_v36  ;;  %4823 = vrot.lane.b32.xlu0 %v11265_v18, %s15567_s26  ;;  %v11334_v36 = vpack.i.bf16 %v11324_v12, %v2469_v45 }
 0x3a0   : > { %5030 = vrot.lane.b32.xlu1 %v2468_v1, %s15571_s24 }
 0x3a1   : > { %v11320_v60 = vpop.permute.xlu0 %5163  ;;  %15718 = vst [vmem:[#allocation154_spill] sm:$0xff] %v11334_v36 }
 0x3a2   : > { %15714 = vst [vmem:[#allocation150_spill] sm:$0xff] %v11320_v60  ;;  %v11322_v58 = vpop.permute.xlu1 %5268  ;;  %v11346_v60 = vld [vmem:[#allocation3 + $0xe0] sm:$0xff] }
 0x3a3   : > { %15715 = vst [vmem:[#allocation151_spill] sm:$0xff] %v11322_v58  ;;  %5032 = vrot.lane.b32.xlu0 %v2469_v45, %s15571_s24  ;;  %15722 = vst [vmem:[#allocation158_spill] sm:$0xff] %v11346_v60 }
 0x3a4   : > { %4929 = vrot.lane.b32.xlu1 %v11294_v61, %s15594_s2 }
 0x3a5   : > { %v11329_v35 = vpop.permute.xlu0 %5377 }
 0x3a6   : > { %15716 = vst [vmem:[#allocation152_spill] sm:$0xff] %v11329_v35  ;;  %v11331_v2 = vpop.permute.xlu1 %5165  ;;  %v2504_v35 = vld [vmem:[#allocation3 + $0xde] sm:$0xff] }
 0x3a7   : > { %15717 = vst [vmem:[#allocation153_spill] sm:$0xff] %v11331_v2  ;;  %8496 = vrot.lane.b32.xlu0 %v11334_v36, %s15594_s2  ;;  %v11348_v2 = vld [vmem:[#allocation3 + $0xda] sm:$0xff]  ;;  %v11358_v19 = vpack.i.bf16 %v2505_v39, %v2504_v35  ;;  %v8500_v40 = vpack.i.bf16 %v2504_v35, %v2503_v25 }
 0x3a8   : > { %3066 = vrot.lane.b32.xlu1 %v11336_v50, %s15586_s22  ;;  %15723 = vst [vmem:[#allocation159_spill] sm:$0xff] %v11348_v2 }
 0x3a9   : > { %v11342_v1 = vpop.permute.xlu0 %5480  ;;  %15726 = vst [vmem:[#allocation162_spill] sm:$0xff] %v11358_v19 }
 0x3aa   : > { %15720 = vst [vmem:[#allocation156_spill] sm:$0xff] %v11342_v1  ;;  %v11344_v58 = vpop.permute.xlu1 %5379 }
 0x3ab   : > { %15721 = vst [vmem:[#allocation157_spill] sm:$0xff] %v11344_v58  ;;  %3064 = vrot.lane.b32.xlu0 %v11346_v60, %s15586_s22  ;;  %v11362_v58 = vpack.i.bf16 %v11348_v2, %v11294_v61 }
 0x3ac   : > { %5494 = vrot.lane.b32.xlu1 %v11336_v50, %s15583_s30  ;;  %v15854_v50 = vld [vmem:[#allocation62_spill] sm:$0xff] }
 0x3ad   : > { %v11354_v45 = vpop.permute.xlu0 %5270  ;;  %15727 = vst [vmem:[#allocation163_spill] sm:$0xff] %v11362_v58 }
 0x3ae   : > { %15724 = vst [vmem:[#allocation160_spill] sm:$0xff] %v11354_v45  ;;  %v11356_v36 = vpop.permute.xlu1 %5022  ;;  %v2471_v45 = vld [vmem:[#allocation3 + $0xe4] sm:$0xff] }
 0x3af   : > { %15725 = vst [vmem:[#allocation161_spill] sm:$0xff] %v11356_v36  ;;  %8511 = vrot.lane.b32.xlu0 %v11358_v19, %s15595_s19  ;;  %v11380_v19 = vpack.i.bf16 %v2471_v45, %v11324_v12 }
 0x3b0   : > { %8491 = vrot.lane.b32.xlu1 %v11362_v58, %s15567_s26 }
 0x3b1   : > { %v11368_v1 = vpop.permute.xlu0 %4919  ;;  %15732 = vst [vmem:[#allocation168_spill] sm:$0xff] %v11380_v19 }
 0x3b2   : > { %15728 = vst [vmem:[#allocation164_spill] sm:$0xff] %v11368_v1  ;;  %v11370_v38 = vpop.permute.xlu1 %4921  ;;  %v11410_v1 = vld [vmem:[#allocation3 + $0xee] sm:$0xff] }
 0x3b3   : > { %15729 = vst [vmem:[#allocation165_spill] sm:$0xff] %v11370_v38  ;;  %5175 = vrot.lane.b32.xlu0 %v11348_v2, %s15589_s0  ;;  %v11397_v38 = vld [vmem:[#allocation3 + $0xe2] sm:$0xff] }
 0x3b4   : > { %8501 = vrot.lane.b32.xlu1 %v8500_v40, %s15571_s24  ;;  %15737 = vst [vmem:[#allocation173_spill] sm:$0xff] %v11397_v38 }
 0x3b5   : > { %v11375_v36 = vpop.permute.xlu0 %4815 }
 0x3b6   : > { %15730 = vst [vmem:[#allocation166_spill] sm:$0xff] %v11375_v36  ;;  %v11377_v57 = vpop.permute.xlu1 %8406 }
 0x3b7   : > { %15731 = vst [vmem:[#allocation167_spill] sm:$0xff] %v11377_v57  ;;  %5389 = vrot.lane.b32.xlu0 %v2504_v35, %s15593_s1  ;;  %v11399_v35 = vld [vmem:[#allocation3 + $0xea] sm:$0xff] }
 0x3b8   : > { %8506 = vrot.lane.b32.xlu1 %v11380_v19, %s15589_s0  ;;  %15738 = vst [vmem:[#allocation174_spill] sm:$0xff] %v11399_v35  ;;  %v8515_v36 = vpack.i.bf16 %v11399_v35, %v11397_v38  ;;  %v8525_v19 = vpack.i.bf16 %v11410_v1, %v2505_v39 }
 0x3b9   : > { %v11385_v58 = vpop.permute.xlu0 %5024 }
 0x3ba   : > { %15733 = vst [vmem:[#allocation169_spill] sm:$0xff] %v11385_v58  ;;  %v11387_v25 = vpop.permute.xlu1 %8411 }
 0x3bb   : > { %15734 = vst [vmem:[#allocation170_spill] sm:$0xff] %v11387_v25  ;;  %5492 = vrot.lane.b32.xlu0 %v11346_v60, %s15583_s30 }
 0x3bc   : > { %5280 = vrot.lane.b32.xlu1 %v11324_v12, %s15595_s19 }
 0x3bd   : > { %v11393_v40 = vpop.permute.xlu0 %8421 }
 0x3be   : > { %15735 = vst [vmem:[#allocation171_spill] sm:$0xff] %v11393_v40  ;;  %v11395_v57 = vpop.permute.xlu1 %8416 }
 0x3bf   : > { %15736 = vst [vmem:[#allocation172_spill] sm:$0xff] %v11395_v57  ;;  %5282 = vrot.lane.b32.xlu0 %v2471_v45, %s15595_s19 }
 0x3c0   : > { %5177 = vrot.lane.b32.xlu1 %v11397_v38, %s15589_s0 }
 0x3c1   : > { %v11404_v25 = vpop.permute.xlu0 %8431 }
 0x3c2   : > { %15739 = vst [vmem:[#allocation175_spill] sm:$0xff] %v11404_v25  ;;  %v11406_v58 = vpop.permute.xlu1 %8426 }
 0x3c3   : > { %15740 = vst [vmem:[#allocation176_spill] sm:$0xff] %v11406_v58  ;;  %8516 = vrot.lane.b32.xlu0 %v8515_v36, %s15567_s26  ;;  %v11428_v36 = vpack.i.bf16 %v11419_v43, %v2471_v45 }
 0x3c4   : > { %5391 = vrot.lane.b32.xlu1 %v2505_v39, %s15593_s1 }
 0x3c5   : > { %v11414_v40 = vpop.permute.xlu0 %8441  ;;  %15745 = vst [vmem:[#allocation181_spill] sm:$0xff] %v11428_v36 }
 0x3c6   : > { %15741 = vst [vmem:[#allocation177_spill] sm:$0xff] %v11414_v40  ;;  %v11416_v57 = vpop.permute.xlu1 %3058  ;;  %v11432_v40 = vld [vmem:[#allocation3 + $0xf4] sm:$0xff] }
 0x3c7   : > { %15742 = vst [vmem:[#allocation178_spill] sm:$0xff] %v11416_v57  ;;  %8526 = vrot.lane.b32.xlu0 %v8525_v19, %s15571_s24  ;;  %15747 = vst [vmem:[#allocation183_spill] sm:$0xff] %v11432_v40  ;;  %v2507_v57 = vld [vmem:[#allocation3 + $0xf6] sm:$0xff]  ;;  %v8530_v39 = vpack.i.bf16 %v11432_v40, %v11419_v43 }
 0x3c8   : > { %3070 = vrot.lane.b32.xlu1 %v2406_v53, %s15586_s22  ;;  %v8535_v45 = vpack.i.bf16 %v2507_v57, %v11410_v1 }
 0x3c9   : > { %v11423_v25 = vpop.permute.xlu0 %3056 }
 0x3ca   : > { %15743 = vst [vmem:[#allocation179_spill] sm:$0xff] %v11423_v25  ;;  %v11425_v58 = vpop.permute.xlu1 %5486 }
 0x3cb   : > { %15744 = vst [vmem:[#allocation180_spill] sm:$0xff] %v11425_v58  ;;  %3068 = vrot.lane.b32.xlu0 %v11430_v63, %s15586_s22  ;;  %v2474_v58 = vld [vmem:[#allocation3 + $0xfc] sm:$0xff] }
 0x3cc   : > { %8521 = vrot.lane.b32.xlu1 %v11428_v36, %s15594_s2  ;;  %v11452_v36 = vpack.i.bf16 %v2474_v58, %v11432_v40  ;;  %v8555_v15 = vpack.i.bf16 %v2475_v16, %v2474_v58  ;;  %v2511_v58 = vld [vmem:[#allocation3 + $0x110] sm:$0xff] }
 0x3cd   : > { %v11438_v19 = vpop.permute.xlu0 %8456 }
 0x3ce   : > { %15748 = vst [vmem:[#allocation184_spill] sm:$0xff] %v11438_v19  ;;  %v11440_v53 = vpop.permute.xlu1 %4821  ;;  %15752 = vst [vmem:[#allocation188_spill] sm:$0xff] %v11452_v36  ;;  %v2408_v19 = vld [vmem:[#allocation3 + $0x108] sm:$0xff] }
 0x3cf   : > { %15749 = vst [vmem:[#allocation185_spill] sm:$0xff] %v11440_v53  ;;  %8531 = vrot.lane.b32.xlu0 %v8530_v39, %s15589_s0  ;;  %v11457_v53 = vld [vmem:[#allocation3 + $0xf2] sm:$0xff] }
 0x3d0   : > { %8536 = vrot.lane.b32.xlu1 %v8535_v45, %s15595_s19  ;;  %15753 = vst [vmem:[#allocation189_spill] sm:$0xff] %v11457_v53  ;;  %v8540_v45 = vpack.i.bf16 %v2440_v9, %v11457_v53  ;;  %v2441_v9 = vld [vmem:[#allocation3 + $0x102] sm:$0xff] }
 0x3d1   : > { %v11447_v25 = vpop.permute.xlu0 %5167 }
 0x3d2   : > { %15750 = vst [vmem:[#allocation186_spill] sm:$0xff] %v11447_v25  ;;  %v11449_v47 = vpop.permute.xlu1 %8436  ;;  %v2407_v25 = vld [vmem:[#allocation3 + $0x100] sm:$0xff] }
 0x3d3   : > { %15751 = vst [vmem:[#allocation187_spill] sm:$0xff] %v11449_v47  ;;  %8546 = vrot.lane.b32.xlu0 %v11452_v36, %s15594_s2  ;;  %v2508_v47 = vld [vmem:[#allocation3 + $0xfe] sm:$0xff] }
 0x3d4   : > { %3074 = vrot.lane.b32.xlu1 %v2408_v19, %s15586_s22  ;;  %v8560_v19 = vpack.i.bf16 %v2509_v24, %v2508_v47  ;;  %v8550_v59 = vpack.i.bf16 %v2508_v47, %v2507_v57 }
 0x3d5   : > { %v11459_v56 = vpop.permute.xlu0 %5381 }
 0x3d6   : > { %15754 = vst [vmem:[#allocation190_spill] sm:$0xff] %v11459_v56  ;;  %v11461_v39 = vpop.permute.xlu1 %8446 }
 0x3d7   : > { %15755 = vst [vmem:[#allocation191_spill] sm:$0xff] %v11461_v39  ;;  %3072 = vrot.lane.b32.xlu0 %v2407_v25, %s15586_s22  ;;  %v8565_v25 = vpack.i.bf16 %v2442_v28, %v2441_v9 }
 0x3d8   : > { %8541 = vrot.lane.b32.xlu1 %v8540_v45, %s15567_s26  ;;  %v2510_v45 = vld [vmem:[#allocation3 + $0x10e] sm:$0xff] }
 0x3d9   : > { %v11466_v40 = vpop.permute.xlu0 %5484 }
 0x3da   : > { %15756 = vst [vmem:[#allocation192_spill] sm:$0xff] %v11466_v40  ;;  %v11468_v36 = vpop.permute.xlu1 %8451  ;;  %v2513_v40 = vld [vmem:[#allocation3 + $0x11c] sm:$0xff] }
 0x3db   : > { %15757 = vst [vmem:[#allocation193_spill] sm:$0xff] %v11468_v36  ;;  %8561 = vrot.lane.b32.xlu0 %v8560_v19, %s15595_s19  ;;  %v8575_v19 = vpack.i.bf16 %v2510_v45, %v2509_v24  ;;  %v8570_v36 = vpack.i.bf16 %v2476_v27, %v2475_v16 }
 0x3dc   : > { %8551 = vrot.lane.b32.xlu1 %v8550_v59, %s15571_s24  ;;  %v2515_v59 = vld [vmem:[#allocation3 + $0x116] sm:$0xff] }
 0x3dd   : > { %v11472_v39 = vpop.permute.xlu0 %5274  ;;  %v8585_v9 = vpack.i.bf16 %v2515_v59, %v2510_v45  ;;  %v2443_v45 = vld [vmem:[#allocation3 + $0x4] sm:$0xff] }
 0x3de   : > { %15758 = vst [vmem:[#allocation194_spill] sm:$0xff] %v11472_v39  ;;  %v11474_v56 = vpop.permute.xlu1 %5272 }
 0x3df   : > { %15759 = vst [vmem:[#allocation195_spill] sm:$0xff] %v11474_v56  ;;  %8566 = vrot.lane.b32.xlu0 %v8565_v25, %s15567_s26  ;;  %v2512_v25 = vld [vmem:[#allocation3 + $0x114] sm:$0xff]  ;;  %v2410_v56 = vld [vmem:[#allocation3 + $0xa] sm:$0xff] }
 0x3e0   : > { %8556 = vrot.lane.b32.xlu1 %v8555_v15, %s15589_s0  ;;  %v2514_v15 = vld [vmem:[#allocation3 + $0x124] sm:$0xff] }
 0x3e1   : > { %v11478_v57 = vpop.permute.xlu0 %5026 }
 0x3e2   : > { %15760 = vst [vmem:[#allocation196_spill] sm:$0xff] %v11478_v57  ;;  %v11480_v47 = vpop.permute.xlu1 %5169  ;;  %v8590_v57 = vpack.i.bf16 %v2514_v15, %v2513_v40  ;;  %v2376_v40 = vld [vmem:[#allocation3 + $0x8] sm:$0xff] }
 0x3e3   : > { %15761 = vst [vmem:[#allocation197_spill] sm:$0xff] %v11480_v47  ;;  %8576 = vrot.lane.b32.xlu0 %v8575_v19, %s15571_s24  ;;  %v8580_v19 = vpack.i.bf16 %v2512_v25, %v2476_v27  ;;  %v2517_v47 = vld [vmem:[#allocation3 + $0x126] sm:$0xff] }
 0x3e4   : > { %8571 = vrot.lane.b32.xlu1 %v8570_v36, %s15594_s2  ;;  %v2516_v36 = vld [vmem:[#allocation3 + $0x11e] sm:$0xff] }
 0x3e5   : > { %v11484_v39 = vpop.permute.xlu0 %4925  ;;  %v2409_v27 = vld [vmem:[#allocation3 + $0x2] sm:$0xff] }
 0x3e6   : > { %15762 = vst [vmem:[#allocation198_spill] sm:$0xff] %v11484_v39  ;;  %v11486_v28 = vpop.permute.xlu1 %5383  ;;  %v2444_v39 = vld [vmem:[#allocation3 + $0xc] sm:$0xff] }
 0x3e7   : > { %15763 = vst [vmem:[#allocation199_spill] sm:$0xff] %v11486_v28  ;;  %3076 = vrot.lane.b32.xlu0 %v2511_v58, %s15586_s22  ;;  %v8595_v58 = vpack.i.bf16 %v2517_v47, %v2516_v36  ;;  %v2479_v47 = vld [vmem:[#allocation3 + $0x16] sm:$0xff] }
 0x3e8   : > { %8586 = vrot.lane.b32.xlu1 %v8585_v9, %s15595_s19  ;;  %v8605_v9 = vpack.i.bf16 %v2444_v39, %v2443_v45  ;;  %v2477_v39 = vld [vmem:[#allocation3 + $0x6] sm:$0xff] }
 0x3e9   : > { %v11490_v24 = vpop.permute.xlu0 %8461 }
 0x3ea   : > { %15764 = vst [vmem:[#allocation200_spill] sm:$0xff] %v11490_v24  ;;  %v11492_v16 = vpop.permute.xlu1 %4923  ;;  %v2377_v24 = vld [vmem:[#allocation3 + $0x10] sm:$0xff] }
 0x3eb   : > { %15765 = vst [vmem:[#allocation201_spill] sm:$0xff] %v11492_v16  ;;  %8581 = vrot.lane.b32.xlu0 %v8580_v19, %s15589_s0  ;;  %v8615_v19 = vpack.i.bf16 %v2377_v24, %v2376_v40  ;;  %v2478_v16 = vld [vmem:[#allocation3 + $0xe] sm:$0xff] }
 0x3ec   : > { %8591 = vrot.lane.b32.xlu1 %v8590_v57, %s15589_s0  ;;  %v8600_v57 = vpack.i.bf16 %v2410_v56, %v2409_v27  ;;  %v2411_v56 = vld [vmem:[#allocation3 + $0x12] sm:$0xff] }
 0x3ed   : > { %v11496_v59 = vpop.permute.xlu0 %5490 }
 0x3ee   : > { %15766 = vst [vmem:[#allocation202_spill] sm:$0xff] %v11496_v59  ;;  %v11498_v28 = vpop.permute.xlu1 %4819  ;;  %v2480_v59 = vld [vmem:[#allocation3 + $0x1e] sm:$0xff] }
 0x3ef   : > { %15767 = vst [vmem:[#allocation203_spill] sm:$0xff] %v11498_v28  ;;  %8596 = vrot.lane.b32.xlu0 %v8595_v58, %s15595_s19  ;;  %v8610_v58 = vpack.i.bf16 %v2478_v16, %v2477_v39  ;;  %v2412_v28 = vld [vmem:[#allocation3 + $0x1a] sm:$0xff] }
 0x3f0   : > { %8606 = vrot.lane.b32.xlu1 %v8605_v9, %s15594_s2  ;;  %v8630_v9 = vpack.i.bf16 %v2480_v59, %v2479_v47  ;;  %v8620_v40 = vpack.i.bf16 %v2412_v28, %v2411_v56  ;;  %v2445_v16 = vld [vmem:[#allocation3 + $0x14] sm:$0xff]  ;;  %v2413_v56 = vld [vmem:[#allocation3 + $0x22] sm:$0xff] }
 0x3f1   : > { %v11502_v25 = vpop.permute.xlu0 %8466  ;;  %v2378_v28 = vld [vmem:[#allocation3 + $0x18] sm:$0xff] }
 0x3f2   : > { %15768 = vst [vmem:[#allocation204_spill] sm:$0xff] %v11502_v25  ;;  %v11504_v15 = vpop.permute.xlu1 %5028  ;;  %v2446_v25 = vld [vmem:[#allocation3 + $0x1c] sm:$0xff] }
 0x3f3   : > { %15769 = vst [vmem:[#allocation205_spill] sm:$0xff] %v11504_v15  ;;  %8601 = vrot.lane.b32.xlu0 %v8600_v57, %s15567_s26  ;;  %v8640_v57 = vpack.i.bf16 %v2447_v32, %v2446_v25 }
 0x3f4   : > { %8616 = vrot.lane.b32.xlu1 %v8615_v19, %s15586_s22  ;;  %v2379_v19 = vld [vmem:[#allocation3 + $0x20] sm:$0xff] }
 0x3f5   : > { %v11508_v36 = vpop.permute.xlu0 %8476 }
 0x3f6   : > { %15770 = vst [vmem:[#allocation206_spill] sm:$0xff] %v11508_v36  ;;  %v11510_v45 = vpop.permute.xlu1 %3062  ;;  %v2380_v36 = vld [vmem:[#allocation3 + $0x28] sm:$0xff] }
 0x3f7   : > { %15771 = vst [vmem:[#allocation207_spill] sm:$0xff] %v11510_v45  ;;  %8611 = vrot.lane.b32.xlu0 %v8610_v58, %s15571_s24  ;;  %v8625_v58 = vpack.i.bf16 %v2446_v25, %v2445_v16  ;;  %v2414_v45 = vld [vmem:[#allocation3 + $0x2a] sm:$0xff] }
 0x3f8   : > { %8631 = vrot.lane.b32.xlu1 %v8630_v9, %s15571_s24  ;;  %v8650_v9 = vpack.i.bf16 %v2380_v36, %v2379_v19 }
 0x3f9   : > { %v11514_v24 = vpop.permute.xlu0 %3060 }
 0x3fa   : > { %15772 = vst [vmem:[#allocation208_spill] sm:$0xff] %v11514_v24  ;;  %v11516_v27 = vpop.permute.xlu1 %8471  ;;  %v2481_v24 = vld [vmem:[#allocation3 + $0x26] sm:$0xff] }
 0x3fb   : > { %15773 = vst [vmem:[#allocation209_spill] sm:$0xff] %v11516_v27  ;;  %8621 = vrot.lane.b32.xlu0 %v8620_v40, %s15567_s26  ;;  %v8635_v40 = vpack.i.bf16 %v2379_v19, %v2378_v28  ;;  %v5841_v19 = vld [vmem:[%s15017_s3 + $0x8] sm:$0xff] }
 0x3fc   : > { %8641 = vrot.lane.b32.xlu1 %v8640_v57, %s15589_s0  ;;  %v8655_v57 = vpack.i.bf16 %v2414_v45, %v2413_v56  ;;  %v5840_v45 = vld [vmem:[%s15017_s3] sm:$0xff] }
 0x3fd   : > { %v11520_v39 = vpop.permute.xlu0 %8481 }
 0x3fe   : > { %15774 = vst [vmem:[#allocation210_spill] sm:$0xff] %v11520_v39  ;;  %v11522_v47 = vpop.permute.xlu1 %8486  ;;  %v2381_v39 = vld [vmem:[#allocation3 + $0x30] sm:$0xff] }
 0x3ff   : > { %15775 = vst [vmem:[#allocation211_spill] sm:$0xff] %v11522_v47  ;;  %8626 = vrot.lane.b32.xlu0 %v8625_v58, %s15594_s2  ;;  %v8645_v58 = vpack.i.bf16 %v2481_v24, %v2480_v59  ;;  %v2482_v47 = vld [vmem:[#allocation3 + $0x2e] sm:$0xff]  ;;  %v8670_v56 = vpack.i.bf16 %v2381_v39, %v2380_v36  ;;  %v5843_v36 = vld [vmem:[%s15017_s3 + $0x18] sm:$0xff] }
 0x400   : > { %8651 = vrot.lane.b32.xlu1 %v8650_v9, %s15593_s1  ;;  %v11536_v9 = vpack.i.bf16 %v2448_v3, %v2447_v32  ;;  %v8665_v32 = vpack.i.bf16 %v2482_v47, %v2481_v24 }
 0x401   : > { %v11526_v27 = vpop.permute.xlu0 %5276 }
 0x402   : > { %15776 = vst [vmem:[#allocation212_spill] sm:$0xff] %v11526_v27  ;;  %v11528_v15 = vpop.permute.xlu1 %5171  ;;  %v11554_v27 = vld [vmem:[#allocation3 + $0x36] sm:$0xff] }
 0x403   : > { %15777 = vst [vmem:[#allocation213_spill] sm:$0xff] %v11528_v15  ;;  %8636 = vrot.lane.b32.xlu0 %v8635_v40, %s15586_s22  ;;  %v15218_v40 = vmov 0.0|0.0  }
 0x404   : > { %8656 = vrot.lane.b32.xlu1 %v8655_v57, %s15567_s26  ;;  %7804 = vmatprep.subr.bf16.mxu1 %v15218_v40  ;;  %v8680_v40 = vpack.i.bf16 %v11554_v27, %v2482_v47 }
 0x405   : > { %v11532_v25 = vpop.permute.xlu0 %5173 }
 0x406   : > { %15778 = vst [vmem:[#allocation214_spill] sm:$0xff] %v11532_v25  ;;  %v11534_v16 = vpop.permute.xlu1 %5385 }
 0x407   : > { %15779 = vst [vmem:[#allocation215_spill] sm:$0xff] %v11534_v16  ;;  %8646 = vrot.lane.b32.xlu0 %v8645_v58, %s15595_s19  ;;  %v7805_v58 = vpack.c.bf16 %v5841_v19, %v5840_v45  ;;  %v11552_v16 = vld [vmem:[#allocation3 + $0x34] sm:$0xff] }
 0x408   : > { %8661 = vrot.lane.b32.xlu1 %v11536_v9, %s15594_s2  ;;  %v8675_v19 = vpack.i.bf16 %v11552_v16, %v2448_v3  ;;  %v5845_v3 = vld [vmem:[%s15017_s3 + $0x28] sm:$0xff] }
 0x409   : > { %v11547_v28 = vpop.permute.xlu0 %5387  ;;  %7806 = vmatpush1.bf16.msra.mxu1 %v7805_v58  ;;  %v11571_v58 = vld [vmem:[#allocation3 + $0x38] sm:$0xff] }
 0x40a   : > { %15780 = vst [vmem:[#allocation216_spill] sm:$0xff] %v11547_v28  ;;  %v11549_v59 = vpop.permute.xlu1 %5488  ;;  %v5842_v28 = vld [vmem:[%s15017_s3 + $0x10] sm:$0xff] }
 0x40b   : > { %15781 = vst [vmem:[#allocation217_spill] sm:$0xff] %v11549_v59  ;;  %8666 = vrot.lane.b32.xlu0 %v8665_v32, %s15571_s24  ;;  %v15784_v32 = vmov 0.0|0.0   ;;  %v11573_v59 = vld [vmem:[#allocation3 + $0x48] sm:$0xff] }
 0x40c   : > { %8671 = vrot.lane.b32.xlu1 %v8670_v56, %s15586_s22  ;;  %7807 = vmatprep.subr.bf16.mxu1 %v15784_v32  ;;  %v7808_v56 = vpack.c.bf16 %v5843_v36, %v5842_v28  ;;  %v8685_v36 = vpack.i.bf16 %v11571_v58, %v2381_v39  ;;  %v5847_v39 = vld [vmem:[%s15017_s3 + $0x38] sm:$0xff] }
 0x40d   : > { %v11564_v24 = vpop.permute.xlu0 %4927 }
 0x40e   : > { %15782 = vst [vmem:[#allocation218_spill] sm:$0xff] %v11564_v24  ;;  %v11566_v45 = vpop.permute.xlu1 %5278  ;;  %7809 = vmatpush1.bf16.msra.mxu1 %v7808_v56  ;;  %v5844_v24 = vld [vmem:[%s15017_s3 + $0x20] sm:$0xff]  ;;  %v11593_v56 = vld [vmem:[#allocation3 + $0x4e] sm:$0xff] }
 0x40f   : > { %15783 = vst [vmem:[#allocation219_spill] sm:$0xff] %v11566_v45  ;;  %8676 = vrot.lane.b32.xlu0 %v8675_v19, %s15589_s0  ;;  %v11588_v45 = vld [vmem:[#allocation3 + $0x50] sm:$0xff]  ;;  %7810 = vmatprep.subr.bf16.mxu1 %v15784_v32  ;;  %v7811_v19 = vpack.c.bf16 %v5845_v3, %v5844_v24 }
 0x410   : > { %8681 = vrot.lane.b32.xlu1 %v8680_v40, %s15595_s19  ;;  %v8700_v40 = vpack.i.bf16 %v11588_v45, %v11573_v59  ;;  %v9271_v24 = vld [vmem:[#allocation3 + $0x56] sm:$0xff] }
 0x411   : > { %v11583_v47 = vpop.permute.xlu0 %4823  ;;  %v8710_v3 = vpack.i.bf16 %v9271_v24, %v11593_v56  ;;  %v2452_v24 = vld [vmem:[#allocation3 + $0x4c] sm:$0xff] }
 0x412   : > { %15785 = vst [vmem:[#allocation220_spill] sm:$0xff] %v11583_v47  ;;  %v11585_v28 = vpop.permute.xlu1 %5030  ;;  %v5846_v47 = vld [vmem:[%s15017_s3 + $0x30] sm:$0xff]  ;;  %7812 = vmatpush1.bf16.msra.mxu1 %v7811_v19 }
 0x413   : > { %15786 = vst [vmem:[#allocation221_spill] sm:$0xff] %v11585_v28  ;;  %8686 = vrot.lane.b32.xlu0 %v8685_v36, %s15593_s1  ;;  %v7814_v28 = vpack.c.bf16 %v5847_v39, %v5846_v47  ;;  %7813 = vmatprep.subr.bf16.mxu1 %v15784_v32  ;;  %v5848_v36 = vld [vmem:[%s15017_s3 + $0x40] sm:$0xff]  ;;  %v5849_v47 = vld [vmem:[%s15017_s3 + $0x48] sm:$0xff] }
 0x414   : > { %8701 = vrot.lane.b32.xlu1 %v8700_v40, %s15586_s22  ;;  %v7817_v19 = vpack.c.bf16 %v5849_v47, %v5848_v36 }
 0x415   : > { %v11603_v25 = vpop.permute.xlu0 %5032 }
 0x416   : > { %15787 = vst [vmem:[#allocation222_spill] sm:$0xff] %v11603_v25  ;;  %v11605_v15 = vpop.permute.xlu1 %4929  ;;  %7815 = vmatpush1.bf16.msra.mxu1 %v7814_v28  ;;  %v5851_v28 = vld [vmem:[%s15017_s3 + $0x58] sm:$0xff] }
 0x417   : > { %15788 = vst [vmem:[#allocation223_spill] sm:$0xff] %v11605_v15  ;;  %8691 = vrot.lane.b32.xlu0 %v8655_v57, %s15583_s30  ;;  %7816 = vmatprep.subr.bf16.mxu1 %v15784_v32  ;;  %v2418_v57 = vld [vmem:[#allocation3 + $0x4a] sm:$0xff] }
 0x418   : > { %8711 = vrot.lane.b32.xlu1 %v8710_v3, %s15595_s19  ;;  %v5850_v15 = vld [vmem:[%s15017_s3 + $0x50] sm:$0xff]  ;;  %v8720_v26 = vpack.i.bf16 %v9273_v30, %v2418_v57 }
 0x419   : > { %v11617_v39 = vpop.permute.xlu0 %8496 }
 0x41a   : > { %15789 = vst [vmem:[#allocation224_spill] sm:$0xff] %v11617_v39  ;;  %v11619_v25 = vpop.permute.xlu1 %3066  ;;  %7818 = vmatpush1.bf16.msra.mxu1 %v7817_v19  ;;  %v9272_v39 = vld [vmem:[#allocation3 + $0x54] sm:$0xff]  ;;  %v5853_v19 = vld [vmem:[%s15017_s3 + $0x68] sm:$0xff] }
 0x41b   : > { %15790 = vst [vmem:[#allocation225_spill] sm:$0xff] %v11619_v25  ;;  %8696 = vrot.lane.b32.xlu0 %v11536_v9, %s15577_s16  ;;  %v8705_v25 = vpack.i.bf16 %v9272_v39, %v2452_v24  ;;  %7819 = vmatprep.subr.bf16.mxu1 %v15784_v32  ;;  %v7820_v9 = vpack.c.bf16 %v5851_v28, %v5850_v15  ;;  %v11649_v15 = vld [vmem:[#allocation3 + $0x42] sm:$0xff]  ;;  %v11651_v28 = vld [vmem:[#allocation3 + $0x3a] sm:$0xff] }
 0x41c   : > { %8716 = vrot.lane.b32.xlu1 %v8700_v40, %s15564_s12  ;;  %v5852_v40 = vld [vmem:[%s15017_s3 + $0x60] sm:$0xff] }
 0x41d   : > { %v11631_v36 = vpop.permute.xlu0 %3064  ;;  %v7823_v30 = vpack.c.bf16 %v5853_v19, %v5852_v40  ;;  %v2450_v40 = vld [vmem:[#allocation3 + $0x3c] sm:$0xff]  ;;  %v2451_v19 = vld [vmem:[#allocation3 + $0x44] sm:$0xff] }
 0x41e   : > { %15791 = vst [vmem:[#allocation226_spill] sm:$0xff] %v11631_v36  ;;  %v11633_v47 = vpop.permute.xlu1 %5494  ;;  %7821 = vmatpush1.bf16.msra.mxu1 %v7820_v9 }
 0x41f   : > { %15792 = vst [vmem:[#allocation227_spill] sm:$0xff] %v11633_v47  ;;  %8706 = vrot.lane.b32.xlu0 %v8705_v25, %s15589_s0  ;;  %7822 = vmatprep.subr.bf16.mxu1 %v15784_v32 }
 0x420   : > { %8721 = vrot.lane.b32.xlu1 %v8720_v26, %s15565_s25  ;;  %v2415_v26 = vld [vmem:[#allocation3 + $0x32] sm:$0xff] }
 0x421   : > { %v11644_v47 = vpop.permute.xlu0 %8511 }
 0x422   : > { %15793 = vst [vmem:[#allocation228_spill] sm:$0xff] %v11644_v47  ;;  %v11646_v39 = vpop.permute.xlu1 %8491  ;;  %7824 = vmatpush1.bf16.msra.mxu1 %v7823_v30  ;;  %v11660_v47 = vpack.i.bf16 %v2418_v57, %v11649_v15 }
 0x423   : > { %15794 = vst [vmem:[#allocation229_spill] sm:$0xff] %v11646_v39  ;;  %8726 = vrot.lane.b32.xlu0 %v8705_v25, %s15574_s13  ;;  %v11663_v39 = vpack.i.bf16 %v11651_v28, %v2415_v26  ;;  %7825 = vmatprep.subr.bf16.mxu1 %v15784_v32  ;;  %v5854_v25 = vld [vmem:[%s15017_s3 + $0x70] sm:$0xff]  ;;  %v11681_v26 = vpack.i.bf16 %v2450_v40, %v11552_v16  ;;  %v5857_v16 = vld [vmem:[%s15017_s3 + $0x88] sm:$0xff] }
 0x424   : > { %8731 = vrot.lane.b32.xlu1 %v8710_v3, %s15566_s15  ;;  %v5855_v3 = vld [vmem:[%s15017_s3 + $0x78] sm:$0xff] }
 0x425   : > { %v11655_v9 = vpop.permute.xlu0 %5175 }
 0x426   : > { %15795 = vst [vmem:[#allocation230_spill] sm:$0xff] %v11655_v9  ;;  %v11657_v36 = vpop.permute.xlu1 %8501  ;;  %v7826_v9 = vpack.c.bf16 %v5855_v3, %v5854_v25  ;;  %v8760_v3 = vpack.i.bf16 %v11593_v56, %v2485_v6 }
 0x427   : > { %15796 = vst [vmem:[#allocation231_spill] sm:$0xff] %v11657_v36  ;;  %8741 = vrot.lane.b32.xlu0 %v11660_v47, %s15567_s26  ;;  %v11683_v36 = vpack.i.bf16 %v2452_v24, %v2451_v19 }
 0x428   : > { %8736 = vrot.lane.b32.xlu1 %v11663_v39, %s15567_s26  ;;  %7827 = vmatpush1.bf16.msra.mxu1 %v7826_v9  ;;  %v5858_v9 = vld [vmem:[%s15017_s3 + $0x90] sm:$0xff] }
 0x429   : > { %v11676_v57 = vpop.permute.xlu0 %5389  ;;  %7828 = vmatprep.subr.bf16.mxu1 %v15784_v32  ;;  %v7832_v56 = vpack.c.bf16 %v5859_v8, %v5858_v9  ;;  %v5863_v9 = vld [vmem:[%s15017_s3 + $0xb8] sm:$0xff] }
 0x42a   : > { %15797 = vst [vmem:[#allocation232_spill] sm:$0xff] %v11676_v57  ;;  %v11678_v30 = vpop.permute.xlu1 %8506  ;;  %v5856_v57 = vld [vmem:[%s15017_s3 + $0x80] sm:$0xff] }
 0x42b   : > { %15798 = vst [vmem:[#allocation233_spill] sm:$0xff] %v11678_v30  ;;  %8746 = vrot.lane.b32.xlu0 %v11681_v26, %s15594_s2  ;;  %v8755_v30 = vpack.i.bf16 %v2484_v42, %v11554_v27  ;;  %v7829_v20 = vpack.c.bf16 %v5857_v16, %v5856_v57  ;;  %v8765_v57 = vpack.i.bf16 %v2383_v5, %v11571_v58 }
 0x42c   : > { %8751 = vrot.lane.b32.xlu1 %v11683_v36, %s15594_s2  ;;  %v8770_v16 = vpack.i.bf16 %v2451_v19, %v2450_v40  ;;  %v8775_v40 = vpack.i.bf16 %v2485_v6, %v2484_v42  ;;  %v8780_v19 = vpack.i.bf16 %v11573_v59, %v2383_v5  ;;  %v8790_v5 = vpack.i.bf16 %v11649_v15, %v11651_v28 }
 0x42d   : > { %v11695_v24 = vpop.permute.xlu0 %5492  ;;  %7830 = vmatpush1.bf16.msra.mxu1 %v7829_v20 }
 0x42e   : > { %15799 = vst [vmem:[#allocation234_spill] sm:$0xff] %v11695_v24  ;;  %v11697_v25 = vpop.permute.xlu1 %5280  ;;  %7831 = vmatprep.subr.bf16.mxu1 %v15784_v32 }
 0x42f   : > { %15800 = vst [vmem:[#allocation235_spill] sm:$0xff] %v11697_v25  ;;  %8761 = vrot.lane.b32.xlu0 %v8760_v3, %s15571_s24  ;;  %v5860_v25 = vld [vmem:[%s15017_s3 + $0xa0] sm:$0xff]  ;;  %v5861_v3 = vld [vmem:[%s15017_s3 + $0xa8] sm:$0xff] }
 0x430   : > { %8756 = vrot.lane.b32.xlu1 %v8755_v30, %s15571_s24  ;;  %v7835_v8 = vpack.c.bf16 %v5861_v3, %v5860_v25  ;;  %v5862_v30 = vld [vmem:[%s15017_s3 + $0xb0] sm:$0xff]  ;;  %v15235_v3 = vmov 0.0  }
 0x431   : > { %v11710_v24 = vpop.permute.xlu0 %5282  ;;  %7833 = vmatpush1.bf16.msra.mxu1 %v7832_v56  ;;  %v7838_v25 = vpack.c.bf16 %v5863_v9, %v5862_v30  ;;  %v9274_v9 = vld [vmem:[#allocation3 + $0xa0] sm:$0xff] }
 0x432   : > { %15801 = vst [vmem:[#allocation236_spill] sm:$0xff] %v11710_v24  ;;  %v11712_v27 = vpop.permute.xlu1 %5177  ;;  %7834 = vmatprep.subr.bf16.mxu1 %v15784_v32  ;;  %v15860_v24 = vld [vmem:[#allocation81_spill] sm:$0xff] }
 0x433   : > { %15802 = vst [vmem:[#allocation237_spill] sm:$0xff] %v11712_v27  ;;  %8766 = vrot.lane.b32.xlu0 %v8765_v57, %s15586_s22 }
 0x434   : > { %8771 = vrot.lane.b32.xlu1 %v8770_v16, %s15589_s0 }
 0x435   : > { %v11724_v20 = vpop.permute.xlu0 %8516  ;;  %7836 = vmatpush1.bf16.msra.mxu1 %v7835_v8  ;;  %v5864_v8 = vld [vmem:[%s15017_s3 + $0xc0] sm:$0xff] }
 0x436   : > { %15803 = vst [vmem:[#allocation238_spill] sm:$0xff] %v11724_v20  ;;  %v11726_v58 = vpop.permute.xlu1 %5391  ;;  %7837 = vmatprep.subr.bf16.mxu1 %v15784_v32 }
 0x437   : > { %15804 = vst [vmem:[#allocation239_spill] sm:$0xff] %v11726_v58  ;;  %8776 = vrot.lane.b32.xlu0 %v8775_v40, %s15595_s19  ;;  %v15846_v58 = vld [vmem:[#allocation70_spill] sm:$0xff] }
 0x438   : > { %8781 = vrot.lane.b32.xlu1 %v8780_v19, %s15593_s1 }
 0x439   : > { %v11738_v56 = vpop.permute.xlu0 %8526  ;;  %7839 = vmatpush1.bf16.msra.mxu1 %v7838_v25  ;;  %v9275_v25 = vld [vmem:[#allocation3 + $0xa8] sm:$0xff] }
 0x43a   : > { %15805 = vst [vmem:[#allocation240_spill] sm:$0xff] %v11738_v56  ;;  %v11740_v6 = vpop.permute.xlu1 %3070  ;;  %6015 = vmatprep.subr.mxu1 %v15235_v3  ;;  %v9278_v3 = vld [vmem:[#allocation3 + $0xa4] sm:$0xff] }
 0x43b   : > { %15806 = vst [vmem:[#allocation241_spill] sm:$0xff] %v11740_v6  ;;  %8786 = vrot.lane.b32.xlu0 %v8765_v57, %s15564_s12 }
 0x43c   : > { %8791 = vrot.lane.b32.xlu1 %v8790_v5, %s15565_s25  ;;  %v9277_v5 = vld [vmem:[#allocation3 + $0xaa] sm:$0xff] }
 0x43d   : > { %v11747_v42 = vpop.permute.xlu0 %3068  ;;  %6016 = vmatpush1.msra.mxu1 %v5864_v8 }
 0x43e   : > { %15807 = vst [vmem:[#allocation242_spill] sm:$0xff] %v11747_v42  ;;  %v11749_v59 = vpop.permute.xlu1 %8521  ;;  %v15835_v42 = vld [vmem:[#allocation53_spill] sm:$0xff] }
 0x43f   : > { %15808 = vst [vmem:[#allocation243_spill] sm:$0xff] %v11749_v59  ;;  %8796 = vrot.lane.b32.xlu0 %v8770_v16, %s15574_s13  ;;  %v8044_v59 = vunpack.i.h.bf16 %v10732_v49 }
 0x440   : > { %8801 = vrot.lane.b32.xlu1 %v8775_v40, %s15566_s15 }
 0x441   : > { %v11757_v15 = vpop.permute.xlu0 %8531 }
 0x442   : > { %15809 = vst [vmem:[#allocation244_spill] sm:$0xff] %v11757_v15  ;;  %v11759_v28 = vpop.permute.xlu1 %8536  ;;  %v11836_v15 = vld [vmem:[#allocation3 + $0xc8] sm:$0xff] }
 0x443   : > { %15810 = vst [vmem:[#allocation245_spill] sm:$0xff] %v11759_v28  ;;  %8806 = vrot.lane.b32.xlu0 %v8780_v19, %s15563_s14 }
 0x444   : > { %8811 = vrot.lane.b32.xlu1 %v11663_v39, %s15583_s30 }
 0x445   : > { %v11764_v57 = vpop.permute.xlu0 %8546 }
 0x446   : > { %15811 = vst [vmem:[#allocation246_spill] sm:$0xff] %v11764_v57  ;;  %v11766_v30 = vpop.permute.xlu1 %3074  ;;  %v11787_v57 = vld [vmem:[#allocation3 + $0xb8] sm:$0xff] }
 0x447   : > { %15812 = vst [vmem:[#allocation247_spill] sm:$0xff] %v11766_v30  ;;  %8816 = vrot.lane.b32.xlu0 %v11681_v26, %s15577_s16  ;;  %v8830_v26 = vpack.i.bf16 %v9275_v25, %v9274_v9  ;;  %v8034_v25 = vunpack.i.h.bf16 %v10725_v52  ;;  %v11809_v9 = vld [vmem:[#allocation3 + $0xb4] sm:$0xff]  ;;  %v11838_v30 = vld [vmem:[#allocation3 + $0xc0] sm:$0xff] }
 0x448   : > { %8821 = vrot.lane.b32.xlu1 %v11660_v47, %s15583_s30  ;;  %v9276_v47 = vld [vmem:[#allocation3 + $0xa2] sm:$0xff]  ;;  %v15922_v0 = vpack.i.bf16 %v11136_v29, %v11809_v9  ;;  %v15926_v9 = vld [vmem:[#allocation111_spill] sm:$0xff] }
 0x449   : > { %v11772_v16 = vpop.permute.xlu0 %3072  ;;  %v8840_v8 = vpack.i.bf16 %v9277_v5, %v9276_v47  ;;  %v8043_v5 = vunpack.i.l.bf16 %v10732_v49  ;;  %v9284_v47 = vld [vmem:[#allocation3 + $0x58] sm:$0xff] }
 0x44a   : > { %15813 = vst [vmem:[#allocation248_spill] sm:$0xff] %v11772_v16  ;;  %v11774_v40 = vpop.permute.xlu1 %8541  ;;  %v4277_v56 = vsel %vm4265_vm0, %v9284_v47, %v8034_v25  ;;  %v8048_v25 = vunpack.i.l.bf16 %v10730_v13 }
 0x44b   : > { %15814 = vst [vmem:[#allocation249_spill] sm:$0xff] %v11774_v40  ;;  %8826 = vrot.lane.b32.xlu0 %v11683_v36, %s15577_s16  ;;  %v9279_v36 = vld [vmem:[#allocation3 + $0xac] sm:$0xff]  ;;  %v11824_v40 = vpack.i.bf16 %v11233_v41, %v11265_v18 }
 0x44c   : > { %8836 = vrot.lane.b32.xlu1 %v11263_v17, %s15573_s29  ;;  %v8845_v32 = vpack.i.bf16 %v9279_v36, %v9278_v3  ;;  %v11801_v3 = vld [vmem:[#allocation3 + $0xb0] sm:$0xff] }
 0x44d   : > { %v11780_v39 = vpop.permute.xlu0 %8561  ;;  %v11805_v36 = vld [vmem:[#allocation3 + $0xb2] sm:$0xff] }
 0x44e   : > { %15815 = vst [vmem:[#allocation250_spill] sm:$0xff] %v11780_v39  ;;  %v11782_v19 = vpop.permute.xlu1 %8551 }
 0x44f   : > { %15816 = vst [vmem:[#allocation251_spill] sm:$0xff] %v11782_v19  ;;  %8831 = vrot.lane.b32.xlu0 %v8830_v26, %s15593_s1  ;;  %v8033_v19 = vunpack.i.l.bf16 %v10725_v52  ;;  %v8039_v52 = vunpack.i.h.bf16 %v10723_v51 }
 0x450   : > { %5179 = vrot.lane.b32.xlu1 %v11399_v35, %s15589_s0 }
 0x451   : > { %v11795_v26 = vpop.permute.xlu0 %8566 }
 0x452   : > { %15817 = vst [vmem:[#allocation252_spill] sm:$0xff] %v11795_v26  ;;  %v11797_v39 = vpop.permute.xlu1 %8556  ;;  %v4276_v26 = vsel %vm4265_vm0, %v11588_v45, %v8033_v19 }
 0x453   : > { %15818 = vst [vmem:[#allocation253_spill] sm:$0xff] %v11797_v39  ;;  %v8038_v39 = vunpack.i.l.bf16 %v10723_v51  ;;  %4825 = vrot.lane.b32.xlu0 %v11233_v41, %s15567_s26  ;;  %v4312_v51 = vsel %vm4300_vm1, %v4277_v56, %v8039_v52 }
 0x454   : > { %4931 = vrot.lane.b32.xlu1 %v11348_v2, %s15594_s2 }
 0x455   : > { %v11832_v20 = vpop.permute.xlu0 %8576  ;;  %v4311_v49 = vsel %vm4300_vm1, %v4276_v26, %v8038_v39  ;;  %v15829_v26 = vld [vmem:[#allocation71_spill] sm:$0xff]  ;;  %v15836_v39 = vld [vmem:[#allocation68_spill] sm:$0xff] }
 0x456   : > { %15819 = vst [vmem:[#allocation254_spill] sm:$0xff] %v11832_v20  ;;  %v11834_v28 = vpop.permute.xlu1 %8571  ;;  %v8049_v20 = vunpack.i.h.bf16 %v10730_v13  ;;  %v4346_v45 = vsel %vm4335_vm2, %v4311_v49, %v8043_v5  ;;  %v9287_v5 = vld [vmem:[#allocation3 + $0x66] sm:$0xff]  ;;  %v9288_v13 = vld [vmem:[#allocation3 + $0x5e] sm:$0xff]  ;;  %v8133_v35 = vunpack.i.l.bf16 %v15836_v39 }
 0x457   : > { %15820 = vst [vmem:[#allocation255_spill] sm:$0xff] %v11834_v28  ;;  %8841 = vrot.lane.b32.xlu0 %v8840_v8, %s15583_s30  ;;  %v4347_v28 = vsel %vm4335_vm2, %v4312_v51, %v8044_v59  ;;  %v11870_v59 = vsel %vm4265_vm0, %v9287_v5, %v10715_v23  ;;  %v4381_v52 = vsel %vm4370_vm3, %v4346_v45, %v8048_v25  ;;  %v8114_v25 = vunpack.i.h.bf16 %v10838_v31  ;;  %v15827_v8 = vld [vmem:[#allocation27_spill] sm:$0xff] }
 0x458   : > { %8846 = vrot.lane.b32.xlu1 %v8845_v32, %s15577_s16  ;;  %v5569_v32 = vsel %vm4265_vm0, %v9288_v13, %v10744_v62  ;;  %v4382_v47 = vsel %vm4370_vm3, %v4347_v28, %v8049_v20  ;;  %v8109_v62 = vunpack.i.h.bf16 %v10791_v37  ;;  %v8108_v20 = vunpack.i.l.bf16 %v10791_v37  ;;  %v12119_v13 = vld [vmem:[#allocation3 + $0xf8] sm:$0xff] }
 0x459   : > { %v11856_v19 = vpop.permute.xlu0 %3076  ;;  %v8124_v37 = vunpack.i.h.bf16 %v15827_v8  ;;  %v8128_v51 = vunpack.i.l.bf16 %v15829_v26 }
 0x45a   : > { %15821 = vst [vmem:[#allocation256_spill] sm:$0xff] %v11856_v19  ;;  %v11858_v16 = vpop.permute.xlu1 %8586 }
 0x45b   : > { %15822 = vst [vmem:[#allocation257_spill] sm:$0xff] %v11858_v16  ;;  %5284 = vrot.lane.b32.xlu0 %v11419_v43, %s15595_s19  ;;  %v5603_v43 = vsel %vm4300_vm1, %v5569_v32, %v10767_v55  ;;  %v8113_v55 = vunpack.i.l.bf16 %v10838_v31  ;;  %v9289_v32 = vld [vmem:[#allocation3 + $0x68] sm:$0xff]  ;;  %v15830_v16 = vpack.i.bf16 %v11154_v10, %v11787_v57 }
 0x45c   : > { %5393 = vrot.lane.b32.xlu1 %v11410_v1, %s15593_s1  ;;  %v5637_v56 = vsel %vm4335_vm2, %v5603_v43, %v10751_v22  ;;  %v4279_v45 = vsel %vm4265_vm0, %v9289_v32, %v8109_v62  ;;  %v9290_v22 = vld [vmem:[#allocation3 + $0x60] sm:$0xff] }
 0x45d   : > { %v11887_v1 = vpop.permute.xlu0 %8581  ;;  %v4278_v43 = vsel %vm4265_vm0, %v9290_v22, %v8108_v20  ;;  %v15832_v32 = vld [vmem:[#allocation26_spill] sm:$0xff] }
 0x45e   : > { %15823 = vst [vmem:[#allocation258_spill] sm:$0xff] %v11887_v1  ;;  %v11889_v5 = vpop.permute.xlu1 %8591  ;;  %v4313_v28 = vsel %vm4300_vm1, %v4278_v43, %v8113_v55  ;;  %v8119_v22 = vunpack.i.h.bf16 %v15832_v32  ;;  %v8118_v55 = vunpack.i.l.bf16 %v15832_v32 }
 0x45f   : > { %15824 = vst [vmem:[#allocation259_spill] sm:$0xff] %v11889_v5  ;;  %5034 = vrot.lane.b32.xlu0 %v11324_v12, %s15571_s24  ;;  %v8123_v12 = vunpack.i.l.bf16 %v15827_v8  ;;  %v4314_v5 = vsel %vm4300_vm1, %v4279_v45, %v8114_v25  ;;  %v4417_v8 = vsel %vm4405_vm4, %v4382_v47, %v8124_v37  ;;  %v15838_v47 = vld [vmem:[#allocation117_spill] sm:$0xff] }
 0x460   : > { %5496 = vrot.lane.b32.xlu1 %v11430_v63, %s15583_s30  ;;  %v4348_v20 = vsel %vm4335_vm2, %v4313_v28, %v8118_v55  ;;  %v4349_v6 = vsel %vm4335_vm2, %v4314_v5, %v8119_v22  ;;  %v8134_v5 = vunpack.i.h.bf16 %v15836_v39  ;;  %v15844_v39 = vld [vmem:[#allocation52_spill] sm:$0xff] }
 0x461   : > { %v11912_v49 = vpop.permute.xlu0 %8596  ;;  %v4416_v1 = vsel %vm4405_vm4, %v4381_v52, %v8123_v12  ;;  %v15837_v12 = vpack.i.bf16 %v11209_v44, %v11166_v48  ;;  %v15842_v44 = vld [vmem:[#allocation58_spill] sm:$0xff]  ;;  %v4384_v45 = vsel %vm4370_vm3, %v4349_v6, %v15844_v39  ;;  %v15849_v39 = vld [vmem:[#allocation183_spill] sm:$0xff] }
 0x462   : > { %15828 = vst [vmem:[#allocation27_spill] sm:$0xff] %v11912_v49  ;;  %v11914_v23 = vpop.permute.xlu1 %8606  ;;  %v8129_v49 = vunpack.i.h.bf16 %v15829_v26  ;;  %v4451_v32 = vsel %vm4440_vm5, %v4416_v1, %v8128_v51  ;;  %v5671_v26 = vsel %vm4370_vm3, %v5637_v56, %v15835_v42  ;;  %v9291_v51 = vld [vmem:[#allocation3 + $0x76] sm:$0xff]  ;;  %v15839_v1 = vld [vmem:[#allocation54_spill] sm:$0xff]  ;;  %v15840_v56 = vld [vmem:[#allocation55_spill] sm:$0xff] }
 0x463   : > { %8851 = vrot.lane.b32.xlu0 %v15830_v16, %s15564_s12  ;;  %v11960_v28 = vsel %vm4265_vm0, %v9291_v51, %v15839_v1  ;;  %v5604_v37 = vsel %vm4300_vm1, %v11870_v59, %v15840_v56  ;;  %v11974_v51 = vsel %vm4475_vm7, %v4451_v32, %v8133_v35  ;;  %v15850_v56 = vld [vmem:[#allocation56_spill] sm:$0xff]  ;;  %v8183_v32 = vunpack.i.l.bf16 %v15854_v50 }
 0x464   : > { %4827 = vrot.lane.b32.xlu1 %v11346_v60, %s15567_s26  ;;  %v4452_v52 = vsel %vm4440_vm5, %v4417_v8, %v8129_v49  ;;  %v9292_v49 = vld [vmem:[#allocation3 + $0x6e] sm:$0xff]  ;;  %v15841_v8 = vld [vmem:[#allocation73_spill] sm:$0xff] }
 0x465   : > { %v11938_v16 = vpop.permute.xlu0 %8601  ;;  %v5571_v22 = vsel %vm4265_vm0, %v9292_v49, %v15841_v8  ;;  %v8179_v49 = vunpack.i.h.bf16 %v15846_v58  ;;  %v8178_v8 = vunpack.i.l.bf16 %v15846_v58 }
 0x466   : > { %v11940_v19 = vpop.permute.xlu1 %8616  ;;  %v5605_v55 = vsel %vm4300_vm1, %v5571_v22, %v15842_v44  ;;  %v11984_v22 = vsel %vm4475_vm7, %v4452_v52, %v8134_v5  ;;  %v15847_v44 = vld [vmem:[#allocation75_spill] sm:$0xff] }
 0x467   : > { %8856 = vrot.lane.b32.xlu0 %v15837_v12, %s15565_s25  ;;  %v15843_v12 = vld [vmem:[#allocation37_spill] sm:$0xff]  ;;  %v5638_v6 = vsel %vm4335_vm2, %v5604_v37, %v15847_v44  ;;  %v5639_v58 = vsel %vm4335_vm2, %v5605_v55, %v15850_v56  ;;  %v4281_v55 = vsel %vm4265_vm0, %v9293_v7, %v8179_v49  ;;  %v9294_v56 = vld [vmem:[#allocation3 + $0x70] sm:$0xff]  ;;  %v9295_v7 = vld [vmem:[#allocation3 + $0xe4] sm:$0xff] }
 0x468   : > { %8861 = vrot.lane.b32.xlu1 %v15838_v47, %s15574_s13  ;;  %v4383_v47 = vsel %vm4370_vm3, %v4348_v20, %v15843_v12  ;;  %v4280_v5 = vsel %vm4265_vm0, %v9294_v56, %v8178_v8  ;;  %v15855_v20 = vld [vmem:[#allocation92_spill] sm:$0xff]  ;;  %v15856_v52 = vld [vmem:[#allocation83_spill] sm:$0xff]  ;;  %v15882_v56 = vld [vmem:[#allocation30_spill] sm:$0xff] }
 0x469   : > { %v11976_v1 = vpop.permute.xlu0 %8611  ;;  %v8189_v27 = vunpack.i.h.bf16 %v15855_v20  ;;  %v8188_v37 = vunpack.i.l.bf16 %v15855_v20  ;;  %v5672_v12 = vsel %vm4370_vm3, %v5638_v6, %v15856_v52  ;;  %v15857_v44 = vld [vmem:[#allocation76_spill] sm:$0xff]  ;;  %v15859_v20 = vld [vmem:[#allocation86_spill] sm:$0xff] }
 0x46a   : > { %v11978_v63 = vpop.permute.xlu1 %8631  ;;  %v8194_v43 = vunpack.i.h.bf16 %v15857_v44  ;;  %v8193_v14 = vunpack.i.l.bf16 %v15857_v44  ;;  %v5706_v6 = vsel %vm4405_vm4, %v5672_v12, %v15860_v24  ;;  %v4315_v44 = vsel %vm4300_vm1, %v4280_v5, %v8183_v32  ;;  %v15864_v5 = vld [vmem:[#allocation72_spill] sm:$0xff] }
 0x46b   : > { %5181 = vrot.lane.b32.xlu0 %v11457_v53, %s15589_s0  ;;  %v8184_v53 = vunpack.i.h.bf16 %v15854_v50  ;;  %v5705_v50 = vsel %vm4405_vm4, %v5671_v26, %v15859_v20  ;;  %v4350_v20 = vsel %vm4335_vm2, %v4315_v44, %v8188_v37  ;;  %v15867_v37 = vld [vmem:[#allocation65_spill] sm:$0xff]  ;;  %v15875_v26 = vpack.i.bf16 %v11787_v57, %v11801_v3  ;;  %v15889_v49 = vld [vmem:[#allocation36_spill] sm:$0xff]  ;;  %v9301_v57 = vld [vmem:[#allocation3 + $0x88] sm:$0xff] }
 0x46c   : > { %5286 = vrot.lane.b32.xlu1 %v15849_v39, %s15595_s19  ;;  %v4419_v32 = vsel %vm4405_vm4, %v4384_v45, %v8194_v43  ;;  %v8199_v44 = vunpack.i.h.bf16 %v15867_v37  ;;  %v15869_v45 = vld [vmem:[#allocation29_spill] sm:$0xff]  ;;  %v8253_v33 = vunpack.i.l.bf16 %v15889_v49 }
 0x46d   : > { %v12004_v35 = vpop.permute.xlu0 %8621  ;;  %v4316_v2 = vsel %vm4300_vm1, %v4281_v55, %v8184_v53  ;;  %v4418_v53 = vsel %vm4405_vm4, %v4383_v47, %v8193_v14  ;;  %v15865_v55 = vld [vmem:[#allocation23_spill] sm:$0xff]  ;;  %v15870_v47 = vld [vmem:[#allocation28_spill] sm:$0xff]  ;;  %v15888_v3 = vld [vmem:[#allocation97_spill] sm:$0xff] }
 0x46e   : > { %v12006_v39 = vpop.permute.xlu1 %8641  ;;  %v4351_v24 = vsel %vm4335_vm2, %v4316_v2, %v8189_v27  ;;  %v8198_v2 = vunpack.i.l.bf16 %v15867_v37  ;;  %v15868_v27 = vld [vmem:[#allocation67_spill] sm:$0xff] }
 0x46f   : > { %4933 = vrot.lane.b32.xlu0 %v11397_v38, %s15594_s2  ;;  %v15862_v38 = vld [vmem:[#allocation94_spill] sm:$0xff] }
 0x470   : > { %5036 = vrot.lane.b32.xlu1 %v9295_v7, %s15571_s24  ;;  %v5739_v4 = vsel %vm4440_vm5, %v5705_v50, %v15862_v38  ;;  %v5740_v38 = vsel %vm4440_vm5, %v5706_v6, %v15864_v5  ;;  %v15866_v50 = vpack.i.bf16 %v11145_v11, %v11154_v10  ;;  %v5673_v6 = vsel %vm4370_vm3, %v5639_v58, %v15870_v47  ;;  %v9296_v5 = vld [vmem:[#allocation3 + $0x86] sm:$0xff] }
 0x471   : > { %v12031_v7 = vpop.permute.xlu0 %8626  ;;  %v5773_v43 = vsel %vm4475_vm7, %v5739_v4, %v15868_v27  ;;  %v5774_v14 = vsel %vm4475_vm7, %v5740_v38, %v15869_v45  ;;  %v12064_v10 = vsel %vm4370_vm3, %v4350_v20, %v15835_v42  ;;  %v15872_v38 = vld [vmem:[#allocation74_spill] sm:$0xff]  ;;  %v15873_v45 = vld [vmem:[#allocation93_spill] sm:$0xff]  ;;  %v4454_v42 = vsel %vm4440_vm5, %v4419_v32, %v8199_v44 }
 0x472   : > { %v12033_v8 = vpop.permute.xlu1 %8651  ;;  %v5606_v58 = vsel %vm4300_vm1, %v11960_v28, %v15872_v38  ;;  %v9297_v27 = vld [vmem:[#allocation3 + $0x7e] sm:$0xff]  ;;  %v8239_v20 = vunpack.i.h.bf16 %v15888_v3  ;;  %v9300_v44 = vld [vmem:[#allocation3 + $0xe8] sm:$0xff] }
 0x473   : > { %8866 = vrot.lane.b32.xlu0 %v15865_v55, %s15566_s15  ;;  %v15871_v55 = vld [vmem:[#allocation69_spill] sm:$0xff]  ;;  %v15876_v28 = vld [vmem:[#allocation90_spill] sm:$0xff] }
 0x474   : > { %8871 = vrot.lane.b32.xlu1 %v15866_v50, %s15563_s14  ;;  %v12060_v59 = vsel %vm4265_vm0, %v9296_v5, %v15871_v55  ;;  %v12068_v50 = vsel %vm4370_vm3, %v4351_v24, %v15856_v52  ;;  %v5573_v5 = vsel %vm4265_vm0, %v9297_v27, %v15873_v45  ;;  %v4453_v55 = vsel %vm4440_vm5, %v4418_v53, %v8198_v2  ;;  %v9298_v24 = vld [vmem:[#allocation3 + $0xf6] sm:$0xff]  ;;  %v15878_v27 = vld [vmem:[#allocation87_spill] sm:$0xff] }
 0x475   : > { %v12070_v4 = vpop.permute.xlu0 %8636  ;;  %v12090_v38 = vsel %vm4510_vm6, %v5773_v43, %v15876_v28  ;;  %v12094_v53 = vsel %vm4510_vm6, %v5774_v14, %v15878_v27  ;;  %v15881_v45 = vld [vmem:[#allocation84_spill] sm:$0xff]  ;;  %v5607_v52 = vsel %vm4300_vm1, %v5573_v5, %v15882_v56  ;;  %v15885_v28 = vld [vmem:[#allocation33_spill] sm:$0xff]  ;;  %v15887_v5 = vld [vmem:[#allocation79_spill] sm:$0xff] }
 0x476   : > { %v12072_v37 = vpop.permute.xlu1 %8656  ;;  %15877 = vst [vmem:[#allocation71_spill] sm:$0xff] %v12090_v38  ;;  %15879 = vst [vmem:[#allocation26_spill] sm:$0xff] %v12094_v53  ;;  %v8233_v62 = vunpack.i.l.bf16 %v15885_v28  ;;  %v15886_v2 = vld [vmem:[#allocation89_spill] sm:$0xff]  ;;  %v8234_v56 = vunpack.i.h.bf16 %v15885_v28 }
 0x477   : > { %5395 = vrot.lane.b32.xlu0 %v9298_v24, %s15593_s1  ;;  %v5640_v24 = vsel %vm4335_vm2, %v5606_v58, %v15881_v45  ;;  %v8249_v32 = vunpack.i.h.bf16 %v15886_v2  ;;  %v8248_v58 = vunpack.i.l.bf16 %v15886_v2  ;;  %v5641_v45 = vsel %vm4335_vm2, %v5607_v52, %v15887_v5  ;;  %v9302_v53 = vld [vmem:[#allocation3 + $0x80] sm:$0xff] }
 0x478   : > { %8876 = vrot.lane.b32.xlu1 %v15875_v26, %s15593_s1  ;;  %v15884_v26 = vld [vmem:[#allocation98_spill] sm:$0xff]  ;;  %v4521_v60 = vsel %vm4510_vm6, %v11974_v51, %v8233_v62 }
 0x479   : > { %v8244_v12 = vunpack.i.h.bf16 %v15884_v26  ;;  %v8243_v43 = vunpack.i.l.bf16 %v15884_v26  ;;  %v12106_v14 = vpop.permute.xlu0 %8646  ;;  %v8238_v26 = vunpack.i.l.bf16 %v15888_v3  ;;  %v4283_v5 = vsel %vm4265_vm0, %v9301_v57, %v8249_v32  ;;  %v15894_v51 = vld [vmem:[#allocation102_spill] sm:$0xff]  ;;  %v15897_v57 = vld [vmem:[#allocation35_spill] sm:$0xff] }
 0x47a   : > { %v12108_v27 = vpop.permute.xlu1 %8661  ;;  %v4282_v52 = vsel %vm4265_vm0, %v9302_v53, %v8248_v58  ;;  %v15895_v32 = vld [vmem:[#allocation154_spill] sm:$0xff]  ;;  %v15896_v53 = vpack.i.bf16 %v11166_v48, %v11805_v36  ;;  %v8263_v58 = vunpack.i.l.bf16 %v15897_v57 }
 0x47b   : > { %5498 = vrot.lane.b32.xlu0 %v12119_v13, %s15583_s30  ;;  %v12129_v3 = vsel %vm4475_vm7, %v4453_v55, %v8243_v43  ;;  %v12132_v41 = vsel %vm4475_vm7, %v4454_v42, %v8244_v12  ;;  %v4522_v12 = vsel %vm4510_vm6, %v11984_v22, %v8234_v56  ;;  %v15893_v42 = vld [vmem:[#allocation99_spill] sm:$0xff]  ;;  %v4317_v38 = vsel %vm4300_vm1, %v4282_v52, %v8253_v33  ;;  %v15898_v56 = vld [vmem:[#allocation105_spill] sm:$0xff]  ;;  %v15899_v33 = vld [vmem:[#allocation100_spill] sm:$0xff] }
 0x47c   : > { %4829 = vrot.lane.b32.xlu1 %v9300_v44, %s15567_s26  ;;  %v8254_v44 = vunpack.i.h.bf16 %v15889_v49  ;;  %v8259_v2 = vunpack.i.h.bf16 %v15893_v42  ;;  %v8258_v62 = vunpack.i.l.bf16 %v15893_v42  ;;  %v5707_v49 = vsel %vm4405_vm4, %v5673_v6, %v15894_v51  ;;  %v15900_v43 = vld [vmem:[#allocation38_spill] sm:$0xff] }
 0x47d   : > { %v12137_v31 = vpop.permute.xlu0 %8666  ;;  %v8264_v22 = vunpack.i.h.bf16 %v15897_v57  ;;  %v5741_v42 = vsel %vm4440_vm5, %v5707_v49, %v15898_v56  ;;  %v4556_v6 = vsel %vm4545_vm8, %v4521_v60, %v8238_v26  ;;  %v5674_v52 = vsel %vm4370_vm3, %v5640_v24, %v15899_v33  ;;  %v15901_v56 = vld [vmem:[#allocation39_spill] sm:$0xff]  ;;  %v15902_v26 = vld [vmem:[#allocation42_spill] sm:$0xff]  ;;  %v15905_v33 = vld [vmem:[#allocation109_spill] sm:$0xff] }
 0x47e   : > { %v12139_v28 = vpop.permute.xlu1 %8671  ;;  %v4318_v51 = vsel %vm4300_vm1, %v4283_v5, %v8254_v44  ;;  %v4557_v48 = vsel %vm4545_vm8, %v4522_v12, %v8239_v20  ;;  %v4352_v57 = vsel %vm4335_vm2, %v4317_v38, %v8258_v62  ;;  %v8269_v49 = vunpack.i.h.bf16 %v15900_v43  ;;  %v15903_v24 = vld [vmem:[#allocation91_spill] sm:$0xff]  ;;  %v15904_v44 = vld [vmem:[#allocation14_spill] sm:$0xff]  ;;  %v12188_v38 = vld [vmem:[#allocation3 + $0xfc] sm:$0xff] }
 0x47f   : > { %8881 = vrot.lane.b32.xlu0 %v15895_v32, %s15573_s29  ;;  %v8268_v32 = vunpack.i.l.bf16 %v15900_v43  ;;  %v5708_v60 = vsel %vm4405_vm4, %v5674_v52, %v15901_v56  ;;  %v8278_v55 = vunpack.i.l.bf16 %v15902_v26  ;;  %v12178_v5 = vsel %vm4370_vm3, %v5641_v45, %v15903_v24  ;;  %15906 = vst [vmem:[#allocation53_spill] sm:$0xff] %v12188_v38  ;;  %v9305_v62 = vld [vmem:[#allocation3 + $0x96] sm:$0xff] }
 0x480   : > { %8886 = vrot.lane.b32.xlu1 %v15896_v53, %s15583_s30  ;;  %v5775_v20 = vsel %vm4475_vm7, %v5741_v42, %v15904_v44  ;;  %v8279_v12 = vunpack.i.h.bf16 %v15902_v26  ;;  %v8283_v25 = vunpack.i.l.bf16 %v15905_v33  ;;  %v4421_v45 = vsel %vm4405_vm4, %v12068_v50, %v8264_v22  ;;  %v15907_v42 = vld [vmem:[#allocation103_spill] sm:$0xff]  ;;  %v15909_v24 = vld [vmem:[#allocation104_spill] sm:$0xff] }
 0x481   : > { %v12167_v36 = vpop.permute.xlu0 %8676  ;;  %v4420_v43 = vsel %vm4405_vm4, %v12064_v10, %v8263_v58  ;;  %v12198_v52 = vsel %vm4265_vm0, %v9305_v62, %v15907_v42  ;;  %v8284_v56 = vunpack.i.h.bf16 %v15905_v33  ;;  %v12202_v26 = vsel %vm4335_vm2, %v4318_v51, %v8259_v2  ;;  %v15910_v33 = vld [vmem:[#allocation40_spill] sm:$0xff] }
 0x482   : > { %v12169_v53 = vpop.permute.xlu1 %8681  ;;  %15908 = vst [vmem:[#allocation68_spill] sm:$0xff] %v12202_v26  ;;  %v12205_v44 = vsel %vm4440_vm5, %v4420_v43, %v8268_v32  ;;  %v12211_v50 = vsel %vm4370_vm3, %v4352_v57, %v15870_v47  ;;  %v4456_v58 = vsel %vm4440_vm5, %v4421_v45, %v8269_v49  ;;  %v4591_v51 = vsel %vm4580_vm9, %v4556_v6, %v8278_v55  ;;  %v15911_v32 = vld [vmem:[#allocation15_spill] sm:$0xff]  ;;  %v15914_v42 = vld [vmem:[#allocation44_spill] sm:$0xff]  ;;  %v15915_v55 = vld [vmem:[#allocation41_spill] sm:$0xff] }
 0x483   : > { %5183 = vrot.lane.b32.xlu0 %v12184_v46, %s15589_s0  ;;  %v12223_v43 = vsel %vm4510_vm6, %v5775_v20, %v15911_v32  ;;  %v4592_v57 = vsel %vm4580_vm9, %v4557_v48, %v8279_v12  ;;  %v4626_v62 = vsel %vm4615_vm10, %v4591_v51, %v8283_v25  ;;  %v8293_v26 = vunpack.i.l.bf16 %v15914_v42  ;;  %v9307_v49 = vld [vmem:[#allocation3 + $0xea] sm:$0xff]  ;;  %v15917_v48 = vld [vmem:[#allocation16_spill] sm:$0xff] }
 0x484   : > { %5288 = vrot.lane.b32.xlu1 %v12188_v38, %s15595_s19  ;;  %v5742_v38 = vsel %vm4440_vm5, %v5708_v60, %v15909_v24  ;;  %15912 = vst [vmem:[#allocation117_spill] sm:$0xff] %v12223_v43  ;;  %v9306_v60 = vld [vmem:[#allocation3 + $0x8e] sm:$0xff]  ;;  %v15913_v24 = vld [vmem:[#allocation17_spill] sm:$0xff]  ;;  %v8294_v32 = vunpack.i.h.bf16 %v15914_v42  ;;  %v5608_v25 = vsel %vm4300_vm1, %v12060_v59, %v15917_v48  ;;  %v8603_v42 = vunpack.i.l.bf16 %v11938_v16 }
 0x485   : > { %v12213_v10 = vpop.permute.xlu0 %8686  ;;  %v5776_v2 = vsel %vm4475_vm7, %v5742_v38, %v15910_v33  ;;  %v5575_v47 = vsel %vm4265_vm0, %v9306_v60, %v15913_v24  ;;  %v9308_v38 = vld [vmem:[#allocation3 + $0xec] sm:$0xff]  ;;  %v4627_v33 = vsel %vm4615_vm10, %v4592_v57, %v8284_v56  ;;  %v15918_v51 = vld [vmem:[#allocation20_spill] sm:$0xff]  ;;  %v8604_v43 = vunpack.i.h.bf16 %v11938_v16 }
 0x486   : > { %v12215_v22 = vpop.permute.xlu1 %8701  ;;  %v5609_v6 = vsel %vm4300_vm1, %v5575_v47, %v15915_v55  ;;  %v15916_v20 = vld [vmem:[#allocation19_spill] sm:$0xff]  ;;  %v8304_v60 = vunpack.i.h.bf16 %v15918_v51  ;;  %v8303_v57 = vunpack.i.l.bf16 %v15918_v51 }
 0x487   : > { %4935 = vrot.lane.b32.xlu0 %v9307_v49, %s15594_s2  ;;  %v8288_v45 = vunpack.i.l.bf16 %v15916_v20  ;;  %v8289_v12 = vunpack.i.h.bf16 %v15916_v20  ;;  %v15920_v55 = vld [vmem:[#allocation107_spill] sm:$0xff]  ;;  %v15921_v20 = vld [vmem:[#allocation106_spill] sm:$0xff] }
 0x488   : > { %5038 = vrot.lane.b32.xlu1 %v9308_v38, %s15571_s24  ;;  %v15919_v38 = vld [vmem:[#allocation101_spill] sm:$0xff]  ;;  %v5642_v56 = vsel %vm4335_vm2, %v5608_v25, %v15920_v55  ;;  %v5643_v48 = vsel %vm4335_vm2, %v5609_v6, %v15921_v20 }
 0x489   : > { %v12242_v24 = vpop.permute.xlu0 %8691  ;;  %v12248_v47 = vsel %vm4510_vm6, %v5776_v2, %v15919_v38  ;;  %v4661_v59 = vsel %vm4650_vm11, %v4626_v62, %v8288_v45  ;;  %v15923_v2 = vpack.i.bf16 %v11265_v18, %v11145_v11  ;;  %v4662_v51 = vsel %vm4650_vm11, %v4627_v33, %v8289_v12  ;;  %v15924_v62 = vld [vmem:[#allocation108_spill] sm:$0xff]  ;;  %v15925_v38 = vld [vmem:[#allocation46_spill] sm:$0xff] }
 0x48a   : > { %v12244_v49 = vpop.permute.xlu1 %8711  ;;  %v4696_v25 = vsel %vm4685_vm12, %v4661_v59, %v8293_v26  ;;  %v8298_v45 = vunpack.i.l.bf16 %v15924_v62  ;;  %v8309_v6 = vunpack.i.h.bf16 %v15925_v38  ;;  %v8308_v16 = vunpack.i.l.bf16 %v15925_v38  ;;  %v2375_v26 = vld [vmem:[#allocation3] sm:$0xff] }
 0x48b   : > { %8891 = vrot.lane.b32.xlu0 %v15922_v0, %s15577_s16  ;;  %v4697_v55 = vsel %vm4685_vm12, %v4662_v51, %v8294_v32  ;;  %v8299_v29 = vunpack.i.h.bf16 %v15924_v62  ;;  %v4524_v0 = vsel %vm4510_vm6, %v12132_v41, %v8304_v60  ;;  %v8314_v18 = vunpack.i.h.bf16 %v15926_v9  ;;  %v9309_v60 = vld [vmem:[#allocation3 + $0x8] sm:$0xff]  ;;  %v9310_v38 = vld [vmem:[#allocation3 + $0xfe] sm:$0xff] }
 0x48c   : > { %8896 = vrot.lane.b32.xlu1 %v15923_v2, %s15564_s12  ;;  %v8313_v11 = vunpack.i.l.bf16 %v15926_v9  ;;  %v4523_v12 = vsel %vm4510_vm6, %v12129_v3, %v8303_v57  ;;  %v4266_v20 = vsel %vm4265_vm0, %v2375_v26, %v8603_v42  ;;  %v8613_v32 = vunpack.i.l.bf16 %v11976_v1 }
 0x48d   : > { %v12277_v59 = vpop.permute.xlu0 %8696  ;;  %v12286_v2 = vsel %vm4720_vm13, %v4696_v25, %v8298_v45  ;;  %v8608_v41 = vunpack.i.l.bf16 %v11914_v23  ;;  %v4267_v51 = vsel %vm4265_vm0, %v9309_v60, %v8604_v43  ;;  %v8614_v62 = vunpack.i.h.bf16 %v11976_v1  ;;  %v15930_v43 = vld [vmem:[#allocation110_spill] sm:$0xff] }
 0x48e   : > { %v12279_v33 = vpop.permute.xlu1 %8716  ;;  %15927 = vst [vmem:[#allocation54_spill] sm:$0xff] %v12286_v2  ;;  %v15928_v3 = vpack.i.bf16 %v11294_v61, %v11235_v54  ;;  %v12297_v57 = vsel %vm4720_vm13, %v4697_v55, %v8299_v29  ;;  %v12300_v42 = vsel %vm4545_vm8, %v4523_v12, %v8308_v16  ;;  %v12303_v25 = vsel %vm4545_vm8, %v4524_v0, %v8309_v6  ;;  %v15933_v54 = vld [vmem:[#allocation22_spill] sm:$0xff] }
 0x48f   : > { %5397 = vrot.lane.b32.xlu0 %v9310_v38, %s15593_s1  ;;  %15929 = vst [vmem:[#allocation55_spill] sm:$0xff] %v12297_v57  ;;  %v12307_v1 = vsel %vm4370_vm3, %v5642_v56, %v15930_v43  ;;  %v8609_v45 = vunpack.i.h.bf16 %v11914_v23  ;;  %v12312_v9 = vsel %vm4475_vm7, %v12205_v44, %v8313_v11  ;;  %v12315_v61 = vsel %vm4475_vm7, %v4456_v58, %v8314_v18  ;;  %v12331_v12 = vld [vmem:[#allocation3 + $0x100] sm:$0xff]  ;;  %v9315_v43 = vld [vmem:[#allocation3 + $0x10] sm:$0xff] }
 0x490   : > { %8901 = vrot.lane.b32.xlu1 %v15928_v3, %s15565_s25  ;;  %15931 = vst [vmem:[#allocation73_spill] sm:$0xff] %v12312_v9  ;;  %15932 = vst [vmem:[#allocation58_spill] sm:$0xff] %v12315_v61  ;;  %v4301_v16 = vsel %vm4300_vm1, %v4266_v20, %v8608_v41  ;;  %v8624_v23 = vunpack.i.h.bf16 %v12004_v35  ;;  %v8623_v44 = vunpack.i.l.bf16 %v12004_v35  ;;  %v8644_v58 = vunpack.i.h.bf16 %v12006_v39  ;;  %v12335_v20 = vld [vmem:[#allocation3 + $0x102] sm:$0xff]  ;;  %v9316_v9 = vld [vmem:[#allocation3 + $0xf0] sm:$0xff] }
 0x491   : > { %v12319_v29 = vpop.permute.xlu0 %8706  ;;  %v4302_v56 = vsel %vm4300_vm1, %v4267_v51, %v8609_v45  ;;  %v4336_v0 = vsel %vm4335_vm2, %v4301_v16, %v8613_v32  ;;  %v8643_v18 = vunpack.i.l.bf16 %v12006_v39  ;;  %v8628_v26 = vunpack.i.l.bf16 %v12031_v7  ;;  %v15934_v32 = vld [vmem:[#allocation48_spill] sm:$0xff]  ;;  %v15935_v51 = vld [vmem:[#allocation50_spill] sm:$0xff]  ;;  %v15938_v16 = vld [vmem:[#allocation121_spill] sm:$0xff] }
 0x492   : > { %v12321_v6 = vpop.permute.xlu1 %8721  ;;  %v4337_v11 = vsel %vm4335_vm2, %v4302_v56, %v8614_v62  ;;  %v12341_v35 = vsel %vm4370_vm3, %v5643_v48, %v15934_v32  ;;  %v8619_v41 = vunpack.i.h.bf16 %v11940_v19  ;;  %v8618_v39 = vunpack.i.l.bf16 %v11940_v19  ;;  %v9313_v38 = vld [vmem:[#allocation3 + $0xa6] sm:$0xff]  ;;  %v9314_v19 = vld [vmem:[#allocation3 + $0x18] sm:$0xff] }
 0x493   : > { %5500 = vrot.lane.b32.xlu0 %v12331_v12, %s15583_s30  ;;  %v8629_v60 = vunpack.i.h.bf16 %v12031_v7  ;;  %v12349_v62 = vsel %vm4405_vm4, %v12178_v5, %v15935_v51  ;;  %v15936_v3 = vld [vmem:[#allocation114_spill] sm:$0xff]  ;;  %v8634_v48 = vunpack.i.h.bf16 %v11978_v63  ;;  %v4269_v7 = vsel %vm4265_vm0, %v9314_v19, %v8624_v23  ;;  %v9317_v61 = vld [vmem:[#allocation3 + $0xf2] sm:$0xff] }
 0x494   : > { %5185 = vrot.lane.b32.xlu1 %v12335_v20, %s15589_s0  ;;  %v12353_v45 = vsel %vm4265_vm0, %v9313_v38, %v15936_v3  ;;  %v4268_v5 = vsel %vm4265_vm0, %v9315_v43, %v8623_v44  ;;  %v4371_v51 = vsel %vm4370_vm3, %v4336_v0, %v8618_v39  ;;  %v4372_v57 = vsel %vm4370_vm3, %v4337_v11, %v8619_v41  ;;  %v15939_v19 = vld [vmem:[#allocation138_spill] sm:$0xff] }
 0x495   : > { %15937 = vst [vmem:[#allocation37_spill] sm:$0xff] %v12353_v45  ;;  %v12357_v55 = vpop.permute.xlu0 %8726  ;;  %v8633_v38 = vunpack.i.l.bf16 %v11978_v63  ;;  %v4407_v3 = vsel %vm4405_vm4, %v4372_v57, %v8644_v58  ;;  %v4406_v56 = vsel %vm4405_vm4, %v4371_v51, %v8643_v18  ;;  %v4303_v2 = vsel %vm4300_vm1, %v4268_v5, %v8628_v26  ;;  %v9318_v5 = vld [vmem:[#allocation3 + $0x20] sm:$0xff]  ;;  %v9319_v51 = vld [vmem:[#allocation3 + $0x28] sm:$0xff] }
 0x496   : > { %v12359_v32 = vpop.permute.xlu1 %8731  ;;  %v4304_v43 = vsel %vm4300_vm1, %v4269_v7, %v8629_v60  ;;  %v8639_v0 = vunpack.i.h.bf16 %v12070_v4  ;;  %v8638_v23 = vunpack.i.l.bf16 %v12070_v4  ;;  %v8658_v63 = vunpack.i.l.bf16 %v12072_v37  ;;  %v15940_v7 = vld [vmem:[#allocation139_spill] sm:$0xff] }
 0x497   : > { %4831 = vrot.lane.b32.xlu0 %v9316_v9, %s15567_s26  ;;  %v8659_v57 = vunpack.i.h.bf16 %v12072_v37  ;;  %v8649_v44 = vunpack.i.h.bf16 %v12106_v14  ;;  %v8648_v11 = vunpack.i.l.bf16 %v12106_v14  ;;  %v8663_v58 = vunpack.i.l.bf16 %v12108_v27 }
 0x498   : > { %4937 = vrot.lane.b32.xlu1 %v9317_v61, %s15594_s2  ;;  %v8654_v61 = vunpack.i.h.bf16 %v12033_v8  ;;  %v8653_v26 = vunpack.i.l.bf16 %v12033_v8  ;;  %v4338_v4 = vsel %vm4335_vm2, %v4303_v2, %v8633_v38  ;;  %v8664_v41 = vunpack.i.h.bf16 %v12108_v27 }
 0x499   : > { %v12379_v9 = vpop.permute.xlu0 %8741  ;;  %v4339_v37 = vsel %vm4335_vm2, %v4304_v43, %v8634_v48  ;;  %v8669_v39 = vunpack.i.h.bf16 %v12137_v31  ;;  %v8668_v14 = vunpack.i.l.bf16 %v12137_v31  ;;  %v8679_v60 = vunpack.i.h.bf16 %v12167_v36 }
 0x49a   : > { %v12381_v18 = vpop.permute.xlu1 %8736  ;;  %v4374_v8 = vsel %vm4370_vm3, %v4339_v37, %v8639_v0  ;;  %v4373_v2 = vsel %vm4370_vm3, %v4338_v4, %v8638_v23  ;;  %v4270_v27 = vsel %vm4265_vm0, %v9318_v5, %v8658_v63  ;;  %v8678_v48 = vunpack.i.l.bf16 %v12167_v36  ;;  %v15941_v4 = vld [vmem:[#allocation120_spill] sm:$0xff] }
 0x49b   : > { %8906 = vrot.lane.b32.xlu0 %v15939_v19, %s15574_s13  ;;  %v4271_v31 = vsel %vm4265_vm0, %v9319_v51, %v8659_v57  ;;  %v4442_v38 = vsel %vm4440_vm5, %v4407_v3, %v8649_v44  ;;  %v4441_v43 = vsel %vm4440_vm5, %v4406_v56, %v8648_v11  ;;  %v4305_v19 = vsel %vm4300_vm1, %v4270_v27, %v8663_v58  ;;  %v12415_v11 = vld [vmem:[#allocation3 + $0x104] sm:$0xff] }
 0x49c   : > { %8911 = vrot.lane.b32.xlu1 %v15940_v7, %s15566_s15  ;;  %v4306_v0 = vsel %vm4300_vm1, %v4271_v31, %v8664_v41  ;;  %v8674_v23 = vunpack.i.h.bf16 %v12139_v28  ;;  %v8673_v63 = vunpack.i.l.bf16 %v12139_v28  ;;  %v8684_v36 = vunpack.i.h.bf16 %v12169_v53  ;;  %v9321_v58 = vld [vmem:[#allocation3 + $0x106] sm:$0xff] }
 0x49d   : > { %v12403_v45 = vpop.permute.xlu0 %8746  ;;  %v4340_v57 = vsel %vm4335_vm2, %v4305_v19, %v8668_v14  ;;  %v4341_v3 = vsel %vm4335_vm2, %v4306_v0, %v8669_v39  ;;  %v4409_v56 = vsel %vm4405_vm4, %v4374_v8, %v8679_v60  ;;  %v8683_v44 = vunpack.i.l.bf16 %v12169_v53 }
 0x49e   : > { %v12405_v7 = vpop.permute.xlu1 %8751  ;;  %v12423_v28 = vsel %vm4300_vm1, %v12198_v52, %v15941_v4  ;;  %v4408_v41 = vsel %vm4405_vm4, %v4373_v2, %v8678_v48  ;;  %v8689_v37 = vunpack.i.h.bf16 %v12213_v10  ;;  %v8688_v39 = vunpack.i.l.bf16 %v12213_v10 }
 0x49f   : > { %5290 = vrot.lane.b32.xlu0 %v12415_v11, %s15595_s19  ;;  %v15942_v53 = vunpack.i.l.bf16 %v15938_v16  ;;  %v4476_v60 = vsel %vm4475_vm7, %v4441_v43, %v8653_v26  ;;  %v4477_v8 = vsel %vm4475_vm7, %v4442_v38, %v8654_v61  ;;  %v8694_v5 = vunpack.i.h.bf16 %v12242_v24  ;;  %v12453_v38 = vld [vmem:[#allocation3 + $0xf4] sm:$0xff]  ;;  %v12457_v43 = vld [vmem:[#allocation3 + $0x108] sm:$0xff] }
 0x4a0   : > { %5399 = vrot.lane.b32.xlu1 %v9321_v58, %s15593_s1  ;;  %v12442_v2 = vsel %vm4370_vm3, %v4341_v3, %v8674_v23  ;;  %v12445_v10 = vsel %vm4370_vm3, %v4340_v57, %v8673_v63  ;;  %v4444_v48 = vsel %vm4440_vm5, %v4409_v56, %v8684_v36  ;;  %v4443_v26 = vsel %vm4440_vm5, %v4408_v41, %v8683_v44  ;;  %v9325_v63 = vld [vmem:[#allocation3 + $0x48] sm:$0xff] }
 0x4a1   : > { %v12432_v14 = vsel %vm4405_vm4, %v12211_v50, %v15942_v53  ;;  %v12437_v52 = vpop.permute.xlu0 %8761  ;;  %v8693_v50 = vunpack.i.l.bf16 %v12242_v24  ;;  %v8699_v51 = vunpack.i.h.bf16 %v12277_v59  ;;  %v8698_v31 = vunpack.i.l.bf16 %v12277_v59  ;;  %15943 = vst [vmem:[#allocation52_spill] sm:$0xff] %v12453_v38 }
 0x4a2   : > { %v12439_v27 = vpop.permute.xlu1 %8756  ;;  %v12462_v24 = vsel %vm4475_vm7, %v4443_v26, %v8688_v39  ;;  %v12465_v19 = vsel %vm4475_vm7, %v4444_v48, %v8689_v37  ;;  %v8703_v0 = vunpack.i.l.bf16 %v12215_v22  ;;  %v8743_v59 = vunpack.i.l.bf16 %v12379_v9 }
 0x4a3   : > { %5040 = vrot.lane.b32.xlu0 %v12453_v38, %s15571_s24  ;;  %v4512_v23 = vsel %vm4510_vm6, %v4477_v8, %v8694_v5  ;;  %v8753_v57 = vunpack.i.l.bf16 %v12405_v7  ;;  %v4511_v44 = vsel %vm4510_vm6, %v4476_v60, %v8693_v50  ;;  %v8763_v41 = vunpack.i.l.bf16 %v12437_v52  ;;  %v15944_v60 = vld [vmem:[#allocation181_spill] sm:$0xff] }
 0x4a4   : > { %5502 = vrot.lane.b32.xlu1 %v12457_v43, %s15583_s30  ;;  %v4546_v37 = vsel %vm4545_vm8, %v4511_v44, %v8698_v31  ;;  %v12483_v39 = vsel %vm4545_vm8, %v4512_v23, %v8699_v51  ;;  %v8744_v53 = vunpack.i.h.bf16 %v12379_v9  ;;  %v8738_v8 = vunpack.i.l.bf16 %v12381_v18  ;;  %v9324_v5 = vld [vmem:[#allocation3 + $0x40] sm:$0xff] }
 0x4a5   : > { %v12473_v3 = vpop.permute.xlu0 %8766  ;;  %v4274_v48 = vsel %vm4265_vm0, %v9324_v5, %v8743_v59  ;;  %v8739_v50 = vunpack.i.h.bf16 %v12381_v18  ;;  %v8748_v26 = vunpack.i.l.bf16 %v12403_v45  ;;  %v8754_v51 = vunpack.i.h.bf16 %v12405_v7 }
 0x4a6   : > { %v12475_v56 = vpop.permute.xlu1 %8771  ;;  %v8709_v31 = vunpack.i.h.bf16 %v12319_v29  ;;  %v4309_v9 = vsel %vm4300_vm1, %v4274_v48, %v8753_v57  ;;  %v8764_v23 = vunpack.i.h.bf16 %v12437_v52  ;;  %v8758_v44 = vunpack.i.l.bf16 %v12439_v27  ;;  %v9326_v52 = vld [vmem:[#allocation3 + $0x30] sm:$0xff] }
 0x4a7   : > { %8916 = vrot.lane.b32.xlu0 %v11824_v40, %s15563_s14  ;;  %v8708_v59 = vunpack.i.l.bf16 %v12319_v29  ;;  %v8749_v18 = vunpack.i.h.bf16 %v12403_v45  ;;  %v4344_v5 = vsel %vm4335_vm2, %v4309_v9, %v8763_v41  ;;  %v8768_v7 = vunpack.i.l.bf16 %v12473_v3  ;;  %v12515_v45 = vld [vmem:[#allocation3 + $0x10a] sm:$0xff]  ;;  %v9328_v9 = vld [vmem:[#allocation3 + $0x38] sm:$0xff] }
 0x4a8   : > { %8926 = vrot.lane.b32.xlu1 %v15944_v60, %s15573_s29  ;;  %v4275_v57 = vsel %vm4265_vm0, %v9325_v63, %v8744_v53  ;;  %v4272_v48 = vsel %vm4265_vm0, %v9326_v52, %v8738_v8  ;;  %v8759_v36 = vunpack.i.h.bf16 %v12439_v27  ;;  %v15945_v29 = vpack.i.bf16 %v11836_v15, %v11838_v30 }
 0x4a9   : > { %v12499_v4 = vpop.permute.xlu0 %8776  ;;  %v4273_v63 = vsel %vm4265_vm0, %v9328_v9, %v8739_v50  ;;  %v4307_v53 = vsel %vm4300_vm1, %v4272_v48, %v8748_v26  ;;  %v4310_v8 = vsel %vm4300_vm1, %v4275_v57, %v8754_v51  ;;  %v4379_v52 = vsel %vm4370_vm3, %v4344_v5, %v8703_v0 }
 0x4aa   : > { %v12501_v60 = vpop.permute.xlu1 %8781  ;;  %v4345_v27 = vsel %vm4335_vm2, %v4310_v8, %v8764_v23  ;;  %v4342_v15 = vsel %vm4335_vm2, %v4307_v53, %v8758_v44  ;;  %v8769_v30 = vunpack.i.h.bf16 %v12473_v3  ;;  %v4308_v61 = vsel %vm4300_vm1, %v4273_v63, %v8749_v18 }
 0x4ab   : > { %8921 = vrot.lane.b32.xlu0 %v15945_v29, %s15593_s1  ;;  %v4377_v41 = vsel %vm4370_vm3, %v4342_v15, %v8768_v7  ;;  %v8729_v26 = vunpack.i.h.bf16 %v12357_v55  ;;  %v8728_v51 = vunpack.i.l.bf16 %v12357_v55  ;;  %v4343_v23 = vsel %vm4335_vm2, %v4308_v61, %v8759_v36 }
 0x4ac   : > { %5187 = vrot.lane.b32.xlu1 %v12515_v45, %s15589_s0  ;;  %v15946_v0 = vunpack.i.h.bf16 %v12215_v22  ;;  %v15947_v44 = vunpack.i.l.bf16 %v10739_v21  ;;  %v8774_v5 = vunpack.i.h.bf16 %v12475_v56  ;;  %v8734_v61 = vunpack.i.h.bf16 %v12359_v32 }
 0x4ad   : > { %v8787_v29 = vpop.permute.xlu0 %8786  ;;  %v4412_v36 = vsel %vm4405_vm4, %v4377_v41, %v8708_v59  ;;  %v8773_v9 = vunpack.i.l.bf16 %v12475_v56  ;;  %v15950_v56 = vld [vmem:[#allocation131_spill] sm:$0xff] }
 0x4ae   : > { %v8792_v58 = vpop.permute.xlu1 %8791  ;;  %v8789_v38 = vunpack.i.h.bf16 %v8787_v29  ;;  %v8788_v50 = vunpack.i.l.bf16 %v8787_v29  ;;  %v4380_v3 = vsel %vm4370_vm3, %v4345_v27, %v15946_v0  ;;  %v4414_v18 = vsel %vm4405_vm4, %v4379_v52, %v15947_v44 }
 0x4af   : > { %v8793_v57 = vunpack.i.l.bf16 %v8792_v58  ;;  %4833 = vrot.lane.b32.xlu0 %v12119_v13, %s15567_s26  ;;  %v4378_v13 = vsel %vm4370_vm3, %v4343_v23, %v8769_v30  ;;  %v15948_v27 = vunpack.i.h.bf16 %v10739_v21  ;;  %v15949_v52 = vunpack.i.l.bf16 %v10737_v34 }
 0x4b0   : > { %4939 = vrot.lane.b32.xlu1 %v12184_v46, %s15594_s2  ;;  %v4581_v7 = vsel %vm4580_vm9, %v4546_v37, %v8788_v50  ;;  %v8794_v46 = vunpack.i.h.bf16 %v8792_v58  ;;  %v4582_v63 = vsel %vm4580_vm9, %v12483_v39, %v8789_v38  ;;  %v4413_v38 = vsel %vm4405_vm4, %v4378_v13, %v8709_v31 }
 0x4b1   : > { %v8797_v48 = vpop.permute.xlu0 %8796  ;;  %v12553_v37 = vsel %vm4405_vm4, %v4380_v3, %v15948_v27  ;;  %v12558_v15 = vsel %vm4440_vm5, %v4414_v18, %v15949_v52  ;;  %v4616_v58 = vsel %vm4615_vm10, %v4581_v7, %v8793_v57  ;;  %v15951_v21 = vunpack.i.l.bf16 %v12244_v49 }
 0x4b2   : > { %v8802_v22 = vpop.permute.xlu1 %8801  ;;  %v8799_v53 = vunpack.i.h.bf16 %v8797_v48  ;;  %v8798_v8 = vunpack.i.l.bf16 %v8797_v48  ;;  %v4411_v41 = vsel %vm4405_vm4, %v12442_v2, %v8774_v5  ;;  %v8779_v29 = vunpack.i.h.bf16 %v12499_v4 }
 0x4b3   : > { %v8803_v59 = vunpack.i.l.bf16 %v8802_v22  ;;  %8931 = vrot.lane.b32.xlu0 %v15950_v56, %s15583_s30  ;;  %v4447_v39 = vsel %vm4440_vm5, %v4412_v36, %v15951_v21  ;;  %v8778_v50 = vunpack.i.l.bf16 %v12499_v4  ;;  %v4617_v23 = vsel %vm4615_vm10, %v4582_v63, %v8794_v46  ;;  %v12582_v36 = vld [vmem:[#allocation3 + $0x10c] sm:$0xff] }
 0x4b4   : > { %8936 = vrot.lane.b32.xlu1 %v11263_v17, %s15577_s16  ;;  %v4651_v30 = vsel %vm4650_vm11, %v4616_v58, %v8798_v8  ;;  %v8804_v57 = vunpack.i.h.bf16 %v8802_v22  ;;  %v4410_v31 = vsel %vm4405_vm4, %v12445_v10, %v8773_v9  ;;  %v4652_v3 = vsel %vm4650_vm11, %v4617_v23, %v8799_v53  ;;  %v9330_v46 = vld [vmem:[#allocation3 + $0x10e] sm:$0xff]  ;;  %v15953_v10 = vld [vmem:[#allocation34_spill] sm:$0xff] }
 0x4b5   : > { %v8807_v0 = vpop.permute.xlu0 %8806  ;;  %v15952_v2 = vunpack.i.h.bf16 %v12244_v49  ;;  %v4686_v7 = vsel %vm4685_vm12, %v4651_v30, %v8803_v59  ;;  %v15954_v48 = vunpack.i.l.bf16 %v15953_v10  ;;  %v8784_v49 = vunpack.i.h.bf16 %v12501_v60  ;;  %v15955_v58 = vld [vmem:[#allocation60_spill] sm:$0xff]  ;;  %v15957_v23 = vld [vmem:[#allocation66_spill] sm:$0xff] }
 0x4b6   : > { %v8812_v17 = vpop.permute.xlu1 %8811  ;;  %v8809_v44 = vunpack.i.h.bf16 %v8807_v0  ;;  %v8808_v18 = vunpack.i.l.bf16 %v8807_v0  ;;  %v8783_v9 = vunpack.i.l.bf16 %v12501_v60  ;;  %v4446_v53 = vsel %vm4440_vm5, %v4411_v41, %v8779_v29 }
 0x4b7   : > { %v4448_v5 = vsel %vm4440_vm5, %v4413_v38, %v15952_v2  ;;  %v8814_v13 = vunpack.i.h.bf16 %v8812_v17  ;;  %v8813_v4 = vunpack.i.l.bf16 %v8812_v17  ;;  %5292 = vrot.lane.b32.xlu0 %v12582_v36, %s15595_s19  ;;  %v4482_v22 = vsel %vm4475_vm7, %v4447_v39, %v15954_v48 }
 0x4b8   : > { %5401 = vrot.lane.b32.xlu1 %v9330_v46, %s15593_s1  ;;  %v4721_v63 = vsel %vm4720_vm13, %v4686_v7, %v8808_v18  ;;  %v4445_v8 = vsel %vm4440_vm5, %v4410_v31, %v8778_v50  ;;  %v15956_v59 = vunpack.i.l.bf16 %v15955_v58  ;;  %v4687_v38 = vsel %vm4685_vm12, %v4652_v3, %v8804_v57  ;;  %v15959_v31 = vld [vmem:[#allocation53_spill] sm:$0xff]  ;;  %v15960_v57 = vld [vmem:[#allocation71_spill] sm:$0xff] }
 0x4b9   : > { %v8817_v27 = vpop.permute.xlu0 %8816  ;;  %v4722_v60 = vsel %vm4720_vm13, %v4687_v38, %v8809_v44  ;;  %v15958_v0 = vunpack.i.l.bf16 %v15957_v23  ;;  %v4514_v29 = vsel %vm4510_vm6, %v12465_v19, %v8814_v13  ;;  %v4513_v50 = vsel %vm4510_vm6, %v12462_v24, %v8813_v4  ;;  %v12617_v7 = vld [vmem:[#allocation3 + $0x110] sm:$0xff] }
 0x4ba   : > { %v8822_v52 = vpop.permute.xlu1 %8821  ;;  %v4756_v56 = vsel %vm4755_vm14, %v4721_v63, %v15956_v59  ;;  %v8819_v21 = vunpack.i.h.bf16 %v8817_v27  ;;  %v8818_v39 = vunpack.i.l.bf16 %v8817_v27  ;;  %v15961_v3 = vunpack.i.h.bf16 %v15953_v10  ;;  %v15968_v38 = vld [vmem:[#allocation128_spill] sm:$0xff] }
 0x4bb   : > { %v8823_v30 = vunpack.i.l.bf16 %v8822_v52  ;;  %6032 = vmatmul.mubr.f32.vlgmr.msra.gmra.mrb[40].mxu1 %v4756_v56  ;;  %v4517_v41 = vsel %vm4510_vm6, %v4482_v22, %v15958_v0  ;;  %v8824_v17 = vunpack.i.h.bf16 %v8822_v52  ;;  %5042 = vrot.lane.b32.xlu0 %v15959_v31, %s15571_s24  ;;  %v4480_v18 = vsel %vm4475_vm7, %v4445_v8, %v8783_v9  ;;  %v15967_v56 = vld [vmem:[#allocation158_spill] sm:$0xff]  ;;  %v15973_v31 = vld [vmem:[#allocation25_spill] sm:$0xff] }
 0x4bc   : > { %7043 = vmatprep.mubr.msk.f32.mxu1 %vm4545_vm8, %v15960_v57  ;;  %v4483_v44 = vsel %vm4475_vm7, %v4448_v5, %v15961_v3  ;;  %v4549_v2 = vsel %vm4545_vm8, %v4514_v29, %v8819_v21  ;;  %v4548_v19 = vsel %vm4545_vm8, %v4513_v50, %v8818_v39  ;;  %5504 = vrot.lane.b32.xlu1 %v12617_v7, %s15583_s30  ;;  %v15962_v13 = vunpack.i.h.bf16 %v12279_v33 }
 0x4bd   : > { %v4481_v24 = vsel %vm4475_vm7, %v4446_v53, %v8784_v49  ;;  %v15963_v46 = vunpack.i.l.bf16 %v12279_v33  ;;  %v8827_v10 = vpop.permute.xlu0 %8826  ;;  %v15964_v22 = vunpack.i.h.bf16 %v15955_v58  ;;  %v4515_v63 = vsel %vm4510_vm6, %v4480_v18, %v8823_v30  ;;  %v15965_v49 = vld [vmem:[#allocation63_spill] sm:$0xff]  ;;  %v15970_v58 = vld [vmem:[#allocation26_spill] sm:$0xff] }
 0x4be   : > { %v4584_v4 = vsel %vm4580_vm9, %v4549_v2, %v15962_v13  ;;  %v12628_v48 = vpop.permute.xlu1 %8836  ;;  %v8829_v8 = vunpack.i.h.bf16 %v8827_v10  ;;  %v8828_v27 = vunpack.i.l.bf16 %v8827_v10  ;;  %v15966_v53 = vunpack.i.l.bf16 %v15965_v49 }
 0x4bf   : > { %v4583_v5 = vsel %vm4580_vm9, %v4548_v19, %v15963_v46  ;;  %v4757_v9 = vsel %vm4755_vm14, %v4722_v60, %v15964_v22  ;;  %v8733_v33 = vunpack.i.l.bf16 %v12359_v32  ;;  %v4516_v59 = vsel %vm4510_vm6, %v4481_v24, %v8824_v17  ;;  %v15977_v24 = vld [vmem:[#allocation125_spill] sm:$0xff] }
 0x4c0   : > { %6037 = vmatmul.mubr.f32.gmra.mrb[42].mxu1 %v4757_v9  ;;  %v4552_v52 = vsel %vm4545_vm8, %v4517_v41, %v15966_v53  ;;  %v15969_v21 = vpack.i.bf16 %v15967_v56, %v15968_v38  ;;  %v15971_v39 = vunpack.i.l.bf16 %v12321_v6  ;;  %v15972_v60 = vunpack.i.h.bf16 %v12321_v6  ;;  %4835 = vrot.lane.b32.xlu1 %v12331_v12, %s15567_s26  ;;  %v15981_v9 = vld [vmem:[#allocation24_spill] sm:$0xff]  ;;  %v15988_v53 = vld [vmem:[#allocation49_spill] sm:$0xff] }
 0x4c1   : > { %7044 = vmatprep.mubr.msk.f32.mxu1 %vm4545_vm8, %v15970_v58  ;;  %v4550_v41 = vsel %vm4545_vm8, %v4515_v63, %v8828_v27  ;;  %v4551_v29 = vsel %vm4545_vm8, %v4516_v59, %v8829_v8  ;;  %v15974_v57 = vunpack.i.l.bf16 %v15973_v31  ;;  %v15975_v3 = vunpack.i.h.bf16 %v15973_v31  ;;  %v12667_v2 = vpop.permute.xlu0 %8831  ;;  %v15983_v63 = vld [vmem:[#allocation173_spill] sm:$0xff] }
 0x4c2   : > { %8941 = vrot.lane.b32.xlu0 %v15969_v21, %s15564_s12  ;;  %v4618_v30 = vsel %vm4615_vm10, %v4583_v5, %v15971_v39  ;;  %v4619_v0 = vsel %vm4615_vm10, %v4584_v4, %v15972_v60  ;;  %v12669_v19 = vpop.permute.xlu1 %5179  ;;  %v5710_v13 = vsel %vm4405_vm4, %v12307_v1, %v15977_v24  ;;  %v15978_v4 = vunpack.i.h.bf16 %v15957_v23  ;;  %v15979_v5 = vld [vmem:[#allocation43_spill] sm:$0xff]  ;;  %v15986_v27 = vld [vmem:[#allocation57_spill] sm:$0xff]  ;;  %v15991_v21 = vld [vmem:[#allocation32_spill] sm:$0xff] }
 0x4c3   : > { %v4653_v50 = vsel %vm4650_vm11, %v4618_v30, %v8728_v51  ;;  %v4654_v17 = vsel %vm4650_vm11, %v4619_v0, %v8729_v26  ;;  %v4585_v6 = vsel %vm4580_vm9, %v4550_v41, %v15974_v57  ;;  %v4586_v18 = vsel %vm4580_vm9, %v4551_v29, %v15975_v3  ;;  %v15976_v51 = vld [vmem:[#allocation123_spill] sm:$0xff]  ;;  %v15993_v30 = vld [vmem:[#allocation168_spill] sm:$0xff]  ;;  %v15995_v41 = vld [vmem:[#allocation78_spill] sm:$0xff] }
 0x4c4   : > { %v4688_v12 = vsel %vm4685_vm12, %v4653_v50, %v8733_v33  ;;  %v4689_v55 = vsel %vm4685_vm12, %v4654_v17, %v8734_v61  ;;  %v5743_v26 = vsel %vm4440_vm5, %v12349_v62, %v15976_v51  ;;  %v4518_v46 = vsel %vm4510_vm6, %v4483_v44, %v15978_v4  ;;  %v15984_v62 = vld [vmem:[#allocation159_spill] sm:$0xff]  ;;  %8951 = vrot.lane.b32.xlu1 %v15993_v30, %s15574_s13  ;;  %v15997_v17 = vld [vmem:[#allocation113_spill] sm:$0xff] }
 0x4c5   : > { %v15980_v10 = vunpack.i.l.bf16 %v15979_v5  ;;  %v15982_v32 = vunpack.i.l.bf16 %v15981_v9  ;;  %v15985_v8 = vpack.i.bf16 %v15983_v63, %v15984_v62  ;;  %v15987_v1 = vunpack.i.l.bf16 %v15986_v27  ;;  %v15999_v57 = vld [vmem:[#allocation117_spill] sm:$0xff]  ;;  %v16004_v4 = vld [vmem:[#allocation51_spill] sm:$0xff]  ;;  %v16007_v63 = vld [vmem:[#allocation64_spill] sm:$0xff] }
 0x4c6   : > { %v15989_v44 = vunpack.i.l.bf16 %v15988_v53  ;;  %v15990_v59 = vunpack.i.h.bf16 %v15988_v53  ;;  %v8223_v58 = vunpack.i.l.bf16 %v15991_v21  ;;  %v15994_v60 = vunpack.i.h.bf16 %v15979_v5  ;;  %v12729_v3 = vpop.permute.xlu1 %4931  ;;  %v16015_v30 = vld [vmem:[#allocation129_spill] sm:$0xff] }
 0x4c7   : > { %v4723_v22 = vsel %vm4720_vm13, %v4688_v12, %v15980_v10  ;;  %v4484_v61 = vsel %vm4475_vm7, %v12558_v15, %v15982_v32  ;;  %8946 = vrot.lane.b32.xlu0 %v15985_v8, %s15565_s25  ;;  %v15992_v15 = vunpack.i.h.bf16 %v10737_v34  ;;  %v15996_v29 = vunpack.i.l.bf16 %v15995_v41 }
 0x4c8   : > { %v4758_v23 = vsel %vm4755_vm14, %v4723_v22, %v15987_v1  ;;  %v4620_v33 = vsel %vm4615_vm10, %v4585_v6, %v15989_v44  ;;  %v4621_v38 = vsel %vm4615_vm10, %v4586_v18, %v15990_v59  ;;  %v4724_v0 = vsel %vm4720_vm13, %v4689_v55, %v15994_v60  ;;  %v12727_v6 = vpop.permute.xlu0 %4825  ;;  %v16000_v18 = vld [vmem:[#allocation45_spill] sm:$0xff] }
 0x4c9   : > { %v4450_v39 = vsel %vm4440_vm5, %v12553_v37, %v15992_v15  ;;  %6042 = vmatmul.mubr.f32.gmra.mrb[44].mxu1 %v4758_v23  ;;  %v4587_v50 = vsel %vm4580_vm9, %v4552_v52, %v15996_v29  ;;  %v5777_v31 = vsel %vm4475_vm7, %v5743_v26, %v15997_v17  ;;  %v15998_v34 = vunpack.i.l.bf16 %v15933_v54  ;;  %v16003_v26 = vld [vmem:[#allocation118_spill] sm:$0xff]  ;;  %v16012_v44 = vld [vmem:[#allocation61_spill] sm:$0xff] }
 0x4ca   : > { %7045 = vmatprep.mubr.msk.f32.mxu1 %vm4545_vm8, %v15999_v57  ;;  %v16001_v12 = vunpack.i.l.bf16 %v16000_v18  ;;  %v16002_v55 = vunpack.i.h.bf16 %v15965_v49  ;;  %v5744_v24 = vsel %vm4440_vm5, %v5710_v13, %v16003_v26  ;;  %v16005_v5 = vunpack.i.l.bf16 %v16004_v4  ;;  %v16009_v49 = vld [vmem:[#allocation127_spill] sm:$0xff]  ;;  %v12781_v57 = vpop.permute.xlu1 %8846  ;;  %v16021_v26 = vld [vmem:[#allocation80_spill] sm:$0xff] }
 0x4cb   : > { %v12723_v37 = vsel %vm4440_vm5, %v12432_v14, %v15998_v34  ;;  %v12739_v14 = vld [vmem:[#allocation3 + $0x112] sm:$0xff]  ;;  %v16006_v22 = vunpack.i.h.bf16 %v16000_v18  ;;  %v16008_v62 = vunpack.i.l.bf16 %v16007_v63  ;;  %v16010_v1 = vunpack.i.h.bf16 %v15981_v9 }
 0x4cc   : > { %v4655_v52 = vsel %vm4650_vm11, %v4620_v33, %v16001_v12  ;;  %v4553_v51 = vsel %vm4545_vm8, %v4518_v46, %v16002_v55  ;;  %v5778_v46 = vsel %vm4475_vm7, %v5744_v24, %v16009_v49  ;;  %5189 = vrot.lane.b32.xlu0 %v12739_v14, %s15589_s0  ;;  %v16011_v23 = vunpack.i.h.bf16 %v15986_v27  ;;  %v12766_v9 = vld [vmem:[#allocation3 + $0x114] sm:$0xff]  ;;  %v12779_v34 = vpop.permute.xlu0 %8841  ;;  %v16019_v18 = vld [vmem:[#allocation115_spill] sm:$0xff]  ;;  %v16023_v24 = vld [vmem:[#allocation133_spill] sm:$0xff] }
 0x4cd   : > { %v4690_v10 = vsel %vm4685_vm12, %v4655_v52, %v16005_v5  ;;  %v4656_v32 = vsel %vm4650_vm11, %v4621_v38, %v16006_v22  ;;  %v4519_v8 = vsel %vm4510_vm6, %v4484_v61, %v16008_v62  ;;  %v4485_v13 = vsel %vm4475_vm7, %v4450_v39, %v16010_v1  ;;  %v9332_v38 = vld [vmem:[#allocation3 + $0x9e] sm:$0xff]  ;;  %5294 = vrot.lane.b32.xlu1 %v12766_v9, %s15595_s19  ;;  %v16016_v39 = vld [vmem:[#allocation47_spill] sm:$0xff] }
 0x4ce   : > { %v4759_v53 = vsel %vm4755_vm14, %v4724_v0, %v16011_v23  ;;  %v16013_v33 = vunpack.i.l.bf16 %v16012_v44  ;;  %v16014_v61 = vld [vmem:[#allocation122_spill] sm:$0xff]  ;;  %v8349_v60 = vunpack.i.h.bf16 %v16015_v30  ;;  %v16017_v27 = vunpack.i.l.bf16 %v16016_v39  ;;  %v16025_v22 = vld [vmem:[#allocation77_spill] sm:$0xff]  ;;  %v16029_v23 = vld [vmem:[#allocation132_spill] sm:$0xff] }
 0x4cf   : > { %v5577_v15 = vsel %vm4265_vm0, %v9332_v38, %v16014_v61  ;;  %6047 = vmatmul.mubr.f32.gmra.mrb[46].mxu1 %v4759_v53  ;;  %v16018_v29 = vunpack.i.h.bf16 %v15995_v41  ;;  %v8348_v17 = vunpack.i.l.bf16 %v16015_v30  ;;  %v5811_v12 = vsel %vm4510_vm6, %v5777_v31, %v16019_v18  ;;  %v16028_v1 = vld [vmem:[#allocation130_spill] sm:$0xff]  ;;  %v16030_v53 = vld [vmem:[#allocation95_spill] sm:$0xff] }
 0x4d0   : > { %v4622_v59 = vsel %vm4615_vm10, %v4587_v50, %v16013_v33  ;;  %v4725_v0 = vsel %vm4720_vm13, %v4690_v10, %v16017_v27  ;;  %7046 = vmatprep.mubr.msk.f32.mxu1 %vm4545_vm8, %v12248_v47  ;;  %v16020_v52 = vunpack.i.h.bf16 %v16004_v4  ;;  %v16022_v41 = vunpack.i.l.bf16 %v16021_v26  ;;  %v16024_v10 = vld [vmem:[#allocation112_spill] sm:$0xff]  ;;  %4941 = vrot.lane.b32.xlu0 %v12335_v20, %s15594_s2 }
 0x4d1   : > { %v4588_v50 = vsel %vm4580_vm9, %v4553_v51, %v16018_v29  ;;  %v5611_v5 = vsel %vm4300_vm1, %v5577_v15, %v16023_v24  ;;  %v5812_v47 = vsel %vm4510_vm6, %v5778_v46, %v16024_v10  ;;  %v16026_v62 = vunpack.i.l.bf16 %v16025_v22  ;;  %5044 = vrot.lane.b32.xlu1 %v12415_v11, %s15571_s24  ;;  %v16035_v15 = vld [vmem:[#allocation31_spill] sm:$0xff]  ;;  %v16038_v11 = vld [vmem:[#allocation82_spill] sm:$0xff] }
 0x4d2   : > { %v4691_v55 = vsel %vm4685_vm12, %v4656_v32, %v16020_v52  ;;  %v4554_v51 = vsel %vm4545_vm8, %v4519_v8, %v16022_v41  ;;  %v16027_v31 = vunpack.i.h.bf16 %v16007_v63  ;;  %v5644_v32 = vsel %vm4335_vm2, %v12423_v28, %v16028_v1  ;;  %v16033_v63 = vld [vmem:[#allocation18_spill] sm:$0xff]  ;;  %v16048_v1 = vld [vmem:[#allocation88_spill] sm:$0xff] }
 0x4d3   : > { %v4657_v49 = vsel %vm4650_vm11, %v4622_v59, %v16026_v62  ;;  %v8353_v8 = vunpack.i.l.bf16 %v16029_v23  ;;  %v16031_v33 = vunpack.i.l.bf16 %v16030_v53  ;;  %v16032_v38 = vunpack.i.h.bf16 %v16012_v44  ;;  %v16045_v62 = vld [vmem:[#allocation153_spill] sm:$0xff] }
 0x4d4   : > { %v4520_v4 = vsel %vm4510_vm6, %v4485_v13, %v16027_v31  ;;  %v8273_v61 = vunpack.i.l.bf16 %v16033_v63  ;;  %v4594_v13 = vsel %vm4580_vm9, %v12303_v25, %v8349_v60  ;;  %v16034_v28 = vunpack.i.h.bf16 %v16016_v39  ;;  %v12829_v25 = vpop.permute.xlu0 %5284  ;;  %v12831_v60 = vpop.permute.xlu1 %5393 }
 0x4d5   : > { %v4760_v46 = vsel %vm4755_vm14, %v4725_v0, %v16031_v33  ;;  %v4623_v59 = vsel %vm4615_vm10, %v4588_v50, %v16032_v38  ;;  %v16036_v30 = vunpack.i.l.bf16 %v16035_v15  ;;  %v4593_v44 = vsel %vm4580_vm9, %v12300_v42, %v8348_v17  ;;  %v16037_v0 = vld [vmem:[#allocation124_spill] sm:$0xff]  ;;  %v16042_v42 = vld [vmem:[#allocation146_spill] sm:$0xff] }
 0x4d6   : > { %6052 = vmatmul.mubr.f32.gmra.mrb[48].mxu1 %v4760_v46  ;;  %v4726_v20 = vsel %vm4720_vm13, %v4691_v55, %v16034_v28  ;;  %v5645_v29 = vsel %vm4335_vm2, %v5611_v5, %v16037_v0  ;;  %v16039_v39 = vunpack.i.l.bf16 %v16038_v11  ;;  %v16040_v18 = vunpack.i.h.bf16 %v16021_v26  ;;  %v16041_v55 = vld [vmem:[#allocation135_spill] sm:$0xff]  ;;  %v16050_v33 = vld [vmem:[#allocation160_spill] sm:$0xff] }
 0x4d7   : > { %v4589_v27 = vsel %vm4580_vm9, %v4554_v51, %v16036_v30  ;;  %7047 = vmatprep.mubr.msk.f32.mxu1 %vm4545_vm8, %v5811_v12  ;;  %v8358_v41 = vunpack.i.l.bf16 %v16041_v55  ;;  %v5678_v17 = vsel %vm4370_vm3, %v5644_v32, %v16042_v42  ;;  %v16043_v51 = vld [vmem:[#allocation150_spill] sm:$0xff]  ;;  %v16044_v24 = vunpack.i.h.bf16 %v16025_v22  ;;  %v16057_v0 = vld [vmem:[#allocation151_spill] sm:$0xff] }
 0x4d8   : > { %v4692_v50 = vsel %vm4685_vm12, %v4657_v49, %v16039_v39  ;;  %v4555_v52 = vsel %vm4545_vm8, %v4520_v4, %v16040_v18  ;;  %v5711_v12 = vsel %vm4405_vm4, %v12341_v35, %v16043_v51  ;;  %v4628_v10 = vsel %vm4615_vm10, %v4593_v44, %v8353_v8  ;;  %v16046_v49 = vld [vmem:[#allocation162_spill] sm:$0xff]  ;;  %v16051_v8 = vld [vmem:[#allocation155_spill] sm:$0xff]  ;;  %v12877_v18 = vpop.permute.xlu0 %5034 }
 0x4d9   : > { %v4658_v5 = vsel %vm4650_vm11, %v4623_v59, %v16044_v24  ;;  %v5712_v26 = vsel %vm4405_vm4, %v5678_v17, %v16045_v62  ;;  %8956 = vrot.lane.b32.xlu0 %v16046_v49, %s15566_s15  ;;  %v16047_v31 = vunpack.i.h.bf16 %v16030_v53  ;;  %v16049_v32 = vunpack.i.l.bf16 %v16048_v1  ;;  %v16053_v59 = vld [vmem:[#allocation59_spill] sm:$0xff]  ;;  %v16060_v24 = vld [vmem:[#allocation152_spill] sm:$0xff] }
 0x4da   : > { %v8354_v22 = vunpack.i.h.bf16 %v16029_v23  ;;  %v5746_v46 = vsel %vm4440_vm5, %v5712_v26, %v16050_v33  ;;  %v16052_v38 = vpack.i.bf16 %v16051_v8, %v15967_v56  ;;  %v16054_v28 = vunpack.i.l.bf16 %v16053_v59  ;;  %v12879_v56 = vpop.permute.xlu1 %5496  ;;  %v16061_v62 = vld [vmem:[#allocation96_spill] sm:$0xff]  ;;  %v16067_v33 = vld [vmem:[#allocation37_spill] sm:$0xff] }
 0x4db   : > { %v4761_v4 = vsel %vm4755_vm14, %v4726_v20, %v16047_v31  ;;  %v4624_v35 = vsel %vm4615_vm10, %v4589_v27, %v16049_v32  ;;  %v16055_v20 = vunpack.i.h.bf16 %v16035_v15  ;;  %v16056_v27 = vld [vmem:[#allocation134_spill] sm:$0xff]  ;;  %v8359_v23 = vunpack.i.h.bf16 %v16041_v55  ;;  %v16063_v26 = vld [vmem:[#allocation156_spill] sm:$0xff]  ;;  %v16064_v31 = vld [vmem:[#allocation157_spill] sm:$0xff] }
 0x4dc   : > { %6057 = vmatmul.mubr.f32.gmra.mrb[50].mxu1 %v4761_v4  ;;  %8961 = vrot.lane.b32.xlu1 %v16052_v38, %s15563_s14  ;;  %v4727_v53 = vsel %vm4720_vm13, %v4692_v50, %v16054_v28  ;;  %v8363_v44 = vunpack.i.l.bf16 %v16056_v27  ;;  %v5745_v39 = vsel %vm4440_vm5, %v5711_v12, %v16057_v0  ;;  %v16058_v17 = vunpack.i.h.bf16 %v16038_v11  ;;  %v9334_v4 = vld [vmem:[#allocation3 + $0x116] sm:$0xff]  ;;  %v16068_v28 = vld [vmem:[#allocation186_spill] sm:$0xff] }
 0x4dd   : > { %v4590_v30 = vsel %vm4580_vm9, %v4555_v52, %v16055_v20  ;;  %7048 = vmatprep.mubr.msk.f32.mxu1 %vm4545_vm8, %v5812_v47  ;;  %v4663_v15 = vsel %vm4650_vm11, %v4628_v10, %v8358_v41  ;;  %v16059_v52 = vld [vmem:[#allocation143_spill] sm:$0xff]  ;;  %v5779_v55 = vsel %vm4475_vm7, %v5745_v39, %v16060_v24  ;;  %v16062_v12 = vunpack.i.l.bf16 %v16061_v62  ;;  %5403 = vrot.lane.b32.xlu0 %v9334_v4, %s15593_s1  ;;  %v12919_v39 = vpop.permute.xlu0 %8851 }
 0x4de   : > { %v4693_v50 = vsel %vm4685_vm12, %v4658_v5, %v16058_v17  ;;  %v5679_v51 = vsel %vm4370_vm3, %v5645_v29, %v16059_v52  ;;  %v5813_v49 = vsel %vm4510_vm6, %v5779_v55, %v16063_v26  ;;  %v5780_v11 = vsel %vm4475_vm7, %v5746_v46, %v16064_v31  ;;  %v12898_v5 = vld [vmem:[#allocation3 + $0x118] sm:$0xff]  ;;  %v12921_v17 = vpop.permute.xlu1 %4827  ;;  %v9335_v26 = vld [vmem:[#allocation3 + $0xae] sm:$0xff] }
 0x4df   : > { %v4659_v47 = vsel %vm4650_vm11, %v4624_v35, %v16062_v12  ;;  %v4762_v41 = vsel %vm4755_vm14, %v4727_v53, %v8273_v61  ;;  %v16065_v29 = vunpack.i.h.bf16 %v16048_v1  ;;  %v8274_v32 = vunpack.i.h.bf16 %v16033_v63  ;;  %v16066_v35 = vld [vmem:[#allocation164_spill] sm:$0xff]  ;;  %v16070_v1 = vld [vmem:[#allocation126_spill] sm:$0xff]  ;;  %v16071_v63 = vld [vmem:[#allocation195_spill] sm:$0xff] }
 0x4e0   : > { %v5612_v38 = vsel %vm4300_vm1, %v16067_v33, %v16066_v35  ;;  %v5713_v46 = vsel %vm4405_vm4, %v5679_v51, %v16068_v28  ;;  %6062 = vmatmul.mubr.f32.gmra.mrb[52].mxu1 %v4762_v41  ;;  %5506 = vrot.lane.b32.xlu1 %v12898_v5, %s15583_s30  ;;  %v16069_v61 = vunpack.i.h.bf16 %v16053_v59  ;;  %v8344_v20 = vunpack.i.h.bf16 %v16070_v1  ;;  %v16073_v55 = vld [vmem:[#allocation161_spill] sm:$0xff]  ;;  %v16078_v41 = vld [vmem:[#allocation188_spill] sm:$0xff] }
 0x4e1   : > { %v4625_v10 = vsel %vm4615_vm10, %v4590_v30, %v16065_v29  ;;  %v4629_v30 = vsel %vm4615_vm10, %v4594_v13, %v8354_v22  ;;  %v5747_v0 = vsel %vm4440_vm5, %v5713_v46, %v16071_v63  ;;  %7049 = vmatprep.mubr.msk.f32.mxu1 %vm4545_vm8, %v5813_v49  ;;  %v4694_v51 = vsel %vm4685_vm12, %v4659_v47, %v8223_v58  ;;  %v16074_v49 = vld [vmem:[#allocation166_spill] sm:$0xff]  ;;  %v16076_v47 = vld [vmem:[#allocation179_spill] sm:$0xff]  ;;  %v16079_v29 = vld [vmem:[#allocation85_spill] sm:$0xff] }
 0x4e2   : > { %v4728_v53 = vsel %vm4720_vm13, %v4693_v50, %v16069_v61  ;;  %v8364_v59 = vunpack.i.h.bf16 %v16056_v27  ;;  %v4664_v50 = vsel %vm4650_vm11, %v4629_v30, %v8359_v23  ;;  %v16072_v24 = vunpack.i.h.bf16 %v16061_v62  ;;  %5107 = vrot.lane.b32.xlu0 %v12898_v5, %s15586_s22  ;;  %v16075_v27 = vld [vmem:[#allocation145_spill] sm:$0xff]  ;;  %v12956_v61 = vpop.permute.xlu0 %8856 }
 0x4e3   : > { %v4698_v22 = vsel %vm4685_vm12, %v4663_v15, %v8363_v44  ;;  %v5646_v12 = vsel %vm4335_vm2, %v5612_v38, %v16073_v55  ;;  %v5579_v31 = vsel %vm4265_vm0, %v9335_v26, %v16074_v49  ;;  %v4763_v58 = vsel %vm4755_vm14, %v4728_v53, %v8274_v32  ;;  %v16077_v15 = vld [vmem:[#allocation190_spill] sm:$0xff]  ;;  %v16081_v32 = vld [vmem:[#allocation137_spill] sm:$0xff]  ;;  %v12958_v53 = vpop.permute.xlu1 %8861  ;;  %v16086_v49 = vld [vmem:[#allocation140_spill] sm:$0xff] }
 0x4e4   : > { %v4660_v13 = vsel %vm4650_vm11, %v4625_v10, %v16072_v24  ;;  %v5814_v23 = vsel %vm4510_vm6, %v5780_v11, %v16075_v27  ;;  %v8343_v62 = vunpack.i.l.bf16 %v16070_v1  ;;  %v5680_v44 = vsel %vm4370_vm3, %v5646_v12, %v16076_v47  ;;  %6067 = vmatmul.mubr.f32.gmra.mrb[54].mxu1 %v4763_v58  ;;  %8971 = vrot.lane.b32.xlu1 %v16078_v41, %s15573_s29  ;;  %v16082_v38 = vld [vmem:[#allocation141_spill] sm:$0xff] }
 0x4e5   : > { %v5781_v4 = vsel %vm4475_vm7, %v5747_v0, %v16077_v15  ;;  %v16080_v10 = vunpack.i.l.bf16 %v16079_v29  ;;  %v8368_v33 = vunpack.i.l.bf16 %v16081_v32  ;;  %v8374_v11 = vunpack.i.h.bf16 %v16082_v38  ;;  %v16083_v28 = vld [vmem:[#allocation197_spill] sm:$0xff]  ;;  %7050 = vmatprep.mubr.msk.f32.mxu1 %vm4545_vm8, %v5814_v23  ;;  %v16085_v0 = vld [vmem:[#allocation136_spill] sm:$0xff] }
 0x4e6   : > { %v5714_v46 = vsel %vm4405_vm4, %v5680_v44, %v16083_v28  ;;  %v16084_v30 = vunpack.i.h.bf16 %v15991_v21  ;;  %v8379_v24 = vunpack.i.h.bf16 %v16085_v0  ;;  %v8373_v55 = vunpack.i.l.bf16 %v16082_v38  ;;  %v9336_v26 = vld [vmem:[#allocation3 + $0xb6] sm:$0xff]  ;;  %8966 = vrot.lane.b32.xlu0 %v11824_v40, %s15593_s1  ;;  %v16094_v28 = vld [vmem:[#allocation199_spill] sm:$0xff] }
 0x4e7   : > { %v4729_v35 = vsel %vm4720_vm13, %v4694_v51, %v16080_v10  ;;  %v8378_v51 = vunpack.i.l.bf16 %v16085_v0  ;;  %v4699_v12 = vsel %vm4685_vm12, %v4664_v50, %v8364_v59  ;;  %v5580_v58 = vsel %vm4265_vm0, %v9336_v26, %v16086_v49  ;;  %v16087_v27 = vld [vmem:[#allocation165_spill] sm:$0xff]  ;;  %v16088_v44 = vld [vmem:[#allocation192_spill] sm:$0xff]  ;;  %v16089_v59 = vld [vmem:[#allocation194_spill] sm:$0xff]  ;;  %v12997_v0 = vpop.permute.xlu1 %5286 }
 0x4e8   : > { %v4695_v63 = vsel %vm4685_vm12, %v4660_v13, %v16084_v30  ;;  %v5613_v23 = vsel %vm4300_vm1, %v5579_v31, %v16087_v27  ;;  %v4764_v21 = vsel %vm4755_vm14, %v4729_v35, %v8343_v62  ;;  %v12974_v13 = vld [vmem:[#allocation3 + $0x11a] sm:$0xff]  ;;  %v5815_v15 = vsel %vm4510_vm6, %v5781_v4, %v16088_v44  ;;  %v16092_v62 = vld [vmem:[#allocation58_spill] sm:$0xff]  ;;  %v12995_v30 = vpop.permute.xlu0 %5181  ;;  %v16096_v49 = vld [vmem:[#allocation167_spill] sm:$0xff] }
 0x4e9   : > { %v8369_v41 = vunpack.i.h.bf16 %v16081_v32  ;;  %v5748_v50 = vsel %vm4440_vm5, %v5714_v46, %v16089_v59  ;;  %v16090_v10 = vld [vmem:[#allocation201_spill] sm:$0xff]  ;;  %6072 = vmatmul.mubr.f32.gmra.mrb[56].mxu1 %v4764_v21  ;;  %5191 = vrot.lane.b32.xlu1 %v12974_v13, %s15589_s0  ;;  %v16091_v40 = vunpack.i.h.bf16 %v16079_v29  ;;  %v4526_v35 = vsel %vm4510_vm6, %v16092_v62, %v8374_v11  ;;  %v16097_v27 = vld [vmem:[#allocation178_spill] sm:$0xff]  ;;  %v16098_v21 = vld [vmem:[#allocation196_spill] sm:$0xff] }
 0x4ea   : > { %v5614_v38 = vsel %vm4300_vm1, %v5580_v58, %v16090_v10  ;;  %v16093_v4 = vld [vmem:[#allocation169_spill] sm:$0xff]  ;;  %v5782_v46 = vsel %vm4475_vm7, %v5748_v50, %v16094_v28  ;;  %7051 = vmatprep.mubr.msk.f32.mxu1 %vm4545_vm8, %v5815_v15  ;;  %v13000_v26 = vsel %vm4720_vm13, %v4698_v22, %v8368_v33  ;;  %v8409_v11 = vunpack.i.h.bf16 %v16096_v49  ;;  %v16099_v59 = vld [vmem:[#allocation203_spill] sm:$0xff]  ;;  %4837 = vrot.lane.b32.xlu0 %v12457_v43, %s15567_s26  ;;  %v16102_v62 = vld [vmem:[#allocation208_spill] sm:$0xff] }
 0x4eb   : > { %v4730_v31 = vsel %vm4720_vm13, %v4695_v63, %v16091_v40  ;;  %v5647_v32 = vsel %vm4335_vm2, %v5613_v23, %v16093_v4  ;;  %v16095_v29 = vld [vmem:[#allocation73_spill] sm:$0xff]  ;;  %v8408_v58 = vunpack.i.l.bf16 %v16096_v49  ;;  %v5648_v44 = vsel %vm4335_vm2, %v5614_v38, %v16098_v21  ;;  %v16103_v38 = vld [vmem:[#allocation180_spill] sm:$0xff] }
 0x4ec   : > { %v4525_v63 = vsel %vm4510_vm6, %v16095_v29, %v8373_v55  ;;  %v5681_v23 = vsel %vm4370_vm3, %v5647_v32, %v16097_v27  ;;  %v9337_v15 = vld [vmem:[#allocation3 + $0xbe] sm:$0xff]  ;;  %v4765_v33 = vsel %vm4755_vm14, %v4730_v31, %v8344_v20  ;;  %v5682_v4 = vsel %vm4370_vm3, %v5648_v44, %v16102_v62  ;;  %v13035_v49 = vpop.permute.xlu0 %4933  ;;  %v16109_v21 = vld [vmem:[#allocation172_spill] sm:$0xff] }
 0x4ed   : > { %v5581_v50 = vsel %vm4265_vm0, %v9337_v15, %v16099_v59  ;;  %v16100_v10 = vld [vmem:[#allocation213_spill] sm:$0xff]  ;;  %v16101_v55 = vld [vmem:[#allocation170_spill] sm:$0xff]  ;;  %6077 = vmatmul.mubr.f32.gmra.mrb[58].mxu1 %v4765_v33  ;;  %4943 = vrot.lane.b32.xlu1 %v12515_v45, %s15594_s2  ;;  %v5816_v32 = vsel %vm4510_vm6, %v5782_v46, %v16103_v38  ;;  %v13027_v28 = vsel %vm4720_vm13, %v4699_v12, %v8369_v41  ;;  %v13037_v45 = vpop.permute.xlu1 %5036  ;;  %v16106_v12 = vld [vmem:[#allocation212_spill] sm:$0xff]  ;;  %v8418_v44 = vunpack.i.l.bf16 %v16109_v21 }
 0x4ee   : > { %v5715_v22 = vsel %vm4405_vm4, %v5681_v23, %v16100_v10  ;;  %v8414_v40 = vunpack.i.h.bf16 %v16101_v55  ;;  %v4560_v43 = vsel %vm4545_vm8, %v4525_v63, %v8378_v51  ;;  %v4561_v1 = vsel %vm4545_vm8, %v4526_v35, %v8379_v24  ;;  %v16104_v31 = vld [vmem:[#allocation214_spill] sm:$0xff]  ;;  %7052 = vmatprep.mubr.msk.f32.mxu1 %vm4545_vm8, %v5816_v32  ;;  %v16107_v51 = vld [vmem:[#allocation219_spill] sm:$0xff]  ;;  %v16110_v15 = vld [vmem:[#allocation205_spill] sm:$0xff] }
 0x4ef   : > { %v8413_v20 = vunpack.i.l.bf16 %v16101_v55  ;;  %v5716_v29 = vsel %vm4405_vm4, %v5682_v4, %v16104_v31  ;;  %v16105_v23 = vld [vmem:[#allocation198_spill] sm:$0xff]  ;;  %v5749_v41 = vsel %vm4440_vm5, %v5715_v22, %v16106_v12  ;;  %v16111_v10 = vld [vmem:[#allocation215_spill] sm:$0xff]  ;;  %v16115_v31 = vld [vmem:[#allocation217_spill] sm:$0xff] }
 0x4f0   : > { %v5615_v46 = vsel %vm4300_vm1, %v5581_v50, %v16105_v23  ;;  %v5750_v24 = vsel %vm4440_vm5, %v5716_v29, %v16107_v51  ;;  %v16108_v35 = vld [vmem:[#allocation54_spill] sm:$0xff]  ;;  %v5783_v33 = vsel %vm4475_vm7, %v5749_v41, %v16111_v10  ;;  %v16112_v55 = vld [vmem:[#allocation163_spill] sm:$0xff]  ;;  %v4596_v38 = vsel %vm4580_vm9, %v4561_v1, %v8414_v40  ;;  %v16117_v41 = vld [vmem:[#allocation185_spill] sm:$0xff] }
 0x4f1   : > { %v4766_v63 = vsel %vm4755_vm14, %v16108_v35, %v8408_v58  ;;  %v5649_v59 = vsel %vm4335_vm2, %v5615_v46, %v16110_v15  ;;  %8976 = vrot.lane.b32.xlu0 %v16112_v55, %s15583_s30  ;;  %v16113_v50 = vld [vmem:[#allocation55_spill] sm:$0xff]  ;;  %v5817_v29 = vsel %vm4510_vm6, %v5783_v33, %v16115_v31  ;;  %v16116_v23 = vld [vmem:[#allocation154_spill] sm:$0xff]  ;;  %v4595_v46 = vsel %vm4580_vm9, %v4560_v43, %v8413_v20  ;;  %v16118_v51 = vld [vmem:[#allocation216_spill] sm:$0xff]  ;;  %v13072_v15 = vpop.permute.xlu0 %8866 }
 0x4f2   : > { %v4767_v22 = vsel %vm4755_vm14, %v16113_v50, %v8409_v11  ;;  %v16114_v32 = vld [vmem:[#allocation207_spill] sm:$0xff]  ;;  %6082 = vmatmul.mubr.f32.gmra.mrb[60].mxu1 %v4766_v63  ;;  %8981 = vrot.lane.b32.xlu1 %v16116_v23, %s15577_s16  ;;  %v5784_v35 = vsel %vm4475_vm7, %v5750_v24, %v16118_v51  ;;  %v16119_v40 = vld [vmem:[#allocation230_spill] sm:$0xff]  ;;  %v13074_v63 = vpop.permute.xlu1 %8871  ;;  %v8419_v43 = vunpack.i.h.bf16 %v16109_v21  ;;  %v4630_v24 = vsel %vm4615_vm10, %v4595_v46, %v8418_v44  ;;  %v16123_v31 = vld [vmem:[#allocation176_spill] sm:$0xff] }
 0x4f3   : > { %v5683_v58 = vsel %vm4370_vm3, %v5649_v59, %v16114_v32  ;;  %v9338_v12 = vld [vmem:[#allocation3 + $0xc6] sm:$0xff]  ;;  %7053 = vmatprep.mubr.msk.f32.mxu1 %vm4545_vm8, %v5817_v29  ;;  %v16124_v23 = vld [vmem:[#allocation200_spill] sm:$0xff]  ;;  %v13087_v51 = vld [vmem:[#allocation3 + $0x11c] sm:$0xff] }
 0x4f4   : > { %v5582_v11 = vsel %vm4265_vm0, %v9338_v12, %v16117_v41  ;;  %v5717_v1 = vsel %vm4405_vm4, %v5683_v58, %v16119_v40  ;;  %v16120_v59 = vld [vmem:[#allocation171_spill] sm:$0xff]  ;;  %v16121_v20 = vld [vmem:[#allocation218_spill] sm:$0xff]  ;;  %v8428_v58 = vunpack.i.l.bf16 %v16123_v31  ;;  %v8463_v29 = vunpack.i.l.bf16 %v16124_v23  ;;  %v16125_v12 = vld [vmem:[#allocation221_spill] sm:$0xff] }
 0x4f5   : > { %v8423_v10 = vunpack.i.l.bf16 %v16120_v59  ;;  %v5616_v33 = vsel %vm4300_vm1, %v5582_v11, %v16121_v20  ;;  %v16122_v55 = vld [vmem:[#allocation235_spill] sm:$0xff]  ;;  %5296 = vrot.lane.b32.xlu0 %v13087_v51, %s15595_s19  ;;  %v8424_v21 = vunpack.i.h.bf16 %v16120_v59  ;;  %v16126_v40 = vld [vmem:[#allocation220_spill] sm:$0xff]  ;;  %v16127_v20 = vld [vmem:[#allocation226_spill] sm:$0xff] }
 0x4f6   : > { %v5751_v50 = vsel %vm4440_vm5, %v5717_v1, %v16122_v55  ;;  %v5650_v41 = vsel %vm4335_vm2, %v5616_v33, %v16125_v12  ;;  %v9340_v11 = vld [vmem:[#allocation3 + $0xce] sm:$0xff]  ;;  %6087 = vmatmul.mubr.f32.gmra.mrb[62].mxu1 %v4767_v22  ;;  %v9341_v46 = vld [vmem:[#allocation3 + $0x11e] sm:$0xff]  ;;  %v13107_v22 = vpop.permute.xlu0 %5395 }
 0x4f7   : > { %v5583_v1 = vsel %vm4265_vm0, %v9340_v11, %v16126_v40  ;;  %v5684_v44 = vsel %vm4370_vm3, %v5650_v41, %v16127_v20  ;;  %5405 = vrot.lane.b32.xlu1 %v9341_v46, %s15593_s1  ;;  %v16128_v55 = vld [vmem:[#allocation202_spill] sm:$0xff]  ;;  %v16129_v12 = vld [vmem:[#allocation223_spill] sm:$0xff]  ;;  %v16130_v32 = vld [vmem:[#allocation232_spill] sm:$0xff]  ;;  %v8833_v11 = vunpack.i.l.bf16 %v12667_v2  ;;  %v13109_v41 = vpop.permute.xlu1 %8876  ;;  %v4631_v40 = vsel %vm4615_vm10, %v4596_v38, %v8419_v43 }
 0x4f8   : > { %v5818_v33 = vsel %vm4510_vm6, %v5784_v35, %v16128_v55  ;;  %v5617_v4 = vsel %vm4300_vm1, %v5583_v1, %v16129_v12  ;;  %v5785_v59 = vsel %vm4475_vm7, %v5751_v50, %v16130_v32  ;;  %v16131_v62 = vld [vmem:[#allocation237_spill] sm:$0xff]  ;;  %v16132_v35 = vld [vmem:[#allocation175_spill] sm:$0xff]  ;;  %v8843_v1 = vunpack.i.l.bf16 %v12779_v34  ;;  %v16133_v12 = vld [vmem:[#allocation222_spill] sm:$0xff] }
 0x4f9   : > { %v5718_v27 = vsel %vm4405_vm4, %v5684_v44, %v16131_v62  ;;  %7054 = vmatprep.mubr.msk.f32.mxu1 %vm4545_vm8, %v5818_v33  ;;  %v8433_v46 = vunpack.i.l.bf16 %v16132_v35  ;;  %v4665_v55 = vsel %vm4650_vm11, %v4630_v24, %v8423_v10  ;;  %v8464_v32 = vunpack.i.h.bf16 %v16124_v23  ;;  %v9342_v50 = vld [vmem:[#allocation3 + $0xd6] sm:$0xff]  ;;  %5046 = vrot.lane.b32.xlu0 %v12582_v36, %s15571_s24  ;;  %v13122_v33 = vld [vmem:[#allocation3 + $0x120] sm:$0xff]  ;;  %v16137_v20 = vld [vmem:[#allocation239_spill] sm:$0xff] }
 0x4fa   : > { %v5584_v62 = vsel %vm4265_vm0, %v9342_v50, %v12727_v6  ;;  %v4768_v44 = vsel %vm4755_vm14, %v13000_v26, %v8463_v29  ;;  %v4700_v38 = vsel %vm4685_vm12, %v4665_v55, %v8428_v58  ;;  %v8429_v43 = vunpack.i.h.bf16 %v16123_v31  ;;  %v16134_v24 = vld [vmem:[#allocation236_spill] sm:$0xff]  ;;  %v16135_v6 = vld [vmem:[#allocation234_spill] sm:$0xff]  ;;  %v16136_v26 = vld [vmem:[#allocation225_spill] sm:$0xff] }
 0x4fb   : > { %v5651_v10 = vsel %vm4335_vm2, %v5617_v4, %v16133_v12  ;;  %v5752_v23 = vsel %vm4440_vm5, %v5718_v27, %v16134_v24  ;;  %6092 = vmatmul.mubr.f32.gmra.mrb[64].mxu1 %v4768_v44  ;;  %5109 = vrot.lane.b32.xlu1 %v13122_v33, %s15586_s22  ;;  %v5819_v50 = vsel %vm4510_vm6, %v5785_v59, %v16135_v6  ;;  %v8848_v4 = vunpack.i.l.bf16 %v12781_v57  ;;  %v5499_v27 = vpop.permute.xlu0 %5498  ;;  %v13142_v55 = vpop.permute.xlu1 %4829  ;;  %v16138_v24 = vld [vmem:[#allocation182_spill] sm:$0xff] }
 0x4fc   : > { %v5685_v29 = vsel %vm4370_vm3, %v5651_v10, %v16136_v26  ;;  %v5786_v58 = vsel %vm4475_vm7, %v5752_v23, %v16137_v20  ;;  %v4492_v31 = vsel %vm4475_vm7, %v12723_v37, %v8833_v11  ;;  %7055 = vmatprep.mubr.msk.f32.mxu1 %vm4545_vm8, %v5819_v50  ;;  %v8838_v44 = vunpack.i.l.bf16 %v12628_v48  ;;  %v16141_v6 = vld [vmem:[#allocation174_spill] sm:$0xff]  ;;  %v16143_v50 = vld [vmem:[#allocation227_spill] sm:$0xff] }
 0x4fd   : > { %v5618_v59 = vsel %vm4300_vm1, %v5584_v62, %v12729_v3  ;;  %v4527_v12 = vsel %vm4510_vm6, %v4492_v31, %v8843_v1  ;;  %v8853_v10 = vunpack.i.l.bf16 %v12919_v39  ;;  %v5719_v20 = vsel %vm4405_vm4, %v5685_v29, %v12669_v19  ;;  %v16140_v19 = vld [vmem:[#allocation189_spill] sm:$0xff] }
 0x4fe   : > { %v5652_v37 = vsel %vm4335_vm2, %v5618_v59, %v12877_v18  ;;  %v8858_v11 = vunpack.i.l.bf16 %v12956_v61  ;;  %v16139_v23 = vpack.i.bf16 %v16138_v24, %v16051_v8  ;;  %v4769_v3 = vsel %vm4755_vm14, %v13027_v28, %v8464_v32  ;;  %v16144_v24 = vld [vmem:[#allocation242_spill] sm:$0xff] }
 0x4ff   : > { %v8434_v1 = vunpack.i.h.bf16 %v16132_v35  ;;  %v5753_v62 = vsel %vm4440_vm5, %v5719_v20, %v12829_v25  ;;  %6097 = vmatmul.mubr.f32.gmra.mrb[66].mxu1 %v4769_v3  ;;  %v16142_v18 = vpack.i.bf16 %v16140_v19, %v16141_v6  ;;  %v5820_v29 = vsel %vm4510_vm6, %v5786_v58, %v16143_v50  ;;  %v13173_v35 = vpop.permute.xlu0 %8881  ;;  %v13175_v25 = vpop.permute.xlu1 %8886 }
 0x500   : > { %8986 = vrot.lane.b32.xlu0 %v16139_v23, %s15564_s12  ;;  %v4666_v8 = vsel %vm4650_vm11, %v4631_v40, %v8424_v21  ;;  %v8839_v31 = vunpack.i.h.bf16 %v12628_v48  ;;  %v4562_v28 = vsel %vm4545_vm8, %v4527_v12, %v8848_v4  ;;  %7056 = vmatprep.mubr.msk.f32.mxu1 %vm4545_vm8, %v5820_v29  ;;  %v4735_v32 = vsel %vm4720_vm13, %v4700_v38, %v8433_v46  ;;  %v13192_v38 = vld [vmem:[#allocation3 + $0x122] sm:$0xff] }
 0x501   : > { %8991 = vrot.lane.b32.xlu1 %v16142_v18, %s15565_s25  ;;  %v4701_v59 = vsel %vm4685_vm12, %v4666_v8, %v8429_v43  ;;  %v4597_v20 = vsel %vm4580_vm9, %v4562_v28, %v8853_v10  ;;  %v8863_v58 = vunpack.i.l.bf16 %v12958_v53  ;;  %v5686_v21 = vsel %vm4370_vm3, %v5652_v37, %v16144_v24  ;;  %v16145_v43 = vld [vmem:[#allocation100_spill] sm:$0xff] }
 0x502   : > { %v4770_v48 = vsel %vm4755_vm14, %v4735_v32, %v8838_v44  ;;  %v5787_v40 = vsel %vm4475_vm7, %v5753_v62, %v12831_v60  ;;  %v4632_v4 = vsel %vm4615_vm10, %v4597_v20, %v8858_v11  ;;  %v5720_v12 = vsel %vm4405_vm4, %v5686_v21, %v12995_v30  ;;  %v16146_v10 = vld [vmem:[#allocation68_spill] sm:$0xff] }
 0x503   : > { %v8868_v46 = vunpack.i.l.bf16 %v13072_v15  ;;  %v4388_v37 = vsel %vm4370_vm3, %v16146_v10, %v16145_v43  ;;  %v5821_v44 = vsel %vm4510_vm6, %v5787_v40, %v12879_v56  ;;  %6102 = vmatmul.mubr.f32.gmra.mrb[68].mxu1 %v4770_v48  ;;  %v8339_v60 = vunpack.i.h.bf16 %v15933_v54  ;;  %v5184_v3 = vpop.permute.xlu0 %5183  ;;  %v5289_v62 = vpop.permute.xlu1 %5288  ;;  %v13239_v20 = vld [vmem:[#allocation3 + $0xf6] sm:$0xff] }
 0x504   : > { %5508 = vrot.lane.b32.xlu0 %v13122_v33, %s15583_s30  ;;  %v16147_v30 = vunpack.i.h.bf16 %v15938_v16  ;;  %v8834_v23 = vunpack.i.h.bf16 %v12667_v2  ;;  %7057 = vmatprep.mubr.msk.f32.mxu1 %vm4545_vm8, %v5821_v44  ;;  %v4736_v19 = vsel %vm4720_vm13, %v4701_v59, %v8434_v1  ;;  %v8844_v56 = vunpack.i.h.bf16 %v12779_v34  ;;  %v13263_v44 = vld [vmem:[#allocation3 + $0x124] sm:$0xff] }
 0x505   : > { %5193 = vrot.lane.b32.xlu1 %v13192_v38, %s15589_s0  ;;  %v4667_v6 = vsel %vm4650_vm11, %v4632_v4, %v8863_v58  ;;  %v5754_v18 = vsel %vm4440_vm5, %v5720_v12, %v12997_v0  ;;  %v8873_v54 = vunpack.i.l.bf16 %v13074_v63  ;;  %v8883_v2 = vunpack.i.l.bf16 %v13173_v35  ;;  %v13224_v0 = vld [vmem:[#allocation3 + $0xec] sm:$0xff] }
 0x506   : > { %v4423_v11 = vsel %vm4405_vm4, %v4388_v37, %v16147_v30  ;;  %v5788_v16 = vsel %vm4475_vm7, %v5754_v18, %v13107_v22  ;;  %v4771_v50 = vsel %vm4755_vm14, %v4736_v19, %v8839_v31  ;;  %v4702_v1 = vsel %vm4685_vm12, %v4667_v6, %v8868_v46  ;;  %v16148_v22 = vld [vmem:[#allocation52_spill] sm:$0xff]  ;;  %v9344_v31 = vld [vmem:[#allocation3 + $0xde] sm:$0xff]  ;;  %v13269_v30 = vld [vmem:[#allocation3 + $0x126] sm:$0xff] }
 0x507   : > { %v4458_v34 = vsel %vm4440_vm5, %v4423_v11, %v8339_v60  ;;  %v5822_v29 = vsel %vm4510_vm6, %v5788_v16, %v5499_v27  ;;  %6107 = vmatmul.mubr.f32.gmra.mrb[70].mxu1 %v4771_v50  ;;  %v8995_v8 = vpack.i.bf16 %v16148_v22, %v13224_v0  ;;  %v5585_v32 = vsel %vm4265_vm0, %v9344_v31, %v12921_v17  ;;  %v13233_v27 = vpop.permute.xlu0 %4935  ;;  %v13235_v59 = vpop.permute.xlu1 %5038  ;;  %v16149_v60 = vld [vmem:[#allocation241_spill] sm:$0xff]  ;;  %v16150_v11 = vld [vmem:[#allocation116_spill] sm:$0xff] }
 0x508   : > { %4839 = vrot.lane.b32.xlu0 %v12617_v7, %s15567_s26  ;;  %v4493_v28 = vsel %vm4475_vm7, %v4458_v34, %v8834_v23  ;;  %v8849_v7 = vunpack.i.h.bf16 %v12781_v57  ;;  %7058 = vmatprep.mubr.msk.f32.mxu1 %vm4545_vm8, %v5822_v29  ;;  %v8854_v57 = vunpack.i.h.bf16 %v12919_v39  ;;  %v5619_v17 = vsel %vm4300_vm1, %v5585_v32, %v13035_v49  ;;  %v13291_v22 = vld [vmem:[#allocation3 + $0xf8] sm:$0xff]  ;;  %v9352_v32 = vld [vmem:[#allocation3 + $0xe8] sm:$0xff] }
 0x509   : > { %4945 = vrot.lane.b32.xlu1 %v12739_v14, %s15594_s2  ;;  %v13237_v14 = vld [vmem:[#allocation3 + $0xee] sm:$0xff]  ;;  %v4528_v21 = vsel %vm4510_vm6, %v4493_v28, %v8844_v56  ;;  %v4737_v48 = vsel %vm4720_vm13, %v4702_v1, %v8873_v54  ;;  %v8859_v40 = vunpack.i.h.bf16 %v12956_v61  ;;  %v5653_v46 = vsel %vm4335_vm2, %v5619_v17, %v13037_v45 }
 0x50a   : > { %v9000_v58 = vpack.i.bf16 %v13239_v20, %v13237_v14  ;;  %v4772_v4 = vsel %vm4755_vm14, %v4737_v48, %v8883_v2  ;;  %v4563_v12 = vsel %vm4545_vm8, %v4528_v21, %v8849_v7  ;;  %v8864_v61 = vunpack.i.h.bf16 %v12958_v53  ;;  %v13282_v54 = vld [vmem:[#allocation3 + $0x128] sm:$0xff]  ;;  %v16152_v7 = vld [vmem:[#allocation21_spill] sm:$0xff] }
 0x50b   : > { %6112 = vmatmul.mubr.f32.gmra.mrb[72].mxu1 %v4772_v4  ;;  %v13255_v39 = vpop.permute.xlu0 %8891  ;;  %v13257_v43 = vpop.permute.xlu1 %8896  ;;  %v4598_v49 = vsel %vm4580_vm9, %v4563_v12, %v8854_v57  ;;  %v8869_v37 = vunpack.i.h.bf16 %v13072_v15  ;;  %v5687_v45 = vsel %vm4370_vm3, %v5653_v46, %v16149_v60  ;;  %v8318_v23 = vunpack.i.l.bf16 %v16150_v11  ;;  %v16151_v1 = vld [vmem:[#allocation119_spill] sm:$0xff]  ;;  %v16153_v4 = vld [vmem:[#allocation148_spill] sm:$0xff] }
 0x50c   : > { %8996 = vrot.lane.b32.xlu0 %v8995_v8, %s15574_s13  ;;  %v4633_v10 = vsel %vm4615_vm10, %v4598_v49, %v8859_v40  ;;  %v5721_v53 = vsel %vm4405_vm4, %v5687_v45, %v5184_v3  ;;  %v8874_v6 = vunpack.i.h.bf16 %v13074_v63  ;;  %v8884_v18 = vunpack.i.h.bf16 %v13173_v35  ;;  %v9349_v3 = vld [vmem:[#allocation3 + $0x90] sm:$0xff]  ;;  %v9354_v46 = vld [vmem:[#allocation3 + $0xe6] sm:$0xff] }
 0x50d   : > { %9001 = vrot.lane.b32.xlu1 %v9000_v58, %s15566_s15  ;;  %v4668_v15 = vsel %vm4650_vm11, %v4633_v10, %v8864_v61  ;;  %v5755_v2 = vsel %vm4440_vm5, %v5721_v53, %v5289_v62  ;;  %v4284_v50 = vsel %vm4265_vm0, %v9349_v3, %v8318_v23  ;;  %v8328_v34 = vunpack.i.l.bf16 %v16151_v1  ;;  %v9351_v8 = vld [vmem:[#allocation3 + $0xf0] sm:$0xff]  ;;  %v9353_v58 = vld [vmem:[#allocation3 + $0xe0] sm:$0xff] }
 0x50e   : > { %v4703_v16 = vsel %vm4685_vm12, %v4668_v15, %v8869_v37  ;;  %v13294_v28 = vpack.i.bf16 %v13291_v22, %v9351_v8  ;;  %v8323_v62 = vunpack.i.l.bf16 %v16152_v7  ;;  %v9010_v21 = vpack.i.bf16 %v9352_v32, %v9353_v58  ;;  %v16154_v45 = vld [vmem:[#allocation91_spill] sm:$0xff]  ;;  %v16155_v53 = vld [vmem:[#allocation149_spill] sm:$0xff] }
 0x50f   : > { %v5398_v19 = vpop.permute.xlu0 %5397  ;;  %v13275_v56 = vpop.permute.xlu1 %8901  ;;  %v4738_v57 = vsel %vm4720_vm13, %v4703_v16, %v8874_v6  ;;  %v8398_v12 = vunpack.i.l.bf16 %v16153_v4  ;;  %v5586_v49 = vsel %vm4265_vm0, %v9354_v46, %v13142_v55  ;;  %v8878_v15 = vunpack.i.l.bf16 %v13109_v41  ;;  %v13330_v16 = vld [vmem:[#allocation3 + $0x104] sm:$0xff] }
 0x510   : > { %5298 = vrot.lane.b32.xlu0 %v13263_v44, %s15595_s19  ;;  %v5789_v63 = vsel %vm4475_vm7, %v5755_v2, %v5398_v19  ;;  %v4773_v17 = vsel %vm4755_vm14, %v4738_v57, %v8884_v18  ;;  %v4319_v48 = vsel %vm4300_vm1, %v4284_v50, %v8323_v62  ;;  %v5620_v37 = vsel %vm4300_vm1, %v5586_v49, %v13233_v27  ;;  %v9356_v50 = vld [vmem:[#allocation3 + $0xe2] sm:$0xff] }
 0x511   : > { %5407 = vrot.lane.b32.xlu1 %v13269_v30, %s15593_s1  ;;  %v4354_v40 = vsel %vm4335_vm2, %v4319_v48, %v8328_v34  ;;  %v8403_v19 = vunpack.i.l.bf16 %v16155_v53  ;;  %v5654_v6 = vsel %vm4335_vm2, %v5620_v37, %v13235_v59  ;;  %v9015_v2 = vpack.i.bf16 %v12582_v36, %v13330_v16  ;;  %v13347_v48 = vld [vmem:[#allocation3 + $0x12a] sm:$0xff] }
 0x512   : > { %v4389_v23 = vsel %vm4370_vm3, %v4354_v40, %v16154_v45  ;;  %v8888_v3 = vunpack.i.l.bf16 %v13175_v25  ;;  %v8319_v58 = vunpack.i.h.bf16 %v16150_v11  ;;  %v8898_v57 = vunpack.i.l.bf16 %v13257_v43  ;;  %v9358_v45 = vld [vmem:[#allocation3 + $0x98] sm:$0xff] }
 0x513   : > { %v5501_v35 = vpop.permute.xlu0 %5500  ;;  %v5186_v29 = vpop.permute.xlu1 %5185  ;;  %v4424_v55 = vsel %vm4405_vm4, %v4389_v23, %v8398_v12  ;;  %v8903_v12 = vunpack.i.l.bf16 %v13275_v56 }
 0x514   : > { %5048 = vrot.lane.b32.xlu0 %v12766_v9, %s15571_s24  ;;  %v5823_v31 = vsel %vm4510_vm6, %v5789_v63, %v5501_v35  ;;  %v8893_v63 = vunpack.i.l.bf16 %v13255_v39  ;;  %v4459_v59 = vsel %vm4440_vm5, %v4424_v55, %v8403_v19  ;;  %v16156_v35 = vld [vmem:[#allocation248_spill] sm:$0xff]  ;;  %v4285_v23 = vsel %vm4265_vm0, %v9358_v45, %v8319_v58  ;;  %v16157_v58 = vld [vmem:[#allocation110_spill] sm:$0xff] }
 0x515   : > { %5111 = vrot.lane.b32.xlu1 %v13282_v54, %s15586_s22  ;;  %7059 = vmatprep.mubr.msk.f32.mxu1 %vm4545_vm8, %v5823_v31  ;;  %v5688_v8 = vsel %vm4370_vm3, %v5654_v6, %v16156_v35  ;;  %v4494_v62 = vsel %vm4475_vm7, %v4459_v59, %v8878_v15  ;;  %v8329_v19 = vunpack.i.h.bf16 %v16151_v1  ;;  %v8324_v6 = vunpack.i.h.bf16 %v16152_v7  ;;  %v9359_v7 = vld [vmem:[#allocation3 + $0xe4] sm:$0xff] }
 0x516   : > { %6117 = vmatmul.mubr.f32.gmra.mrb[74].mxu1 %v4773_v17  ;;  %v5722_v36 = vsel %vm4405_vm4, %v5688_v8, %v5186_v29  ;;  %v13353_v29 = vld [vmem:[#allocation3 + $0x12c] sm:$0xff]  ;;  %v13378_v59 = vld [vmem:[#allocation3 + $0x100] sm:$0xff] }
 0x517   : > { %v13309_v61 = vpop.permute.xlu0 %4831  ;;  %v13311_v10 = vpop.permute.xlu1 %4937  ;;  %v4320_v1 = vsel %vm4300_vm1, %v4285_v23, %v8324_v6  ;;  %v8904_v6 = vunpack.i.h.bf16 %v13275_v56 }
 0x518   : > { %9006 = vrot.lane.b32.xlu0 %v13294_v28, %s15563_s14  ;;  %v4355_v8 = vsel %vm4335_vm2, %v4320_v1, %v8329_v19 }
 0x519   : > { %9011 = vrot.lane.b32.xlu1 %v9010_v21, %s15593_s1  ;;  %v4529_v21 = vsel %vm4510_vm6, %v4494_v62, %v8888_v3  ;;  %v8399_v62 = vunpack.i.h.bf16 %v16153_v4 }
 0x51a   : > { %v4564_v40 = vsel %vm4545_vm8, %v4529_v21, %v8893_v63  ;;  %v9025_v63 = vpack.i.bf16 %v13224_v0, %v9359_v7  ;;  %v4390_v21 = vsel %vm4370_vm3, %v4355_v8, %v16157_v58  ;;  %v13439_v7 = vld [vmem:[#allocation3 + $0xfc] sm:$0xff]  ;;  %v13453_v58 = vld [vmem:[#allocation3 + $0x132] sm:$0xff] }
 0x51b   : > { %v13326_v18 = vpop.permute.xlu0 %8906  ;;  %v13328_v27 = vpop.permute.xlu1 %8911  ;;  %v4599_v55 = vsel %vm4580_vm9, %v4564_v40, %v8898_v57  ;;  %v4425_v40 = vsel %vm4405_vm4, %v4390_v21, %v8399_v62 }
 0x51c   : > { %5510 = vrot.lane.b32.xlu0 %v13282_v54, %s15583_s30  ;;  %v8908_v46 = vunpack.i.l.bf16 %v13326_v18  ;;  %v8913_v3 = vunpack.i.l.bf16 %v13328_v27 }
 0x51d   : > { %4841 = vrot.lane.b32.xlu1 %v12898_v5, %s15567_s26  ;;  %v9357_v5 = vld [vmem:[#allocation3 + $0xea] sm:$0xff] }
 0x51e   : > { %v9020_v34 = vpack.i.bf16 %v9357_v5, %v9356_v50 }
 0x51f   : > { %v5291_v31 = vpop.permute.xlu0 %5290  ;;  %v5400_v32 = vpop.permute.xlu1 %5399 }
 0x520   : > { %9016 = vrot.lane.b32.xlu0 %v9015_v2, %s15573_s29  ;;  %v5756_v17 = vsel %vm4440_vm5, %v5722_v36, %v5291_v31  ;;  %v4634_v2 = vsel %vm4615_vm10, %v4599_v55, %v8903_v12  ;;  %v8879_v12 = vunpack.i.h.bf16 %v13109_v41 }
 0x521   : > { %9021 = vrot.lane.b32.xlu1 %v9020_v34, %s15583_s30  ;;  %v5790_v11 = vsel %vm4475_vm7, %v5756_v17, %v5400_v32  ;;  %v4669_v50 = vsel %vm4650_vm11, %v4634_v2, %v8908_v46  ;;  %v13398_v46 = vld [vmem:[#allocation3 + $0x12e] sm:$0xff] }
 0x522   : > { %v4704_v32 = vsel %vm4685_vm12, %v4669_v50, %v8913_v3  ;;  %v8909_v3 = vunpack.i.h.bf16 %v13326_v18  ;;  %v13434_v50 = vld [vmem:[#allocation3 + $0x102] sm:$0xff] }
 0x523   : > { %v5041_v49 = vpop.permute.xlu0 %5040  ;;  %v5503_v37 = vpop.permute.xlu1 %5502 }
 0x524   : > { %5195 = vrot.lane.b32.xlu0 %v13347_v48, %s15589_s0  ;;  %v5824_v15 = vsel %vm4510_vm6, %v5790_v11, %v5503_v37  ;;  %v8889_v11 = vunpack.i.h.bf16 %v13175_v25  ;;  %v13403_v37 = vld [vmem:[#allocation3 + $0x130] sm:$0xff]  ;;  %v5587_v25 = vsel %vm4265_vm0, %v13237_v14, %v13309_v61 }
 0x525   : > { %5300 = vrot.lane.b32.xlu1 %v13353_v29, %s15595_s19  ;;  %7060 = vmatprep.mubr.msk.f32.mxu1 %vm4545_vm8, %v5824_v15  ;;  %v8899_v15 = vunpack.i.h.bf16 %v13257_v43  ;;  %v5621_v2 = vsel %vm4300_vm1, %v5587_v25, %v13311_v10  ;;  %v13432_v43 = vld [vmem:[#allocation3 + $0xfa] sm:$0xff]  ;;  %v9040_v10 = vpack.i.bf16 %v13330_v16, %v13439_v7 }
 0x526   : > { %v9035_v1 = vpack.i.bf16 %v13434_v50, %v13432_v43  ;;  %v5655_v56 = vsel %vm4335_vm2, %v5621_v2, %v5041_v49  ;;  %v16158_v49 = vld [vmem:[#allocation247_spill] sm:$0xff] }
 0x527   : > { %v13373_v5 = vpop.permute.xlu0 %8916  ;;  %v13375_v34 = vpop.permute.xlu1 %8926 }
 0x528   : > { %4947 = vrot.lane.b32.xlu0 %v12974_v13, %s15594_s2  ;;  %v9030_v13 = vpack.i.bf16 %v13378_v59, %v13291_v22  ;;  %v8918_v36 = vunpack.i.l.bf16 %v13373_v5  ;;  %v8928_v31 = vunpack.i.l.bf16 %v13375_v34  ;;  %v8404_v22 = vunpack.i.h.bf16 %v16155_v53 }
 0x529   : > { %5050 = vrot.lane.b32.xlu1 %v13087_v51, %s15571_s24  ;;  %v8894_v53 = vunpack.i.h.bf16 %v13255_v39  ;;  %v8919_v62 = vunpack.i.h.bf16 %v13373_v5 }
 0x52a   : > { %v4739_v0 = vsel %vm4720_vm13, %v4704_v32, %v8918_v36  ;;  %v4460_v45 = vsel %vm4440_vm5, %v4425_v40, %v8404_v22  ;;  %v5689_v36 = vsel %vm4370_vm3, %v5655_v56, %v16158_v49  ;;  %v8929_v22 = vunpack.i.h.bf16 %v13375_v34  ;;  %v9367_v56 = vld [vmem:[#allocation3 + $0xa0] sm:$0xff] }
 0x52b   : > { %v13393_v57 = vpop.permute.xlu0 %8921  ;;  %v5188_v4 = vpop.permute.xlu1 %5187  ;;  %v4774_v17 = vsel %vm4755_vm14, %v4739_v0, %v8928_v31  ;;  %v4495_v19 = vsel %vm4475_vm7, %v4460_v45, %v8879_v12 }
 0x52c   : > { %9026 = vrot.lane.b32.xlu0 %v9025_v63, %s15577_s16  ;;  %6122 = vmatmul.mubr.f32.gmra.mrb[76].mxu1 %v4774_v17  ;;  %v4530_v55 = vsel %vm4510_vm6, %v4495_v19, %v8889_v11  ;;  %v5723_v0 = vsel %vm4405_vm4, %v5689_v36, %v5188_v4  ;;  %v16159_v11 = vld [vmem:[#allocation142_spill] sm:$0xff]  ;;  %v16160_v19 = vld [vmem:[#allocation147_spill] sm:$0xff]  ;;  %v13501_v36 = vld [vmem:[#allocation3 + $0x136] sm:$0xff] }
 0x52d   : > { %9031 = vrot.lane.b32.xlu1 %v9030_v13, %s15564_s12  ;;  %v4565_v39 = vsel %vm4545_vm8, %v4530_v55, %v8894_v53  ;;  %v8914_v13 = vunpack.i.h.bf16 %v13328_v27  ;;  %v13458_v27 = vld [vmem:[#allocation3 + $0x134] sm:$0xff]  ;;  %v8383_v53 = vunpack.i.l.bf16 %v16159_v11  ;;  %v8388_v34 = vunpack.i.l.bf16 %v16160_v19 }
 0x52e   : > { %v4600_v18 = vsel %vm4580_vm9, %v4565_v39, %v8899_v15  ;;  %v13477_v15 = vld [vmem:[#allocation3 + $0xfe] sm:$0xff]  ;;  %v13479_v39 = vld [vmem:[#allocation3 + $0x106] sm:$0xff] }
 0x52f   : > { %v13409_v23 = vpop.permute.xlu0 %4833  ;;  %v13411_v41 = vpop.permute.xlu1 %4939  ;;  %v4635_v63 = vsel %vm4615_vm10, %v4600_v18, %v8904_v6  ;;  %v9045_v6 = vpack.i.bf16 %v13479_v39, %v13477_v15 }
 0x530   : > { %5409 = vrot.lane.b32.xlu0 %v13398_v46, %s15593_s1  ;;  %v4670_v8 = vsel %vm4650_vm11, %v4635_v63, %v8909_v3  ;;  %v13485_v3 = vld [vmem:[#allocation3 + $0x108] sm:$0xff]  ;;  %v16161_v63 = vld [vmem:[#allocation144_spill] sm:$0xff] }
 0x531   : > { %5512 = vrot.lane.b32.xlu1 %v13403_v37, %s15583_s30  ;;  %v4705_v5 = vsel %vm4685_vm12, %v4670_v8, %v8914_v13  ;;  %v8393_v13 = vunpack.i.l.bf16 %v16161_v63 }
 0x532   : > { %v4740_v40 = vsel %vm4720_vm13, %v4705_v5, %v8919_v62 }
 0x533   : > { %v13428_v14 = vpop.permute.xlu0 %8931  ;;  %v13430_v61 = vpop.permute.xlu1 %8936  ;;  %v4775_v25 = vsel %vm4755_vm14, %v4740_v40, %v8929_v22  ;;  %v16163_v22 = vld [vmem:[#allocation48_spill] sm:$0xff]  ;;  %v5588_v40 = vsel %vm4265_vm0, %v13239_v20, %v13409_v23 }
 0x534   : > { %5113 = vrot.lane.b32.xlu0 %v13403_v37, %s15586_s22  ;;  %v5622_v20 = vsel %vm4300_vm1, %v5588_v40, %v13411_v41 }
 0x535   : > { %4843 = vrot.lane.b32.xlu1 %v13122_v33, %s15567_s26 }
 0x537   : > { %v5293_v31 = vpop.permute.xlu0 %5292  ;;  %v5402_v32 = vpop.permute.xlu1 %5401 }
 0x538   : > { %9036 = vrot.lane.b32.xlu0 %v9035_v1, %s15565_s25  ;;  %v5757_v21 = vsel %vm4440_vm5, %v5723_v0, %v5293_v31  ;;  %v13489_v1 = vpack.i.bf16 %v13485_v3, %v13378_v59  ;;  %v16162_v31 = vld [vmem:[#allocation193_spill] sm:$0xff] }
 0x539   : > { %9041 = vrot.lane.b32.xlu1 %v9040_v10, %s15574_s13  ;;  %v5791_v4 = vsel %vm4475_vm7, %v5757_v21, %v5402_v32  ;;  %v4286_v10 = vsel %vm4265_vm0, %v9367_v56, %v8383_v53  ;;  %v8453_v32 = vunpack.i.l.bf16 %v16162_v31  ;;  %v13507_v0 = vld [vmem:[#allocation3 + $0x138] sm:$0xff] }
 0x53a   : > { %v4321_v18 = vsel %vm4300_vm1, %v4286_v10, %v8388_v34  ;;  %v16164_v34 = vld [vmem:[#allocation184_spill] sm:$0xff] }
 0x53b   : > { %v5043_v17 = vpop.permute.xlu0 %5042  ;;  %v5505_v12 = vpop.permute.xlu1 %5504  ;;  %v4356_v59 = vsel %vm4335_vm2, %v4321_v18, %v8393_v13  ;;  %v8938_v18 = vunpack.i.l.bf16 %v13430_v61  ;;  %v13537_v13 = vld [vmem:[#allocation3 + $0x13a] sm:$0xff] }
 0x53c   : > { %5197 = vrot.lane.b32.xlu0 %v13453_v58, %s15589_s0  ;;  %v5825_v45 = vsel %vm4510_vm6, %v5791_v4, %v5505_v12  ;;  %v4391_v5 = vsel %vm4370_vm3, %v4356_v59, %v16163_v22  ;;  %v9060_v12 = vpack.i.bf16 %v13087_v51, %v12766_v9  ;;  %v5656_v51 = vsel %vm4335_vm2, %v5622_v20, %v5043_v17 }
 0x53d   : > { %5302 = vrot.lane.b32.xlu1 %v13458_v27, %s15595_s19  ;;  %7061 = vmatprep.mubr.msk.f32.mxu1 %vm4545_vm8, %v5825_v45  ;;  %v4426_v53 = vsel %vm4405_vm4, %v4391_v5, %v8453_v32  ;;  %v8923_v45 = vunpack.i.l.bf16 %v13393_v57  ;;  %v16165_v32 = vld [vmem:[#allocation256_spill] sm:$0xff] }
 0x53e   : > { %6127 = vmatmul.mubr.f32.gmra.mrb[78].mxu1 %v4775_v25  ;;  %v8458_v25 = vunpack.i.l.bf16 %v16164_v34  ;;  %v5690_v22 = vsel %vm4370_vm3, %v5656_v51, %v16165_v32 }
 0x53f   : > { %v13475_v55 = vpop.permute.xlu0 %8941  ;;  %v13483_v2 = vpop.permute.xlu1 %4835 }
 0x540   : > { %4949 = vrot.lane.b32.xlu0 %v13192_v38, %s15594_s2  ;;  %v4461_v9 = vsel %vm4440_vm5, %v4426_v53, %v8458_v25  ;;  %v8943_v41 = vunpack.i.l.bf16 %v13475_v55 }
 0x541   : > { %5052 = vrot.lane.b32.xlu1 %v13263_v44, %s15571_s24  ;;  %v4496_v10 = vsel %vm4475_vm7, %v4461_v9, %v8923_v45  ;;  %v9368_v9 = vld [vmem:[#allocation3 + $0xf2] sm:$0xff] }
 0x542   : > { %v9065_v51 = vpack.i.bf16 %v13432_v43, %v9368_v9  ;;  %v8384_v43 = vunpack.i.h.bf16 %v16159_v11 }
 0x543   : > { %v13497_v8 = vpop.permute.xlu0 %8946  ;;  %v13499_v62 = vpop.permute.xlu1 %8951 }
 0x544   : > { %9046 = vrot.lane.b32.xlu0 %v9045_v6, %s15566_s15  ;;  %v8933_v6 = vunpack.i.l.bf16 %v13428_v14  ;;  %v8948_v17 = vunpack.i.l.bf16 %v13497_v8  ;;  %v8953_v45 = vunpack.i.l.bf16 %v13499_v62 }
 0x545   : > { %9051 = vrot.lane.b32.xlu1 %v13489_v1, %s15563_s14 }
 0x546   : > { %v4531_v59 = vsel %vm4510_vm6, %v4496_v10, %v8933_v6 }
 0x547   : > { %v5190_v21 = vpop.permute.xlu0 %5189  ;;  %v5295_v4 = vpop.permute.xlu1 %5294 }
 0x548   : > { %5411 = vrot.lane.b32.xlu0 %v13501_v36, %s15593_s1  ;;  %v5724_v40 = vsel %vm4405_vm4, %v5690_v22, %v5190_v21 }
 0x549   : > { %5514 = vrot.lane.b32.xlu1 %v13507_v0, %s15583_s30  ;;  %v5758_v6 = vsel %vm4440_vm5, %v5724_v40, %v5295_v4 }
 0x54b   : > { %v13527_v23 = vpop.permute.xlu0 %4941  ;;  %v13531_v56 = vpop.permute.xlu1 %5044 }
 0x54c   : > { %5115 = vrot.lane.b32.xlu0 %v13507_v0, %s15586_s22 }
 0x54d   : > { %9061 = vrot.lane.b32.xlu1 %v9060_v12, %s15573_s29 }
 0x54f   : > { %v13546_v5 = vpop.permute.xlu0 %8956  ;;  %v13549_v12 = vpop.permute.xlu1 %8961 }
 0x550   : > { %9056 = vrot.lane.b32.xlu0 %v13294_v28, %s15593_s1  ;;  %v4566_v28 = vsel %vm4545_vm8, %v4531_v59, %v8938_v18  ;;  %v8958_v21 = vunpack.i.l.bf16 %v13546_v5  ;;  %v9369_v59 = vld [vmem:[#allocation3 + $0xf4] sm:$0xff]  ;;  %v8963_v4 = vunpack.i.l.bf16 %v13549_v12 }
 0x551   : > { %5199 = vrot.lane.b32.xlu1 %v13537_v13, %s15589_s0  ;;  %v4601_v53 = vsel %vm4580_vm9, %v4566_v28, %v8943_v41  ;;  %v9070_v41 = vpack.i.bf16 %v13439_v7, %v9369_v59  ;;  %v8389_v7 = vunpack.i.h.bf16 %v16160_v19  ;;  %v13592_v59 = vld [vmem:[#allocation3 + $0x140] sm:$0xff] }
 0x552   : > { %v4636_v25 = vsel %vm4615_vm10, %v4601_v53, %v8948_v17 }
 0x553   : > { %v5404_v20 = vpop.permute.xlu0 %5403  ;;  %v5507_v18 = vpop.permute.xlu1 %5506  ;;  %v4671_v17 = vsel %vm4650_vm11, %v4636_v25, %v8953_v45  ;;  %v2537_v25 = vld [vmem:[#allocation3 + $0x13e] sm:$0xff] }
 0x554   : > { %4845 = vrot.lane.b32.xlu0 %v13282_v54, %s15567_s26  ;;  %v5792_v10 = vsel %vm4475_vm7, %v5758_v6, %v5404_v20  ;;  %v4706_v28 = vsel %vm4685_vm12, %v4671_v17, %v8958_v21  ;;  %v13577_v6 = vld [vmem:[#allocation3 + $0x13c] sm:$0xff]  ;;  %v9370_v20 = vld [vmem:[#allocation3 + $0xa8] sm:$0xff] }
 0x555   : > { %4951 = vrot.lane.b32.xlu1 %v13347_v48, %s15594_s2  ;;  %v5826_v22 = vsel %vm4510_vm6, %v5792_v10, %v5507_v18  ;;  %v4741_v11 = vsel %vm4720_vm13, %v4706_v28, %v8963_v4  ;;  %v4287_v9 = vsel %vm4265_vm0, %v9370_v20, %v8384_v43  ;;  %v8394_v18 = vunpack.i.h.bf16 %v16161_v63  ;;  %v13600_v4 = vld [vmem:[#allocation3 + $0x110] sm:$0xff] }
 0x556   : > { %7062 = vmatprep.mubr.msk.f32.mxu1 %vm4545_vm8, %v5826_v22  ;;  %v8454_v22 = vunpack.i.h.bf16 %v16162_v31  ;;  %v9075_v43 = vpack.i.bf16 %v13600_v4, %v13485_v3  ;;  %v13606_v28 = vld [vmem:[#allocation3 + $0x10a] sm:$0xff]  ;;  %v8924_v3 = vunpack.i.h.bf16 %v13393_v57  ;;  %v8459_v20 = vunpack.i.h.bf16 %v16164_v34 }
 0x557   : > { %v13571_v40 = vpop.permute.xlu0 %5107  ;;  %v13575_v53 = vpop.permute.xlu1 %8971  ;;  %v9110_v24 = vpack.i.bf16 %v13606_v28, %v13434_v50 }
 0x558   : > { %9066 = vrot.lane.b32.xlu0 %v9065_v51, %s15583_s30  ;;  %v8973_v45 = vunpack.i.l.bf16 %v13575_v53  ;;  %v4322_v51 = vsel %vm4300_vm1, %v4287_v9, %v8389_v7  ;;  %v13608_v7 = vld [vmem:[#allocation3 + $0x112] sm:$0xff]  ;;  %v8934_v9 = vunpack.i.h.bf16 %v13428_v14  ;;  %v8944_v14 = vunpack.i.h.bf16 %v13475_v55 }
 0x559   : > { %9071 = vrot.lane.b32.xlu1 %v9070_v41, %s15577_s16  ;;  %v4357_v41 = vsel %vm4335_vm2, %v4322_v51, %v8394_v18  ;;  %v13626_v51 = vld [vmem:[#allocation3 + $0x142] sm:$0xff]  ;;  %v8939_v18 = vunpack.i.h.bf16 %v13430_v61  ;;  %v13648_v55 = vld [vmem:[#allocation3 + $0x10c] sm:$0xff] }
 0x55a   : > { %v4776_v19 = vsel %vm4755_vm14, %v4741_v11, %v8973_v45  ;;  %v9080_v45 = vpack.i.bf16 %v13608_v7, %v13606_v28  ;;  %v4392_v31 = vsel %vm4370_vm3, %v4357_v41, %v16042_v42 }
 0x55b   : > { %v13585_v21 = vpop.permute.xlu0 %8966  ;;  %v5192_v10 = vpop.permute.xlu1 %5191  ;;  %6132 = vmatmul.mubr.f32.gmra.mrb[80].mxu1 %v4776_v19 }
 0x55c   : > { %5304 = vrot.lane.b32.xlu0 %v13577_v6, %s15595_s19  ;;  %v8968_v35 = vunpack.i.l.bf16 %v13585_v21 }
 0x55d   : > { %5413 = vrot.lane.b32.xlu1 %v2537_v25, %s15593_s1  ;;  %v4427_v25 = vsel %vm4405_vm4, %v4392_v31, %v8454_v22 }
 0x55e   : > { %v4462_v42 = vsel %vm4440_vm5, %v4427_v25, %v8459_v20 }
 0x55f   : > { %v13598_v17 = vpop.permute.xlu0 %4837  ;;  %v13604_v63 = vpop.permute.xlu1 %4943  ;;  %v4497_v57 = vsel %vm4475_vm7, %v4462_v42, %v8924_v3  ;;  %v13650_v3 = vld [vmem:[#allocation3 + $0x114] sm:$0xff] }
 0x560   : > { %5054 = vrot.lane.b32.xlu0 %v13353_v29, %s15571_s24  ;;  %v4532_v34 = vsel %vm4510_vm6, %v4497_v57, %v8934_v9  ;;  %v13660_v9 = vld [vmem:[#allocation3 + $0x116] sm:$0xff] }
 0x561   : > { %5117 = vrot.lane.b32.xlu1 %v13592_v59, %s15586_s22  ;;  %v4567_v61 = vsel %vm4545_vm8, %v4532_v34, %v8939_v18  ;;  %v8959_v34 = vunpack.i.h.bf16 %v13546_v5  ;;  %v13680_v5 = vld [vmem:[#allocation3 + $0x144] sm:$0xff] }
 0x563   : > { %v13618_v11 = vpop.permute.xlu0 %8976 }
 0x564   : > { %9076 = vrot.lane.b32.xlu0 %v9075_v43, %s15564_s12  ;;  %v13622_v19 = vpop.permute.xlu1 %8981  ;;  %v5589_v43 = vsel %vm4265_vm0, %v13477_v15, %v13483_v2  ;;  %v9085_v15 = vpack.i.bf16 %v13650_v3, %v13648_v55  ;;  %v4602_v2 = vsel %vm4580_vm9, %v4567_v61, %v8944_v14 }
 0x565   : > { %9081 = vrot.lane.b32.xlu1 %v9080_v45, %s15565_s25  ;;  %v8949_v45 = vunpack.i.h.bf16 %v13497_v8  ;;  %v5623_v31 = vsel %vm4300_vm1, %v5589_v43, %v13527_v23  ;;  %v8954_v8 = vunpack.i.h.bf16 %v13499_v62  ;;  %v13658_v23 = vld [vmem:[#allocation3 + $0x10e] sm:$0xff]  ;;  %v8983_v28 = vunpack.i.l.bf16 %v13622_v19 }
 0x566   : > { %v9090_v42 = vpack.i.bf16 %v13660_v9, %v13658_v23  ;;  %v5657_v18 = vsel %vm4335_vm2, %v5623_v31, %v13531_v56  ;;  %v8974_v31 = vunpack.i.h.bf16 %v13575_v53 }
 0x567   : > { %v5297_v41 = vpop.permute.xlu0 %5296  ;;  %v4637_v57 = vsel %vm4615_vm10, %v4602_v2, %v8949_v45  ;;  %v5691_v62 = vsel %vm4370_vm3, %v5657_v18, %v13571_v40  ;;  %v8964_v45 = vunpack.i.h.bf16 %v13549_v12  ;;  %v13685_v40 = vld [vmem:[#allocation3 + $0x146] sm:$0xff] }
 0x568   : > { %5516 = vrot.lane.b32.xlu0 %v13592_v59, %s15583_s30  ;;  %v5725_v14 = vsel %vm4405_vm4, %v5691_v62, %v5192_v10  ;;  %v4672_v61 = vsel %vm4650_vm11, %v4637_v57, %v8954_v8  ;;  %v13697_v18 = vld [vmem:[#allocation3 + $0x148] sm:$0xff]  ;;  %v13704_v62 = vld [vmem:[#allocation3 + $0x118] sm:$0xff] }
 0x569   : > { %5201 = vrot.lane.b32.xlu1 %v13626_v51, %s15589_s0  ;;  %v5406_v22 = vpop.permute.xlu1 %5405  ;;  %v5759_v2 = vsel %vm4440_vm5, %v5725_v14, %v5297_v41  ;;  %v4707_v10 = vsel %vm4685_vm12, %v4672_v61, %v8959_v34  ;;  %v16166_v41 = vld [vmem:[#allocation187_spill] sm:$0xff]  ;;  %v13708_v14 = vpack.i.bf16 %v13704_v62, %v13600_v4 }
 0x56a   : > { %v5793_v12 = vsel %vm4475_vm7, %v5759_v2, %v5406_v22  ;;  %v8438_v8 = vunpack.i.l.bf16 %v16166_v41  ;;  %v4742_v53 = vsel %vm4720_vm13, %v4707_v10, %v8964_v45  ;;  %v9379_v61 = vld [vmem:[#allocation3 + $0xb0] sm:$0xff] }
 0x56b   : > { %v13646_v25 = vpop.permute.xlu0 %5046  ;;  %v4777_v34 = vsel %vm4755_vm14, %v4742_v53, %v8974_v31  ;;  %v16167_v2 = vld [vmem:[#allocation191_spill] sm:$0xff]  ;;  %v16168_v31 = vld [vmem:[#allocation177_spill] sm:$0xff] }
 0x56c   : > { %4847 = vrot.lane.b32.xlu0 %v13403_v37, %s15567_s26  ;;  %v4288_v45 = vsel %vm4265_vm0, %v9379_v61, %v8438_v8  ;;  %v8448_v10 = vunpack.i.l.bf16 %v16167_v2 }
 0x56d   : > { %4953 = vrot.lane.b32.xlu1 %v13453_v58, %s15594_s2  ;;  %v13656_v20 = vpop.permute.xlu1 %5109 }
 0x570   : > { %9086 = vrot.lane.b32.xlu0 %v9085_v15, %s15574_s13 }
 0x571   : > { %9091 = vrot.lane.b32.xlu1 %v9090_v42, %s15566_s15 }
 0x572   : > { %v13673_v43 = vpop.permute.xlu0 %8986 }
 0x573   : > { %v13678_v56 = vpop.permute.xlu1 %8991 }
 0x574   : > { %5306 = vrot.lane.b32.xlu0 %v13680_v5, %s15595_s19 }
 0x575   : > { %5415 = vrot.lane.b32.xlu1 %v13685_v40, %s15593_s1 }
 0x576   : > { %v5509_v15 = vpop.permute.xlu0 %5508 }
 0x577   : > { %v5827_v42 = vsel %vm4510_vm6, %v5793_v12, %v5509_v15  ;;  %v5194_v57 = vpop.permute.xlu1 %5193  ;;  %v8443_v15 = vunpack.i.l.bf16 %v16168_v31 }
 0x578   : > { %5056 = vrot.lane.b32.xlu0 %v13458_v27, %s15571_s24  ;;  %7063 = vmatprep.mubr.msk.f32.mxu1 %vm4545_vm8, %v5827_v42 }
 0x579   : > { %5119 = vrot.lane.b32.xlu1 %v13697_v18, %s15586_s22  ;;  %6137 = vmatmul.mubr.f32.gmra.mrb[82].mxu1 %v4777_v34  ;;  %v4323_v42 = vsel %vm4300_vm1, %v4288_v45, %v8443_v15  ;;  %v16169_v34 = vld [vmem:[#allocation210_spill] sm:$0xff]  ;;  %v5590_v45 = vsel %vm4265_vm0, %v13479_v39, %v13598_v17  ;;  %v9105_v15 = vpack.i.bf16 %v13353_v29, %v13263_v44  ;;  %v8439_v39 = vunpack.i.h.bf16 %v16166_v41 }
 0x57a   : > { %v13702_v22 = vpop.permute.xlu0 %4839  ;;  %v4358_v4 = vsel %vm4335_vm2, %v4323_v42, %v8448_v10  ;;  %v8483_v8 = vunpack.i.l.bf16 %v16169_v34 }
 0x57b   : > { %v13712_v12 = vpop.permute.xlu1 %4945  ;;  %v4393_v32 = vsel %vm4370_vm3, %v4358_v4, %v16059_v52  ;;  %v8978_v52 = vunpack.i.l.bf16 %v13618_v11  ;;  %v5624_v4 = vsel %vm4300_vm1, %v5590_v45, %v13604_v63  ;;  %v8449_v45 = vunpack.i.h.bf16 %v16167_v2 }
 0x57c   : > { %9096 = vrot.lane.b32.xlu0 %v13708_v14, %s15563_s14  ;;  %v4428_v42 = vsel %vm4405_vm4, %v4393_v32, %v8483_v8  ;;  %v5658_v32 = vsel %vm4335_vm2, %v5624_v4, %v13646_v25  ;;  %v8444_v4 = vunpack.i.h.bf16 %v16168_v31 }
 0x57d   : > { %9101 = vrot.lane.b32.xlu1 %v13489_v1, %s15593_s1  ;;  %v16170_v1 = vld [vmem:[#allocation211_spill] sm:$0xff]  ;;  %v5692_v25 = vsel %vm4370_vm3, %v5658_v32, %v13656_v20 }
 0x57e   : > { %v13720_v53 = vpop.permute.xlu0 %8996  ;;  %v8488_v49 = vunpack.i.l.bf16 %v16170_v1 }
 0x57f   : > { %v13724_v61 = vpop.permute.xlu1 %9001 }
 0x580   : > { %5518 = vrot.lane.b32.xlu0 %v13697_v18, %s15583_s30  ;;  %v4463_v29 = vsel %vm4440_vm5, %v4428_v42, %v8488_v49  ;;  %v13763_v49 = vld [vmem:[#allocation3 + $0x14c] sm:$0xff]  ;;  %v5726_v42 = vsel %vm4405_vm4, %v5692_v25, %v5194_v57  ;;  %v9003_v25 = vunpack.i.l.bf16 %v13724_v61 }
 0x581   : > { %4849 = vrot.lane.b32.xlu1 %v13507_v0, %s15567_s26  ;;  %v4498_v50 = vsel %vm4475_vm7, %v4463_v29, %v8968_v35  ;;  %v9380_v35 = vld [vmem:[#allocation3 + $0xb8] sm:$0xff] }
 0x582   : > { %v5299_v10 = vpop.permute.xlu0 %5298  ;;  %v4533_v63 = vsel %vm4510_vm6, %v4498_v50, %v8978_v52  ;;  %v4289_v41 = vsel %vm4265_vm0, %v9380_v35, %v8439_v39  ;;  %v8993_v50 = vunpack.i.l.bf16 %v13678_v56  ;;  %v8998_v39 = vunpack.i.l.bf16 %v13720_v53 }
 0x583   : > { %v5408_v60 = vpop.permute.xlu1 %5407  ;;  %v4568_v29 = vsel %vm4545_vm8, %v4533_v63, %v8983_v28  ;;  %v5760_v20 = vsel %vm4440_vm5, %v5726_v42, %v5299_v10  ;;  %v4324_v57 = vsel %vm4300_vm1, %v4289_v41, %v8444_v4  ;;  %v9115_v10 = vpack.i.bf16 %v13648_v55, %v13330_v16  ;;  %v2543_v4 = vld [vmem:[#allocation3 + $0x14e] sm:$0xff] }
 0x584   : > { %9106 = vrot.lane.b32.xlu0 %v9105_v15, %s15573_s29  ;;  %v13757_v15 = vld [vmem:[#allocation3 + $0x14a] sm:$0xff]  ;;  %v4359_v2 = vsel %vm4335_vm2, %v4324_v57, %v8449_v45  ;;  %v5794_v31 = vsel %vm4475_vm7, %v5760_v20, %v5408_v60  ;;  %v9120_v63 = vpack.i.bf16 %v13122_v33, %v13704_v62  ;;  %v8969_v62 = vunpack.i.h.bf16 %v13585_v21 }
 0x585   : > { %9111 = vrot.lane.b32.xlu1 %v9110_v24, %s15583_s30  ;;  %v8988_v24 = vunpack.i.l.bf16 %v13673_v43  ;;  %v4394_v33 = vsel %vm4370_vm3, %v4359_v2, %v16076_v47  ;;  %v13817_v47 = vld [vmem:[#allocation3 + $0x150] sm:$0xff]  ;;  %v8984_v2 = vunpack.i.h.bf16 %v13622_v19  ;;  %v13839_v19 = vld [vmem:[#allocation3 + $0x11a] sm:$0xff] }
 0x586   : > { %v13751_v17 = vpop.permute.xlu0 %5048 }
 0x587   : > { %v13755_v8 = vpop.permute.xlu1 %5111  ;;  %v4603_v26 = vsel %vm4580_vm9, %v4568_v29, %v8988_v24  ;;  %v8484_v24 = vunpack.i.h.bf16 %v16169_v34 }
 0x588   : > { %5203 = vrot.lane.b32.xlu0 %v13757_v15, %s15589_s0 }
 0x589   : > { %5308 = vrot.lane.b32.xlu1 %v13763_v49, %s15595_s19  ;;  %v4429_v55 = vsel %vm4405_vm4, %v4394_v33, %v8484_v24 }
 0x58a   : > { %v13772_v52 = vpop.permute.xlu0 %9006 }
 0x58b   : > { %v13778_v32 = vpop.permute.xlu1 %9011  ;;  %v9008_v60 = vunpack.i.l.bf16 %v13772_v52 }
 0x58c   : > { %4955 = vrot.lane.b32.xlu0 %v13537_v13, %s15594_s2  ;;  %v4638_v13 = vsel %vm4615_vm10, %v4603_v26, %v8993_v50  ;;  %v8489_v26 = vunpack.i.h.bf16 %v16170_v1  ;;  %v8979_v50 = vunpack.i.h.bf16 %v13618_v11  ;;  %v5591_v11 = vsel %vm4265_vm0, %v13658_v23, %v13702_v22 }
 0x58d   : > { %5058 = vrot.lane.b32.xlu1 %v13577_v6, %s15571_s24  ;;  %v4673_v45 = vsel %vm4650_vm11, %v4638_v13, %v8998_v39  ;;  %v9125_v23 = vpack.i.bf16 %v13192_v38, %v13839_v19 }
 0x58e   : > { %v5511_v28 = vpop.permute.xlu0 %5510  ;;  %v4708_v29 = vsel %vm4685_vm12, %v4673_v45, %v9003_v25  ;;  %v4464_v20 = vsel %vm4440_vm5, %v4429_v55, %v8489_v26  ;;  %v9004_v26 = vunpack.i.h.bf16 %v13724_v61 }
 0x58f   : > { %v5828_v35 = vsel %vm4510_vm6, %v5794_v31, %v5511_v28  ;;  %v13797_v41 = vpop.permute.xlu1 %4841  ;;  %v4743_v1 = vsel %vm4720_vm13, %v4708_v29, %v9008_v60  ;;  %v4499_v57 = vsel %vm4475_vm7, %v4464_v20, %v8969_v62  ;;  %v8999_v60 = vunpack.i.h.bf16 %v13720_v53  ;;  %v13866_v62 = vld [vmem:[#allocation3 + $0x152] sm:$0xff] }
 0x590   : > { %9116 = vrot.lane.b32.xlu0 %v9115_v10, %s15577_s16  ;;  %7064 = vmatprep.mubr.msk.f32.mxu1 %vm4545_vm8, %v5828_v35  ;;  %v4534_v28 = vsel %vm4510_vm6, %v4499_v57, %v8979_v50  ;;  %v8989_v10 = vunpack.i.h.bf16 %v13673_v43  ;;  %v8994_v43 = vunpack.i.h.bf16 %v13678_v56  ;;  %v13849_v35 = vld [vmem:[#allocation3 + $0x11c] sm:$0xff]  ;;  %v16171_v57 = vld [vmem:[#allocation204_spill] sm:$0xff] }
 0x591   : > { %9121 = vrot.lane.b32.xlu1 %v9120_v63, %s15564_s12  ;;  %v5625_v63 = vsel %vm4300_vm1, %v5591_v11, %v13712_v12  ;;  %v4569_v22 = vsel %vm4545_vm8, %v4534_v28, %v8984_v2  ;;  %v9130_v12 = vpack.i.bf16 %v13263_v44, %v13849_v35  ;;  %v8468_v2 = vunpack.i.l.bf16 %v16171_v57  ;;  %v16172_v28 = vld [vmem:[#allocation209_spill] sm:$0xff] }
 0x592   : > { %v13807_v16 = vpop.permute.xlu0 %9016  ;;  %v5659_v13 = vsel %vm4335_vm2, %v5625_v63, %v13751_v17  ;;  %v4604_v45 = vsel %vm4580_vm9, %v4569_v22, %v8989_v10  ;;  %v6033_v17 = vpop.f32.mrb[40].mxu1 }
 0x593   : > { %v9018_v34 = vunpack.i.l.bf16 %v13807_v16  ;;  %v13812_v42 = vpop.permute.xlu1 %9021  ;;  %v5693_v38 = vsel %vm4370_vm3, %v5659_v13, %v13755_v8  ;;  %v4639_v33 = vsel %vm4615_vm10, %v4604_v45, %v8994_v43  ;;  %6202 = vst [vmem:[#allocation4] sm:$0xff] %v6033_v17  ;;  %v6035_v53 = vpop.f32.mrb[41].mxu1  ;;  %v13872_v8 = vld [vmem:[#allocation3 + $0x154] sm:$0xff]  ;;  %v9019_v29 = vunpack.i.h.bf16 %v13807_v16  ;;  %v13896_v13 = vld [vmem:[#allocation3 + $0x120] sm:$0xff] }
 0x594   : > { %5417 = vrot.lane.b32.xlu0 %v2543_v4, %s15593_s1  ;;  %v9009_v4 = vunpack.i.h.bf16 %v13772_v52  ;;  %v9385_v45 = vld [vmem:[#allocation3 + $0xc0] sm:$0xff] }
 0x595   : > { %5520 = vrot.lane.b32.xlu1 %v13817_v47, %s15583_s30  ;;  %v4778_v21 = vsel %vm4755_vm14, %v4743_v1, %v9018_v34  ;;  %v4674_v34 = vsel %vm4650_vm11, %v4639_v33, %v8999_v60  ;;  %v6038_v1 = vpop.f32.mrb[42].mxu1  ;;  %v4290_v60 = vsel %vm4265_vm0, %v9385_v45, %v8468_v2  ;;  %v9150_v2 = vpack.i.bf16 %v13577_v6, %v13458_v27 }
 0x596   : > { %v5196_v39 = vpop.permute.xlu0 %5195  ;;  %6142 = vmatmul.mubr.f32.gmra.mrb[84].mxu1 %v4778_v21  ;;  %6203 = vst [vmem:[#allocation4 + $0x8] sm:$0xff] %v6038_v1  ;;  %v4709_v52 = vsel %vm4685_vm12, %v4674_v34, %v9004_v26  ;;  %v2544_v34 = vld [vmem:[#allocation3 + $0x156] sm:$0xff]  ;;  %v9023_v45 = vunpack.i.l.bf16 %v13812_v42 }
 0x597   : > { %v5301_v31 = vpop.permute.xlu1 %5300  ;;  %v5727_v44 = vsel %vm4405_vm4, %v5693_v38, %v5196_v39  ;;  %v6040_v39 = vpop.f32.mrb[43].mxu1  ;;  %v4744_v16 = vsel %vm4720_vm13, %v4709_v52, %v9009_v4  ;;  %v16174_v4 = vld [vmem:[#allocation233_spill] sm:$0xff] }
 0x598   : > { %5121 = vrot.lane.b32.xlu0 %v13817_v47, %s15586_s22  ;;  %v5761_v61 = vsel %vm4440_vm5, %v5727_v44, %v5301_v31  ;;  %v8473_v31 = vunpack.i.l.bf16 %v16172_v28  ;;  %v4779_v10 = vsel %vm4755_vm14, %v4744_v16, %v9019_v29  ;;  %v8508_v29 = vunpack.i.l.bf16 %v16174_v4 }
 0x599   : > { %4851 = vrot.lane.b32.xlu1 %v13592_v59, %s15567_s26  ;;  %v9013_v16 = vunpack.i.l.bf16 %v13778_v32 }
 0x59a   : > { %v13837_v24 = vpop.permute.xlu0 %4947  ;;  %v4325_v17 = vsel %vm4300_vm1, %v4290_v60, %v8473_v31 }
 0x59b   : > { %v13847_v25 = vpop.permute.xlu1 %5050 }
 0x59c   : > { %9126 = vrot.lane.b32.xlu0 %v9125_v23, %s15565_s25  ;;  %v13890_v23 = vld [vmem:[#allocation3 + $0x11e] sm:$0xff]  ;;  %v6043_v38 = vpop.f32.mrb[44].mxu1 }
 0x59d   : > { %9131 = vrot.lane.b32.xlu1 %v9130_v12, %s15574_s13  ;;  %v9135_v22 = vpack.i.bf16 %v13269_v30, %v13890_v23  ;;  %v9140_v12 = vpack.i.bf16 %v13282_v54, %v13896_v13  ;;  %6204 = vst [vmem:[#allocation4 + $0x10] sm:$0xff] %v6043_v38  ;;  %v6045_v33 = vpop.f32.mrb[45].mxu1  ;;  %v16173_v30 = vld [vmem:[#allocation206_spill] sm:$0xff] }
 0x59e   : > { %v13859_v56 = vpop.permute.xlu0 %9026  ;;  %v8478_v26 = vunpack.i.l.bf16 %v16173_v30 }
 0x59f   : > { %v13864_v55 = vpop.permute.xlu1 %9031  ;;  %v9028_v38 = vunpack.i.l.bf16 %v13859_v56 }
 0x5a0   : > { %5205 = vrot.lane.b32.xlu0 %v13866_v62, %s15589_s0  ;;  %v4360_v54 = vsel %vm4335_vm2, %v4325_v17, %v8478_v26 }
 0x5a1   : > { %5310 = vrot.lane.b32.xlu1 %v13872_v8, %s15595_s19 }
 0x5a2   : > { %v5410_v50 = vpop.permute.xlu0 %5409 }
 0x5a3   : > { %v5795_v21 = vsel %vm4475_vm7, %v5761_v61, %v5410_v50  ;;  %v5513_v20 = vpop.permute.xlu1 %5512  ;;  %v6048_v61 = vpop.f32.mrb[46].mxu1  ;;  %v13912_v50 = vld [vmem:[#allocation3 + $0x158] sm:$0xff] }
 0x5a4   : > { %v5829_v11 = vsel %vm4510_vm6, %v5795_v21, %v5513_v20  ;;  %4957 = vrot.lane.b32.xlu0 %v13626_v51, %s15594_s2  ;;  %6205 = vst [vmem:[#allocation4 + $0x18] sm:$0xff] %v6048_v61  ;;  %v6050_v1 = vpop.f32.mrb[47].mxu1  ;;  %v16175_v20 = vld [vmem:[#allocation178_spill] sm:$0xff] }
 0x5a5   : > { %5060 = vrot.lane.b32.xlu1 %v13680_v5, %s15571_s24  ;;  %7065 = vmatprep.mubr.msk.f32.mxu1 %vm4545_vm8, %v5829_v11  ;;  %v4395_v39 = vsel %vm4370_vm3, %v4360_v54, %v16175_v20 }
 0x5a6   : > { %v5114_v63 = vpop.permute.xlu0 %5113  ;;  %6147 = vmatmul.mubr.f32.gmra.mrb[86].mxu1 %v4779_v10  ;;  %v4430_v11 = vsel %vm4405_vm4, %v4395_v39, %v8508_v29  ;;  %v16176_v10 = vld [vmem:[#allocation228_spill] sm:$0xff]  ;;  %v9033_v29 = vunpack.i.l.bf16 %v13864_v55 }
 0x5a7   : > { %v13894_v43 = vpop.permute.xlu1 %4843 }
 0x5a8   : > { %9136 = vrot.lane.b32.xlu0 %v9135_v22, %s15566_s15  ;;  %v8513_v22 = vunpack.i.l.bf16 %v16176_v10 }
 0x5a9   : > { %9141 = vrot.lane.b32.xlu1 %v9140_v12, %s15563_s14  ;;  %v6053_v31 = vpop.f32.mrb[48].mxu1  ;;  %v5592_v12 = vsel %vm4265_vm0, %v13660_v9, %v13797_v41  ;;  %v13941_v41 = vld [vmem:[#allocation3 + $0x15a] sm:$0xff] }
 0x5aa   : > { %v13905_v44 = vpop.permute.xlu0 %9036  ;;  %6206 = vst [vmem:[#allocation4 + $0x20] sm:$0xff] %v6053_v31  ;;  %v6055_v60 = vpop.f32.mrb[49].mxu1  ;;  %v5626_v6 = vsel %vm4300_vm1, %v5592_v12, %v13837_v24  ;;  %v4465_v33 = vsel %vm4440_vm5, %v4430_v11, %v8513_v22 }
 0x5ab   : > { %v13907_v53 = vpop.permute.xlu1 %9041  ;;  %v5660_v24 = vsel %vm4335_vm2, %v5626_v6, %v13847_v25  ;;  %v9155_v60 = vpack.i.bf16 %v13839_v19, %v13608_v7  ;;  %v8469_v7 = vunpack.i.h.bf16 %v16171_v57 }
 0x5ac   : > { %5419 = vrot.lane.b32.xlu0 %v2544_v34, %s15593_s1  ;;  %v4500_v34 = vsel %vm4475_vm7, %v4465_v33, %v9013_v16  ;;  %v5694_v20 = vsel %vm4370_vm3, %v5660_v24, %v5114_v63  ;;  %v9043_v31 = vunpack.i.l.bf16 %v13907_v53  ;;  %v9160_v33 = vpack.i.bf16 %v13849_v35, %v13650_v3 }
 0x5ad   : > { %5522 = vrot.lane.b32.xlu1 %v13912_v50, %s15583_s30  ;;  %v4535_v54 = vsel %vm4510_vm6, %v4500_v34, %v9023_v45  ;;  %v8474_v35 = vunpack.i.h.bf16 %v16172_v28 }
 0x5ae   : > { %v5198_v21 = vpop.permute.xlu0 %5197  ;;  %v4570_v1 = vsel %vm4545_vm8, %v4535_v54, %v9028_v38 }
 0x5af   : > { %v5303_v52 = vpop.permute.xlu1 %5302  ;;  %v6058_v9 = vpop.f32.mrb[50].mxu1  ;;  %v4605_v16 = vsel %vm4580_vm9, %v4570_v1, %v9033_v29  ;;  %v13984_v29 = vld [vmem:[#allocation3 + $0x15c] sm:$0xff] }
 0x5b0   : > { %5123 = vrot.lane.b32.xlu0 %v13912_v50, %s15586_s22  ;;  %6207 = vst [vmem:[#allocation4 + $0x28] sm:$0xff] %v6058_v9  ;;  %v6060_v61 = vpop.f32.mrb[51].mxu1 }
 0x5b1   : > { %9151 = vrot.lane.b32.xlu1 %v9150_v2, %s15573_s29  ;;  %v5728_v2 = vsel %vm4405_vm4, %v5694_v20, %v5198_v21  ;;  %v2545_v20 = vld [vmem:[#allocation3 + $0x15e] sm:$0xff] }
 0x5b2   : > { %v13933_v17 = vpop.permute.xlu0 %4949  ;;  %v5762_v12 = vsel %vm4440_vm5, %v5728_v2, %v5303_v52  ;;  %v9386_v2 = vld [vmem:[#allocation3 + $0xc8] sm:$0xff] }
 0x5b3   : > { %v13936_v26 = vpop.permute.xlu1 %5052  ;;  %v6063_v25 = vpop.f32.mrb[52].mxu1  ;;  %v4291_v28 = vsel %vm4265_vm0, %v9386_v2, %v8469_v7 }
 0x5b4   : > { %9146 = vrot.lane.b32.xlu0 %v13708_v14, %s15593_s1  ;;  %v9038_v14 = vunpack.i.l.bf16 %v13905_v44  ;;  %v6065_v22 = vpop.f32.mrb[53].mxu1 }
 0x5b5   : > { %5207 = vrot.lane.b32.xlu1 %v13941_v41, %s15589_s0 }
 0x5b6   : > { %v13952_v39 = vpop.permute.xlu0 %9046  ;;  %v4640_v63 = vsel %vm4615_vm10, %v4605_v16, %v9038_v14 }
 0x5b7   : > { %v13955_v11 = vpop.permute.xlu1 %9051  ;;  %v9048_v21 = vunpack.i.l.bf16 %v13952_v39  ;;  %v6068_v9 = vpop.f32.mrb[54].mxu1 }
 0x5b8   : > { %4853 = vrot.lane.b32.xlu0 %v13697_v18, %s15567_s26  ;;  %v9053_v52 = vunpack.i.l.bf16 %v13955_v11  ;;  %6209 = vst [vmem:[#allocation4 + $0x38] sm:$0xff] %v6068_v9  ;;  %v6070_v54 = vpop.f32.mrb[55].mxu1 }
 0x5b9   : > { %4959 = vrot.lane.b32.xlu1 %v13757_v15, %s15594_s2  ;;  %v4675_v15 = vsel %vm4650_vm11, %v4640_v63, %v9043_v31  ;;  %v4326_v31 = vsel %vm4300_vm1, %v4291_v28, %v8474_v35  ;;  %v8479_v63 = vunpack.i.h.bf16 %v16173_v30 }
 0x5ba   : > { %v5412_v45 = vpop.permute.xlu0 %5411  ;;  %v4710_v3 = vsel %vm4685_vm12, %v4675_v15, %v9048_v21  ;;  %v14001_v21 = vld [vmem:[#allocation3 + $0x160] sm:$0xff] }
 0x5bb   : > { %v5796_v6 = vsel %vm4475_vm7, %v5762_v12, %v5412_v45  ;;  %v5515_v38 = vpop.permute.xlu1 %5514  ;;  %v4745_v57 = vsel %vm4720_vm13, %v4710_v3, %v9053_v52  ;;  %v16177_v52 = vld [vmem:[#allocation208_spill] sm:$0xff]  ;;  %v9014_v3 = vunpack.i.h.bf16 %v13778_v32 }
 0x5bc   : > { %v5830_v34 = vsel %vm4510_vm6, %v5796_v6, %v5515_v38  ;;  %9156 = vrot.lane.b32.xlu0 %v9155_v60, %s15583_s30  ;;  %v6073_v1 = vpop.f32.mrb[56].mxu1  ;;  %v4361_v60 = vsel %vm4335_vm2, %v4326_v31, %v8479_v63  ;;  %v8509_v6 = vunpack.i.h.bf16 %v16174_v4  ;;  %v9039_v31 = vunpack.i.h.bf16 %v13905_v44 }
 0x5bd   : > { %9161 = vrot.lane.b32.xlu1 %v9160_v33, %s15577_s16  ;;  %7066 = vmatprep.mubr.msk.f32.mxu1 %vm4545_vm8, %v5830_v34  ;;  %6210 = vst [vmem:[#allocation4 + $0x40] sm:$0xff] %v6073_v1  ;;  %v6075_v14 = vpop.f32.mrb[57].mxu1  ;;  %v14009_v33 = vld [vmem:[#allocation3 + $0x128] sm:$0xff]  ;;  %v9170_v34 = vpack.i.bf16 %v13453_v58, %v13347_v48  ;;  %v4396_v54 = vsel %vm4370_vm3, %v4361_v60, %v16177_v52  ;;  %v8514_v48 = vunpack.i.h.bf16 %v16176_v10  ;;  %v9024_v58 = vunpack.i.h.bf16 %v13812_v42 }
 0x5be   : > { %v13978_v19 = vpop.permute.xlu0 %5115  ;;  %v9165_v30 = vpack.i.bf16 %v13403_v37, %v14009_v33  ;;  %v4431_v7 = vsel %vm4405_vm4, %v4396_v54, %v8509_v6  ;;  %v14053_v60 = vld [vmem:[#allocation3 + $0x12c] sm:$0xff]  ;;  %v9044_v44 = vunpack.i.h.bf16 %v13907_v53  ;;  %v14080_v54 = vld [vmem:[#allocation3 + $0x164] sm:$0xff] }
 0x5bf   : > { %v13982_v24 = vpop.permute.xlu1 %9061  ;;  %v4466_v14 = vsel %vm4440_vm5, %v4431_v7, %v8514_v48  ;;  %v2563_v7 = vld [vmem:[#allocation3 + $0x166] sm:$0xff] }
 0x5c0   : > { %v9063_v61 = vunpack.i.l.bf16 %v13982_v24  ;;  %5312 = vrot.lane.b32.xlu0 %v13984_v29, %s15595_s19  ;;  %v6078_v12 = vpop.f32.mrb[58].mxu1  ;;  %v4501_v10 = vsel %vm4475_vm7, %v4466_v14, %v9014_v3 }
 0x5c1   : > { %5421 = vrot.lane.b32.xlu1 %v2545_v20, %s15593_s1  ;;  %6211 = vst [vmem:[#allocation4 + $0x48] sm:$0xff] %v6078_v12  ;;  %v6080_v45 = vpop.f32.mrb[59].mxu1  ;;  %v14032_v20 = vld [vmem:[#allocation3 + $0x162] sm:$0xff] }
 0x5c2   : > { %v13992_v25 = vpop.permute.xlu0 %9056  ;;  %v4780_v16 = vsel %vm4755_vm14, %v4745_v57, %v9063_v61  ;;  %v9029_v61 = vunpack.i.h.bf16 %v13859_v56  ;;  %v4536_v57 = vsel %vm4510_vm6, %v4501_v10, %v9024_v58  ;;  %v9034_v56 = vunpack.i.h.bf16 %v13864_v55  ;;  %v16178_v58 = vld [vmem:[#allocation229_spill] sm:$0xff]  ;;  %v2554_v10 = vld [vmem:[#allocation3 + $0x168] sm:$0xff] }
 0x5c3   : > { %v13996_v22 = vpop.permute.xlu1 %5199  ;;  %6152 = vmatmul.mubr.f32.gmra.mrb[88].mxu1 %v4780_v16  ;;  %v5593_v16 = vsel %vm4265_vm0, %v13890_v23, %v13894_v43  ;;  %v9175_v23 = vpack.i.bf16 %v13458_v27, %v14053_v60  ;;  %v9180_v43 = vpack.i.bf16 %v13501_v36, %v13398_v46 }
 0x5c4   : > { %5062 = vrot.lane.b32.xlu0 %v13763_v49, %s15571_s24  ;;  %v4571_v28 = vsel %vm4545_vm8, %v4536_v57, %v9029_v61  ;;  %v5627_v12 = vsel %vm4300_vm1, %v5593_v16, %v13933_v17  ;;  %v8493_v61 = vunpack.i.l.bf16 %v16178_v58  ;;  %v9390_v16 = vld [vmem:[#allocation3 + $0xd0] sm:$0xff] }
 0x5c5   : > { %5125 = vrot.lane.b32.xlu1 %v14001_v21, %s15586_s22  ;;  %v6083_v15 = vpop.f32.mrb[60].mxu1 }
 0x5c6   : > { %v14007_v38 = vpop.permute.xlu0 %4845  ;;  %6212 = vst [vmem:[#allocation4 + $0x50] sm:$0xff] %v6083_v15  ;;  %v6085_v4 = vpop.f32.mrb[61].mxu1 }
 0x5c7   : > { %v14015_v9 = vpop.permute.xlu1 %4951 }
 0x5c8   : > { %9166 = vrot.lane.b32.xlu0 %v9165_v30, %s15564_s12  ;;  %v9049_v30 = vunpack.i.h.bf16 %v13952_v39 }
 0x5c9   : > { %9171 = vrot.lane.b32.xlu1 %v9170_v34, %s15565_s25  ;;  %v6088_v1 = vpop.f32.mrb[62].mxu1 }
 0x5ca   : > { %v14023_v37 = vpop.permute.xlu0 %9066  ;;  %6213 = vst [vmem:[#allocation4 + $0x58] sm:$0xff] %v6088_v1  ;;  %v6090_v32 = vpop.f32.mrb[63].mxu1 }
 0x5cb   : > { %v14027_v35 = vpop.permute.xlu1 %9071 }
 0x5cc   : > { %5524 = vrot.lane.b32.xlu0 %v14001_v21, %s15583_s30 }
 0x5cd   : > { %5209 = vrot.lane.b32.xlu1 %v14032_v20, %s15589_s0 }
 0x5ce   : > { %v5305_v42 = vpop.permute.xlu0 %5304  ;;  %v6093_v63 = vpop.f32.mrb[64].mxu1 }
 0x5cf   : > { %v5414_v2 = vpop.permute.xlu1 %5413  ;;  %6214 = vst [vmem:[#allocation4 + $0x60] sm:$0xff] %v6093_v63  ;;  %v6095_v45 = vpop.f32.mrb[65].mxu1  ;;  %v16179_v63 = vld [vmem:[#allocation231_spill] sm:$0xff] }
 0x5d0   : > { %4855 = vrot.lane.b32.xlu0 %v13817_v47, %s15567_s26  ;;  %v4606_v47 = vsel %vm4580_vm9, %v4571_v28, %v9034_v56 }
 0x5d1   : > { %4961 = vrot.lane.b32.xlu1 %v13866_v62, %s15594_s2  ;;  %v4641_v6 = vsel %vm4615_vm10, %v4606_v47, %v9039_v31  ;;  %v5661_v62 = vsel %vm4335_vm2, %v5627_v12, %v13936_v26  ;;  %v9054_v26 = vunpack.i.h.bf16 %v13955_v11  ;;  %v4292_v31 = vsel %vm4265_vm0, %v9390_v16, %v8493_v61  ;;  %v2560_v16 = vld [vmem:[#allocation3 + $0x16c] sm:$0xff] }
 0x5d2   : > { %v14051_v55 = vpop.permute.xlu0 %5054  ;;  %v6098_v34 = vpop.f32.mrb[66].mxu1  ;;  %v5695_v27 = vsel %vm4370_vm3, %v5661_v62, %v13978_v19  ;;  %v4676_v15 = vsel %vm4650_vm11, %v4641_v6, %v9044_v44  ;;  %v9064_v19 = vunpack.i.h.bf16 %v13982_v24  ;;  %v8503_v12 = vunpack.i.l.bf16 %v16179_v63 }
 0x5d3   : > { %v14061_v17 = vpop.permute.xlu1 %5117  ;;  %v6100_v46 = vpop.f32.mrb[67].mxu1  ;;  %v5729_v36 = vsel %vm4405_vm4, %v5695_v27, %v13996_v22  ;;  %v4711_v22 = vsel %vm4685_vm12, %v4676_v15, %v9049_v30  ;;  %v16181_v34 = vld [vmem:[#allocation244_spill] sm:$0xff]  ;;  %v9068_v61 = vunpack.i.l.bf16 %v14023_v37 }
 0x5d4   : > { %9176 = vrot.lane.b32.xlu0 %v9175_v23, %s15574_s13  ;;  %v5763_v39 = vsel %vm4440_vm5, %v5729_v36, %v5305_v42  ;;  %v4746_v24 = vsel %vm4720_vm13, %v4711_v22, %v9054_v26  ;;  %v9190_v23 = vpack.i.bf16 %v14009_v33, %v13896_v13  ;;  %v8533_v27 = vunpack.i.l.bf16 %v16181_v34  ;;  %v16182_v13 = vld [vmem:[#allocation207_spill] sm:$0xff]  ;;  %v16183_v36 = vld [vmem:[#allocation245_spill] sm:$0xff] }
 0x5d5   : > { %9181 = vrot.lane.b32.xlu1 %v9180_v43, %s15566_s15  ;;  %v5797_v11 = vsel %vm4475_vm7, %v5763_v39, %v5414_v2  ;;  %v4781_v42 = vsel %vm4755_vm14, %v4746_v24, %v9064_v19  ;;  %v9389_v2 = vld [vmem:[#allocation3 + $0x130] sm:$0xff]  ;;  %v8538_v15 = vunpack.i.l.bf16 %v16183_v36  ;;  %v9195_v26 = vpack.i.bf16 %v13763_v49, %v13680_v5  ;;  %v9391_v39 = vld [vmem:[#allocation3 + $0x126] sm:$0xff] }
 0x5d6   : > { %v14073_v53 = vpop.permute.xlu0 %9076  ;;  %v6103_v4 = vpop.f32.mrb[68].mxu1  ;;  %v9185_v28 = vpack.i.bf16 %v13507_v0, %v9389_v2  ;;  %v16180_v43 = vld [vmem:[#allocation224_spill] sm:$0xff]  ;;  %v5594_v19 = vsel %vm4265_vm0, %v9391_v39, %v14007_v38  ;;  %v9058_v22 = vunpack.i.l.bf16 %v13992_v25  ;;  %v8494_v38 = vunpack.i.h.bf16 %v16178_v58  ;;  %v2557_v2 = vld [vmem:[#allocation3 + $0x16a] sm:$0xff] }
 0x5d7   : > { %v14078_v52 = vpop.permute.xlu1 %9081  ;;  %6216 = vst [vmem:[#allocation4 + $0x70] sm:$0xff] %v6103_v4  ;;  %v6105_v3 = vpop.f32.mrb[69].mxu1  ;;  %v8498_v47 = vunpack.i.l.bf16 %v16180_v43  ;;  %v5628_v49 = vsel %vm4300_vm1, %v5594_v19, %v14015_v9  ;;  %v9395_v39 = vld [vmem:[#allocation3 + $0x124] sm:$0xff] }
 0x5d8   : > { %5314 = vrot.lane.b32.xlu0 %v14080_v54, %s15595_s19  ;;  %v5662_v24 = vsel %vm4335_vm2, %v5628_v49, %v14051_v55  ;;  %v9205_v19 = vpack.i.bf16 %v14053_v60, %v9395_v39  ;;  %v2558_v39 = vld [vmem:[#allocation3 + $0x172] sm:$0xff] }
 0x5d9   : > { %5423 = vrot.lane.b32.xlu1 %v2563_v7, %s15593_s1  ;;  %v4327_v0 = vsel %vm4300_vm1, %v4292_v31, %v8498_v47  ;;  %v5696_v55 = vsel %vm4370_vm3, %v5662_v24, %v14061_v17  ;;  %v8504_v47 = vunpack.i.h.bf16 %v16179_v63  ;;  %v9083_v17 = vunpack.i.l.bf16 %v14078_v52 }
 0x5da   : > { %v5517_v48 = vpop.permute.xlu0 %5516  ;;  %v6108_v32 = vpop.f32.mrb[70].mxu1  ;;  %v4362_v30 = vsel %vm4335_vm2, %v4327_v0, %v8503_v12  ;;  %v9394_v12 = vld [vmem:[#allocation3 + $0xd8] sm:$0xff]  ;;  %v8499_v0 = vunpack.i.h.bf16 %v16180_v43 }
 0x5db   : > { %v5831_v1 = vsel %vm4510_vm6, %v5797_v11, %v5517_v48  ;;  %v14090_v14 = vpop.permute.xlu1 %5201  ;;  %6217 = vst [vmem:[#allocation4 + $0x78] sm:$0xff] %v6108_v32  ;;  %v6110_v57 = vpop.f32.mrb[71].mxu1  ;;  %v4397_v33 = vsel %vm4370_vm3, %v4362_v30, %v16182_v13  ;;  %v9392_v11 = vld [vmem:[#allocation3 + $0x122] sm:$0xff] }
 0x5dc   : > { %5064 = vrot.lane.b32.xlu0 %v13872_v8, %s15571_s24  ;;  %7067 = vmatprep.mubr.msk.f32.mxu1 %vm4545_vm8, %v5831_v1  ;;  %v4432_v7 = vsel %vm4405_vm4, %v4397_v33, %v8533_v27 }
 0x5dd   : > { %5127 = vrot.lane.b32.xlu1 %v2554_v10, %s15586_s22  ;;  %6157 = vmatmul.mubr.f32.gmra.mrb[90].mxu1 %v4781_v42  ;;  %v4467_v1 = vsel %vm4440_vm5, %v4432_v7, %v8538_v15  ;;  %v9073_v42 = vunpack.i.l.bf16 %v14027_v35 }
 0x5de   : > { %v14098_v56 = vpop.permute.xlu0 %4847  ;;  %v6113_v44 = vpop.f32.mrb[72].mxu1 }
 0x5df   : > { %v14103_v45 = vpop.permute.xlu1 %4953  ;;  %6218 = vst [vmem:[#allocation4 + $0x80] sm:$0xff] %v6113_v44  ;;  %v6115_v6 = vpop.f32.mrb[73].mxu1  ;;  %v5730_v44 = vsel %vm4405_vm4, %v5696_v55, %v14090_v14 }
 0x5e0   : > { %9186 = vrot.lane.b32.xlu0 %v9185_v28, %s15563_s14  ;;  %v9078_v28 = vunpack.i.l.bf16 %v14073_v53 }
 0x5e1   : > { %9191 = vrot.lane.b32.xlu1 %v9190_v23, %s15593_s1  ;;  %v4293_v23 = vsel %vm4265_vm0, %v9394_v12, %v8494_v38  ;;  %v9397_v12 = vld [vmem:[#allocation3 + $0x12e] sm:$0xff] }
 0x5e2   : > { %v14111_v62 = vpop.permute.xlu0 %9086  ;;  %v4328_v14 = vsel %vm4300_vm1, %v4293_v23, %v8499_v0  ;;  %v9398_v0 = vld [vmem:[#allocation3 + $0x13a] sm:$0xff] }
 0x5e3   : > { %v14115_v46 = vpop.permute.xlu1 %9091  ;;  %v9088_v15 = vunpack.i.l.bf16 %v14111_v62  ;;  %v4363_v63 = vsel %vm4335_vm2, %v4328_v14, %v8504_v47 }
 0x5e4   : > { %5526 = vrot.lane.b32.xlu0 %v2554_v10, %s15583_s30  ;;  %v4502_v10 = vsel %vm4475_vm7, %v4467_v1, %v9058_v22  ;;  %v8534_v22 = vunpack.i.h.bf16 %v16181_v34  ;;  %v8539_v34 = vunpack.i.h.bf16 %v16183_v36  ;;  %v9059_v1 = vunpack.i.h.bf16 %v13992_v25 }
 0x5e5   : > { %4857 = vrot.lane.b32.xlu1 %v13912_v50, %s15567_s26  ;;  %v9393_v50 = vld [vmem:[#allocation3 + $0x12a] sm:$0xff]  ;;  %v4537_v9 = vsel %vm4510_vm6, %v4502_v10, %v9068_v61 }
 0x5e6   : > { %v5307_v4 = vpop.permute.xlu0 %5306  ;;  %v9200_v48 = vpack.i.bf16 %v9393_v50, %v9392_v11  ;;  %v4572_v30 = vsel %vm4545_vm8, %v4537_v9, %v9073_v42  ;;  %v9093_v11 = vunpack.i.l.bf16 %v14115_v46  ;;  %v2564_v42 = vld [vmem:[#allocation3 + $0x16e] sm:$0xff]  ;;  %v9069_v9 = vunpack.i.h.bf16 %v14023_v37 }
 0x5e7   : > { %v5416_v3 = vpop.permute.xlu1 %5415  ;;  %v5764_v27 = vsel %vm4440_vm5, %v5730_v44, %v5307_v4  ;;  %v4607_v33 = vsel %vm4580_vm9, %v4572_v30, %v9078_v28  ;;  %v9396_v4 = vld [vmem:[#allocation3 + $0x138] sm:$0xff]  ;;  %v2555_v28 = vld [vmem:[#allocation3 + $0x170] sm:$0xff]  ;;  %v5595_v37 = vsel %vm4265_vm0, %v9397_v12, %v14098_v56  ;;  %v9079_v44 = vunpack.i.h.bf16 %v14073_v53 }
 0x5e8   : > { %9196 = vrot.lane.b32.xlu0 %v9195_v26, %s15573_s29  ;;  %v5798_v43 = vsel %vm4475_vm7, %v5764_v27, %v5416_v3  ;;  %v9210_v7 = vpack.i.bf16 %v13592_v59, %v9396_v4  ;;  %v16184_v59 = vld [vmem:[#allocation226_spill] sm:$0xff]  ;;  %v9215_v30 = vpack.i.bf16 %v13626_v51, %v9398_v0  ;;  %v9084_v27 = vunpack.i.h.bf16 %v14078_v52 }
 0x5e9   : > { %9201 = vrot.lane.b32.xlu1 %v9200_v48, %s15583_s30  ;;  %v6118_v58 = vpop.f32.mrb[74].mxu1  ;;  %v4398_v60 = vsel %vm4370_vm3, %v4363_v63, %v16184_v59  ;;  %v9089_v51 = vunpack.i.h.bf16 %v14111_v62 }
 0x5ea   : > { %v14138_v32 = vpop.permute.xlu0 %5056  ;;  %6219 = vst [vmem:[#allocation4 + $0x88] sm:$0xff] %v6118_v58  ;;  %v6120_v31 = vpop.f32.mrb[75].mxu1  ;;  %v4433_v38 = vsel %vm4405_vm4, %v4398_v60, %v8534_v22 }
 0x5eb   : > { %v14142_v57 = vpop.permute.xlu1 %5119  ;;  %v4468_v25 = vsel %vm4440_vm5, %v4433_v38, %v8539_v34  ;;  %v9074_v31 = vunpack.i.h.bf16 %v14027_v35  ;;  %v5629_v35 = vsel %vm4300_vm1, %v5595_v37, %v14103_v45  ;;  %v6265_v34 = vld [vmem:[#allocation4 + $0x26] sm:$0x3]  ;;  %v6255_v38 = vld [vmem:[#allocation4 + $0x20] sm:$0x3] }
 0x5ec   : > { %5211 = vrot.lane.b32.xlu0 %v2557_v2, %s15589_s0  ;;  %v4503_v55 = vsel %vm4475_vm7, %v4468_v25, %v9059_v1  ;;  %v5663_v53 = vsel %vm4335_vm2, %v5629_v35, %v14138_v32  ;;  %v6256_v1 = vld [vmem:[#allocation4 + $0x22] sm:$0x3]  ;;  %v6253_v25 = vld [vmem:[#allocation4 + $0x6] sm:$0x3]  ;;  %v6283_v35 = vld [vmem:[#allocation4 + $0x2e] sm:$0x3] }
 0x5ed   : > { %5316 = vrot.lane.b32.xlu1 %v2560_v16, %s15595_s19  ;;  %v4538_v47 = vsel %vm4510_vm6, %v4503_v55, %v9069_v9  ;;  %v5697_v45 = vsel %vm4370_vm3, %v5663_v53, %v14142_v57  ;;  %v2561_v57 = vld [vmem:[#allocation3 + $0x174] sm:$0xff]  ;;  %v14255_v55 = vld [vmem:[#allocation3 + $0x13e] sm:$0xff]  ;;  %v6257_v37 = vmax.f32 %v6255_v38, %v6256_v1 }
 0x5ee   : > { %v14154_v6 = vpop.permute.xlu0 %9096  ;;  %v4573_v56 = vsel %vm4545_vm8, %v4538_v47, %v9074_v31 }
 0x5ef   : > { %v14160_v13 = vpop.permute.xlu1 %9101  ;;  %v9098_v3 = vunpack.i.l.bf16 %v14154_v6  ;;  %v4608_v14 = vsel %vm4580_vm9, %v4573_v56, %v9079_v44  ;;  %v9099_v4 = vunpack.i.h.bf16 %v14154_v6  ;;  %v9402_v44 = vld [vmem:[#allocation3 + $0x140] sm:$0xff] }
 0x5f0   : > { %4963 = vrot.lane.b32.xlu0 %v13941_v41, %s15594_s2  ;;  %v4642_v41 = vsel %vm4615_vm10, %v4607_v33, %v9083_v17  ;;  %v4643_v32 = vsel %vm4615_vm10, %v4608_v14, %v9084_v27  ;;  %v9230_v0 = vpack.i.bf16 %v13697_v18, %v9402_v44  ;;  %v6270_v18 = vld [vmem:[#allocation4 + $0xc] sm:$0x3] }
 0x5f1   : > { %5066 = vrot.lane.b32.xlu1 %v13984_v29, %s15571_s24  ;;  %v4677_v61 = vsel %vm4650_vm11, %v4642_v41, %v9088_v15  ;;  %v9399_v15 = vld [vmem:[#allocation3 + $0x13c] sm:$0xff] }
 0x5f2   : > { %v5519_v26 = vpop.permute.xlu0 %5518  ;;  %v4712_v2 = vsel %vm4685_vm12, %v4677_v61, %v9093_v11  ;;  %v6336_v27 = vld [vmem:[#allocation4 + $0x8c] sm:$0x3]  ;;  %v6337_v53 = vld [vmem:[#allocation4 + $0x8e] sm:$0x3] }
 0x5f3   : > { %v5832_v50 = vsel %vm4510_vm6, %v5798_v43, %v5519_v26  ;;  %v14177_v48 = vpop.permute.xlu1 %4849  ;;  %v4747_v36 = vsel %vm4720_vm13, %v4712_v2, %v9098_v3  ;;  %v9094_v43 = vunpack.i.h.bf16 %v14115_v46  ;;  %v16186_v46 = vld [vmem:[#allocation243_spill] sm:$0xff]  ;;  %v6264_v3 = vld [vmem:[#allocation4 + $0x24] sm:$0x3]  ;;  %v9400_v2 = vld [vmem:[#allocation3 + $0xe0] sm:$0xff] }
 0x5f4   : > { %9206 = vrot.lane.b32.xlu0 %v9205_v19, %s15577_s16  ;;  %7068 = vmatprep.mubr.msk.f32.mxu1 %vm4545_vm8, %v5832_v50  ;;  %v4678_v19 = vsel %vm4650_vm11, %v4643_v32, %v9089_v51  ;;  %v8523_v11 = vunpack.i.l.bf16 %v16186_v46  ;;  %v6266_v12 = vmax.f32 %v6264_v3, %v6265_v34  ;;  %v16188_v51 = vld [vmem:[#allocation253_spill] sm:$0xff]  ;;  %v6327_v32 = vld [vmem:[#allocation4 + $0x64] sm:$0x3] }
 0x5f5   : > { %9211 = vrot.lane.b32.xlu1 %v9210_v7, %s15564_s12  ;;  %v16185_v7 = vld [vmem:[#allocation238_spill] sm:$0xff]  ;;  %v4713_v6 = vsel %vm4685_vm12, %v4678_v19, %v9094_v43  ;;  %v6328_v43 = vld [vmem:[#allocation4 + $0x66] sm:$0x3]  ;;  %v6333_v19 = vld [vmem:[#allocation4 + $0x70] sm:$0x3] }
 0x5f6   : > { %v14187_v49 = vpop.permute.xlu0 %9106  ;;  %v8518_v22 = vunpack.i.l.bf16 %v16185_v7  ;;  %v2556_v34 = vld [vmem:[#allocation3 + $0x178] sm:$0xff]  ;;  %v6329_v38 = vmax.f32 %v6327_v32, %v6328_v43  ;;  %v6342_v32 = vld [vmem:[#allocation4 + $0x74] sm:$0x3]  ;;  %v6343_v43 = vld [vmem:[#allocation4 + $0x76] sm:$0x3] }
 0x5f7   : > { %v9108_v24 = vunpack.i.l.bf16 %v14187_v49  ;;  %v14192_v10 = vpop.permute.xlu1 %9111  ;;  %v9109_v41 = vunpack.i.h.bf16 %v14187_v49  ;;  %v4748_v49 = vsel %vm4720_vm13, %v4713_v6, %v9099_v4  ;;  %v6334_v4 = vld [vmem:[#allocation4 + $0x72] sm:$0x3] }
 0x5f8   : > { %5425 = vrot.lane.b32.xlu0 %v2564_v42, %s15593_s1  ;;  %v6252_v42 = vld [vmem:[#allocation4 + $0x4] sm:$0x3]  ;;  %v4294_v9 = vsel %vm4265_vm0, %v9400_v2, %v8518_v22  ;;  %v6280_v22 = vld [vmem:[#allocation4 + $0x12] sm:$0x3] }
 0x5f9   : > { %5528 = vrot.lane.b32.xlu1 %v2555_v28, %s15583_s30  ;;  %v4782_v58 = vsel %vm4755_vm14, %v4747_v36, %v9108_v24  ;;  %v6261_v36 = vld [vmem:[#allocation4 + $0x8] sm:$0x3] }
 0x5fa   : > { %v5204_v16 = vpop.permute.xlu0 %5203  ;;  %6162 = vmatmul.mubr.f32.gmra.mrb[92].mxu1 %v4782_v58  ;;  %v6262_v58 = vld [vmem:[#allocation4 + $0xa] sm:$0x3] }
 0x5fb   : > { %v5309_v23 = vpop.permute.xlu1 %5308  ;;  %v6263_v56 = vmax.f32 %v6261_v36, %v6262_v58  ;;  %v6335_v36 = vmax.f32 %v6333_v19, %v6334_v4 }
 0x5fc   : > { %5129 = vrot.lane.b32.xlu0 %v2555_v28, %s15586_s22  ;;  %v4783_v28 = vsel %vm4755_vm14, %v4748_v49, %v9109_v41 }
 0x5fd   : > { %4859 = vrot.lane.b32.xlu1 %v14001_v21, %s15567_s26  ;;  %v9220_v21 = vpack.i.bf16 %v13680_v5, %v9399_v15  ;;  %v5731_v5 = vsel %vm4405_vm4, %v5697_v45, %v5204_v16  ;;  %v4329_v16 = vsel %vm4300_vm1, %v4294_v9, %v8523_v11  ;;  %v6279_v15 = vld [vmem:[#allocation4 + $0x10] sm:$0x3]  ;;  %v8558_v45 = vunpack.i.l.bf16 %v16188_v51  ;;  %s16209_s26 = sld [smem:[#allocation264_spill]] }
 0x5fe   : > { %v14213_v17 = vpop.permute.xlu0 %4955  ;;  %v5765_v50 = vsel %vm4440_vm5, %v5731_v5, %v5309_v23  ;;  %v6274_v5 = vld [vmem:[#allocation4 + $0x2a] sm:$0x3]  ;;  %v6338_v11 = vmax.f32 %v6336_v27, %v6337_v53  ;;  %v6281_v58 = vmax.f32 %v6279_v15, %v6280_v22  ;;  %v6300_v22 = vld [vmem:[#allocation4 + $0x58] sm:$0x3] }
 0x5ff   : > { %v14219_v33 = vpop.permute.xlu1 %5058  ;;  %v6123_v63 = vpop.f32.mrb[76].mxu1 }
 0x600   : > { %9216 = vrot.lane.b32.xlu0 %v9215_v30, %s15565_s25  ;;  %6220 = vst [vmem:[#allocation4 + $0x90] sm:$0xff] %v6123_v63  ;;  %v6125_v62 = vpop.f32.mrb[77].mxu1  ;;  %v6282_v30 = vld [vmem:[#allocation4 + $0x2c] sm:$0x3]  ;;  %v6339_v27 = vmax.f32 %v6335_v36, %v6338_v11  ;;  %v6301_v11 = vld [vmem:[#allocation4 + $0x5a] sm:$0x3] }
 0x601   : > { %9221 = vrot.lane.b32.xlu1 %v9220_v21, %s15574_s13  ;;  %v6273_v21 = vld [vmem:[#allocation4 + $0x28] sm:$0x3]  ;;  %v6284_v3 = vmax.f32 %v6282_v30, %v6283_v35  ;;  %v8519_v35 = vunpack.i.h.bf16 %v16185_v7 }
 0x602   : > { %v14228_v52 = vpop.permute.xlu0 %9116  ;;  %v2565_v63 = vld [vmem:[#allocation3 + $0x176] sm:$0xff]  ;;  %v6275_v49 = vmax.f32 %v6273_v21, %v6274_v5  ;;  %v9103_v21 = vunpack.i.l.bf16 %v14160_v13 }
 0x603   : > { %v14233_v26 = vpop.permute.xlu1 %9121  ;;  %v6285_v53 = vmax.f32 %v6281_v58, %v6284_v3 }
 0x604   : > { %5213 = vrot.lane.b32.xlu0 %v2558_v39, %s15589_s0  ;;  %v6267_v39 = vmax.f32 %v6263_v56, %v6266_v12 }
 0x605   : > { %5318 = vrot.lane.b32.xlu1 %v2561_v57, %s15595_s19 }
 0x606   : > { %v5418_v61 = vpop.permute.xlu0 %5417 }
 0x607   : > { %v5799_v59 = vsel %vm4475_vm7, %v5765_v50, %v5418_v61  ;;  %v5521_v60 = vpop.permute.xlu1 %5520  ;;  %v6324_v50 = vld [vmem:[#allocation4 + $0x48] sm:$0x3]  ;;  %v6325_v61 = vld [vmem:[#allocation4 + $0x4a] sm:$0x3]  ;;  %v6354_v1 = vld [vmem:[#allocation4 + $0x94] sm:$0x3] }
 0x608   : > { %v5833_v24 = vsel %vm4510_vm6, %v5799_v59, %v5521_v60  ;;  %4965 = vrot.lane.b32.xlu0 %v14032_v20, %s15594_s2  ;;  %v9225_v20 = vpack.i.bf16 %v13685_v40, %v14255_v55  ;;  %v6254_v40 = vmax.f32 %v6252_v42, %v6253_v25  ;;  %v6271_v59 = vld [vmem:[#allocation4 + $0xe] sm:$0x3]  ;;  %v16190_v42 = vld [vmem:[#allocation250_spill] sm:$0xff]  ;;  %v6346_v30 = vld [vmem:[#allocation4 + $0x92] sm:$0x3] }
 0x609   : > { %5068 = vrot.lane.b32.xlu1 %v14080_v54, %s15571_s24  ;;  %7069 = vmatprep.mubr.msk.f32.mxu1 %vm4545_vm8, %v5833_v24  ;;  %v16187_v54 = vld [vmem:[#allocation240_spill] sm:$0xff]  ;;  %v16189_v60 = vld [vmem:[#allocation225_spill] sm:$0xff]  ;;  %v6355_v24 = vld [vmem:[#allocation4 + $0x96] sm:$0x3]  ;;  %v8563_v2 = vunpack.i.l.bf16 %v16190_v42  ;;  %v6272_v44 = vmax.f32 %v6270_v18, %v6271_v59 }
 0x60a   : > { %v14259_v31 = vpop.permute.xlu0 %5121  ;;  %6167 = vmatmul.mubr.f32.gmra.mrb[94].mxu1 %v4783_v28  ;;  %v8528_v23 = vunpack.i.l.bf16 %v16187_v54  ;;  %v6258_v57 = vmax.f32 %v6254_v40, %v6257_v37  ;;  %v14282_v28 = vld [vmem:[%s15018_s4] ss:$0 sm:$0xff]  ;;  %v6351_v25 = vld [vmem:[#allocation4 + $0x78] sm:$0x3]  ;;  %v6326_v37 = vmax.f32 %v6324_v50, %v6325_v61  ;;  %v6356_v40 = vmax.f32 %v6354_v1, %v6355_v24  ;;  %v9403_v18 = vld [vmem:[#allocation3 + $0x136] sm:$0xff] }
 0x60b   : > { %v14262_v47 = vpop.permute.xlu1 %4851  ;;  %v5596_v5 = vsel %vm4265_vm0, %v9403_v18, %v14177_v48  ;;  %v9118_v61 = vunpack.i.l.bf16 %v14228_v52  ;;  %v14313_v1 = vadd.f32 %v14282_v28, %v6285_v53  ;;  %v6360_v53 = vld [vmem:[#allocation4 + $0x7c] sm:$0x3] }
 0x60c   : > { %9226 = vrot.lane.b32.xlu0 %v9225_v20, %s15566_s15  ;;  %v4364_v14 = vsel %vm4335_vm2, %v4329_v16, %v8528_v23  ;;  %v14287_v20 = vadd.f32 %v14282_v28, %v6267_v39  ;;  %v14290_v12 = vadd.f32 %v14282_v28, %v6258_v57  ;;  %v6352_v23 = vld [vmem:[#allocation4 + $0x7a] sm:$0x3]  ;;  %v9113_v39 = vunpack.i.l.bf16 %v14192_v10 }
 0x60d   : > { %9231 = vrot.lane.b32.xlu1 %v9230_v0, %s15563_s14  ;;  %v4399_v6 = vsel %vm4370_vm3, %v4364_v14, %v16189_v60  ;;  %v6345_v0 = vld [vmem:[#allocation4 + $0x90] sm:$0x3]  ;;  %v6353_v4 = vmax.f32 %v6351_v25, %v6352_v23  ;;  %v5630_v50 = vsel %vm4300_vm1, %v5596_v5, %v14213_v17  ;;  %v6344_v17 = vmax.f32 %v6342_v32, %v6343_v43  ;;  %v6291_v23 = vld [vmem:[#allocation4 + $0x54] sm:$0x3]  ;;  %v6369_v32 = vld [vmem:[#allocation4 + $0x80] sm:$0x3] }
 0x60e   : > { %v14269_v62 = vpop.permute.xlu0 %9126  ;;  %v4434_v9 = vsel %vm4405_vm4, %v4399_v6, %v8558_v45  ;;  %v2559_v14 = vld [vmem:[#allocation3 + $0x17a] sm:$0xff]  ;;  %v6330_v45 = vmax.f32 %v6326_v37, %v6329_v38  ;;  %v6347_v57 = vmax.f32 %v6345_v0, %v6346_v30  ;;  %v6269_v48 = vmax.f32 %v14287_v20, 0.0  ;;  %v6288_v20 = vld [vmem:[#allocation4 + $0x38] sm:$0x3]  ;;  %v6289_v37 = vld [vmem:[#allocation4 + $0x3a] sm:$0x3] }
 0x60f   : > { %v14271_v41 = vpop.permute.xlu1 %9131  ;;  %v4469_v15 = vsel %vm4440_vm5, %v4434_v9, %v8563_v2  ;;  %v6260_v60 = vmax.f32 %v14290_v12, 0.0  ;;  %v6340_v38 = vadd.f32 %v14282_v28, %v6339_v27  ;;  %v6357_v24 = vmax.f32 %v6353_v4, %v6356_v40  ;;  %v6298_v2 = vld [vmem:[#allocation4 + $0x3e] sm:$0x3]  ;;  %v6292_v27 = vld [vmem:[#allocation4 + $0x56] sm:$0x3]  ;;  %v2562_v5 = vld [vmem:[#allocation3 + $0x17c] sm:$0xff] }
 0x610   : > { %5427 = vrot.lane.b32.xlu0 %v2565_v63, %s15593_s1  ;;  %v6276_v63 = vmax.f32 %v6272_v44, %v6275_v49  ;;  %v6297_v49 = vld [vmem:[#allocation4 + $0x3c] sm:$0x3]  ;;  %v4504_v9 = vsel %vm4475_vm7, %v4469_v15, %v9103_v21  ;;  %v14319_v36 = vadd.f32 %v14282_v28, %v6330_v45  ;;  %v6302_v25 = vmax.f32 %v6300_v22, %v6301_v11  ;;  %v6361_v40 = vld [vmem:[#allocation4 + $0x7e] sm:$0x3] }
 0x611   : > { %5530 = vrot.lane.b32.xlu1 %v2556_v34, %s15583_s30  ;;  %v6128_v19 = vpop.f32.mrb[78].mxu1  ;;  %v4539_v44 = vsel %vm4510_vm6, %v4504_v9, %v9113_v39  ;;  %v5664_v0 = vsel %vm4335_vm2, %v5630_v50, %v14219_v33  ;;  %v9123_v30 = vunpack.i.l.bf16 %v14233_v26  ;;  %v6370_v33 = vld [vmem:[#allocation4 + $0x82] sm:$0x3]  ;;  %v6341_v39 = vmax.f32 %v6340_v38, 0.0 }
 0x612   : > { %v14284_v16 = vpop.permute.xlu0 %5205  ;;  %6221 = vst [vmem:[#allocation4 + $0x98] sm:$0xff] %v6128_v19  ;;  %v6130_v59 = vpop.f32.mrb[79].mxu1  ;;  %v14322_v58 = vadd.f32 %v14282_v28, %v6276_v63  ;;  %v4574_v15 = vsel %vm4545_vm8, %v4539_v44, %v9118_v61  ;;  %v5698_v21 = vsel %vm4370_vm3, %v5664_v0, %v14259_v31  ;;  %v6299_v63 = vmax.f32 %v6297_v49, %v6298_v2 }
 0x613   : > { %v14293_v56 = vpop.permute.xlu1 %5310  ;;  %v5732_v43 = vsel %vm4405_vm4, %v5698_v21, %v14284_v16  ;;  %v6358_v19 = vadd.f32 %v14282_v28, %v6357_v24  ;;  %v6290_v4 = vmax.f32 %v6288_v20, %v6289_v37  ;;  %v6332_v31 = vmax.f32 %v14319_v36, 0.0 }
 0x614   : > { %5131 = vrot.lane.b32.xlu0 %v2556_v34, %s15586_s22  ;;  %v2566_v34 = vld [vmem:[#allocation3 + $0x17e] sm:$0xff]  ;;  %v6293_v22 = vmax.f32 %v6291_v23, %v6292_v27  ;;  %v6362_v11 = vmax.f32 %v6360_v53, %v6361_v40  ;;  %v4609_v50 = vsel %vm4580_vm9, %v4574_v15, %v9123_v30  ;;  %v9133_v61 = vunpack.i.l.bf16 %v14271_v41 }
 0x615   : > { %5215 = vrot.lane.b32.xlu1 %v2559_v14, %s15589_s0  ;;  %v9128_v14 = vunpack.i.l.bf16 %v14269_v62  ;;  %v6371_v59 = vmax.f32 %v6369_v32, %v6370_v33  ;;  %v5766_v49 = vsel %vm4440_vm5, %v5732_v43, %v14293_v56  ;;  %v9240_v23 = vpack.i.bf16 %v6269_v48, %v6341_v39  ;;  %s16208_s0 = sld [smem:[#allocation263_spill]] }
 0x616   : > { %v14305_v3 = vpop.permute.xlu0 %4957  ;;  %v6359_v44 = vmax.f32 %v6358_v19, 0.0  ;;  %v6294_v56 = vmax.f32 %v6290_v4, %v6293_v22  ;;  %v6287_v48 = vmax.f32 %v14313_v1, 0.0  ;;  %v8524_v43 = vunpack.i.h.bf16 %v16186_v46 }
 0x617   : > { %v14309_v6 = vpop.permute.xlu1 %5060  ;;  %v6278_v19 = vmax.f32 %v14322_v58, 0.0 }
 0x618   : > { %4227 = vrot.lane.b32.xlu0 %v13872_v8, %s15573_s29  ;;  %v6348_v8 = vmax.f32 %v6344_v17, %v6347_v57  ;;  %v6303_v57 = vmax.f32 %v6299_v63, %v6302_v25  ;;  %v4644_v17 = vsel %vm4615_vm10, %v4609_v50, %v9128_v14  ;;  %v9235_v14 = vpack.i.bf16 %v6260_v60, %v6332_v31 }
 0x619   : > { %5429 = vrot.lane.b32.xlu1 %v2566_v34, %s15593_s1  ;;  %v6372_v34 = vld [vmem:[#allocation4 + $0x9c] sm:$0x3]  ;;  %v6373_v38 = vld [vmem:[#allocation4 + $0x9e] sm:$0x3]  ;;  %v6363_v24 = vld [vmem:[#allocation4 + $0x98] sm:$0x3]  ;;  %v4679_v53 = vsel %vm4650_vm11, %v4644_v17, %v9133_v61  ;;  %v9250_v39 = vpack.i.bf16 %v6287_v48, %v6359_v44  ;;  %v6295_v31 = vadd.f32 %v14282_v28, %v6294_v56 }
 0x61a   : > { %v14333_v45 = vpop.permute.xlu0 %9136  ;;  %v6349_v16 = vadd.f32 %v14282_v28, %v6348_v8  ;;  %v6374_v36 = vmax.f32 %v6372_v34, %v6373_v38  ;;  %v6364_v25 = vld [vmem:[#allocation4 + $0x9a] sm:$0x3]  ;;  %v6304_v8 = vadd.f32 %v14282_v28, %v6303_v57  ;;  %v8529_v38 = vunpack.i.h.bf16 %v16187_v54  ;;  %s7082_s1 = sshll.u32 %s9578_s21, 5  ;;  %s9496_s21 = smov [#allocation5]  }
 0x61b   : > { %v14337_v18 = vpop.permute.xlu1 %9141  ;;  %v9138_v2 = vunpack.i.l.bf16 %v14333_v45  ;;  %v6365_v0 = vmax.f32 %v6363_v24, %v6364_v25  ;;  %v9404_v57 = vld [vmem:[#allocation3 + $0xe8] sm:$0xff]  ;;  %v6296_v7 = vmax.f32 %v6295_v31, 0.0  ;;  %v8559_v24 = vunpack.i.h.bf16 %v16188_v51  ;;  %s14972_s17 = scalar_lea.hbm %s16209_s26, %s7082_s1  ;;  %s9418_s11 = sshll.u32 %s9496_s21, 4  ;;  %s9419_s11 = int_to_ptr.vmem [resolvable:$false] %s9418_s11 }
 0x61c   : > { %5320 = vrot.lane.b32.xlu0 %v2562_v5, %s15595_s19  ;;  %v6375_v27 = vmax.f32 %v6371_v59, %v6374_v36  ;;  %v9143_v40 = vunpack.i.l.bf16 %v14337_v18  ;;  %v6350_v32 = vmax.f32 %v6349_v16, 0.0  ;;  %v6305_v12 = vmax.f32 %v6304_v8, 0.0 }
 0x61d   : > { %4229 = vrot.lane.b32.xlu1 %v13984_v29, %s15573_s29  ;;  %v2567_v29 = vld [vmem:[#allocation3 + $0x180] sm:$0xff]  ;;  %v6366_v15 = vmax.f32 %v6362_v11, %v6365_v0  ;;  %v4714_v63 = vsel %vm4685_vm12, %v4679_v53, %v9138_v2  ;;  %v4295_v46 = vsel %vm4265_vm0, %v9404_v57, %v8519_v35  ;;  %v9104_v25 = vunpack.i.h.bf16 %v14160_v13 }
 0x61e   : > { %v5420_v9 = vpop.permute.xlu0 %5419  ;;  %v6376_v33 = vadd.f32 %v14282_v28, %v6375_v27  ;;  %v4749_v22 = vsel %vm4720_vm13, %v4714_v63, %v9143_v40  ;;  %v9245_v50 = vpack.i.bf16 %v6278_v19, %v6350_v32  ;;  %v4330_v59 = vsel %vm4300_vm1, %v4295_v46, %v8524_v43 }
 0x61f   : > { %v5800_v20 = vsel %vm4475_vm7, %v5766_v49, %v5420_v9  ;;  %v5523_v37 = vpop.permute.xlu1 %5522  ;;  %v6367_v1 = vadd.f32 %v14282_v28, %v6366_v15  ;;  %v4365_v35 = vsel %vm4335_vm2, %v4330_v59, %v8529_v38  ;;  %v16191_v9 = vld [vmem:[#allocation242_spill] sm:$0xff]  ;;  %v9114_v51 = vunpack.i.h.bf16 %v14192_v10 }
 0x620   : > { %v5834_v30 = vsel %vm4510_vm6, %v5800_v20, %v5523_v37  ;;  %5532 = vrot.lane.b32.xlu0 %v2567_v29, %s15583_s30  ;;  %v6377_v60 = vmax.f32 %v6376_v33, 0.0  ;;  %v4400_v36 = vsel %vm4370_vm3, %v4365_v35, %v16191_v9  ;;  %v8564_v37 = vunpack.i.h.bf16 %v16190_v42 }
 0x621   : > { %7070 = vmatprep.mubr.msk.f32.mxu1 %vm4545_vm8, %v5834_v30  ;;  %9241 = vrot.lane.b32.xlu1 %v9240_v23, %s15586_s22  ;;  %v6368_v16 = vmax.f32 %v6367_v1, 0.0  ;;  %v4435_v54 = vsel %vm4405_vm4, %v4400_v36, %v8559_v24  ;;  %v9119_v23 = vunpack.i.h.bf16 %v14228_v52  ;;  %v9124_v13 = vunpack.i.h.bf16 %v14233_v26  ;;  %v9406_v36 = vld [vmem:[#allocation3 + $0x146] sm:$0xff] }
 0x622   : > { %v14360_v21 = vpop.permute.xlu0 %5123  ;;  %v9260_v61 = vpack.i.bf16 %v6305_v12, %v6377_v60  ;;  %v4470_v44 = vsel %vm4440_vm5, %v4435_v54, %v8564_v37  ;;  %v5597_v10 = vsel %vm4265_vm0, %v14255_v55, %v14262_v47  ;;  %v9129_v52 = vunpack.i.h.bf16 %v14269_v62 }
 0x623   : > { %v14367_v5 = vpop.permute.xlu1 %9151  ;;  %v9255_v49 = vpack.i.bf16 %v6296_v7, %v6368_v16  ;;  %v4505_v0 = vsel %vm4475_vm7, %v4470_v44, %v9104_v25  ;;  %v5631_v40 = vsel %vm4300_vm1, %v5597_v10, %v14305_v3  ;;  %v9139_v33 = vunpack.i.h.bf16 %v14333_v45  ;;  %v16195_v7 = vld [vmem:[#allocation258_spill] sm:$0xff]  ;;  %v16197_v44 = vld [vmem:[#allocation257_spill] sm:$0xff] }
 0x624   : > { %v9153_v4 = vunpack.i.l.bf16 %v14367_v5  ;;  %9236 = vrot.lane.b32.xlu0 %v9235_v14, %s15594_s2  ;;  %v4540_v27 = vsel %vm4510_vm6, %v4505_v0, %v9114_v51  ;;  %v9134_v14 = vunpack.i.h.bf16 %v14271_v41  ;;  %v5665_v32 = vsel %vm4335_vm2, %v5631_v40, %v14309_v6 }
 0x625   : > { %9251 = vrot.lane.b32.xlu1 %v9250_v39, %s15583_s30  ;;  %v4575_v42 = vsel %vm4545_vm8, %v4540_v27, %v9119_v23  ;;  %v5699_v55 = vsel %vm4370_vm3, %v5665_v32, %v14360_v21  ;;  %v9144_v43 = vunpack.i.h.bf16 %v14337_v18  ;;  %v9154_v19 = vunpack.i.h.bf16 %v14367_v5  ;;  %v16192_v21 = vld [vmem:[#allocation249_spill] sm:$0xff]  ;;  %v9405_v5 = vld [vmem:[#allocation3 + $0xf0] sm:$0xff] }
 0x626   : > { %v14379_v58 = vpop.permute.xlu0 %9146  ;;  %v4784_v11 = vsel %vm4755_vm14, %v4749_v22, %v9153_v4  ;;  %v4610_v15 = vsel %vm4580_vm9, %v4575_v42, %v9124_v13  ;;  %v8543_v4 = vunpack.i.l.bf16 %v16192_v21  ;;  %v16193_v22 = vld [vmem:[#allocation251_spill] sm:$0xff]  ;;  %v8583_v35 = vunpack.i.l.bf16 %v16195_v7 }
 0x627   : > { %v5208_v34 = vpop.permute.xlu1 %5207  ;;  %6172 = vmatmul.mubr.f32.gmra.mrb[96].mxu1 %v4784_v11  ;;  %v4645_v26 = vsel %vm4615_vm10, %v4610_v15, %v9129_v52  ;;  %v8553_v11 = vunpack.i.l.bf16 %v16193_v22  ;;  %v9148_v51 = vunpack.i.l.bf16 %v14379_v58  ;;  %v8588_v0 = vunpack.i.l.bf16 %v16197_v44 }
 0x628   : > { %9246 = vrot.lane.b32.xlu0 %v9245_v50, %s15595_s19  ;;  %v5733_v47 = vsel %vm4405_vm4, %v5699_v55, %v5208_v34  ;;  %v4680_v3 = vsel %vm4650_vm11, %v4645_v26, %v9134_v14  ;;  %v4296_v46 = vsel %vm4265_vm0, %v9405_v5, %v8543_v4  ;;  %v9407_v26 = vld [vmem:[#allocation3 + $0xf8] sm:$0xff] }
 0x629   : > { %9261 = vrot.lane.b32.xlu1 %v9260_v61, %s15574_s13  ;;  %v4715_v6 = vsel %vm4685_vm12, %v4680_v3, %v9139_v33  ;;  %v16194_v61 = vld [vmem:[#allocation246_spill] sm:$0xff]  ;;  %v8554_v33 = vunpack.i.h.bf16 %v16193_v22 }
 0x62a   : > { %v14388_v17 = vpop.permute.xlu0 %4853  ;;  %v4750_v31 = vsel %vm4720_vm13, %v4715_v6, %v9144_v43  ;;  %v8548_v16 = vunpack.i.l.bf16 %v16194_v61 }
 0x62b   : > { %v14390_v2 = vpop.permute.xlu1 %4959  ;;  %v4785_v18 = vsel %vm4755_vm14, %v4750_v31, %v9154_v19  ;;  %v5598_v54 = vsel %vm4265_vm0, %v9406_v36, %v14388_v17 }
 0x62c   : > { %9256 = vrot.lane.b32.xlu0 %v9255_v49, %s15564_s12  ;;  %v4331_v59 = vsel %vm4300_vm1, %v4296_v46, %v8548_v16  ;;  %v16196_v49 = vld [vmem:[#allocation241_spill] sm:$0xff]  ;;  %v5632_v27 = vsel %vm4300_vm1, %v5598_v54, %v14390_v2 }
 0x62d   : > { %v4366_v38 = vsel %vm4335_vm2, %v4331_v59, %v8553_v11  ;;  %v16198_v11 = vld [vmem:[#allocation248_spill] sm:$0xff] }
 0x62e   : > { %v14397_v20 = vpop.permute.xlu0 %9156  ;;  %v6133_v8 = vpop.f32.mrb[80].mxu1  ;;  %v4401_v9 = vsel %vm4370_vm3, %v4366_v38, %v16196_v49  ;;  %v9149_v38 = vunpack.i.h.bf16 %v14379_v58 }
 0x62f   : > { %v14401_v29 = vpop.permute.xlu1 %9161  ;;  %v6135_v53 = vpop.f32.mrb[81].mxu1  ;;  %v4436_v37 = vsel %vm4405_vm4, %v4401_v9, %v8583_v35  ;;  %v8589_v9 = vunpack.i.h.bf16 %v16197_v44  ;;  %v9159_v36 = vunpack.i.h.bf16 %v14397_v20 }
 0x630   : > { %v4471_v17 = vsel %vm4440_vm5, %v4436_v37, %v8588_v0  ;;  %v9163_v52 = vunpack.i.l.bf16 %v14401_v29  ;;  %v9164_v58 = vunpack.i.h.bf16 %v14401_v29  ;;  %v9408_v0 = vld [vmem:[#allocation3 + $0x14e] sm:$0xff] }
 0x631   : > { %v4506_v10 = vsel %vm4475_vm7, %v4471_v17, %v9148_v51 }
 0x632   : > { %v5313_v30 = vpop.permute.xlu0 %5312 }
 0x633   : > { %v5422_v56 = vpop.permute.xlu1 %5421  ;;  %v5767_v41 = vsel %vm4440_vm5, %v5733_v47, %v5313_v30  ;;  %v9158_v30 = vunpack.i.l.bf16 %v14397_v20  ;;  %v8549_v47 = vunpack.i.h.bf16 %v16194_v61 }
 0x634   : > { %v5801_v45 = vsel %vm4475_vm7, %v5767_v41, %v5422_v56  ;;  %v8544_v56 = vunpack.i.h.bf16 %v16192_v21 }
 0x635   : > { %v4541_v15 = vsel %vm4510_vm6, %v4506_v10, %v9158_v30 }
 0x636   : > { %v5063_v48 = vpop.permute.xlu0 %5062  ;;  %v4297_v32 = vsel %vm4265_vm0, %v9407_v26, %v8544_v56  ;;  %v4576_v3 = vsel %vm4545_vm8, %v4541_v15, %v9163_v52 }
 0x637   : > { %v5126_v63 = vpop.permute.xlu1 %5125  ;;  %v5666_v53 = vsel %vm4335_vm2, %v5632_v27, %v5063_v48 }
 0x638   : > { %v5700_v2 = vsel %vm4370_vm3, %v5666_v53, %v5126_v63 }
 0x63a   : > { %v14424_v62 = vpop.permute.xlu0 %9166 }
 0x63b   : > { %v14429_v39 = vpop.permute.xlu1 %9171  ;;  %v9168_v14 = vunpack.i.l.bf16 %v14424_v62  ;;  %v9169_v20 = vunpack.i.h.bf16 %v14424_v62 }
 0x63c   : > { %v9173_v43 = vunpack.i.l.bf16 %v14429_v39  ;;  %v9174_v17 = vunpack.i.h.bf16 %v14429_v39 }
 0x63d   : > { %v4611_v63 = vsel %vm4580_vm9, %v4576_v3, %v9168_v14 }
 0x63e   : > { %v5525_v1 = vpop.permute.xlu0 %5524 }
 0x63f   : > { %v5835_v12 = vsel %vm4510_vm6, %v5801_v45, %v5525_v1  ;;  %v5210_v60 = vpop.permute.xlu1 %5209  ;;  %v4332_v45 = vsel %vm4300_vm1, %v4297_v32, %v8549_v47 }
 0x640   : > { %7071 = vmatprep.mubr.msk.f32.mxu1 %vm4545_vm8, %v5835_v12  ;;  %v5734_v55 = vsel %vm4405_vm4, %v5700_v2, %v5210_v60  ;;  %v4367_v1 = vsel %vm4335_vm2, %v4332_v45, %v8554_v33  ;;  %v8584_v12 = vunpack.i.h.bf16 %v16195_v7  ;;  %v4646_v60 = vsel %vm4615_vm10, %v4611_v63, %v9173_v43  ;;  %v16199_v63 = vld [vmem:[#allocation252_spill] sm:$0xff] }
 0x641   : > { %6177 = vmatmul.mubr.f32.gmra.mrb[98].mxu1 %v4785_v18  ;;  %v4402_v61 = vsel %vm4370_vm3, %v4367_v1, %v16198_v11  ;;  %v16200_v1 = vld [vmem:[#allocation255_spill] sm:$0xff] }
 0x642   : > { %v14439_v57 = vpop.permute.xlu0 %4855  ;;  %v4437_v59 = vsel %vm4405_vm4, %v4402_v61, %v8584_v12  ;;  %v8569_v12 = vunpack.i.h.bf16 %v16199_v63  ;;  %v8574_v11 = vunpack.i.h.bf16 %v16200_v1 }
 0x643   : > { %v14443_v50 = vpop.permute.xlu1 %4961  ;;  %v4472_v37 = vsel %vm4440_vm5, %v4437_v59, %v8589_v9  ;;  %v5599_v30 = vsel %vm4265_vm0, %v9408_v0, %v14439_v57  ;;  %v9410_v59 = vld [vmem:[#allocation3 + $0x108] sm:$0xff] }
 0x644   : > { %v5633_v27 = vsel %vm4300_vm1, %v5599_v30, %v14443_v50  ;;  %v16202_v9 = vld [vmem:[#allocation259_spill] sm:$0xff] }
 0x646   : > { %v14447_v34 = vpop.permute.xlu0 %9176 }
 0x647   : > { %v14451_v24 = vpop.permute.xlu1 %9181  ;;  %v9178_v6 = vunpack.i.l.bf16 %v14447_v34  ;;  %v9179_v57 = vunpack.i.h.bf16 %v14447_v34 }
 0x648   : > { %v9183_v31 = vunpack.i.l.bf16 %v14451_v24  ;;  %v9184_v50 = vunpack.i.h.bf16 %v14451_v24 }
 0x649   : > { %v4681_v46 = vsel %vm4650_vm11, %v4646_v60, %v9178_v6  ;;  %v8568_v6 = vunpack.i.l.bf16 %v16199_v63  ;;  %v9409_v60 = vld [vmem:[#allocation3 + $0x100] sm:$0xff] }
 0x64a   : > { %v5315_v25 = vpop.permute.xlu0 %5314  ;;  %v4716_v49 = vsel %vm4685_vm12, %v4681_v46, %v9183_v31 }
 0x64b   : > { %v5424_v23 = vpop.permute.xlu1 %5423  ;;  %v5768_v41 = vsel %vm4440_vm5, %v5734_v55, %v5315_v25  ;;  %v4298_v31 = vsel %vm4265_vm0, %v9409_v60, %v8568_v6 }
 0x64c   : > { %v6138_v8 = vpop.f32.mrb[82].mxu1  ;;  %v5802_v21 = vsel %vm4475_vm7, %v5768_v41, %v5424_v23  ;;  %v4507_v23 = vsel %vm4475_vm7, %v4472_v37, %v9149_v38  ;;  %v4299_v38 = vsel %vm4265_vm0, %v9410_v59, %v8569_v12  ;;  %v16203_v37 = vld [vmem:[#allocation27_spill] sm:$0xff] }
 0x64d   : > { %6223 = vst [vmem:[#allocation4 + $0xa8] sm:$0xff] %v6138_v8  ;;  %v6140_v13 = vpop.f32.mrb[83].mxu1  ;;  %v4542_v44 = vsel %vm4510_vm6, %v4507_v23, %v9159_v36  ;;  %v8593_v36 = vunpack.i.l.bf16 %v16202_v9  ;;  %v6594_v12 = vld [vmem:[%s15019_s5 + $0xa8] sm:$0xff] }
 0x64e   : > { %v5065_v42 = vpop.permute.xlu0 %5064  ;;  %v4577_v56 = vsel %vm4545_vm8, %v4542_v44, %v9164_v58  ;;  %v9411_v58 = vld [vmem:[#allocation3 + $0x156] sm:$0xff] }
 0x64f   : > { %v5128_v40 = vpop.permute.xlu1 %5127  ;;  %v5667_v53 = vsel %vm4335_vm2, %v5633_v27, %v5065_v42  ;;  %v4612_v10 = vsel %vm4580_vm9, %v4577_v56, %v9169_v20 }
 0x650   : > { %v5701_v52 = vsel %vm4370_vm3, %v5667_v53, %v5128_v40  ;;  %v4647_v62 = vsel %vm4615_vm10, %v4612_v10, %v9174_v17 }
 0x651   : > { %v4682_v39 = vsel %vm4650_vm11, %v4647_v62, %v9179_v57  ;;  %v6573_v62 = vld [vmem:[%s15019_s5] sm:$0xff] }
 0x652   : > { %v14474_v48 = vpop.permute.xlu0 %9186  ;;  %v4717_v24 = vsel %vm4685_vm12, %v4682_v39, %v9184_v50  ;;  %v8594_v50 = vunpack.i.h.bf16 %v16202_v9  ;;  %v6595_v9 = vld [vmem:[%s15019_s5 + $0xb0] sm:$0xff] }
 0x653   : > { %v14480_v19 = vpop.permute.xlu1 %9191  ;;  %v9188_v22 = vunpack.i.l.bf16 %v14474_v48  ;;  %v9189_v42 = vunpack.i.h.bf16 %v14474_v48 }
 0x654   : > { %v9193_v23 = vunpack.i.l.bf16 %v14480_v19 }
 0x655   : > { %v4751_v54 = vsel %vm4720_vm13, %v4716_v49, %v9188_v22  ;;  %v4752_v43 = vsel %vm4720_vm13, %v4717_v24, %v9189_v42  ;;  %v6575_v24 = vld [vmem:[%s15019_s5 + $0x10] sm:$0xff] }
 0x656   : > { %v5527_v4 = vpop.permute.xlu0 %5526 }
 0x657   : > { %v5836_v18 = vsel %vm4510_vm6, %v5802_v21, %v5527_v4  ;;  %v14491_v5 = vpop.permute.xlu1 %4857  ;;  %v8573_v21 = vunpack.i.l.bf16 %v16200_v1 }
 0x658   : > { %7072 = vmatprep.mubr.msk.f32.mxu1 %vm4545_vm8, %v5836_v18  ;;  %v16201_v18 = vld [vmem:[#allocation254_spill] sm:$0xff]  ;;  %v5600_v0 = vsel %vm4265_vm0, %v9411_v58, %v14491_v5 }
 0x659   : > { %v8578_v46 = vunpack.i.l.bf16 %v16201_v18  ;;  %v4333_v61 = vsel %vm4300_vm1, %v4298_v31, %v8573_v21  ;;  %v6589_v5 = vld [vmem:[%s15019_s5 + $0x80] sm:$0xff] }
 0x65a   : > { %v9197_v16 = vpop.permute.xlu0 %9196 }
 0x65b   : > { %v9198_v7 = vunpack.i.l.bf16 %v9197_v16  ;;  %v14500_v35 = vpop.permute.xlu1 %9201  ;;  %v9199_v26 = vunpack.i.h.bf16 %v9197_v16  ;;  %v4368_v49 = vsel %vm4335_vm2, %v4333_v61, %v8578_v46 }
 0x65c   : > { %v9203_v20 = vunpack.i.l.bf16 %v14500_v35 }
 0x65d   : > { %v4786_v25 = vsel %vm4755_vm14, %v4751_v54, %v9198_v7  ;;  %v4787_v48 = vsel %vm4755_vm14, %v4752_v43, %v9199_v26  ;;  %v8579_v7 = vunpack.i.h.bf16 %v16201_v18  ;;  %v6574_v26 = vld [vmem:[%s15019_s5 + $0x8] sm:$0xff]  ;;  %v6593_v43 = vld [vmem:[%s15019_s5 + $0xa0] sm:$0xff] }
 0x65e   : > { %v5212_v51 = vpop.permute.xlu0 %5211  ;;  %6182 = vmatmul.mubr.f32.gmra.mrb[100].mxu1 %v4786_v25  ;;  %v4334_v25 = vsel %vm4300_vm1, %v4299_v38, %v8574_v11  ;;  %v7848_v59 = vpack.c.bf16 %v6594_v12, %v6593_v43  ;;  %v6577_v38 = vld [vmem:[%s15019_s5 + $0x20] sm:$0xff] }
 0x65f   : > { %v5317_v8 = vpop.permute.xlu1 %5316  ;;  %v5735_v14 = vsel %vm4405_vm4, %v5701_v52, %v5212_v51  ;;  %v8598_v51 = vunpack.i.l.bf16 %v16203_v37  ;;  %v4369_v53 = vsel %vm4335_vm2, %v4334_v25, %v8579_v7  ;;  %v6578_v7 = vld [vmem:[%s15019_s5 + $0x28] sm:$0xff] }
 0x660   : > { %v5769_v34 = vsel %vm4440_vm5, %v5735_v14, %v5317_v8  ;;  %v16204_v8 = vld [vmem:[#allocation247_spill] sm:$0xff]  ;;  %v8599_v14 = vunpack.i.h.bf16 %v16203_v37 }
 0x661   : > { %v4403_v44 = vsel %vm4370_vm3, %v4368_v49, %v16204_v8  ;;  %v9204_v49 = vunpack.i.h.bf16 %v14500_v35  ;;  %v7850_v8 = vpack.c.bf16 %v6578_v7, %v6577_v38  ;;  %v6309_v38 = vld [vmem:[#allocation4 + $0x5c] sm:$0x3]  ;;  %v6310_v7 = vld [vmem:[#allocation4 + $0x5e] sm:$0x3] }
 0x662   : > { %v4964_v13 = vpop.permute.xlu0 %4963  ;;  %v4438_v10 = vsel %vm4405_vm4, %v4403_v44, %v8593_v36 }
 0x663   : > { %v14519_v29 = vpop.permute.xlu1 %5066  ;;  %v5634_v27 = vsel %vm4300_vm1, %v5600_v0, %v4964_v13  ;;  %v6590_v13 = vld [vmem:[%s15019_s5 + $0x88] sm:$0xff]  ;;  %v4473_v39 = vsel %vm4440_vm5, %v4438_v10, %v8598_v51 }
 0x664   : > { %v7840_v42 = vpack.c.bf16 %v6590_v13, %v6589_v5  ;;  %v6598_v10 = vld [vmem:[%s15019_s5 + $0xc8] sm:$0xff]  ;;  %v9412_v5 = vld [vmem:[#allocation3 + $0x15e] sm:$0xff] }
 0x666   : > { %v14524_v15 = vpop.permute.xlu0 %9206  ;;  %7841 = vmatprep.subr.bf16.mxu1 %v7840_v42 }
 0x667   : > { %v14529_v2 = vpop.permute.xlu1 %9211  ;;  %v9208_v57 = vunpack.i.l.bf16 %v14524_v15  ;;  %v9209_v36 = vunpack.i.h.bf16 %v14524_v15 }
 0x669   : > { %v6143_v32 = vpop.f32.mrb[84].mxu1 }
 0x66a   : > { %6224 = vst [vmem:[#allocation4 + $0xb0] sm:$0xff] %v6143_v32  ;;  %v5426_v40 = vpop.permute.xlu0 %5425  ;;  %v6145_v33 = vpop.f32.mrb[85].mxu1  ;;  %v6591_v32 = vld [vmem:[%s15019_s5 + $0x90] sm:$0xff] }
 0x66b   : > { %v5803_v55 = vsel %vm4475_vm7, %v5769_v34, %v5426_v40  ;;  %v5529_v47 = vpop.permute.xlu1 %5528  ;;  %v6592_v34 = vld [vmem:[%s15019_s5 + $0x98] sm:$0xff]  ;;  %v4508_v40 = vsel %vm4475_vm7, %v4473_v39, %v9193_v23  ;;  %v5668_v33 = vsel %vm4335_vm2, %v5634_v27, %v14519_v29  ;;  %v9213_v29 = vunpack.i.l.bf16 %v14529_v2 }
 0x66c   : > { %v5837_v3 = vsel %vm4510_vm6, %v5803_v55, %v5529_v47  ;;  %v7842_v55 = vpack.c.bf16 %v6574_v26, %v6573_v62  ;;  %v7844_v47 = vpack.c.bf16 %v6592_v34, %v6591_v32  ;;  %v4543_v6 = vsel %vm4510_vm6, %v4508_v40, %v9203_v20  ;;  %v6580_v27 = vld [vmem:[%s15019_s5 + $0x38] sm:$0xff] }
 0x66d   : > { %7073 = vmatprep.mubr.msk.f32.mxu1 %vm4545_vm8, %v5837_v3  ;;  %v6576_v3 = vld [vmem:[%s15019_s5 + $0x18] sm:$0xff]  ;;  %v4578_v60 = vsel %vm4545_vm8, %v4543_v6, %v9208_v57  ;;  %v9214_v57 = vunpack.i.h.bf16 %v14529_v2 }
 0x66e   : > { %v5130_v41 = vpop.permute.xlu0 %5129  ;;  %6187 = vmatmul.mubr.f32.gmra.mrb[102].mxu1 %v4787_v48  ;;  %v16205_v48 = vld [vmem:[#allocation256_spill] sm:$0xff]  ;;  %v7846_v11 = vpack.c.bf16 %v6576_v3, %v6575_v24  ;;  %v4613_v25 = vsel %vm4580_vm9, %v4578_v60, %v9213_v29 }
 0x66f   : > { %v14541_v45 = vpop.permute.xlu1 %4859  ;;  %v4404_v63 = vsel %vm4370_vm3, %v4369_v53, %v16205_v48  ;;  %v5702_v1 = vsel %vm4370_vm3, %v5668_v33, %v5130_v41  ;;  %7843 = vmatpush3.bf16.msra.mxu1 %v7842_v55  ;;  %v9194_v41 = vunpack.i.h.bf16 %v14480_v19  ;;  %v6596_v19 = vld [vmem:[%s15019_s5 + $0xb8] sm:$0xff]  ;;  %v6597_v53 = vld [vmem:[%s15019_s5 + $0xc0] sm:$0xff]  ;;  %v6582_v33 = vld [vmem:[%s15019_s5 + $0x48] sm:$0xff] }
 0x670   : > { %v4439_v61 = vsel %vm4405_vm4, %v4404_v63, %v8594_v50  ;;  %7845 = vmatprep.subr.bf16.mxu1 %v7844_v47  ;;  %v7852_v20 = vpack.c.bf16 %v6596_v19, %v6595_v9  ;;  %v5601_v13 = vsel %vm4265_vm0, %v9412_v5, %v14541_v45  ;;  %v7856_v40 = vpack.c.bf16 %v6598_v10, %v6597_v53  ;;  %v6581_v45 = vld [vmem:[%s15019_s5 + $0x40] sm:$0xff]  ;;  %v6604_v53 = vld [vmem:[%s15019_s5 + $0xf8] sm:$0xff]  ;;  %v6587_v10 = vld [vmem:[%s15019_s5 + $0x70] sm:$0xff] }
 0x671   : > { %v7858_v63 = vpack.c.bf16 %v6582_v33, %v6581_v45 }
 0x672   : > { %v14544_v4 = vpop.permute.xlu0 %9216 }
 0x673   : > { %v14549_v22 = vpop.permute.xlu1 %9221  ;;  %v9218_v31 = vunpack.i.l.bf16 %v14544_v4  ;;  %7847 = vmatpush3.bf16.msra.mxu1 %v7846_v11  ;;  %v9219_v2 = vunpack.i.h.bf16 %v14544_v4 }
 0x674   : > { %v9223_v37 = vunpack.i.l.bf16 %v14549_v22  ;;  %7849 = vmatprep.subr.bf16.mxu1 %v7848_v59  ;;  %v9224_v4 = vunpack.i.h.bf16 %v14549_v22 }
 0x675   : > { %v4648_v58 = vsel %vm4615_vm10, %v4613_v25, %v9218_v31  ;;  %v6601_v25 = vld [vmem:[%s15019_s5 + $0xe0] sm:$0xff] }
 0x676   : > { %v5214_v16 = vpop.permute.xlu0 %5213  ;;  %v4683_v62 = vsel %vm4650_vm11, %v4648_v58, %v9223_v37  ;;  %v6602_v37 = vld [vmem:[%s15019_s5 + $0xe8] sm:$0xff] }
 0x677   : > { %v5319_v54 = vpop.permute.xlu1 %5318  ;;  %v5736_v18 = vsel %vm4405_vm4, %v5702_v1, %v5214_v16  ;;  %v4474_v16 = vsel %vm4440_vm5, %v4439_v61, %v8599_v14  ;;  %7851 = vmatpush3.bf16.msra.mxu1 %v7850_v8  ;;  %v7864_v58 = vpack.c.bf16 %v6602_v37, %v6601_v25  ;;  %v6307_v8 = vld [vmem:[#allocation4 + $0x42] sm:$0x3] }
 0x678   : > { %v5770_v51 = vsel %vm4440_vm5, %v5736_v18, %v5319_v54  ;;  %v4509_v44 = vsel %vm4475_vm7, %v4474_v16, %v9194_v41  ;;  %v6579_v54 = vld [vmem:[%s15019_s5 + $0x30] sm:$0xff]  ;;  %7853 = vmatprep.subr.bf16.mxu1 %v7852_v20  ;;  %v6600_v16 = vld [vmem:[%s15019_s5 + $0xd8] sm:$0xff] }
 0x679   : > { %v6148_v30 = vpop.f32.mrb[86].mxu1  ;;  %v7854_v34 = vpack.c.bf16 %v6580_v27, %v6579_v54  ;;  %v6378_v54 = vld [vmem:[#allocation4 + $0xa8] sm:$0x3]  ;;  %v6379_v27 = vld [vmem:[#allocation4 + $0xaa] sm:$0x3] }
 0x67a   : > { %6225 = vst [vmem:[#allocation4 + $0xb8] sm:$0xff] %v6148_v30  ;;  %v14566_v56 = vpop.permute.xlu0 %4965  ;;  %v6150_v17 = vpop.f32.mrb[87].mxu1 }
 0x67b   : > { %v14571_v52 = vpop.permute.xlu1 %5068  ;;  %v4544_v17 = vsel %vm4510_vm6, %v4509_v44, %v9204_v49  ;;  %v5635_v42 = vsel %vm4300_vm1, %v5601_v13, %v14566_v56  ;;  %7855 = vmatpush3.bf16.msra.mxu1 %v7854_v34  ;;  %v6583_v49 = vld [vmem:[%s15019_s5 + $0x50] sm:$0xff]  ;;  %v6311_v44 = vmax.f32 %v6309_v38, %v6310_v7  ;;  %v6588_v13 = vld [vmem:[%s15019_s5 + $0x78] sm:$0xff]  ;;  %v16206_v34 = vmov 0.0|0.0  }
 0x67c   : > { %v4579_v39 = vsel %vm4545_vm8, %v4544_v17, %v9209_v36  ;;  %v5669_v56 = vsel %vm4335_vm2, %v5635_v42, %v14571_v52  ;;  %7857 = vmatprep.subr.bf16.mxu1 %v7856_v40  ;;  %v6584_v36 = vld [vmem:[%s15019_s5 + $0x58] sm:$0xff]  ;;  %v6603_v17 = vld [vmem:[%s15019_s5 + $0xf0] sm:$0xff] }
 0x67d   : > { %v4614_v55 = vsel %vm4580_vm9, %v4579_v39, %v9214_v57  ;;  %v7868_v5 = vpack.c.bf16 %v6604_v53, %v6603_v17  ;;  %v6380_v39 = vmax.f32 %v6378_v54, %v6379_v27 }
 0x67e   : > { %v14611_v21 = vpop.permute.xlu0 %9226  ;;  %v4649_v6 = vsel %vm4615_vm10, %v4614_v55, %v9219_v2 }
 0x67f   : > { %v14619_v46 = vpop.permute.xlu1 %9231  ;;  %v9228_v35 = vunpack.i.l.bf16 %v14611_v21  ;;  %v9229_v29 = vunpack.i.h.bf16 %v14611_v21  ;;  %v4684_v12 = vsel %vm4650_vm11, %v4649_v6, %v9224_v4  ;;  %7859 = vmatpush3.bf16.msra.mxu1 %v7858_v63 }
 0x680   : > { %v9233_v50 = vunpack.i.l.bf16 %v14619_v46  ;;  %v9234_v22 = vunpack.i.h.bf16 %v14619_v46  ;;  %v6599_v46 = vld [vmem:[%s15019_s5 + $0xd0] sm:$0xff] }
 0x681   : > { %v4718_v32 = vsel %vm4685_vm12, %v4683_v62, %v9228_v35  ;;  %v4719_v31 = vsel %vm4685_vm12, %v4684_v12, %v9229_v29  ;;  %v7860_v19 = vpack.c.bf16 %v6600_v16, %v6599_v46  ;;  %v6585_v35 = vld [vmem:[%s15019_s5 + $0x60] sm:$0xff]  ;;  %v6414_v12 = vld [vmem:[#allocation4 + $0xb8] sm:$0x3] }
 0x682   : > { %v5428_v23 = vpop.permute.xlu0 %5427  ;;  %v4753_v24 = vsel %vm4720_vm13, %v4718_v32, %v9233_v50  ;;  %v4754_v41 = vsel %vm4720_vm13, %v4719_v31, %v9234_v22  ;;  %v6415_v22 = vld [vmem:[#allocation4 + $0xba] sm:$0x3]  ;;  %v6406_v31 = vld [vmem:[#allocation4 + $0xb6] sm:$0x3]  ;;  %v14740_v16 = vld [vmem:[%s15018_s4] ss:$0 sm:$0xff] }
 0x683   : > { %v5804_v0 = vsel %vm4475_vm7, %v5770_v51, %v5428_v23  ;;  %v5531_v30 = vpop.permute.xlu1 %5530  ;;  %v7862_v23 = vpack.c.bf16 %v6584_v36, %v6583_v49  ;;  %7861 = vmatprep.subr.bf16.mxu1 %v7860_v19 }
 0x684   : > { %v5838_v15 = vsel %vm4510_vm6, %v5804_v0, %v5531_v30  ;;  %v6586_v0 = vld [vmem:[%s15019_s5 + $0x68] sm:$0xff]  ;;  %v6306_v30 = vld [vmem:[#allocation4 + $0x40] sm:$0x3] }
 0x685   : > { %7074 = vmatprep.mubr.msk.f32.mxu1 %vm4545_vm8, %v5838_v15  ;;  %7863 = vmatpush3.bf16.msra.mxu1 %v7862_v23  ;;  %v7866_v15 = vpack.c.bf16 %v6586_v0, %v6585_v35  ;;  %v6308_v20 = vmax.f32 %v6306_v30, %v6307_v8  ;;  %v6241_v35 = vld [vmem:[#allocation4 + $0x1e] sm:$0x3]  ;;  %v6318_v0 = vld [vmem:[#allocation4 + $0x60] sm:$0x3]  ;;  %v6319_v30 = vld [vmem:[#allocation4 + $0x62] sm:$0x3] }
 0x686   : > { %v5132_v14 = vpop.permute.xlu0 %5131  ;;  %7865 = vmatprep.subr.bf16.mxu1 %v7864_v58  ;;  %v6240_v58 = vld [vmem:[#allocation4 + $0x1c] sm:$0x3]  ;;  %v6237_v8 = vld [vmem:[#allocation4] sm:$0x3]  ;;  %v6320_v27 = vmax.f32 %v6318_v0, %v6319_v30 }
 0x687   : > { %v5216_v26 = vpop.permute.xlu1 %5215  ;;  %v5703_v3 = vsel %vm4370_vm3, %v5669_v56, %v5132_v14  ;;  %v6312_v57 = vmax.f32 %v6308_v20, %v6311_v44  ;;  %v7870_v14 = vpack.c.bf16 %v6588_v13, %v6587_v10  ;;  %v6238_v44 = vld [vmem:[#allocation4 + $0x2] sm:$0x3]  ;;  %v6316_v20 = vld [vmem:[#allocation4 + $0x46] sm:$0x3]  ;;  %v6242_v54 = vmax.f32 %v6240_v58, %v6241_v35  ;;  %v6608_v35 = vld [vmem:[%s15019_s5 + $0x118] sm:$0xff] }
 0x688   : > { %v5737_v52 = vsel %vm4405_vm4, %v5703_v3, %v5216_v26  ;;  %v6239_v17 = vmax.f32 %v6237_v8, %v6238_v44  ;;  %v6609_v44 = vld [vmem:[%s15019_s5 + $0x120] sm:$0xff] }
 0x689   : > { %7867 = vmatpush3.bf16.msra.mxu1 %v7866_v15  ;;  %v6313_v26 = vadd.f32 %v14282_v28, %v6312_v57  ;;  %v6315_v15 = vld [vmem:[#allocation4 + $0x44] sm:$0x3] }
 0x68a   : > { %v4228_v47 = vpop.permute.xlu0 %4227  ;;  %7869 = vmatprep.subr.bf16.mxu1 %v7868_v5  ;;  %v6317_v53 = vmax.f32 %v6315_v15, %v6316_v20  ;;  %v6243_v57 = vmax.f32 %v6239_v17, %v6242_v54  ;;  %v6610_v54 = vld [vmem:[%s15019_s5 + $0x128] sm:$0xff] }
 0x68b   : > { %v5430_v43 = vpop.permute.xlu1 %5429  ;;  %v4788_v48 = vsel %vm4755_vm14, %v4753_v24, %v4228_v47  ;;  %v6314_v40 = vmax.f32 %v6313_v26, 0.0  ;;  %v6396_v47 = vld [vmem:[#allocation4 + $0xb0] sm:$0x3]  ;;  %v6397_v24 = vld [vmem:[#allocation4 + $0xb2] sm:$0x3] }
 0x68c   : > { %6192 = vmatmul.mubr.f32.gmra.mrb[104].mxu1 %v4788_v48  ;;  %v6321_v5 = vmax.f32 %v6317_v53, %v6320_v27 }
 0x68d   : > { %7871 = vmatpush3.bf16.msra.mxu1 %v7870_v14 }
 0x68e   : > { %v5321_v1 = vpop.permute.xlu0 %5320  ;;  %7872 = vmatprep.subr.bf16.mxu1 %v16206_v34 }
 0x68f   : > { %v5771_v60 = vsel %vm4440_vm5, %v5737_v52, %v5321_v1  ;;  %v4230_v18 = vpop.permute.xlu1 %4229 }
 0x690   : > { %v5805_v11 = vsel %vm4475_vm7, %v5771_v60, %v5430_v43  ;;  %v4789_v59 = vsel %vm4755_vm14, %v4754_v41, %v4230_v18  ;;  %v6398_v43 = vmax.f32 %v6396_v47, %v6397_v24  ;;  %v6405_v60 = vld [vmem:[#allocation4 + $0xb4] sm:$0x3] }
 0x691   : > { %v6407_v38 = vmax.f32 %v6405_v60, %v6406_v31 }
 0x692   : > { %v5533_v61 = vpop.permute.xlu0 %5532 }
 0x693   : > { %v5839_v21 = vsel %vm4510_vm6, %v5805_v11, %v5533_v61  ;;  %v9242_v13 = vpop.permute.xlu1 %9241 }
 0x694   : > { %7075 = vmatprep.mubr.msk.f32.mxu1 %vm4545_vm8, %v5839_v21  ;;  %v6416_v21 = vmax.f32 %v6414_v12, %v6415_v22  ;;  %v9243_v47 = vunpack.i.l.bf16 %v9242_v13 }
 0x695   : > { %6197 = vmatmul.mubr.f32.gmra.mrb[106].mxu1 %v4789_v59 }
 0x696   : > { %v6153_v9 = vpop.f32.mrb[88].mxu1  ;;  %v9237_v10 = vpop.permute.xlu0 %9236 }
 0x697   : > { %6226 = vst [vmem:[#allocation4 + $0xc0] sm:$0xff] %v6153_v9  ;;  %v6155_v51 = vpop.f32.mrb[89].mxu1 }
 0x69a   : > { %v9247_v14 = vpop.permute.xlu0 %9246 }
 0x69e   : > { %v6381_v62 = vld [vmem:[#allocation4 + $0xc4] sm:$0x3]  ;;  %v6382_v50 = vld [vmem:[#allocation4 + $0xc6] sm:$0x3]  ;;  %v9257_v24 = vpop.permute.xlu0 %9256 }
 0x69f   : > { %v6383_v42 = vmax.f32 %v6381_v62, %v6382_v50  ;;  %v6250_v62 = vadd.f32 %v14740_v16, %v6243_v57  ;;  %v6322_v50 = vadd.f32 %v14740_v16, %v6321_v5  ;;  %v6611_v57 = vld [vmem:[%s15019_s5 + $0x130] sm:$0xff]  ;;  %v6612_v5 = vld [vmem:[%s15019_s5 + $0x138] sm:$0xff] }
 0x6a1   : > { %v6384_v32 = vmax.f32 %v6380_v39, %v6383_v42  ;;  %v9239_v39 = vunpack.i.h.bf16 %v9237_v10  ;;  %v9238_v42 = vunpack.i.l.bf16 %v9237_v10  ;;  %v6251_v26 = vmax.f32 %v6250_v62, 0.0 }
 0x6a2   : > { %v7879_v10 = vpack.c.bf16 %v6610_v54, %v6609_v44 }
 0x6a3   : > { %v6385_v2 = vadd.f32 %v14282_v28, %v6384_v32  ;;  %v6323_v32 = vmax.f32 %v6322_v50, 0.0  ;;  %v7882_v50 = vpack.c.bf16 %v6612_v5, %v6611_v57  ;;  %v6387_v57 = vld [vmem:[#allocation4 + $0xac] sm:$0x3]  ;;  %v6388_v5 = vld [vmem:[#allocation4 + $0xae] sm:$0x3] }
 0x6a5   : > { %v6386_v45 = vmax.f32 %v6385_v2, 0.0  ;;  %v6524_v2 = vsel %vm4300_vm1, %v6251_v26, %v9239_v39  ;;  %v6614_v39 = vld [vmem:[%s15019_s5 + $0x148] sm:$0xff]  ;;  %v6615_v26 = vld [vmem:[%s15019_s5 + $0x150] sm:$0xff] }
 0x6a7   : > { %v9265_v33 = vpack.i.bf16 %v6314_v40, %v6386_v45  ;;  %v6531_v40 = vsel %vm4300_vm1, %v6323_v32, %v9238_v42  ;;  %v9252_v45 = vpop.permute.xlu1 %9251  ;;  %v6616_v32 = vld [vmem:[%s15019_s5 + $0x158] sm:$0xff] }
 0x6a8   : > { %v9253_v12 = vunpack.i.l.bf16 %v9252_v45 }
 0x6a9   : > { %9266 = vrot.lane.b32.xlu0 %v9265_v33, %s15563_s14  ;;  %v9249_v33 = vunpack.i.h.bf16 %v9247_v14 }
 0x6ab   : > { %v9262_v22 = vpop.permute.xlu1 %9261 }
 0x6b0   : > { %v6158_v55 = vpop.f32.mrb[90].mxu1 }
 0x6b1   : > { %6227 = vst [vmem:[#allocation4 + $0xc8] sm:$0xff] %v6158_v55  ;;  %v6160_v56 = vpop.f32.mrb[91].mxu1  ;;  %v9248_v55 = vunpack.i.l.bf16 %v9247_v14  ;;  %v6613_v14 = vld [vmem:[%s15019_s5 + $0x140] sm:$0xff] }
 0x6b2   : > { %v9244_v56 = vunpack.i.h.bf16 %v9242_v13  ;;  %v7885_v42 = vpack.c.bf16 %v6614_v39, %v6613_v14 }
 0x6b8   : > { %v6399_v4 = vld [vmem:[#allocation4 + $0xcc] sm:$0x3]  ;;  %v6400_v3 = vld [vmem:[#allocation4 + $0xce] sm:$0x3] }
 0x6b9   : > { %v6401_v48 = vmax.f32 %v6399_v4, %v6400_v3  ;;  %v6525_v3 = vsel %vm4370_vm3, %v6524_v2, %v9244_v56  ;;  %v7888_v2 = vpack.c.bf16 %v6616_v32, %v6615_v26 }
 0x6bb   : > { %v6402_v63 = vmax.f32 %v6398_v43, %v6401_v48  ;;  %v6532_v43 = vsel %vm4370_vm3, %v6531_v40, %v9243_v47  ;;  %v6617_v40 = vld [vmem:[%s15019_s5 + $0x160] sm:$0xff]  ;;  %v6619_v47 = vld [vmem:[%s15019_s5 + $0x170] sm:$0xff] }
 0x6bd   : > { %v6403_v6 = vadd.f32 %v14282_v28, %v6402_v63  ;;  %v6526_v63 = vsel %vm4440_vm5, %v6525_v3, %v9249_v33 }
 0x6bf   : > { %v6404_v29 = vmax.f32 %v6403_v6, 0.0  ;;  %v6533_v6 = vsel %vm4440_vm5, %v6532_v43, %v9248_v55 }
 0x6c0   : > { %v6534_v31 = vsel %vm4510_vm6, %v6533_v6, %v9253_v12 }
 0x6c1   : > { %6539 = vrot.lane.b32.xlu1 %v6404_v29, %s15594_s2  ;;  %v9259_v29 = vunpack.i.h.bf16 %v9257_v24  ;;  %s9420_s2 = scalar_lea.vmem %s9419_s11, 64 }
 0x6cd   : > { %v6163_v52 = vpop.f32.mrb[92].mxu1 }
 0x6ce   : > { %6228 = vst [vmem:[#allocation4 + $0xd0] sm:$0xff] %v6163_v52  ;;  %v6165_v1 = vpop.f32.mrb[93].mxu1  ;;  %v9258_v52 = vunpack.i.l.bf16 %v9257_v24  ;;  %v6620_v24 = vld [vmem:[%s15019_s5 + $0x178] sm:$0xff] }
 0x6cf   : > { %v9254_v1 = vunpack.i.h.bf16 %v9252_v45  ;;  %v6618_v45 = vld [vmem:[%s15019_s5 + $0x168] sm:$0xff] }
 0x6d0   : > { %v7891_v33 = vpack.c.bf16 %v6618_v45, %v6617_v40 }
 0x6d1   : > { %v6527_v60 = vsel %vm4510_vm6, %v6526_v63, %v9254_v1  ;;  %v6622_v63 = vld [vmem:[%s15019_s5 + $0x188] sm:$0xff] }
 0x6d5   : > { %v6417_v18 = vld [vmem:[#allocation4 + $0xd4] sm:$0x3]  ;;  %v6418_v11 = vld [vmem:[#allocation4 + $0xd6] sm:$0x3]  ;;  %v6408_v61 = vld [vmem:[#allocation4 + $0xd0] sm:$0x3] }
 0x6d6   : > { %v6419_v41 = vmax.f32 %v6417_v18, %v6418_v11  ;;  %v6409_v59 = vld [vmem:[#allocation4 + $0xd2] sm:$0x3]  ;;  %v6528_v18 = vsel %vm4580_vm9, %v6527_v60, %v9259_v29  ;;  %v6535_v11 = vsel %vm4580_vm9, %v6534_v31, %v9258_v52 }
 0x6d7   : > { %v6410_v7 = vmax.f32 %v6408_v61, %v6409_v59  ;;  %v9264_v61 = vunpack.i.h.bf16 %v9262_v22 }
 0x6d8   : > { %v6420_v46 = vmax.f32 %v6416_v21, %v6419_v41  ;;  %v9263_v21 = vunpack.i.l.bf16 %v9262_v22 }
 0x6d9   : > { %v6411_v28 = vmax.f32 %v6407_v38, %v6410_v7 }
 0x6da   : > { %v6421_v49 = vadd.f32 %v14740_v16, %v6420_v46  ;;  %v6536_v7 = vsel %vm4650_vm11, %v6535_v11, %v9263_v21  ;;  %v6529_v46 = vsel %vm4650_vm11, %v6528_v18, %v9264_v61 }
 0x6db   : > { %v6412_v9 = vadd.f32 %v14740_v16, %v6411_v28 }
 0x6dc   : > { %v6422_v19 = vmax.f32 %v6421_v49, 0.0 }
 0x6dd   : > { %v6168_v36 = vpop.f32.mrb[94].mxu1  ;;  %v6413_v25 = vmax.f32 %v6412_v9, 0.0 }
 0x6de   : > { %6547 = vrot.lane.b32.xlu1 %v6422_v19, %s15595_s19  ;;  %v6170_v37 = vpop.f32.mrb[95].mxu1 }
 0x6df   : > { %6543 = vrot.lane.b32.xlu0 %v6413_v25, %s15586_s22  ;;  %v6605_v37 = vld [vmem:[%s15019_s5 + $0x100] sm:$0xff] }
 0x6fa   : > { %v6173_v51 = vpop.f32.mrb[96].mxu1 }
 0x6fb   : > { %6230 = vst [vmem:[#allocation4 + $0xe0] sm:$0xff] %v6173_v51  ;;  %v6175_v23 = vpop.f32.mrb[97].mxu1  ;;  %v6606_v51 = vld [vmem:[%s15019_s5 + $0x108] sm:$0xff] }
 0x6fc   : > { %v6607_v23 = vld [vmem:[%s15019_s5 + $0x110] sm:$0xff]  ;;  %v7873_v58 = vpack.c.bf16 %v6606_v51, %v6605_v37 }
 0x6fd   : > { %v7876_v8 = vpack.c.bf16 %v6608_v35, %v6607_v23 }
 0x702   : > { %v6423_v0 = vld [vmem:[#allocation4 + $0xe0] sm:$0x3]  ;;  %v6424_v30 = vld [vmem:[#allocation4 + $0xe2] sm:$0x3]  ;;  %v6432_v6 = vld [vmem:[#allocation4 + $0xe4] sm:$0x3] }
 0x703   : > { %v6425_v27 = vmax.f32 %v6423_v0, %v6424_v30  ;;  %v6433_v29 = vld [vmem:[#allocation4 + $0xe6] sm:$0x3] }
 0x704   : > { %v6434_v21 = vmax.f32 %v6432_v6, %v6433_v29  ;;  %v6777_v6 = vld [vmem:[%s15021_s7 + $0x18] sm:$0xff] }
 0x714   : > { %v6178_v4 = vpop.f32.mrb[98].mxu1 }
 0x715   : > { %6231 = vst [vmem:[#allocation4 + $0xe8] sm:$0xff] %v6178_v4  ;;  %v6180_v48 = vpop.f32.mrb[99].mxu1  ;;  %v6621_v4 = vld [vmem:[%s15019_s5 + $0x180] sm:$0xff] }
 0x716   : > { %v7894_v48 = vpack.c.bf16 %v6620_v24, %v6619_v47  ;;  %v7897_v22 = vpack.c.bf16 %v6622_v63, %v6621_v4  ;;  %v6774_v47 = vld [vmem:[%s15021_s7] sm:$0xff]  ;;  %v6776_v63 = vld [vmem:[%s15021_s7 + $0x10] sm:$0xff] }
 0x71b   : > { %v9267_v41 = vpop.permute.xlu0 %9266 }
 0x71c   : > { %v9269_v59 = vunpack.i.h.bf16 %v9267_v41  ;;  %v9268_v38 = vunpack.i.l.bf16 %v9267_v41  ;;  %v6441_v3 = vld [vmem:[#allocation4 + $0xe8] sm:$0x3]  ;;  %v6442_v43 = vld [vmem:[#allocation4 + $0xea] sm:$0x3] }
 0x71d   : > { %v6443_v31 = vmax.f32 %v6441_v3, %v6442_v43 }
 0x71e   : > { %v6537_v28 = vsel %vm4720_vm13, %v6536_v7, %v9268_v38  ;;  %v6530_v49 = vsel %vm4720_vm13, %v6529_v46, %v9269_v59 }
 0x71f   : > { %6697 = vmatprep.mubr.f32.mxu1 %v6537_v28 }
 0x720   : > { %6698 = vmatmul.mubr.f32.vlgmr.msra.gmra.mrb[108].mxu1 %v6530_v49 }
 0x721   : > { %7874 = vmatpush1.bf16.msra.mxu1 %v7873_v58 }
 0x722   : > { %7875 = vmatprep.subr.bf16.mxu1 %v16206_v34 }
 0x725   : > { %7877 = vmatpush1.bf16.msra.mxu1 %v7876_v8 }
 0x726   : > { %7878 = vmatprep.subr.bf16.mxu1 %v16206_v34 }
 0x729   : > { %7880 = vmatpush1.bf16.msra.mxu1 %v7879_v10  ;;  %v6391_v10 = vld [vmem:[#allocation4 + $0xca] sm:$0x3] }
 0x72a   : > { %7881 = vmatprep.subr.bf16.mxu1 %v16206_v34 }
 0x72d   : > { %7883 = vmatpush1.bf16.msra.mxu1 %v7882_v50 }
 0x72e   : > { %7884 = vmatprep.subr.bf16.mxu1 %v16206_v34 }
 0x731   : > { %v6183_v9 = vpop.f32.mrb[100].mxu1  ;;  %7886 = vmatpush1.bf16.msra.mxu1 %v7885_v42 }
 0x732   : > { %6232 = vst [vmem:[#allocation4 + $0xf0] sm:$0xff] %v6183_v9  ;;  %v6185_v19 = vpop.f32.mrb[101].mxu1  ;;  %7887 = vmatprep.subr.bf16.mxu1 %v16206_v34 }
 0x733   : > { %v6540_v39 = vpop.permute.xlu1 %6539 }
 0x735   : > { %7889 = vmatpush1.bf16.msra.mxu1 %v7888_v2 }
 0x736   : > { %7890 = vmatprep.subr.bf16.mxu1 %v16206_v34 }
 0x739   : > { %7892 = vmatpush1.bf16.msra.mxu1 %v7891_v33  ;;  %v6459_v49 = vld [vmem:[#allocation4 + $0xf0] sm:$0x3]  ;;  %v6460_v9 = vld [vmem:[#allocation4 + $0xf2] sm:$0x3] }
 0x73a   : > { %7893 = vmatprep.subr.bf16.mxu1 %v16206_v34  ;;  %v6461_v58 = vmax.f32 %v6459_v49, %v6460_v9  ;;  %v6786_v49 = vld [vmem:[%s15021_s7 + $0x60] sm:$0xff]  ;;  %v6787_v9 = vld [vmem:[%s15021_s7 + $0x68] sm:$0xff] }
 0x73d   : > { %7895 = vmatpush1.bf16.msra.mxu1 %v7894_v48 }
 0x73e   : > { %7896 = vmatprep.subr.bf16.mxu1 %v16206_v34 }
 0x741   : > { %v6188_v36 = vpop.f32.mrb[102].mxu1  ;;  %7898 = vmatpush1.bf16.msra.mxu1 %v7897_v22 }
 0x742   : > { %6233 = vst [vmem:[#allocation4 + $0xf8] sm:$0xff] %v6188_v36  ;;  %v6190_v25 = vpop.f32.mrb[103].mxu1  ;;  %7899 = vmatprep.subr.bf16.mxu1 %v16206_v34  ;;  %v6450_v36 = vld [vmem:[#allocation4 + $0xec] sm:$0x3] }
 0x743   : > { %v6451_v25 = vld [vmem:[#allocation4 + $0xee] sm:$0x3] }
 0x744   : > { %v6452_v30 = vmax.f32 %v6450_v36, %v6451_v25  ;;  %v6788_v36 = vld [vmem:[%s15021_s7 + $0x70] sm:$0xff]  ;;  %v6789_v25 = vld [vmem:[%s15021_s7 + $0x78] sm:$0xff] }
 0x749   : > { %v6426_v15 = vld [vmem:[#allocation4 + $0xfc] sm:$0x3]  ;;  %v6427_v20 = vld [vmem:[#allocation4 + $0xfe] sm:$0x3] }
 0x74a   : > { %v6428_v17 = vmax.f32 %v6426_v15, %v6427_v20 }
 0x74c   : > { %v6429_v53 = vmax.f32 %v6425_v27, %v6428_v17 }
 0x74e   : > { %v6430_v13 = vadd.f32 %v14740_v16, %v6429_v53  ;;  %v6390_v53 = vld [vmem:[#allocation4 + $0xc8] sm:$0x3] }
 0x750   : > { %v6431_v62 = vmax.f32 %v6430_v13, 0.0  ;;  %v6392_v13 = vmax.f32 %v6390_v53, %v6391_v10  ;;  %v6548_v32 = vpop.permute.xlu1 %6547  ;;  %v6872_v53 = vld [vmem:[%s15023_s9 + $0x20] sm:$0xff]  ;;  %v6873_v10 = vld [vmem:[%s15023_s9 + $0x28] sm:$0xff] }
 0x751   : > { %v6544_v26 = vpop.permute.xlu0 %6543 }
 0x752   : > { %6551 = vrot.lane.b32.xlu0 %v6431_v62, %s15583_s30  ;;  %v6389_v62 = vmax.f32 %v6387_v57, %v6388_v5  ;;  %v7930_v57 = vpack.c.bf16 %v6873_v10, %v6872_v53  ;;  %v6874_v5 = vld [vmem:[%s15023_s9 + $0x30] sm:$0xff]  ;;  %s380_s30 = scalar_lea.vmem [#allocation5], %s7039_s28 }
 0x753   : > { %s6976_s29 = sshll.u32 %s380_s30, 4  ;;  %s14974_s29 = int_to_ptr.vmem [resolvable:$true] %s6976_s29 }
 0x754   : > { %v6393_v50 = vmax.f32 %v6389_v62, %v6392_v13  ;;  %v6875_v13 = vld [vmem:[%s15023_s9 + $0x38] sm:$0xff]  ;;  %s9414_s10 = scalar_lea.vmem %s14974_s29, 32  ;;  %p9421_p0 = scmp.lt.s32.totalorder %s14974_s29, %s9419_s11 }
 0x755   : > { %v7933_v62 = vpack.c.bf16 %v6875_v13, %v6874_v5  ;;  %p9415_p11 = scmp.ne.s32.totalorder %s14974_s29, %s9414_s10  ;;  %p9422_p1 = scmp.lt.s32.totalorder %s9420_s2, %s9414_s10 }
 0x756   : > { %v6394_v14 = vadd.f32 %v14740_v16, %v6393_v50  ;;  %v6876_v50 = vld [vmem:[%s15023_s9 + $0x40] sm:$0xff] }
 0x757   : > { %p9416_p12 = pnand %p9415_p11, %p9595_p5  ;;  %p9423_p2 = por %p9422_p1, %p9421_p0 }
 0x758   : > { %v6395_v42 = vmax.f32 %v6394_v14, 0.0  ;;  %v6877_v14 = vld [vmem:[%s15023_s9 + $0x48] sm:$0xff] }
 0x759   : > { %p9417_p13 = pneg %p9416_p12 }
 0x75a   : > { %v6566_v2 = vsel %vm4300_vm1, %v6395_v42, %v6540_v39  ;;  %v7936_v39 = vpack.c.bf16 %v6877_v14, %v6876_v50  ;;  %v6878_v42 = vld [vmem:[%s15023_s9 + $0x50] sm:$0xff] }
 0x75b   : > { %v6567_v40 = vsel %vm4370_vm3, %v6566_v2, %v6544_v26  ;;  %v6879_v26 = vld [vmem:[%s15023_s9 + $0x58] sm:$0xff]  ;;  %v6880_v2 = vld [vmem:[%s15023_s9 + $0x60] sm:$0xff]  ;;  %p9424_p3 = pnand %p9423_p2, %p9417_p13 }
 0x75f   : > { %v6193_v55 = vpop.f32.mrb[104].mxu1 }
 0x760   : > { %6234 = vst [vmem:[#allocation4 + $0x100] sm:$0xff] %v6193_v55  ;;  %v6195_v56 = vpop.f32.mrb[105].mxu1  ;;  %v6568_v55 = vsel %vm4440_vm5, %v6567_v40, %v6548_v32  ;;  %v7939_v32 = vpack.c.bf16 %v6879_v26, %v6878_v42  ;;  %v6881_v40 = vld [vmem:[%s15023_s9 + $0x68] sm:$0xff] }
 0x767   : > { %v6444_v52 = vld [vmem:[#allocation4 + $0x104] sm:$0x3]  ;;  %v6445_v1 = vld [vmem:[#allocation4 + $0x106] sm:$0x3]  ;;  %v6435_v12 = vld [vmem:[#allocation4 + $0x100] sm:$0x3] }
 0x768   : > { %v6198_v60 = vpop.f32.mrb[106].mxu1  ;;  %v6446_v18 = vmax.f32 %v6444_v52, %v6445_v1  ;;  %v6436_v11 = vld [vmem:[#allocation4 + $0x102] sm:$0x3]  ;;  %v7903_v52 = vpack.c.bf16 %v6777_v6, %v6776_v63  ;;  %v6778_v1 = vld [vmem:[%s15021_s7 + $0x20] sm:$0xff] }
 0x769   : > { %6235 = vst [vmem:[#allocation4 + $0x108] sm:$0xff] %v6198_v60  ;;  %v6200_v61 = vpop.f32.mrb[107].mxu1  ;;  %v6437_v41 = vmax.f32 %v6435_v12, %v6436_v11  ;;  %v6779_v12 = vld [vmem:[%s15021_s7 + $0x28] sm:$0xff]  ;;  %v6781_v11 = vld [vmem:[%s15021_s7 + $0x38] sm:$0xff] }
 0x76a   : > { %v6447_v59 = vmax.f32 %v6443_v31, %v6446_v18  ;;  %v7906_v60 = vpack.c.bf16 %v6779_v12, %v6778_v1  ;;  %v6780_v18 = vld [vmem:[%s15021_s7 + $0x30] sm:$0xff] }
 0x76b   : > { %v6438_v38 = vmax.f32 %v6434_v21, %v6437_v41  ;;  %v7909_v21 = vpack.c.bf16 %v6781_v11, %v6780_v18  ;;  %v6782_v41 = vld [vmem:[%s15021_s7 + $0x40] sm:$0xff] }
 0x76c   : > { %v6448_v7 = vadd.f32 %v14740_v16, %v6447_v59  ;;  %v6783_v59 = vld [vmem:[%s15021_s7 + $0x48] sm:$0xff] }
 0x76d   : > { %v6439_v46 = vadd.f32 %v14740_v16, %v6438_v38  ;;  %v7912_v38 = vpack.c.bf16 %v6783_v59, %v6782_v41 }
 0x76e   : > { %v6449_v28 = vmax.f32 %v6448_v7, 0.0  ;;  %v6784_v7 = vld [vmem:[%s15021_s7 + $0x50] sm:$0xff] }
 0x76f   : > { %v6440_v19 = vmax.f32 %v6439_v46, 0.0  ;;  %v6785_v46 = vld [vmem:[%s15021_s7 + $0x58] sm:$0xff] }
 0x770   : > { %6559 = vrot.lane.b32.xlu0 %v6449_v28, %s15574_s13  ;;  %v6462_v37 = vld [vmem:[#allocation4 + $0x10c] sm:$0x3]  ;;  %v6463_v51 = vld [vmem:[#allocation4 + $0x10e] sm:$0x3]  ;;  %v6453_v23 = vld [vmem:[#allocation4 + $0x108] sm:$0x3]  ;;  %v7915_v28 = vpack.c.bf16 %v6785_v46, %v6784_v7 }
 0x771   : > { %6555 = vrot.lane.b32.xlu1 %v6440_v19, %s15564_s12  ;;  %v6464_v35 = vmax.f32 %v6462_v37, %v6463_v51  ;;  %v6454_v0 = vld [vmem:[#allocation4 + $0x10a] sm:$0x3]  ;;  %v7918_v19 = vpack.c.bf16 %v6787_v9, %v6786_v49  ;;  %v7921_v37 = vpack.c.bf16 %v6789_v25, %v6788_v36  ;;  %v16207_v51 = vmov 0.0  }
 0x772   : > { %v6455_v8 = vmax.f32 %v6453_v23, %v6454_v0  ;;  %v7077_v23 = vld [vmem:[%s15020_s6] ss:$0 sm:$0xff]  ;;  %v6869_v0 = vld [vmem:[%s15023_s9 + $0x8] sm:$0xff] }
 0x773   : > { %v6465_v44 = vmax.f32 %v6461_v58, %v6464_v35  ;;  %v6868_v35 = vld [vmem:[%s15023_s9] sm:$0xff] }
 0x774   : > { %v6456_v15 = vmax.f32 %v6452_v30, %v6455_v8 }
 0x775   : > { %v6466_v20 = vadd.f32 %v14740_v16, %v6465_v44 }
 0x776   : > { %v6457_v54 = vadd.f32 %v14740_v16, %v6456_v15  ;;  %v6775_v16 = vld [vmem:[%s15021_s7 + $0x8] sm:$0xff]  ;;  %v7924_v15 = vpack.c.bf16 %v6869_v0, %v6868_v35 }
 0x777   : > { %v6467_v27 = vmax.f32 %v6466_v20, 0.0  ;;  %v7900_v3 = vpack.c.bf16 %v6775_v16, %v6774_v47  ;;  %v7079_v47 = vld [vmem:[%s15022_s8] ss:$0 sm:$0xff] }
 0x778   : > { %v6458_v17 = vmax.f32 %v6457_v54, 0.0  ;;  %v6870_v54 = vld [vmem:[%s15023_s9 + $0x10] sm:$0xff] }
 0x779   : > { %7078 = vmatprep.mubr.msk.f32.mxu1 %vm4300_vm1, %v6467_v27  ;;  %v6871_v27 = vld [vmem:[%s15023_s9 + $0x18] sm:$0xff] }
 0x77a   : > { %6563 = vrot.lane.b32.xlu1 %v6458_v17, %s15563_s14  ;;  %v7927_v17 = vpack.c.bf16 %v6871_v27, %v6870_v54 }
 0x7c4   : > { %v6552_v45 = vpop.permute.xlu0 %6551 }
 0x7c5   : > { %v6569_v56 = vsel %vm4510_vm6, %v6568_v55, %v6552_v45  ;;  %v7942_v45 = vpack.c.bf16 %v6881_v40, %v6880_v2  ;;  %v6883_v55 = vld [vmem:[%s15023_s9 + $0x78] sm:$0xff] }
 0x7e2   : > { %v6560_v24 = vpop.permute.xlu0 %6559 }
 0x7e3   : > { %v6556_v33 = vpop.permute.xlu1 %6555 }
 0x7e4   : > { %v6570_v4 = vsel %vm4580_vm9, %v6569_v56, %v6556_v33  ;;  %v6882_v33 = vld [vmem:[%s15023_s9 + $0x70] sm:$0xff] }
 0x7e5   : > { %v6571_v43 = vsel %vm4650_vm11, %v6570_v4, %v6560_v24  ;;  %v7945_v56 = vpack.c.bf16 %v6883_v55, %v6882_v33 }
 0x7ec   : > { %v6564_v48 = vpop.permute.xlu1 %6563 }
 0x7ed   : > { %v6572_v29 = vsel %vm4720_vm13, %v6571_v43, %v6564_v48 }
 0x7ee   : > { %6768 = vmatmul.mubr.f32.vlgmr.msra.gmra.mrb[110].mxu1 %v6572_v29 }
 0x7ef   : > { %7901 = vmatpush3.bf16.msra.mxu1 %v7900_v3  ;;  %7734 = vmatprep.mubr.msk.f32.mxu1 %vm9495_vm15, %v16207_v51 }
 0x7f0   : > { %7902 = vmatprep.subr.bf16.mxu1 %v16206_v34 }
 0x7f3   : > { %v7333_v22 = vpop.f32.mrb[108].mxu1  ;;  %7904 = vmatpush3.bf16.msra.mxu1 %v7903_v52 }
 0x7f4   : > { %v7334_v31 = vpop.f32.mrb[109].mxu1  ;;  %7905 = vmatprep.subr.bf16.mxu1 %v16206_v34 }
 0x7f5   : > { %v7335_v61 = vadd.f32 %v7334_v31, %v7333_v22 }
 0x7f7   : > { %7907 = vmatpush3.bf16.msra.mxu1 %v7906_v60  ;;  %v6700_v58 = vadd.f32 %v7335_v61, %v7077_v23 }
 0x7f8   : > { %7908 = vmatprep.subr.bf16.mxu1 %v16206_v34 }
 0x7fb   : > { %7910 = vmatpush3.bf16.msra.mxu1 %v7909_v21 }
 0x7fc   : > { %7911 = vmatprep.subr.bf16.mxu1 %v16206_v34 }
 0x7ff   : > { %7913 = vmatpush3.bf16.msra.mxu1 %v7912_v38 }
 0x800   : > { %7914 = vmatprep.subr.bf16.mxu1 %v16206_v34 }
 0x803   : > { %7916 = vmatpush3.bf16.msra.mxu1 %v7915_v28 }
 0x804   : > { %7917 = vmatprep.subr.bf16.mxu1 %v16206_v34 }
 0x807   : > { %7919 = vmatpush3.bf16.msra.mxu1 %v7918_v19 }
 0x808   : > { %7920 = vmatprep.subr.bf16.mxu1 %v16206_v34 }
 0x80b   : > { %7922 = vmatpush3.bf16.msra.mxu1 %v7921_v37 }
 0x80c   : > { %7923 = vmatprep.subr.bf16.mxu1 %v16206_v34 }
 0x8c1   : > { %v6769_v30 = vpop.f32.mrb[110].mxu1 }
 0x8c2   : > { %v6770_v8 = vadd.f32 %v6769_v30, %v6700_v58  ;;  %v6771_v44 = vpop.f32.mrb[111].mxu1 }
 0x8c4   : > { %v6773_v20 = vmax.f32 %v6770_v8, 0.0 }
 0x8c6   : > { %7735 = vmatmul.mubr.f32.vlgmr.msra.gmra.mrb[112].mxu1 %v6773_v20 }
 0x8c7   : > { %7925 = vmatpush3.bf16.msra.mxu1 %v7924_v15  ;;  %7769 = vmatprep.mubr.msk.f32.mxu1 %vm9495_vm15, %v16207_v51 }
 0x8c8   : > { %7926 = vmatprep.subr.bf16.mxu1 %v16206_v34 }
 0x8cb   : > { %7928 = vmatpush3.bf16.msra.mxu1 %v7927_v17 }
 0x8cc   : > { %7929 = vmatprep.subr.bf16.mxu1 %v16206_v34 }
 0x8cf   : > { %7931 = vmatpush3.bf16.msra.mxu1 %v7930_v57 }
 0x8d0   : > { %7932 = vmatprep.subr.bf16.mxu1 %v16206_v34 }
 0x8d3   : > { %7934 = vmatpush3.bf16.msra.mxu1 %v7933_v62 }
 0x8d4   : > { %7935 = vmatprep.subr.bf16.mxu1 %v16206_v34 }
 0x8d7   : > { %7937 = vmatpush3.bf16.msra.mxu1 %v7936_v39 }
 0x8d8   : > { %7938 = vmatprep.subr.bf16.mxu1 %v16206_v34 }
 0x8db   : > { %7940 = vmatpush3.bf16.msra.mxu1 %v7939_v32 }
 0x8dc   : > { %7941 = vmatprep.subr.bf16.mxu1 %v16206_v34 }
 0x8df   : > { %7943 = vmatpush3.bf16.msra.mxu1 %v7942_v45 }
 0x8e0   : > { %7944 = vmatprep.subr.bf16.mxu1 %v16206_v34  ;;  %v7080_v34 = vld [vmem:[%s16208_s0] ss:$0 sm:$0xff] }
 0x8e3   : > { %7946 = vmatpush3.bf16.msra.mxu1 %v7945_v56 }
 0x999   : > { %v6863_v16 = vpop.f32.mrb[112].mxu1 }
 0x99a   : > { %v6864_v24 = vadd.f32 %v7079_v47, %v6863_v16  ;;  %v7736_v4 = vpop.f32.mrb[113].mxu1 }
 0x99c   : > { %v6867_v3 = vmax.f32 %v6864_v24, 0.0 }
 0x99e   : > { %7770 = vmatmul.mubr.f32.vlgmr.msra.gmra.mrb[114].mxu1 %v6867_v3 }
 0xa71   : > { %v6957_v43 = vpop.f32.mrb[114].mxu1 }
 0xa72   : > { %v6958_v48 = vadd.f32 %v7080_v34, %v6957_v43  ;;  %v7771_v63 = vpop.f32.mrb[115].mxu1 }
 0xa74   : > { %6961 = vst [vmem:[%s380_s30] sm:$0x3] %v6958_v48 }
 0xa75   : > { %9427 = shalt.err (!%p9424_p3)
}
 0xa76   : > { %s9428_s12 = scalar_lea.hbm %s14972_s17, 32  ;;  %s9432_s19 = scalar_lea.hbm %s16209_s26, 64 }
 0xa77   : > { %p9429_p4 = scmp.ne.s32.totalorder %s14972_s17, %s9428_s12  ;;  %p9433_p9 = scmp.lt.u32.totalorder %s14972_s17, %s16209_s26 }
 0xa78   : > { %p9434_p10 = scmp.lt.u32.totalorder %s9432_s19, %s9428_s12  ;;  %p9436_p12 = scmp.lt.u32.totalorder %s9428_s12, %s14972_s17 }
 0xa79   : > { %p9430_p7 = pnand %p9429_p4, %p9595_p5 }
 0xa7a   : > { %p9435_p11 = por %p9434_p10, %p9433_p9 }
 0xa7b   : > { %p9431_p8 = pneg %p9430_p7 }
 0xa7c   : > { %p9437_p13 = por %p9436_p12, %p9435_p11 }
 0xa7e   : > { %p9438_p0 = pnand %p9437_p13, %p9431_p8 }
 0xa80   : > { %9441 = shalt.err (!%p9438_p0)
}
 0xa81   : > { %7963 = dma.vmem_to_hbm [thread:$0]  (%p9595_p5), %s14974_s29, 32, %s14972_s17, %s6963_s20  }
 0xa82 PF: > { %s16210_s28 = sld [smem:[#allocation10_spill]]  ;;  %s16211_s15 = sld [smem:[#allocation8_spill]] }
 0xa88   : > { %p7969_p1 = scmp.ge.s32.totalorder %s16210_s28, 2  ;;  %s6988_s0 = sand.u32 1, %s16211_s15  }
 0xa89   : > { %s6989_s1 = scalar_lea.sflag [#allocation6], %s6988_s0 }
 0xa8a   : > { %p7966_p2 = pnand %p7969_p1, %p9599_p6 }
 0xa8c   : > { %9459 = dma.done.wait (!%p7966_p2), %s6989_s1, 32  }
 0xa8d   : > { %9461 = vsyncadd (!%p7966_p2), %s6989_s1, 4294967264  ;;  %s16213_s20 = sld [smem:[#allocation11_spill]]  ;;  %s16214_s30 = sld [smem:[#allocation9_spill]] }
 0xa8e   : > { %s16215_s19 = sld [smem:[#allocation12_spill]]  ;;  %s16216_s17 = smov %s9468_s18 }
 0xa93   : > { %p21_p3 = scmp.ge.s32.totalorder %s16213_s20, 4   ;;  %s16217_s18 = smov %s16214_s30 }
 0xa95   :  { %23 = sbr.rel (!%p21_p3) target bundleno = 9 (0x9), region = 99 }
 0xa9c   :  { %6994 = vsyncpa [#allocation6], 1 }
 0xa9d   :  { %6996 = vsyncpa [#allocation6 + $0x1], 1 }

</bundles_post_ra>
